<compile_context>
chip_gen: v7x
topology: tpu7x:2x2x1
jax: 0.10.0
libtpu: 0.0.40
codegen_flags: <defaults>
</compile_context>

<pallas_src>
import math

import jax
import jax.numpy as jnp
from jax import lax
from jax.experimental import pallas as pl
from jax.experimental.pallas import tpu as pltpu

BATCH = 2
LEADS = 12        # must be 12: fc head is Linear(features*12, 512); conv2 channels = leads
SEGS = 4          # must be 4: GraphLearning.conv0 has in_channels=4
FEATS = 32
NUM_CLASSES = 4
GCN_LAYERS = 2
HIDDEN_FC = 512
LEAKY_SLOPE = 0.01
BN_EPS = 1e-5

BW = BATCH * SEGS           # 8 independent GRU sequences (one per (batch, segment))
BLK = 16                    # padded per-(batch, segment) block stride (12 leads -> 16 rows)


# --------------------------------------------------------------------------------------
# The single fused kernel.
# --------------------------------------------------------------------------------------
def _fused_kernel(
    x2d_ref, perm_in_ref,
    wir_ref, wiz_ref, win_ref, whr_ref, whz_ref, whn_ref,
    br_ref, bz_ref, bin_ref, bhn_ref,
    perm_out_ref,
    c0w_ref, c0b_ref, c1w_ref, c1b_ref, c2wt_ref, c2b_ref,
    gmask_ref, hmask_ref, eye_ref, ones_c_ref, ones_r_ref,
    gcn_w_ref, gcn_b_ref,
    fc1w_ref, fc1b_ref, bn1s_ref, bn1t_ref,
    fc2w_ref, fc2b_ref, bn2s_ref, bn2t_ref,
    fc3w_ref, fc3b_ref,
    out_ref,
    hseq_ref, xs_ref, sup_ref, sbuf_ref,
):
    f32 = jnp.float32
    L, F, W, B = LEADS, FEATS, SEGS, BATCH

    # ---------------- 1. GRU over the 4 segments (BW = B*W independent sequences) -------
    # Input reorder (b, l, w) -> time-major (l, b, w) done on the MXU with a 0/1 permutation.
    xin = jnp.dot(perm_in_ref[...], x2d_ref[...], preferred_element_type=f32)   # (L*BW, F)

    # Input projection hoisted out of the recurrence, one matmul per gate.
    gr = jnp.dot(xin, wir_ref[...], preferred_element_type=f32) + br_ref[...]
    gz = jnp.dot(xin, wiz_ref[...], preferred_element_type=f32) + bz_ref[...]
    gn = jnp.dot(xin, win_ref[...], preferred_element_type=f32) + bin_ref[...]

    whr = whr_ref[...]
    whz = whz_ref[...]
    whn = whn_ref[...]
    bhn = bhn_ref[...]

    h = jnp.zeros((BW, F), f32)
    for t in range(L):                                    # static unroll, 12 steps
        sl = slice(t * BW, (t + 1) * BW)                  # 8-row aligned slice
        if t == 0:                                        # h == 0: skip the h @ Whh matmuls
            r = jax.nn.sigmoid(gr[sl, :])
            z = jax.nn.sigmoid(gz[sl, :])
            n = jnp.tanh(gn[sl, :] + r * bhn)
            h = (1.0 - z) * n
        else:
            ghr = jnp.dot(h, whr, preferred_element_type=f32)
            ghz = jnp.dot(h, whz, preferred_element_type=f32)
            ghn = jnp.dot(h, whn, preferred_element_type=f32) + bhn
            r = jax.nn.sigmoid(gr[sl, :] + ghr)
            z = jax.nn.sigmoid(gz[sl, :] + ghz)
            n = jnp.tanh(gn[sl, :] + r * ghn)
            h = (1.0 - z) * n + z * h
        hseq_ref[sl, :] = h                               # aligned scratch store

    # ---------------- 2. reorder GRU output to per-(batch, segment) slabs ---------------
    # rows (lead, batch, segment) -> padded blocks of BLK rows per (batch, segment),
    # lead-major inside each block; done as one MXU matmul with a 0/1 permutation.
    xs_ref[...] = jnp.dot(perm_out_ref[...], hseq_ref[...],
                          preferred_element_type=f32)     # (BW*BLK, F)

    # ---------------- 3. GraphLearning: conv stack + adjacency + Chebyshev --------------
    c0b = c0b_ref[...]          # (1, F)   conv0 bias (broadcast)
    c1w = c1w_ref[...]          # (1, F)   conv1 weight
    c1b = c1b_ref[...]          # (1, L)   conv1 bias (broadcast)
    c2wt = c2wt_ref[...]        # (L, L*L) conv2 weight (transposed)
    c2b = c2b_ref[...]          # (1, L*L) conv2 bias

    y2_sum = jnp.zeros((1, L * L), f32)
    for b in range(B):
        base = b * W * BLK
        y0 = c0b
        for w in range(W):                                # conv0: 4 segments -> 1
            xw = xs_ref[base + w * BLK: base + w * BLK + L, :]          # (L, F)
            y0 = y0 + xw * c0w_ref[w: w + 1, :]
        y0 = jnp.maximum(y0, 0.0)                                       # (L, F)
        # conv1: F -> 1, as a trans_b matmul (no cross-lane reduce)
        y1 = lax.dot_general(c1w, y0, (((1,), (1,)), ((), ())),
                             preferred_element_type=f32) + c1b          # (1, L)
        y1 = jnp.maximum(y1, 0.0)
        y2 = jnp.dot(y1, c2wt, preferred_element_type=f32) + c2b        # conv2: L -> L*L
        y2_sum = y2_sum + jnp.maximum(y2, 0.0)
    y2_mean = y2_sum * (1.0 / B)                                        # mean over batch

    # 144-vector -> (12, 12) adjacency via constant 0/1 masks (MXU "reshape").
    eye = eye_ref[...]
    m = jnp.dot(gmask_ref[...] * y2_mean, hmask_ref[...],
                preferred_element_type=f32)                             # (L, L)
    adj = jnp.maximum(m, 0.0)
    deg_c = jnp.dot(adj, ones_c_ref[...], preferred_element_type=f32)   # (L, 1) row sums
    deg_r = lax.dot_general(ones_r_ref[...], adj, (((1,), (1,)), ((), ())),
                            preferred_element_type=f32)                 # (1, L) row sums
    adj_t = lax.dot_general(eye, adj, (((1,), (1,)), ((), ())),
                            preferred_element_type=f32)                 # adj.T via MXU
    adj_s = 0.5 * (adj + adj_t)
    # degree is taken BEFORE symmetrization, exactly like the PyTorch reference.
    dinv_c = 1.0 / (jnp.sqrt(deg_c) + 1e-7)
    dinv_r = 1.0 / (jnp.sqrt(deg_r) + 1e-7)
    lap = dinv_c * (deg_c * eye - adj_s) * dinv_r                       # normalized Laplacian

    cheb2 = 2.0 * jnp.dot(lap, lap, preferred_element_type=f32)
    cheb3 = 2.0 * jnp.dot(lap, cheb2, preferred_element_type=f32) - lap
    chebs = [None, lap, cheb2, cheb3]              # cheb[0] == zeros (handled analytically)

    # ---------------- 4. GCN layers: out = relu(cheb_k @ (x @ W) + b) + x ---------------
    for layer in range(GCN_LAYERS):
        wg = gcn_w_ref[layer]                      # (F, F)
        bg = gcn_b_ref[layer]                      # (1, F)
        relu_bg = jnp.maximum(bg, 0.0)
        sup_ref[...] = jnp.dot(xs_ref[...], wg,
                               preferred_element_type=f32)   # x @ W for all slabs at once
        for j in range(BW):                        # slab j = (batch, segment), cheb order = j % 4
            k = j % W
            base = j * BLK
            x_j = xs_ref[base: base + L, :]
            if k == 0:                             # cheb[0] == 0  ->  relu(bias) + x
                out_j = relu_bg + x_j
            else:
                s_j = sup_ref[base: base + L, :]
                out_j = jnp.maximum(
                    jnp.dot(chebs[k], s_j, preferred_element_type=f32) + bg, 0.0) + x_j
            xs_ref[base: base + L, :] = out_j      # in-place slab update (stays in VMEM)

    # ---------------- 5. sum over the 4 Chebyshev/segment slabs per batch ---------------
    for b in range(B):
        base = b * W * BLK
        s_b = (xs_ref[base + 0 * BLK: base + 0 * BLK + L, :]
               + xs_ref[base + 1 * BLK: base + 1 * BLK + L, :]
               + xs_ref[base + 2 * BLK: base + 2 * BLK + L, :]
               + xs_ref[base + 3 * BLK: base + 3 * BLK + L, :])
        sbuf_ref[b * BLK: b * BLK + L, :] = s_b

    # ---------------- 6. FC head: Linear -> LeakyReLU -> BN -> Dropout(id) -> ... -------
    # flatten(L, F) @ W1 expressed as 12 per-lead (1,F)x(F,512) matmuls (no reshape needed).
    hb = [fc1b_ref[...] for _ in range(B)]         # (1, 512) accumulators, bias pre-added
    for l in range(L):
        w_l = fc1w_ref[l]                          # (F, 512)
        for b in range(B):
            row = sbuf_ref[b * BLK + l: b * BLK + l + 1, :]             # (1, F)
            hb[b] = hb[b] + jnp.dot(row, w_l, preferred_element_type=f32)
    for b in range(B):
        h1 = hb[b]
        h1 = jnp.where(h1 > 0, h1, LEAKY_SLOPE * h1)
        h1 = h1 * bn1s_ref[...] + bn1t_ref[...]
        h2 = jnp.dot(h1, fc2w_ref[...], preferred_element_type=f32) + fc2b_ref[...]
        h2 = jnp.where(h2 > 0, h2, LEAKY_SLOPE * h2)
        h2 = h2 * bn2s_ref[...] + bn2t_ref[...]
        o = jnp.dot(h2, fc3w_ref[...], preferred_element_type=f32) + fc3b_ref[...]
        out_ref[b: b + 1, :] = o


# --------------------------------------------------------------------------------------
# Wrapper: one pallas_call; the only outside op is a free row-major reshape of x.
# --------------------------------------------------------------------------------------
@jax.jit
def ecg_gcn_forward(x, p):
    assert x.shape == (BATCH, LEADS, SEGS, FEATS)
    x2d = x.reshape(BATCH * LEADS * SEGS, FEATS)       # pure row-major collapse (no transpose)
    return pl.pallas_call(
        _fused_kernel,
        out_shape=jax.ShapeDtypeStruct((BATCH, NUM_CLASSES), jnp.float32),
        scratch_shapes=[
            pltpu.VMEM((LEADS * BW, FEATS), jnp.float32),    # GRU hidden states, time-major
            pltpu.VMEM((BW * BLK, FEATS), jnp.float32),      # per-(batch, segment) slabs
            pltpu.VMEM((BW * BLK, FEATS), jnp.float32),      # x @ W scratch for GCN layers
            pltpu.VMEM((BATCH * BLK, FEATS), jnp.float32),   # per-batch summed slabs
        ],
    )(
        x2d, p["perm_in"],
        p["gru_wir"], p["gru_wiz"], p["gru_win"],
        p["gru_whr"], p["gru_whz"], p["gru_whn"],
        p["gru_br"], p["gru_bz"], p["gru_bin"], p["gru_bhn"],
        p["perm_out"],
        p["conv0_w"], p["conv0_b"], p["conv1_w"], p["conv1_b"], p["conv2_wt"], p["conv2_b"],
        p["gmask"], p["hmask"], p["eye"], p["ones_c"], p["ones_r"],
        p["gcn_w"], p["gcn_b"],
        p["fc_w1"], p["fc_b1"], p["bn_s1"], p["bn_t1"],
        p["fc_w2"], p["fc_b2"], p["bn_s2"], p["bn_t2"],
        p["fc_w3"], p["fc_b3"],
    )


# --------------------------------------------------------------------------------------
# Deterministic synthetic parameters (shapes match the PyTorch module's __init__).
# --------------------------------------------------------------------------------------
def init_params(key):
    F, L, W, B = FEATS, LEADS, SEGS, BATCH
    ks = jax.random.split(key, 32)
    kit = iter(ks)

    def u(shape, scale):
        return jax.random.uniform(next(kit), shape, jnp.float32, -scale, scale)

    p = {}

    # GRU (hidden == input == F).  Per-gate weights stored pre-transposed (x @ W gives the
    # gate pre-activation).  b_ir+b_hr and b_iz+b_hz are folded (mathematically identical);
    # b_in / b_hn stay split because of the r * (W_hn h + b_hn) term.
    kg = 1.0 / math.sqrt(F)
    p["gru_wir"] = u((F, F), kg)
    p["gru_wiz"] = u((F, F), kg)
    p["gru_win"] = u((F, F), kg)
    p["gru_whr"] = u((F, F), kg)
    p["gru_whz"] = u((F, F), kg)
    p["gru_whn"] = u((F, F), kg)
    p["gru_br"] = u((1, F), kg) + u((1, F), kg)
    p["gru_bz"] = u((1, F), kg) + u((1, F), kg)
    p["gru_bin"] = u((1, F), kg)
    p["gru_bhn"] = u((1, F), kg)

    # GraphLearning 1x1 convs.  Scalars are pre-broadcast along lanes so the kernel never
    # extracts single elements out of VMEM.
    p["conv0_w"] = jnp.broadcast_to(u((W, 1), 0.5), (W, F))
    p["conv0_b"] = jnp.broadcast_to(u((1, 1), 0.5), (1, F))
    p["conv1_w"] = u((1, F), 1.0 / math.sqrt(F))
    p["conv1_b"] = jnp.broadcast_to(u((1, 1), 1.0 / math.sqrt(F)), (1, L))
    # Conv2d(L -> L*L); nonnegative weights / positive bias keep node degrees > 0.
    p["conv2_wt"] = jax.random.uniform(next(kit), (L, L * L), jnp.float32, 0.0, 0.3)
    p["conv2_b"] = jnp.full((1, L * L), 0.1, jnp.float32)

    # GraphConvolution layers: xavier_uniform weights, zero bias (as in the PyTorch code).
    xav = math.sqrt(6.0 / (F + F))
    p["gcn_w"] = u((GCN_LAYERS, F, F), xav)
    p["gcn_b"] = jnp.zeros((GCN_LAYERS, 1, F), jnp.float32)

    # FC head (fc_w1 stored as (L, F, 512) == the torch (L*F, 512) matrix, l-major flatten).
    kf1 = 1.0 / math.sqrt(L * F)
    kf2 = 1.0 / math.sqrt(HIDDEN_FC)
    p["fc_w1"] = u((L, F, HIDDEN_FC), kf1)
    p["fc_b1"] = u((1, HIDDEN_FC), kf1)
    p["fc_w2"] = u((HIDDEN_FC, HIDDEN_FC), kf2)
    p["fc_b2"] = u((1, HIDDEN_FC), kf2)
    p["fc_w3"] = u((HIDDEN_FC, NUM_CLASSES), kf2)
    p["fc_b3"] = u((1, NUM_CLASSES), kf2)

    # BatchNorm1d eval mode, folded: y = x * gamma/sqrt(var+eps) + (beta - mean*scale).
    # TODO(synk): fold real running stats / affine params here for a trained checkpoint.
    s = 1.0 / math.sqrt(1.0 + BN_EPS)
    p["bn_s1"] = jnp.full((1, HIDDEN_FC), s, jnp.float32)
    p["bn_t1"] = jnp.zeros((1, HIDDEN_FC), jnp.float32)
    p["bn_s2"] = jnp.full((1, HIDDEN_FC), s, jnp.float32)
    p["bn_t2"] = jnp.zeros((1, HIDDEN_FC), jnp.float32)

    # Constant 0/1 helper matrices: data-layout shuffles run as MXU matmuls, no in-kernel
    # reshapes / transposes required.
    r_in = jnp.arange(L * BW)                       # target row order: (lead, batch, segment)
    src = (r_in % BW) // W * (L * W) + (r_in // BW) * W + (r_in % W)
    p["perm_in"] = (jnp.arange(B * L * W)[None, :] == src[:, None]).astype(jnp.float32)

    r_out = jnp.arange(BW * BLK)                    # target: per-(batch,segment) padded block
    p["perm_out"] = (((r_out % BLK) < L)[:, None]
                     & (jnp.arange(L * BW)[None, :]
                        == ((r_out % BLK) * BW + r_out // BLK)[:, None])).astype(jnp.float32)

    c = jnp.arange(L * L)
    p["gmask"] = (c[None, :] // L == jnp.arange(L)[:, None]).astype(jnp.float32)
    p["hmask"] = (c[:, None] % L == jnp.arange(L)[None, :]).astype(jnp.float32)
    p["eye"] = jnp.eye(L, dtype=jnp.float32)
    p["ones_c"] = jnp.ones((L, 1), jnp.float32)
    p["ones_r"] = jnp.ones((1, L), jnp.float32)
    return p


if __name__ == "__main__":
    key = jax.random.PRNGKey(0)
    k_params, k_x = jax.random.split(key)
    params = init_params(k_params)
    x = jax.random.normal(k_x, (BATCH, LEADS, SEGS, FEATS), jnp.float32)

    out = ecg_gcn_forward(x, params)
    jax.block_until_ready(out)
    assert out.shape == (BATCH, NUM_CLASSES)
    assert bool(jnp.all(jnp.isfinite(out)))
    print("KERNEL_OK")
</pallas_src>

<mosaic_0001>
module attributes {stable_mosaic.version = 11 : i64} {
  func.func @_fused_kernel(%arg0: memref<96x32xf32, #tpu.memory_space<vmem>>, %arg1: memref<96x96xf32, #tpu.memory_space<vmem>>, %arg2: memref<32x32xf32, #tpu.memory_space<vmem>>, %arg3: memref<32x32xf32, #tpu.memory_space<vmem>>, %arg4: memref<32x32xf32, #tpu.memory_space<vmem>>, %arg5: memref<32x32xf32, #tpu.memory_space<vmem>>, %arg6: memref<32x32xf32, #tpu.memory_space<vmem>>, %arg7: memref<32x32xf32, #tpu.memory_space<vmem>>, %arg8: memref<1x32xf32, #tpu.memory_space<vmem>>, %arg9: memref<1x32xf32, #tpu.memory_space<vmem>>, %arg10: memref<1x32xf32, #tpu.memory_space<vmem>>, %arg11: memref<1x32xf32, #tpu.memory_space<vmem>>, %arg12: memref<128x96xf32, #tpu.memory_space<vmem>>, %arg13: memref<4x32xf32, #tpu.memory_space<vmem>>, %arg14: memref<1x32xf32, #tpu.memory_space<vmem>>, %arg15: memref<1x32xf32, #tpu.memory_space<vmem>>, %arg16: memref<1x12xf32, #tpu.memory_space<vmem>>, %arg17: memref<12x144xf32, #tpu.memory_space<vmem>>, %arg18: memref<1x144xf32, #tpu.memory_space<vmem>>, %arg19: memref<12x144xf32, #tpu.memory_space<vmem>>, %arg20: memref<144x12xf32, #tpu.memory_space<vmem>>, %arg21: memref<12x12xf32, #tpu.memory_space<vmem>>, %arg22: memref<12x1xf32, #tpu.memory_space<vmem>>, %arg23: memref<1x12xf32, #tpu.memory_space<vmem>>, %arg24: memref<2x32x32xf32, #tpu.memory_space<vmem>>, %arg25: memref<2x1x32xf32, #tpu.memory_space<vmem>>, %arg26: memref<12x32x512xf32, #tpu.memory_space<vmem>>, %arg27: memref<1x512xf32, #tpu.memory_space<vmem>>, %arg28: memref<1x512xf32, #tpu.memory_space<vmem>>, %arg29: memref<1x512xf32, #tpu.memory_space<vmem>>, %arg30: memref<512x512xf32, #tpu.memory_space<vmem>>, %arg31: memref<1x512xf32, #tpu.memory_space<vmem>>, %arg32: memref<1x512xf32, #tpu.memory_space<vmem>>, %arg33: memref<1x512xf32, #tpu.memory_space<vmem>>, %arg34: memref<512x4xf32, #tpu.memory_space<vmem>>, %arg35: memref<1x4xf32, #tpu.memory_space<vmem>>, %arg36: memref<2x4xf32, #tpu.memory_space<vmem>>, %arg37: memref<96x32xf32, #tpu.memory_space<vmem>>, %arg38: memref<128x32xf32, #tpu.memory_space<vmem>>, %arg39: memref<128x32xf32, #tpu.memory_space<vmem>>, %arg40: memref<32x32xf32, #tpu.memory_space<vmem>>) attributes {dimension_semantics = [], scalar_prefetch = 0 : i64, scratch_operands = 4 : i64, tpu.core_type = #tpu.core_type<tc>} {
    %c0 = arith.constant 0 : index
    %c0_0 = arith.constant 0 : index
    %0 = vector.load %arg1[%c0, %c0_0] : memref<96x96xf32, #tpu.memory_space<vmem>>, vector<96x96xf32>
    %c0_1 = arith.constant 0 : index
    %c0_2 = arith.constant 0 : index
    %1 = vector.load %arg0[%c0_1, %c0_2] : memref<96x32xf32, #tpu.memory_space<vmem>>, vector<96x32xf32>
    %cst = arith.constant dense<0.000000e+00> : vector<96x32xf32>
    %2 = tpu.matmul %0, %1, %cst {dimension_numbers = #tpu.dot_dimension_numbers<[1], [0], [0], [1], [0, 0, 1, 1], [], []>} : vector<96x96xf32>, vector<96x32xf32>, vector<96x32xf32> -> vector<96x32xf32>
    %c0_3 = arith.constant 0 : index
    %c0_4 = arith.constant 0 : index
    %3 = vector.load %arg2[%c0_3, %c0_4] : memref<32x32xf32, #tpu.memory_space<vmem>>, vector<32x32xf32>
    %cst_5 = arith.constant dense<0.000000e+00> : vector<96x32xf32>
    %4 = tpu.matmul %2, %3, %cst_5 {dimension_numbers = #tpu.dot_dimension_numbers<[1], [0], [0], [1], [0, 0, 1, 1], [], []>} : vector<96x32xf32>, vector<32x32xf32>, vector<96x32xf32> -> vector<96x32xf32>
    %c0_6 = arith.constant 0 : index
    %c0_7 = arith.constant 0 : index
    %5 = vector.load %arg8[%c0_6, %c0_7] : memref<1x32xf32, #tpu.memory_space<vmem>>, vector<1x32xf32>
    %6 = vector.broadcast %5 : vector<1x32xf32> to vector<96x32xf32>
    %7 = arith.addf %4, %6 : vector<96x32xf32>
    %c0_8 = arith.constant 0 : index
    %c0_9 = arith.constant 0 : index
    %8 = vector.load %arg3[%c0_8, %c0_9] : memref<32x32xf32, #tpu.memory_space<vmem>>, vector<32x32xf32>
    %cst_10 = arith.constant dense<0.000000e+00> : vector<96x32xf32>
    %9 = tpu.matmul %2, %8, %cst_10 {dimension_numbers = #tpu.dot_dimension_numbers<[1], [0], [0], [1], [0, 0, 1, 1], [], []>} : vector<96x32xf32>, vector<32x32xf32>, vector<96x32xf32> -> vector<96x32xf32>
    %c0_11 = arith.constant 0 : index
    %c0_12 = arith.constant 0 : index
    %10 = vector.load %arg9[%c0_11, %c0_12] : memref<1x32xf32, #tpu.memory_space<vmem>>, vector<1x32xf32>
    %11 = vector.broadcast %10 : vector<1x32xf32> to vector<96x32xf32>
    %12 = arith.addf %9, %11 : vector<96x32xf32>
    %c0_13 = arith.constant 0 : index
    %c0_14 = arith.constant 0 : index
    %13 = vector.load %arg4[%c0_13, %c0_14] : memref<32x32xf32, #tpu.memory_space<vmem>>, vector<32x32xf32>
    %cst_15 = arith.constant dense<0.000000e+00> : vector<96x32xf32>
    %14 = tpu.matmul %2, %13, %cst_15 {dimension_numbers = #tpu.dot_dimension_numbers<[1], [0], [0], [1], [0, 0, 1, 1], [], []>} : vector<96x32xf32>, vector<32x32xf32>, vector<96x32xf32> -> vector<96x32xf32>
    %c0_16 = arith.constant 0 : index
    %c0_17 = arith.constant 0 : index
    %15 = vector.load %arg10[%c0_16, %c0_17] : memref<1x32xf32, #tpu.memory_space<vmem>>, vector<1x32xf32>
    %16 = vector.broadcast %15 : vector<1x32xf32> to vector<96x32xf32>
    %17 = arith.addf %14, %16 : vector<96x32xf32>
    %c0_18 = arith.constant 0 : index
    %c0_19 = arith.constant 0 : index
    %18 = vector.load %arg5[%c0_18, %c0_19] : memref<32x32xf32, #tpu.memory_space<vmem>>, vector<32x32xf32>
    %c0_20 = arith.constant 0 : index
    %c0_21 = arith.constant 0 : index
    %19 = vector.load %arg6[%c0_20, %c0_21] : memref<32x32xf32, #tpu.memory_space<vmem>>, vector<32x32xf32>
    %c0_22 = arith.constant 0 : index
    %c0_23 = arith.constant 0 : index
    %20 = vector.load %arg7[%c0_22, %c0_23] : memref<32x32xf32, #tpu.memory_space<vmem>>, vector<32x32xf32>
    %c0_24 = arith.constant 0 : index
    %c0_25 = arith.constant 0 : index
    %21 = vector.load %arg11[%c0_24, %c0_25] : memref<1x32xf32, #tpu.memory_space<vmem>>, vector<1x32xf32>
    %22 = vector.extract_strided_slice %7 {offsets = [0, 0], sizes = [8, 32], strides = [1, 1]} : vector<96x32xf32> to vector<8x32xf32>
    %23 = arith.negf %22 : vector<8x32xf32>
    %24 = math.exp %23 : vector<8x32xf32>
    %cst_26 = arith.constant 1.000000e+00 : f32
    %25 = vector.broadcast %cst_26 : f32 to vector<8x32xf32>
    %26 = arith.addf %25, %24 : vector<8x32xf32>
    %27 = arith.divf %25, %26 : vector<8x32xf32>
    %28 = vector.extract_strided_slice %12 {offsets = [0, 0], sizes = [8, 32], strides = [1, 1]} : vector<96x32xf32> to vector<8x32xf32>
    %29 = arith.negf %28 : vector<8x32xf32>
    %30 = math.exp %29 : vector<8x32xf32>
    %cst_27 = arith.constant 1.000000e+00 : f32
    %31 = vector.broadcast %cst_27 : f32 to vector<8x32xf32>
    %32 = arith.addf %31, %30 : vector<8x32xf32>
    %33 = arith.divf %31, %32 : vector<8x32xf32>
    %34 = vector.extract_strided_slice %17 {offsets = [0, 0], sizes = [8, 32], strides = [1, 1]} : vector<96x32xf32> to vector<8x32xf32>
    %35 = vector.broadcast %21 : vector<1x32xf32> to vector<8x32xf32>
    %36 = arith.mulf %27, %35 : vector<8x32xf32>
    %37 = arith.addf %34, %36 : vector<8x32xf32>
    %38 = math.tanh %37 : vector<8x32xf32>
    %cst_28 = arith.constant 1.000000e+00 : f32
    %39 = vector.broadcast %cst_28 : f32 to vector<8x32xf32>
    %40 = arith.subf %39, %33 : vector<8x32xf32>
    %41 = arith.mulf %40, %38 : vector<8x32xf32>
    %c0_29 = arith.constant 0 : index
    %c0_30 = arith.constant 0 : index
    %42 = vector.load %arg37[%c0_29, %c0_30] : memref<96x32xf32, #tpu.memory_space<vmem>>, vector<8x32xf32>
    tpu.vector_store %arg37[%c0_29, %c0_30], %41 {strides = array<i32>} : memref<96x32xf32, #tpu.memory_space<vmem>>, vector<8x32xf32>,
    %cst_31 = arith.constant dense<0.000000e+00> : vector<8x32xf32>
    %43 = tpu.matmul %41, %18, %cst_31 {dimension_numbers = #tpu.dot_dimension_numbers<[1], [0], [0], [1], [0, 0, 1, 1], [], []>} : vector<8x32xf32>, vector<32x32xf32>, vector<8x32xf32> -> vector<8x32xf32>
    %cst_32 = arith.constant dense<0.000000e+00> : vector<8x32xf32>
    %44 = tpu.matmul %41, %19, %cst_32 {dimension_numbers = #tpu.dot_dimension_numbers<[1], [0], [0], [1], [0, 0, 1, 1], [], []>} : vector<8x32xf32>, vector<32x32xf32>, vector<8x32xf32> -> vector<8x32xf32>
    %cst_33 = arith.constant dense<0.000000e+00> : vector<8x32xf32>
    %45 = tpu.matmul %41, %20, %cst_33 {dimension_numbers = #tpu.dot_dimension_numbers<[1], [0], [0], [1], [0, 0, 1, 1], [], []>} : vector<8x32xf32>, vector<32x32xf32>, vector<8x32xf32> -> vector<8x32xf32>
    %46 = vector.broadcast %21 : vector<1x32xf32> to vector<8x32xf32>
    %47 = arith.addf %45, %46 : vector<8x32xf32>
    %48 = vector.extract_strided_slice %7 {offsets = [8, 0], sizes = [8, 32], strides = [1, 1]} : vector<96x32xf32> to vector<8x32xf32>
    %49 = arith.addf %48, %43 : vector<8x32xf32>
    %50 = arith.negf %49 : vector<8x32xf32>
    %51 = math.exp %50 : vector<8x32xf32>
    %cst_34 = arith.constant 1.000000e+00 : f32
    %52 = vector.broadcast %cst_34 : f32 to vector<8x32xf32>
    %53 = arith.addf %52, %51 : vector<8x32xf32>
    %54 = arith.divf %52, %53 : vector<8x32xf32>
    %55 = vector.extract_strided_slice %12 {offsets = [8, 0], sizes = [8, 32], strides = [1, 1]} : vector<96x32xf32> to vector<8x32xf32>
    %56 = arith.addf %55, %44 : vector<8x32xf32>
    %57 = arith.negf %56 : vector<8x32xf32>
    %58 = math.exp %57 : vector<8x32xf32>
    %cst_35 = arith.constant 1.000000e+00 : f32
    %59 = vector.broadcast %cst_35 : f32 to vector<8x32xf32>
    %60 = arith.addf %59, %58 : vector<8x32xf32>
    %61 = arith.divf %59, %60 : vector<8x32xf32>
    %62 = vector.extract_strided_slice %17 {offsets = [8, 0], sizes = [8, 32], strides = [1, 1]} : vector<96x32xf32> to vector<8x32xf32>
    %63 = arith.mulf %54, %47 : vector<8x32xf32>
    %64 = arith.addf %62, %63 : vector<8x32xf32>
    %65 = math.tanh %64 : vector<8x32xf32>
    %cst_36 = arith.constant 1.000000e+00 : f32
    %66 = vector.broadcast %cst_36 : f32 to vector<8x32xf32>
    %67 = arith.subf %66, %61 : vector<8x32xf32>
    %68 = arith.mulf %67, %65 : vector<8x32xf32>
    %69 = arith.mulf %61, %41 : vector<8x32xf32>
    %70 = arith.addf %68, %69 : vector<8x32xf32>
    %c8 = arith.constant 8 : index
    %c0_37 = arith.constant 0 : index
    %71 = vector.load %arg37[%c8, %c0_37] : memref<96x32xf32, #tpu.memory_space<vmem>>, vector<8x32xf32>
    tpu.vector_store %arg37[%c8, %c0_37], %70 {strides = array<i32>} : memref<96x32xf32, #tpu.memory_space<vmem>>, vector<8x32xf32>,
    %cst_38 = arith.constant dense<0.000000e+00> : vector<8x32xf32>
    %72 = tpu.matmul %70, %18, %cst_38 {dimension_numbers = #tpu.dot_dimension_numbers<[1], [0], [0], [1], [0, 0, 1, 1], [], []>} : vector<8x32xf32>, vector<32x32xf32>, vector<8x32xf32> -> vector<8x32xf32>
    %cst_39 = arith.constant dense<0.000000e+00> : vector<8x32xf32>
    %73 = tpu.matmul %70, %19, %cst_39 {dimension_numbers = #tpu.dot_dimension_numbers<[1], [0], [0], [1], [0, 0, 1, 1], [], []>} : vector<8x32xf32>, vector<32x32xf32>, vector<8x32xf32> -> vector<8x32xf32>
    %cst_40 = arith.constant dense<0.000000e+00> : vector<8x32xf32>
    %74 = tpu.matmul %70, %20, %cst_40 {dimension_numbers = #tpu.dot_dimension_numbers<[1], [0], [0], [1], [0, 0, 1, 1], [], []>} : vector<8x32xf32>, vector<32x32xf32>, vector<8x32xf32> -> vector<8x32xf32>
    %75 = vector.broadcast %21 : vector<1x32xf32> to vector<8x32xf32>
    %76 = arith.addf %74, %75 : vector<8x32xf32>
    %77 = vector.extract_strided_slice %7 {offsets = [16, 0], sizes = [8, 32], strides = [1, 1]} : vector<96x32xf32> to vector<8x32xf32>
    %78 = arith.addf %77, %72 : vector<8x32xf32>
    %79 = arith.negf %78 : vector<8x32xf32>
    %80 = math.exp %79 : vector<8x32xf32>
    %cst_41 = arith.constant 1.000000e+00 : f32
    %81 = vector.broadcast %cst_41 : f32 to vector<8x32xf32>
    %82 = arith.addf %81, %80 : vector<8x32xf32>
    %83 = arith.divf %81, %82 : vector<8x32xf32>
    %84 = vector.extract_strided_slice %12 {offsets = [16, 0], sizes = [8, 32], strides = [1, 1]} : vector<96x32xf32> to vector<8x32xf32>
    %85 = arith.addf %84, %73 : vector<8x32xf32>
    %86 = arith.negf %85 : vector<8x32xf32>
    %87 = math.exp %86 : vector<8x32xf32>
    %cst_42 = arith.constant 1.000000e+00 : f32
    %88 = vector.broadcast %cst_42 : f32 to vector<8x32xf32>
    %89 = arith.addf %88, %87 : vector<8x32xf32>
    %90 = arith.divf %88, %89 : vector<8x32xf32>
    %91 = vector.extract_strided_slice %17 {offsets = [16, 0], sizes = [8, 32], strides = [1, 1]} : vector<96x32xf32> to vector<8x32xf32>
    %92 = arith.mulf %83, %76 : vector<8x32xf32>
    %93 = arith.addf %91, %92 : vector<8x32xf32>
    %94 = math.tanh %93 : vector<8x32xf32>
    %cst_43 = arith.constant 1.000000e+00 : f32
    %95 = vector.broadcast %cst_43 : f32 to vector<8x32xf32>
    %96 = arith.subf %95, %90 : vector<8x32xf32>
    %97 = arith.mulf %96, %94 : vector<8x32xf32>
    %98 = arith.mulf %90, %70 : vector<8x32xf32>
    %99 = arith.addf %97, %98 : vector<8x32xf32>
    %c16 = arith.constant 16 : index
    %c0_44 = arith.constant 0 : index
    %100 = vector.load %arg37[%c16, %c0_44] : memref<96x32xf32, #tpu.memory_space<vmem>>, vector<8x32xf32>
    tpu.vector_store %arg37[%c16, %c0_44], %99 {strides = array<i32>} : memref<96x32xf32, #tpu.memory_space<vmem>>, vector<8x32xf32>,
    %cst_45 = arith.constant dense<0.000000e+00> : vector<8x32xf32>
    %101 = tpu.matmul %99, %18, %cst_45 {dimension_numbers = #tpu.dot_dimension_numbers<[1], [0], [0], [1], [0, 0, 1, 1], [], []>} : vector<8x32xf32>, vector<32x32xf32>, vector<8x32xf32> -> vector<8x32xf32>
    %cst_46 = arith.constant dense<0.000000e+00> : vector<8x32xf32>
    %102 = tpu.matmul %99, %19, %cst_46 {dimension_numbers = #tpu.dot_dimension_numbers<[1], [0], [0], [1], [0, 0, 1, 1], [], []>} : vector<8x32xf32>, vector<32x32xf32>, vector<8x32xf32> -> vector<8x32xf32>
    %cst_47 = arith.constant dense<0.000000e+00> : vector<8x32xf32>
    %103 = tpu.matmul %99, %20, %cst_47 {dimension_numbers = #tpu.dot_dimension_numbers<[1], [0], [0], [1], [0, 0, 1, 1], [], []>} : vector<8x32xf32>, vector<32x32xf32>, vector<8x32xf32> -> vector<8x32xf32>
    %104 = vector.broadcast %21 : vector<1x32xf32> to vector<8x32xf32>
    %105 = arith.addf %103, %104 : vector<8x32xf32>
    %106 = vector.extract_strided_slice %7 {offsets = [24, 0], sizes = [8, 32], strides = [1, 1]} : vector<96x32xf32> to vector<8x32xf32>
    %107 = arith.addf %106, %101 : vector<8x32xf32>
    %108 = arith.negf %107 : vector<8x32xf32>
    %109 = math.exp %108 : vector<8x32xf32>
    %cst_48 = arith.constant 1.000000e+00 : f32
    %110 = vector.broadcast %cst_48 : f32 to vector<8x32xf32>
    %111 = arith.addf %110, %109 : vector<8x32xf32>
    %112 = arith.divf %110, %111 : vector<8x32xf32>
    %113 = vector.extract_strided_slice %12 {offsets = [24, 0], sizes = [8, 32], strides = [1, 1]} : vector<96x32xf32> to vector<8x32xf32>
    %114 = arith.addf %113, %102 : vector<8x32xf32>
    %115 = arith.negf %114 : vector<8x32xf32>
    %116 = math.exp %115 : vector<8x32xf32>
    %cst_49 = arith.constant 1.000000e+00 : f32
    %117 = vector.broadcast %cst_49 : f32 to vector<8x32xf32>
    %118 = arith.addf %117, %116 : vector<8x32xf32>
    %119 = arith.divf %117, %118 : vector<8x32xf32>
    %120 = vector.extract_strided_slice %17 {offsets = [24, 0], sizes = [8, 32], strides = [1, 1]} : vector<96x32xf32> to vector<8x32xf32>
    %121 = arith.mulf %112, %105 : vector<8x32xf32>
    %122 = arith.addf %120, %121 : vector<8x32xf32>
    %123 = math.tanh %122 : vector<8x32xf32>
    %cst_50 = arith.constant 1.000000e+00 : f32
    %124 = vector.broadcast %cst_50 : f32 to vector<8x32xf32>
    %125 = arith.subf %124, %119 : vector<8x32xf32>
    %126 = arith.mulf %125, %123 : vector<8x32xf32>
    %127 = arith.mulf %119, %99 : vector<8x32xf32>
    %128 = arith.addf %126, %127 : vector<8x32xf32>
    %c24 = arith.constant 24 : index
    %c0_51 = arith.constant 0 : index
    %129 = vector.load %arg37[%c24, %c0_51] : memref<96x32xf32, #tpu.memory_space<vmem>>, vector<8x32xf32>
    tpu.vector_store %arg37[%c24, %c0_51], %128 {strides = array<i32>} : memref<96x32xf32, #tpu.memory_space<vmem>>, vector<8x32xf32>,
    %cst_52 = arith.constant dense<0.000000e+00> : vector<8x32xf32>
    %130 = tpu.matmul %128, %18, %cst_52 {dimension_numbers = #tpu.dot_dimension_numbers<[1], [0], [0], [1], [0, 0, 1, 1], [], []>} : vector<8x32xf32>, vector<32x32xf32>, vector<8x32xf32> -> vector<8x32xf32>
    %cst_53 = arith.constant dense<0.000000e+00> : vector<8x32xf32>
    %131 = tpu.matmul %128, %19, %cst_53 {dimension_numbers = #tpu.dot_dimension_numbers<[1], [0], [0], [1], [0, 0, 1, 1], [], []>} : vector<8x32xf32>, vector<32x32xf32>, vector<8x32xf32> -> vector<8x32xf32>
    %cst_54 = arith.constant dense<0.000000e+00> : vector<8x32xf32>
    %132 = tpu.matmul %128, %20, %cst_54 {dimension_numbers = #tpu.dot_dimension_numbers<[1], [0], [0], [1], [0, 0, 1, 1], [], []>} : vector<8x32xf32>, vector<32x32xf32>, vector<8x32xf32> -> vector<8x32xf32>
    %133 = vector.broadcast %21 : vector<1x32xf32> to vector<8x32xf32>
    %134 = arith.addf %132, %133 : vector<8x32xf32>
    %135 = vector.extract_strided_slice %7 {offsets = [32, 0], sizes = [8, 32], strides = [1, 1]} : vector<96x32xf32> to vector<8x32xf32>
    %136 = arith.addf %135, %130 : vector<8x32xf32>
    %137 = arith.negf %136 : vector<8x32xf32>
    %138 = math.exp %137 : vector<8x32xf32>
    %cst_55 = arith.constant 1.000000e+00 : f32
    %139 = vector.broadcast %cst_55 : f32 to vector<8x32xf32>
    %140 = arith.addf %139, %138 : vector<8x32xf32>
    %141 = arith.divf %139, %140 : vector<8x32xf32>
    %142 = vector.extract_strided_slice %12 {offsets = [32, 0], sizes = [8, 32], strides = [1, 1]} : vector<96x32xf32> to vector<8x32xf32>
    %143 = arith.addf %142, %131 : vector<8x32xf32>
    %144 = arith.negf %143 : vector<8x32xf32>
    %145 = math.exp %144 : vector<8x32xf32>
    %cst_56 = arith.constant 1.000000e+00 : f32
    %146 = vector.broadcast %cst_56 : f32 to vector<8x32xf32>
    %147 = arith.addf %146, %145 : vector<8x32xf32>
    %148 = arith.divf %146, %147 : vector<8x32xf32>
    %149 = vector.extract_strided_slice %17 {offsets = [32, 0], sizes = [8, 32], strides = [1, 1]} : vector<96x32xf32> to vector<8x32xf32>
    %150 = arith.mulf %141, %134 : vector<8x32xf32>
    %151 = arith.addf %149, %150 : vector<8x32xf32>
    %152 = math.tanh %151 : vector<8x32xf32>
    %cst_57 = arith.constant 1.000000e+00 : f32
    %153 = vector.broadcast %cst_57 : f32 to vector<8x32xf32>
    %154 = arith.subf %153, %148 : vector<8x32xf32>
    %155 = arith.mulf %154, %152 : vector<8x32xf32>
    %156 = arith.mulf %148, %128 : vector<8x32xf32>
    %157 = arith.addf %155, %156 : vector<8x32xf32>
    %c32 = arith.constant 32 : index
    %c0_58 = arith.constant 0 : index
    %158 = vector.load %arg37[%c32, %c0_58] : memref<96x32xf32, #tpu.memory_space<vmem>>, vector<8x32xf32>
    tpu.vector_store %arg37[%c32, %c0_58], %157 {strides = array<i32>} : memref<96x32xf32, #tpu.memory_space<vmem>>, vector<8x32xf32>,
    %cst_59 = arith.constant dense<0.000000e+00> : vector<8x32xf32>
    %159 = tpu.matmul %157, %18, %cst_59 {dimension_numbers = #tpu.dot_dimension_numbers<[1], [0], [0], [1], [0, 0, 1, 1], [], []>} : vector<8x32xf32>, vector<32x32xf32>, vector<8x32xf32> -> vector<8x32xf32>
    %cst_60 = arith.constant dense<0.000000e+00> : vector<8x32xf32>
    %160 = tpu.matmul %157, %19, %cst_60 {dimension_numbers = #tpu.dot_dimension_numbers<[1], [0], [0], [1], [0, 0, 1, 1], [], []>} : vector<8x32xf32>, vector<32x32xf32>, vector<8x32xf32> -> vector<8x32xf32>
    %cst_61 = arith.constant dense<0.000000e+00> : vector<8x32xf32>
    %161 = tpu.matmul %157, %20, %cst_61 {dimension_numbers = #tpu.dot_dimension_numbers<[1], [0], [0], [1], [0, 0, 1, 1], [], []>} : vector<8x32xf32>, vector<32x32xf32>, vector<8x32xf32> -> vector<8x32xf32>
    %162 = vector.broadcast %21 : vector<1x32xf32> to vector<8x32xf32>
    %163 = arith.addf %161, %162 : vector<8x32xf32>
    %164 = vector.extract_strided_slice %7 {offsets = [40, 0], sizes = [8, 32], strides = [1, 1]} : vector<96x32xf32> to vector<8x32xf32>
    %165 = arith.addf %164, %159 : vector<8x32xf32>
    %166 = arith.negf %165 : vector<8x32xf32>
    %167 = math.exp %166 : vector<8x32xf32>
    %cst_62 = arith.constant 1.000000e+00 : f32
    %168 = vector.broadcast %cst_62 : f32 to vector<8x32xf32>
    %169 = arith.addf %168, %167 : vector<8x32xf32>
    %170 = arith.divf %168, %169 : vector<8x32xf32>
    %171 = vector.extract_strided_slice %12 {offsets = [40, 0], sizes = [8, 32], strides = [1, 1]} : vector<96x32xf32> to vector<8x32xf32>
    %172 = arith.addf %171, %160 : vector<8x32xf32>
    %173 = arith.negf %172 : vector<8x32xf32>
    %174 = math.exp %173 : vector<8x32xf32>
    %cst_63 = arith.constant 1.000000e+00 : f32
    %175 = vector.broadcast %cst_63 : f32 to vector<8x32xf32>
    %176 = arith.addf %175, %174 : vector<8x32xf32>
    %177 = arith.divf %175, %176 : vector<8x32xf32>
    %178 = vector.extract_strided_slice %17 {offsets = [40, 0], sizes = [8, 32], strides = [1, 1]} : vector<96x32xf32> to vector<8x32xf32>
    %179 = arith.mulf %170, %163 : vector<8x32xf32>
    %180 = arith.addf %178, %179 : vector<8x32xf32>
    %181 = math.tanh %180 : vector<8x32xf32>
    %cst_64 = arith.constant 1.000000e+00 : f32
    %182 = vector.broadcast %cst_64 : f32 to vector<8x32xf32>
    %183 = arith.subf %182, %177 : vector<8x32xf32>
    %184 = arith.mulf %183, %181 : vector<8x32xf32>
    %185 = arith.mulf %177, %157 : vector<8x32xf32>
    %186 = arith.addf %184, %185 : vector<8x32xf32>
    %c40 = arith.constant 40 : index
    %c0_65 = arith.constant 0 : index
    %187 = vector.load %arg37[%c40, %c0_65] : memref<96x32xf32, #tpu.memory_space<vmem>>, vector<8x32xf32>
    tpu.vector_store %arg37[%c40, %c0_65], %186 {strides = array<i32>} : memref<96x32xf32, #tpu.memory_space<vmem>>, vector<8x32xf32>,
    %cst_66 = arith.constant dense<0.000000e+00> : vector<8x32xf32>
    %188 = tpu.matmul %186, %18, %cst_66 {dimension_numbers = #tpu.dot_dimension_numbers<[1], [0], [0], [1], [0, 0, 1, 1], [], []>} : vector<8x32xf32>, vector<32x32xf32>, vector<8x32xf32> -> vector<8x32xf32>
    %cst_67 = arith.constant dense<0.000000e+00> : vector<8x32xf32>
    %189 = tpu.matmul %186, %19, %cst_67 {dimension_numbers = #tpu.dot_dimension_numbers<[1], [0], [0], [1], [0, 0, 1, 1], [], []>} : vector<8x32xf32>, vector<32x32xf32>, vector<8x32xf32> -> vector<8x32xf32>
    %cst_68 = arith.constant dense<0.000000e+00> : vector<8x32xf32>
    %190 = tpu.matmul %186, %20, %cst_68 {dimension_numbers = #tpu.dot_dimension_numbers<[1], [0], [0], [1], [0, 0, 1, 1], [], []>} : vector<8x32xf32>, vector<32x32xf32>, vector<8x32xf32> -> vector<8x32xf32>
    %191 = vector.broadcast %21 : vector<1x32xf32> to vector<8x32xf32>
    %192 = arith.addf %190, %191 : vector<8x32xf32>
    %193 = vector.extract_strided_slice %7 {offsets = [48, 0], sizes = [8, 32], strides = [1, 1]} : vector<96x32xf32> to vector<8x32xf32>
    %194 = arith.addf %193, %188 : vector<8x32xf32>
    %195 = arith.negf %194 : vector<8x32xf32>
    %196 = math.exp %195 : vector<8x32xf32>
    %cst_69 = arith.constant 1.000000e+00 : f32
    %197 = vector.broadcast %cst_69 : f32 to vector<8x32xf32>
    %198 = arith.addf %197, %196 : vector<8x32xf32>
    %199 = arith.divf %197, %198 : vector<8x32xf32>
    %200 = vector.extract_strided_slice %12 {offsets = [48, 0], sizes = [8, 32], strides = [1, 1]} : vector<96x32xf32> to vector<8x32xf32>
    %201 = arith.addf %200, %189 : vector<8x32xf32>
    %202 = arith.negf %201 : vector<8x32xf32>
    %203 = math.exp %202 : vector<8x32xf32>
    %cst_70 = arith.constant 1.000000e+00 : f32
    %204 = vector.broadcast %cst_70 : f32 to vector<8x32xf32>
    %205 = arith.addf %204, %203 : vector<8x32xf32>
    %206 = arith.divf %204, %205 : vector<8x32xf32>
    %207 = vector.extract_strided_slice %17 {offsets = [48, 0], sizes = [8, 32], strides = [1, 1]} : vector<96x32xf32> to vector<8x32xf32>
    %208 = arith.mulf %199, %192 : vector<8x32xf32>
    %209 = arith.addf %207, %208 : vector<8x32xf32>
    %210 = math.tanh %209 : vector<8x32xf32>
    %cst_71 = arith.constant 1.000000e+00 : f32
    %211 = vector.broadcast %cst_71 : f32 to vector<8x32xf32>
    %212 = arith.subf %211, %206 : vector<8x32xf32>
    %213 = arith.mulf %212, %210 : vector<8x32xf32>
    %214 = arith.mulf %206, %186 : vector<8x32xf32>
    %215 = arith.addf %213, %214 : vector<8x32xf32>
    %c48 = arith.constant 48 : index
    %c0_72 = arith.constant 0 : index
    %216 = vector.load %arg37[%c48, %c0_72] : memref<96x32xf32, #tpu.memory_space<vmem>>, vector<8x32xf32>
    tpu.vector_store %arg37[%c48, %c0_72], %215 {strides = array<i32>} : memref<96x32xf32, #tpu.memory_space<vmem>>, vector<8x32xf32>,
    %cst_73 = arith.constant dense<0.000000e+00> : vector<8x32xf32>
    %217 = tpu.matmul %215, %18, %cst_73 {dimension_numbers = #tpu.dot_dimension_numbers<[1], [0], [0], [1], [0, 0, 1, 1], [], []>} : vector<8x32xf32>, vector<32x32xf32>, vector<8x32xf32> -> vector<8x32xf32>
    %cst_74 = arith.constant dense<0.000000e+00> : vector<8x32xf32>
    %218 = tpu.matmul %215, %19, %cst_74 {dimension_numbers = #tpu.dot_dimension_numbers<[1], [0], [0], [1], [0, 0, 1, 1], [], []>} : vector<8x32xf32>, vector<32x32xf32>, vector<8x32xf32> -> vector<8x32xf32>
    %cst_75 = arith.constant dense<0.000000e+00> : vector<8x32xf32>
    %219 = tpu.matmul %215, %20, %cst_75 {dimension_numbers = #tpu.dot_dimension_numbers<[1], [0], [0], [1], [0, 0, 1, 1], [], []>} : vector<8x32xf32>, vector<32x32xf32>, vector<8x32xf32> -> vector<8x32xf32>
    %220 = vector.broadcast %21 : vector<1x32xf32> to vector<8x32xf32>
    %221 = arith.addf %219, %220 : vector<8x32xf32>
    %222 = vector.extract_strided_slice %7 {offsets = [56, 0], sizes = [8, 32], strides = [1, 1]} : vector<96x32xf32> to vector<8x32xf32>
    %223 = arith.addf %222, %217 : vector<8x32xf32>
    %224 = arith.negf %223 : vector<8x32xf32>
    %225 = math.exp %224 : vector<8x32xf32>
    %cst_76 = arith.constant 1.000000e+00 : f32
    %226 = vector.broadcast %cst_76 : f32 to vector<8x32xf32>
    %227 = arith.addf %226, %225 : vector<8x32xf32>
    %228 = arith.divf %226, %227 : vector<8x32xf32>
    %229 = vector.extract_strided_slice %12 {offsets = [56, 0], sizes = [8, 32], strides = [1, 1]} : vector<96x32xf32> to vector<8x32xf32>
    %230 = arith.addf %229, %218 : vector<8x32xf32>
    %231 = arith.negf %230 : vector<8x32xf32>
    %232 = math.exp %231 : vector<8x32xf32>
    %cst_77 = arith.constant 1.000000e+00 : f32
    %233 = vector.broadcast %cst_77 : f32 to vector<8x32xf32>
    %234 = arith.addf %233, %232 : vector<8x32xf32>
    %235 = arith.divf %233, %234 : vector<8x32xf32>
    %236 = vector.extract_strided_slice %17 {offsets = [56, 0], sizes = [8, 32], strides = [1, 1]} : vector<96x32xf32> to vector<8x32xf32>
    %237 = arith.mulf %228, %221 : vector<8x32xf32>
    %238 = arith.addf %236, %237 : vector<8x32xf32>
    %239 = math.tanh %238 : vector<8x32xf32>
    %cst_78 = arith.constant 1.000000e+00 : f32
    %240 = vector.broadcast %cst_78 : f32 to vector<8x32xf32>
    %241 = arith.subf %240, %235 : vector<8x32xf32>
    %242 = arith.mulf %241, %239 : vector<8x32xf32>
    %243 = arith.mulf %235, %215 : vector<8x32xf32>
    %244 = arith.addf %242, %243 : vector<8x32xf32>
    %c56 = arith.constant 56 : index
    %c0_79 = arith.constant 0 : index
    %245 = vector.load %arg37[%c56, %c0_79] : memref<96x32xf32, #tpu.memory_space<vmem>>, vector<8x32xf32>
    tpu.vector_store %arg37[%c56, %c0_79], %244 {strides = array<i32>} : memref<96x32xf32, #tpu.memory_space<vmem>>, vector<8x32xf32>,
    %cst_80 = arith.constant dense<0.000000e+00> : vector<8x32xf32>
    %246 = tpu.matmul %244, %18, %cst_80 {dimension_numbers = #tpu.dot_dimension_numbers<[1], [0], [0], [1], [0, 0, 1, 1], [], []>} : vector<8x32xf32>, vector<32x32xf32>, vector<8x32xf32> -> vector<8x32xf32>
    %cst_81 = arith.constant dense<0.000000e+00> : vector<8x32xf32>
    %247 = tpu.matmul %244, %19, %cst_81 {dimension_numbers = #tpu.dot_dimension_numbers<[1], [0], [0], [1], [0, 0, 1, 1], [], []>} : vector<8x32xf32>, vector<32x32xf32>, vector<8x32xf32> -> vector<8x32xf32>
    %cst_82 = arith.constant dense<0.000000e+00> : vector<8x32xf32>
    %248 = tpu.matmul %244, %20, %cst_82 {dimension_numbers = #tpu.dot_dimension_numbers<[1], [0], [0], [1], [0, 0, 1, 1], [], []>} : vector<8x32xf32>, vector<32x32xf32>, vector<8x32xf32> -> vector<8x32xf32>
    %249 = vector.broadcast %21 : vector<1x32xf32> to vector<8x32xf32>
    %250 = arith.addf %248, %249 : vector<8x32xf32>
    %251 = vector.extract_strided_slice %7 {offsets = [64, 0], sizes = [8, 32], strides = [1, 1]} : vector<96x32xf32> to vector<8x32xf32>
    %252 = arith.addf %251, %246 : vector<8x32xf32>
    %253 = arith.negf %252 : vector<8x32xf32>
    %254 = math.exp %253 : vector<8x32xf32>
    %cst_83 = arith.constant 1.000000e+00 : f32
    %255 = vector.broadcast %cst_83 : f32 to vector<8x32xf32>
    %256 = arith.addf %255, %254 : vector<8x32xf32>
    %257 = arith.divf %255, %256 : vector<8x32xf32>
    %258 = vector.extract_strided_slice %12 {offsets = [64, 0], sizes = [8, 32], strides = [1, 1]} : vector<96x32xf32> to vector<8x32xf32>
    %259 = arith.addf %258, %247 : vector<8x32xf32>
    %260 = arith.negf %259 : vector<8x32xf32>
    %261 = math.exp %260 : vector<8x32xf32>
    %cst_84 = arith.constant 1.000000e+00 : f32
    %262 = vector.broadcast %cst_84 : f32 to vector<8x32xf32>
    %263 = arith.addf %262, %261 : vector<8x32xf32>
    %264 = arith.divf %262, %263 : vector<8x32xf32>
    %265 = vector.extract_strided_slice %17 {offsets = [64, 0], sizes = [8, 32], strides = [1, 1]} : vector<96x32xf32> to vector<8x32xf32>
    %266 = arith.mulf %257, %250 : vector<8x32xf32>
    %267 = arith.addf %265, %266 : vector<8x32xf32>
    %268 = math.tanh %267 : vector<8x32xf32>
    %cst_85 = arith.constant 1.000000e+00 : f32
    %269 = vector.broadcast %cst_85 : f32 to vector<8x32xf32>
    %270 = arith.subf %269, %264 : vector<8x32xf32>
    %271 = arith.mulf %270, %268 : vector<8x32xf32>
    %272 = arith.mulf %264, %244 : vector<8x32xf32>
    %273 = arith.addf %271, %272 : vector<8x32xf32>
    %c64 = arith.constant 64 : index
    %c0_86 = arith.constant 0 : index
    %274 = vector.load %arg37[%c64, %c0_86] : memref<96x32xf32, #tpu.memory_space<vmem>>, vector<8x32xf32>
    tpu.vector_store %arg37[%c64, %c0_86], %273 {strides = array<i32>} : memref<96x32xf32, #tpu.memory_space<vmem>>, vector<8x32xf32>,
    %cst_87 = arith.constant dense<0.000000e+00> : vector<8x32xf32>
    %275 = tpu.matmul %273, %18, %cst_87 {dimension_numbers = #tpu.dot_dimension_numbers<[1], [0], [0], [1], [0, 0, 1, 1], [], []>} : vector<8x32xf32>, vector<32x32xf32>, vector<8x32xf32> -> vector<8x32xf32>
    %cst_88 = arith.constant dense<0.000000e+00> : vector<8x32xf32>
    %276 = tpu.matmul %273, %19, %cst_88 {dimension_numbers = #tpu.dot_dimension_numbers<[1], [0], [0], [1], [0, 0, 1, 1], [], []>} : vector<8x32xf32>, vector<32x32xf32>, vector<8x32xf32> -> vector<8x32xf32>
    %cst_89 = arith.constant dense<0.000000e+00> : vector<8x32xf32>
    %277 = tpu.matmul %273, %20, %cst_89 {dimension_numbers = #tpu.dot_dimension_numbers<[1], [0], [0], [1], [0, 0, 1, 1], [], []>} : vector<8x32xf32>, vector<32x32xf32>, vector<8x32xf32> -> vector<8x32xf32>
    %278 = vector.broadcast %21 : vector<1x32xf32> to vector<8x32xf32>
    %279 = arith.addf %277, %278 : vector<8x32xf32>
    %280 = vector.extract_strided_slice %7 {offsets = [72, 0], sizes = [8, 32], strides = [1, 1]} : vector<96x32xf32> to vector<8x32xf32>
    %281 = arith.addf %280, %275 : vector<8x32xf32>
    %282 = arith.negf %281 : vector<8x32xf32>
    %283 = math.exp %282 : vector<8x32xf32>
    %cst_90 = arith.constant 1.000000e+00 : f32
    %284 = vector.broadcast %cst_90 : f32 to vector<8x32xf32>
    %285 = arith.addf %284, %283 : vector<8x32xf32>
    %286 = arith.divf %284, %285 : vector<8x32xf32>
    %287 = vector.extract_strided_slice %12 {offsets = [72, 0], sizes = [8, 32], strides = [1, 1]} : vector<96x32xf32> to vector<8x32xf32>
    %288 = arith.addf %287, %276 : vector<8x32xf32>
    %289 = arith.negf %288 : vector<8x32xf32>
    %290 = math.exp %289 : vector<8x32xf32>
    %cst_91 = arith.constant 1.000000e+00 : f32
    %291 = vector.broadcast %cst_91 : f32 to vector<8x32xf32>
    %292 = arith.addf %291, %290 : vector<8x32xf32>
    %293 = arith.divf %291, %292 : vector<8x32xf32>
    %294 = vector.extract_strided_slice %17 {offsets = [72, 0], sizes = [8, 32], strides = [1, 1]} : vector<96x32xf32> to vector<8x32xf32>
    %295 = arith.mulf %286, %279 : vector<8x32xf32>
    %296 = arith.addf %294, %295 : vector<8x32xf32>
    %297 = math.tanh %296 : vector<8x32xf32>
    %cst_92 = arith.constant 1.000000e+00 : f32
    %298 = vector.broadcast %cst_92 : f32 to vector<8x32xf32>
    %299 = arith.subf %298, %293 : vector<8x32xf32>
    %300 = arith.mulf %299, %297 : vector<8x32xf32>
    %301 = arith.mulf %293, %273 : vector<8x32xf32>
    %302 = arith.addf %300, %301 : vector<8x32xf32>
    %c72 = arith.constant 72 : index
    %c0_93 = arith.constant 0 : index
    %303 = vector.load %arg37[%c72, %c0_93] : memref<96x32xf32, #tpu.memory_space<vmem>>, vector<8x32xf32>
    tpu.vector_store %arg37[%c72, %c0_93], %302 {strides = array<i32>} : memref<96x32xf32, #tpu.memory_space<vmem>>, vector<8x32xf32>,
    %cst_94 = arith.constant dense<0.000000e+00> : vector<8x32xf32>
    %304 = tpu.matmul %302, %18, %cst_94 {dimension_numbers = #tpu.dot_dimension_numbers<[1], [0], [0], [1], [0, 0, 1, 1], [], []>} : vector<8x32xf32>, vector<32x32xf32>, vector<8x32xf32> -> vector<8x32xf32>
    %cst_95 = arith.constant dense<0.000000e+00> : vector<8x32xf32>
    %305 = tpu.matmul %302, %19, %cst_95 {dimension_numbers = #tpu.dot_dimension_numbers<[1], [0], [0], [1], [0, 0, 1, 1], [], []>} : vector<8x32xf32>, vector<32x32xf32>, vector<8x32xf32> -> vector<8x32xf32>
    %cst_96 = arith.constant dense<0.000000e+00> : vector<8x32xf32>
    %306 = tpu.matmul %302, %20, %cst_96 {dimension_numbers = #tpu.dot_dimension_numbers<[1], [0], [0], [1], [0, 0, 1, 1], [], []>} : vector<8x32xf32>, vector<32x32xf32>, vector<8x32xf32> -> vector<8x32xf32>
    %307 = vector.broadcast %21 : vector<1x32xf32> to vector<8x32xf32>
    %308 = arith.addf %306, %307 : vector<8x32xf32>
    %309 = vector.extract_strided_slice %7 {offsets = [80, 0], sizes = [8, 32], strides = [1, 1]} : vector<96x32xf32> to vector<8x32xf32>
    %310 = arith.addf %309, %304 : vector<8x32xf32>
    %311 = arith.negf %310 : vector<8x32xf32>
    %312 = math.exp %311 : vector<8x32xf32>
    %cst_97 = arith.constant 1.000000e+00 : f32
    %313 = vector.broadcast %cst_97 : f32 to vector<8x32xf32>
    %314 = arith.addf %313, %312 : vector<8x32xf32>
    %315 = arith.divf %313, %314 : vector<8x32xf32>
    %316 = vector.extract_strided_slice %12 {offsets = [80, 0], sizes = [8, 32], strides = [1, 1]} : vector<96x32xf32> to vector<8x32xf32>
    %317 = arith.addf %316, %305 : vector<8x32xf32>
    %318 = arith.negf %317 : vector<8x32xf32>
    %319 = math.exp %318 : vector<8x32xf32>
    %cst_98 = arith.constant 1.000000e+00 : f32
    %320 = vector.broadcast %cst_98 : f32 to vector<8x32xf32>
    %321 = arith.addf %320, %319 : vector<8x32xf32>
    %322 = arith.divf %320, %321 : vector<8x32xf32>
    %323 = vector.extract_strided_slice %17 {offsets = [80, 0], sizes = [8, 32], strides = [1, 1]} : vector<96x32xf32> to vector<8x32xf32>
    %324 = arith.mulf %315, %308 : vector<8x32xf32>
    %325 = arith.addf %323, %324 : vector<8x32xf32>
    %326 = math.tanh %325 : vector<8x32xf32>
    %cst_99 = arith.constant 1.000000e+00 : f32
    %327 = vector.broadcast %cst_99 : f32 to vector<8x32xf32>
    %328 = arith.subf %327, %322 : vector<8x32xf32>
    %329 = arith.mulf %328, %326 : vector<8x32xf32>
    %330 = arith.mulf %322, %302 : vector<8x32xf32>
    %331 = arith.addf %329, %330 : vector<8x32xf32>
    %c80 = arith.constant 80 : index
    %c0_100 = arith.constant 0 : index
    %332 = vector.load %arg37[%c80, %c0_100] : memref<96x32xf32, #tpu.memory_space<vmem>>, vector<8x32xf32>
    tpu.vector_store %arg37[%c80, %c0_100], %331 {strides = array<i32>} : memref<96x32xf32, #tpu.memory_space<vmem>>, vector<8x32xf32>,
    %cst_101 = arith.constant dense<0.000000e+00> : vector<8x32xf32>
    %333 = tpu.matmul %331, %18, %cst_101 {dimension_numbers = #tpu.dot_dimension_numbers<[1], [0], [0], [1], [0, 0, 1, 1], [], []>} : vector<8x32xf32>, vector<32x32xf32>, vector<8x32xf32> -> vector<8x32xf32>
    %cst_102 = arith.constant dense<0.000000e+00> : vector<8x32xf32>
    %334 = tpu.matmul %331, %19, %cst_102 {dimension_numbers = #tpu.dot_dimension_numbers<[1], [0], [0], [1], [0, 0, 1, 1], [], []>} : vector<8x32xf32>, vector<32x32xf32>, vector<8x32xf32> -> vector<8x32xf32>
    %cst_103 = arith.constant dense<0.000000e+00> : vector<8x32xf32>
    %335 = tpu.matmul %331, %20, %cst_103 {dimension_numbers = #tpu.dot_dimension_numbers<[1], [0], [0], [1], [0, 0, 1, 1], [], []>} : vector<8x32xf32>, vector<32x32xf32>, vector<8x32xf32> -> vector<8x32xf32>
    %336 = vector.broadcast %21 : vector<1x32xf32> to vector<8x32xf32>
    %337 = arith.addf %335, %336 : vector<8x32xf32>
    %338 = vector.extract_strided_slice %7 {offsets = [88, 0], sizes = [8, 32], strides = [1, 1]} : vector<96x32xf32> to vector<8x32xf32>
    %339 = arith.addf %338, %333 : vector<8x32xf32>
    %340 = arith.negf %339 : vector<8x32xf32>
    %341 = math.exp %340 : vector<8x32xf32>
    %cst_104 = arith.constant 1.000000e+00 : f32
    %342 = vector.broadcast %cst_104 : f32 to vector<8x32xf32>
    %343 = arith.addf %342, %341 : vector<8x32xf32>
    %344 = arith.divf %342, %343 : vector<8x32xf32>
    %345 = vector.extract_strided_slice %12 {offsets = [88, 0], sizes = [8, 32], strides = [1, 1]} : vector<96x32xf32> to vector<8x32xf32>
    %346 = arith.addf %345, %334 : vector<8x32xf32>
    %347 = arith.negf %346 : vector<8x32xf32>
    %348 = math.exp %347 : vector<8x32xf32>
    %cst_105 = arith.constant 1.000000e+00 : f32
    %349 = vector.broadcast %cst_105 : f32 to vector<8x32xf32>
    %350 = arith.addf %349, %348 : vector<8x32xf32>
    %351 = arith.divf %349, %350 : vector<8x32xf32>
    %352 = vector.extract_strided_slice %17 {offsets = [88, 0], sizes = [8, 32], strides = [1, 1]} : vector<96x32xf32> to vector<8x32xf32>
    %353 = arith.mulf %344, %337 : vector<8x32xf32>
    %354 = arith.addf %352, %353 : vector<8x32xf32>
    %355 = math.tanh %354 : vector<8x32xf32>
    %cst_106 = arith.constant 1.000000e+00 : f32
    %356 = vector.broadcast %cst_106 : f32 to vector<8x32xf32>
    %357 = arith.subf %356, %351 : vector<8x32xf32>
    %358 = arith.mulf %357, %355 : vector<8x32xf32>
    %359 = arith.mulf %351, %331 : vector<8x32xf32>
    %360 = arith.addf %358, %359 : vector<8x32xf32>
    %c88 = arith.constant 88 : index
    %c0_107 = arith.constant 0 : index
    %361 = vector.load %arg37[%c88, %c0_107] : memref<96x32xf32, #tpu.memory_space<vmem>>, vector<8x32xf32>
    tpu.vector_store %arg37[%c88, %c0_107], %360 {strides = array<i32>} : memref<96x32xf32, #tpu.memory_space<vmem>>, vector<8x32xf32>,
    %c0_108 = arith.constant 0 : index
    %c0_109 = arith.constant 0 : index
    %362 = vector.load %arg12[%c0_108, %c0_109] : memref<128x96xf32, #tpu.memory_space<vmem>>, vector<128x96xf32>
    %c0_110 = arith.constant 0 : index
    %c0_111 = arith.constant 0 : index
    %363 = vector.load %arg37[%c0_110, %c0_111] : memref<96x32xf32, #tpu.memory_space<vmem>>, vector<96x32xf32>
    %cst_112 = arith.constant dense<0.000000e+00> : vector<128x32xf32>
    %364 = tpu.matmul %362, %363, %cst_112 {dimension_numbers = #tpu.dot_dimension_numbers<[1], [0], [0], [1], [0, 0, 1, 1], [], []>} : vector<128x96xf32>, vector<96x32xf32>, vector<128x32xf32> -> vector<128x32xf32>
    %c0_113 = arith.constant 0 : index
    %c0_114 = arith.constant 0 : index
    %365 = vector.load %arg38[%c0_113, %c0_114] : memref<128x32xf32, #tpu.memory_space<vmem>>, vector<128x32xf32>
    tpu.vector_store %arg38[%c0_113, %c0_114], %364 {strides = array<i32>} : memref<128x32xf32, #tpu.memory_space<vmem>>, vector<128x32xf32>,
    %c0_115 = arith.constant 0 : index
    %c0_116 = arith.constant 0 : index
    %366 = vector.load %arg14[%c0_115, %c0_116] : memref<1x32xf32, #tpu.memory_space<vmem>>, vector<1x32xf32>
    %c0_117 = arith.constant 0 : index
    %c0_118 = arith.constant 0 : index
    %367 = vector.load %arg15[%c0_117, %c0_118] : memref<1x32xf32, #tpu.memory_space<vmem>>, vector<1x32xf32>
    %c0_119 = arith.constant 0 : index
    %c0_120 = arith.constant 0 : index
    %368 = vector.load %arg16[%c0_119, %c0_120] : memref<1x12xf32, #tpu.memory_space<vmem>>, vector<1x12xf32>
    %c0_121 = arith.constant 0 : index
    %c0_122 = arith.constant 0 : index
    %369 = vector.load %arg17[%c0_121, %c0_122] : memref<12x144xf32, #tpu.memory_space<vmem>>, vector<12x144xf32>
    %c0_123 = arith.constant 0 : index
    %c0_124 = arith.constant 0 : index
    %370 = vector.load %arg18[%c0_123, %c0_124] : memref<1x144xf32, #tpu.memory_space<vmem>>, vector<1x144xf32>
    %cst_125 = arith.constant 0.000000e+00 : f32
    %371 = vector.broadcast %cst_125 : f32 to vector<1x144xf32>
    %c0_126 = arith.constant 0 : index
    %c0_127 = arith.constant 0 : index
    %372 = vector.load %arg38[%c0_126, %c0_127] : memref<128x32xf32, #tpu.memory_space<vmem>>, vector<12x32xf32>
    %c0_128 = arith.constant 0 : index
    %c0_129 = arith.constant 0 : index
    %373 = vector.load %arg13[%c0_128, %c0_129] : memref<4x32xf32, #tpu.memory_space<vmem>>, vector<1x32xf32>
    %374 = vector.broadcast %373 : vector<1x32xf32> to vector<12x32xf32>
    %375 = arith.mulf %372, %374 : vector<12x32xf32>
    %376 = vector.broadcast %366 : vector<1x32xf32> to vector<12x32xf32>
    %377 = arith.addf %376, %375 : vector<12x32xf32>
    %c16_130 = arith.constant 16 : index
    %c0_131 = arith.constant 0 : index
    %378 = vector.load %arg38[%c16_130, %c0_131] : memref<128x32xf32, #tpu.memory_space<vmem>>, vector<12x32xf32>
    %c1 = arith.constant 1 : index
    %c0_132 = arith.constant 0 : index
    %379 = vector.load %arg13[%c1, %c0_132] : memref<4x32xf32, #tpu.memory_space<vmem>>, vector<1x32xf32>
    %380 = vector.broadcast %379 : vector<1x32xf32> to vector<12x32xf32>
    %381 = arith.mulf %378, %380 : vector<12x32xf32>
    %382 = arith.addf %377, %381 : vector<12x32xf32>
    %c32_133 = arith.constant 32 : index
    %c0_134 = arith.constant 0 : index
    %383 = vector.load %arg38[%c32_133, %c0_134] : memref<128x32xf32, #tpu.memory_space<vmem>>, vector<12x32xf32>
    %c2 = arith.constant 2 : index
    %c0_135 = arith.constant 0 : index
    %384 = vector.load %arg13[%c2, %c0_135] : memref<4x32xf32, #tpu.memory_space<vmem>>, vector<1x32xf32>
    %385 = vector.broadcast %384 : vector<1x32xf32> to vector<12x32xf32>
    %386 = arith.mulf %383, %385 : vector<12x32xf32>
    %387 = arith.addf %382, %386 : vector<12x32xf32>
    %c48_136 = arith.constant 48 : index
    %c0_137 = arith.constant 0 : index
    %388 = vector.load %arg38[%c48_136, %c0_137] : memref<128x32xf32, #tpu.memory_space<vmem>>, vector<12x32xf32>
    %c3 = arith.constant 3 : index
    %c0_138 = arith.constant 0 : index
    %389 = vector.load %arg13[%c3, %c0_138] : memref<4x32xf32, #tpu.memory_space<vmem>>, vector<1x32xf32>
    %390 = vector.broadcast %389 : vector<1x32xf32> to vector<12x32xf32>
    %391 = arith.mulf %388, %390 : vector<12x32xf32>
    %392 = arith.addf %387, %391 : vector<12x32xf32>
    %cst_139 = arith.constant 0.000000e+00 : f32
    %393 = vector.broadcast %cst_139 : f32 to vector<12x32xf32>
    %394 = arith.maximumf %392, %393 : vector<12x32xf32>
    %cst_140 = arith.constant dense<0.000000e+00> : vector<1x12xf32>
    %395 = tpu.matmul %367, %394, %cst_140 {dimension_numbers = #tpu.dot_dimension_numbers<[1], [1], [0], [0], [0, 0, 1, 0], [], []>} : vector<1x32xf32>, vector<12x32xf32>, vector<1x12xf32> -> vector<1x12xf32>
    %396 = arith.addf %395, %368 : vector<1x12xf32>
    %cst_141 = arith.constant 0.000000e+00 : f32
    %397 = vector.broadcast %cst_141 : f32 to vector<1x12xf32>
    %398 = arith.maximumf %396, %397 : vector<1x12xf32>
    %cst_142 = arith.constant dense<0.000000e+00> : vector<1x144xf32>
    %399 = tpu.matmul %398, %369, %cst_142 {dimension_numbers = #tpu.dot_dimension_numbers<[1], [0], [0], [1], [0, 0, 1, 1], [], []>} : vector<1x12xf32>, vector<12x144xf32>, vector<1x144xf32> -> vector<1x144xf32>
    %400 = arith.addf %399, %370 : vector<1x144xf32>
    %cst_143 = arith.constant 0.000000e+00 : f32
    %401 = vector.broadcast %cst_143 : f32 to vector<1x144xf32>
    %402 = arith.maximumf %400, %401 : vector<1x144xf32>
    %403 = arith.addf %371, %402 : vector<1x144xf32>
    %c64_144 = arith.constant 64 : index
    %c0_145 = arith.constant 0 : index
    %404 = vector.load %arg38[%c64_144, %c0_145] : memref<128x32xf32, #tpu.memory_space<vmem>>, vector<12x32xf32>
    %c0_146 = arith.constant 0 : index
    %c0_147 = arith.constant 0 : index
    %405 = vector.load %arg13[%c0_146, %c0_147] : memref<4x32xf32, #tpu.memory_space<vmem>>, vector<1x32xf32>
    %406 = vector.broadcast %405 : vector<1x32xf32> to vector<12x32xf32>
    %407 = arith.mulf %404, %406 : vector<12x32xf32>
    %408 = vector.broadcast %366 : vector<1x32xf32> to vector<12x32xf32>
    %409 = arith.addf %408, %407 : vector<12x32xf32>
    %c80_148 = arith.constant 80 : index
    %c0_149 = arith.constant 0 : index
    %410 = vector.load %arg38[%c80_148, %c0_149] : memref<128x32xf32, #tpu.memory_space<vmem>>, vector<12x32xf32>
    %c1_150 = arith.constant 1 : index
    %c0_151 = arith.constant 0 : index
    %411 = vector.load %arg13[%c1_150, %c0_151] : memref<4x32xf32, #tpu.memory_space<vmem>>, vector<1x32xf32>
    %412 = vector.broadcast %411 : vector<1x32xf32> to vector<12x32xf32>
    %413 = arith.mulf %410, %412 : vector<12x32xf32>
    %414 = arith.addf %409, %413 : vector<12x32xf32>
    %c96 = arith.constant 96 : index
    %c0_152 = arith.constant 0 : index
    %415 = vector.load %arg38[%c96, %c0_152] : memref<128x32xf32, #tpu.memory_space<vmem>>, vector<12x32xf32>
    %c2_153 = arith.constant 2 : index
    %c0_154 = arith.constant 0 : index
    %416 = vector.load %arg13[%c2_153, %c0_154] : memref<4x32xf32, #tpu.memory_space<vmem>>, vector<1x32xf32>
    %417 = vector.broadcast %416 : vector<1x32xf32> to vector<12x32xf32>
    %418 = arith.mulf %415, %417 : vector<12x32xf32>
    %419 = arith.addf %414, %418 : vector<12x32xf32>
    %c112 = arith.constant 112 : index
    %c0_155 = arith.constant 0 : index
    %420 = vector.load %arg38[%c112, %c0_155] : memref<128x32xf32, #tpu.memory_space<vmem>>, vector<12x32xf32>
    %c3_156 = arith.constant 3 : index
    %c0_157 = arith.constant 0 : index
    %421 = vector.load %arg13[%c3_156, %c0_157] : memref<4x32xf32, #tpu.memory_space<vmem>>, vector<1x32xf32>
    %422 = vector.broadcast %421 : vector<1x32xf32> to vector<12x32xf32>
    %423 = arith.mulf %420, %422 : vector<12x32xf32>
    %424 = arith.addf %419, %423 : vector<12x32xf32>
    %cst_158 = arith.constant 0.000000e+00 : f32
    %425 = vector.broadcast %cst_158 : f32 to vector<12x32xf32>
    %426 = arith.maximumf %424, %425 : vector<12x32xf32>
    %cst_159 = arith.constant dense<0.000000e+00> : vector<1x12xf32>
    %427 = tpu.matmul %367, %426, %cst_159 {dimension_numbers = #tpu.dot_dimension_numbers<[1], [1], [0], [0], [0, 0, 1, 0], [], []>} : vector<1x32xf32>, vector<12x32xf32>, vector<1x12xf32> -> vector<1x12xf32>
    %428 = arith.addf %427, %368 : vector<1x12xf32>
    %cst_160 = arith.constant 0.000000e+00 : f32
    %429 = vector.broadcast %cst_160 : f32 to vector<1x12xf32>
    %430 = arith.maximumf %428, %429 : vector<1x12xf32>
    %cst_161 = arith.constant dense<0.000000e+00> : vector<1x144xf32>
    %431 = tpu.matmul %430, %369, %cst_161 {dimension_numbers = #tpu.dot_dimension_numbers<[1], [0], [0], [1], [0, 0, 1, 1], [], []>} : vector<1x12xf32>, vector<12x144xf32>, vector<1x144xf32> -> vector<1x144xf32>
    %432 = arith.addf %431, %370 : vector<1x144xf32>
    %cst_162 = arith.constant 0.000000e+00 : f32
    %433 = vector.broadcast %cst_162 : f32 to vector<1x144xf32>
    %434 = arith.maximumf %432, %433 : vector<1x144xf32>
    %435 = arith.addf %403, %434 : vector<1x144xf32>
    %cst_163 = arith.constant 5.000000e-01 : f32
    %436 = vector.broadcast %cst_163 : f32 to vector<1x144xf32>
    %437 = arith.mulf %435, %436 : vector<1x144xf32>
    %c0_164 = arith.constant 0 : index
    %c0_165 = arith.constant 0 : index
    %438 = vector.load %arg21[%c0_164, %c0_165] : memref<12x12xf32, #tpu.memory_space<vmem>>, vector<12x12xf32>
    %c0_166 = arith.constant 0 : index
    %c0_167 = arith.constant 0 : index
    %439 = vector.load %arg19[%c0_166, %c0_167] : memref<12x144xf32, #tpu.memory_space<vmem>>, vector<12x144xf32>
    %440 = vector.broadcast %437 : vector<1x144xf32> to vector<12x144xf32>
    %441 = arith.mulf %439, %440 : vector<12x144xf32>
    %c0_168 = arith.constant 0 : index
    %c0_169 = arith.constant 0 : index
    %442 = vector.load %arg20[%c0_168, %c0_169] : memref<144x12xf32, #tpu.memory_space<vmem>>, vector<144x12xf32>
    %cst_170 = arith.constant dense<0.000000e+00> : vector<12x12xf32>
    %443 = tpu.matmul %441, %442, %cst_170 {dimension_numbers = #tpu.dot_dimension_numbers<[1], [0], [0], [1], [0, 0, 1, 1], [], []>} : vector<12x144xf32>, vector<144x12xf32>, vector<12x12xf32> -> vector<12x12xf32>
    %cst_171 = arith.constant 0.000000e+00 : f32
    %444 = vector.broadcast %cst_171 : f32 to vector<12x12xf32>
    %445 = arith.maximumf %443, %444 : vector<12x12xf32>
    %c0_172 = arith.constant 0 : index
    %c0_173 = arith.constant 0 : index
    %446 = vector.load %arg22[%c0_172, %c0_173] : memref<12x1xf32, #tpu.memory_space<vmem>>, vector<12x1xf32>
    %cst_174 = arith.constant dense<0.000000e+00> : vector<12x1xf32>
    %447 = tpu.matmul %445, %446, %cst_174 {dimension_numbers = #tpu.dot_dimension_numbers<[1], [0], [0], [1], [0, 0, 1, 1], [], []>} : vector<12x12xf32>, vector<12x1xf32>, vector<12x1xf32> -> vector<12x1xf32>
    %c0_175 = arith.constant 0 : index
    %c0_176 = arith.constant 0 : index
    %448 = vector.load %arg23[%c0_175, %c0_176] : memref<1x12xf32, #tpu.memory_space<vmem>>, vector<1x12xf32>
    %cst_177 = arith.constant dense<0.000000e+00> : vector<1x12xf32>
    %449 = tpu.matmul %448, %445, %cst_177 {dimension_numbers = #tpu.dot_dimension_numbers<[1], [1], [0], [0], [0, 0, 1, 0], [], []>} : vector<1x12xf32>, vector<12x12xf32>, vector<1x12xf32> -> vector<1x12xf32>
    %cst_178 = arith.constant dense<0.000000e+00> : vector<12x12xf32>
    %450 = tpu.matmul %438, %445, %cst_178 {dimension_numbers = #tpu.dot_dimension_numbers<[1], [1], [0], [0], [0, 0, 1, 0], [], []>} : vector<12x12xf32>, vector<12x12xf32>, vector<12x12xf32> -> vector<12x12xf32>
    %451 = arith.addf %445, %450 : vector<12x12xf32>
    %cst_179 = arith.constant 5.000000e-01 : f32
    %452 = vector.broadcast %cst_179 : f32 to vector<12x12xf32>
    %453 = arith.mulf %452, %451 : vector<12x12xf32>
    %454 = math.sqrt %447 : vector<12x1xf32>
    %cst_180 = arith.constant 1.000000e-07 : f32
    %455 = vector.broadcast %cst_180 : f32 to vector<12x1xf32>
    %456 = arith.addf %454, %455 : vector<12x1xf32>
    %cst_181 = arith.constant 1.000000e+00 : f32
    %457 = vector.broadcast %cst_181 : f32 to vector<12x1xf32>
    %458 = arith.divf %457, %456 : vector<12x1xf32>
    %459 = math.sqrt %449 : vector<1x12xf32>
    %cst_182 = arith.constant 1.000000e-07 : f32
    %460 = vector.broadcast %cst_182 : f32 to vector<1x12xf32>
    %461 = arith.addf %459, %460 : vector<1x12xf32>
    %cst_183 = arith.constant 1.000000e+00 : f32
    %462 = vector.broadcast %cst_183 : f32 to vector<1x12xf32>
    %463 = arith.divf %462, %461 : vector<1x12xf32>
    %464 = vector.broadcast %447 : vector<12x1xf32> to vector<12x12xf32>
    %465 = arith.mulf %464, %438 : vector<12x12xf32>
    %466 = arith.subf %465, %453 : vector<12x12xf32>
    %467 = vector.broadcast %458 : vector<12x1xf32> to vector<12x12xf32>
    %468 = arith.mulf %467, %466 : vector<12x12xf32>
    %469 = vector.broadcast %463 : vector<1x12xf32> to vector<12x12xf32>
    %470 = arith.mulf %468, %469 : vector<12x12xf32>
    %cst_184 = arith.constant dense<0.000000e+00> : vector<12x12xf32>
    %471 = tpu.matmul %470, %470, %cst_184 {dimension_numbers = #tpu.dot_dimension_numbers<[1], [0], [0], [1], [0, 0, 1, 1], [], []>} : vector<12x12xf32>, vector<12x12xf32>, vector<12x12xf32> -> vector<12x12xf32>
    %cst_185 = arith.constant 2.000000e+00 : f32
    %472 = vector.broadcast %cst_185 : f32 to vector<12x12xf32>
    %473 = arith.mulf %472, %471 : vector<12x12xf32>
    %cst_186 = arith.constant dense<0.000000e+00> : vector<12x12xf32>
    %474 = tpu.matmul %470, %473, %cst_186 {dimension_numbers = #tpu.dot_dimension_numbers<[1], [0], [0], [1], [0, 0, 1, 1], [], []>} : vector<12x12xf32>, vector<12x12xf32>, vector<12x12xf32> -> vector<12x12xf32>
    %cst_187 = arith.constant 2.000000e+00 : f32
    %475 = vector.broadcast %cst_187 : f32 to vector<12x12xf32>
    %476 = arith.mulf %475, %474 : vector<12x12xf32>
    %477 = arith.subf %476, %470 : vector<12x12xf32>
    %c0_188 = arith.constant 0 : index
    %c0_189 = arith.constant 0 : index
    %c0_190 = arith.constant 0 : index
    %478 = vector.load %arg24[%c0_188, %c0_189, %c0_190] : memref<2x32x32xf32, #tpu.memory_space<vmem>>, vector<1x32x32xf32>
    %479 = vector.shape_cast %478 : vector<1x32x32xf32> to vector<32x32xf32>
    %c0_191 = arith.constant 0 : index
    %c0_192 = arith.constant 0 : index
    %c0_193 = arith.constant 0 : index
    %480 = vector.load %arg25[%c0_191, %c0_192, %c0_193] : memref<2x1x32xf32, #tpu.memory_space<vmem>>, vector<1x1x32xf32>
    %481 = vector.shape_cast %480 : vector<1x1x32xf32> to vector<1x32xf32>
    %cst_194 = arith.constant 0.000000e+00 : f32
    %482 = vector.broadcast %cst_194 : f32 to vector<1x32xf32>
    %483 = arith.maximumf %481, %482 : vector<1x32xf32>
    %c0_195 = arith.constant 0 : index
    %c0_196 = arith.constant 0 : index
    %484 = vector.load %arg38[%c0_195, %c0_196] : memref<128x32xf32, #tpu.memory_space<vmem>>, vector<128x32xf32>
    %cst_197 = arith.constant dense<0.000000e+00> : vector<128x32xf32>
    %485 = tpu.matmul %484, %479, %cst_197 {dimension_numbers = #tpu.dot_dimension_numbers<[1], [0], [0], [1], [0, 0, 1, 1], [], []>} : vector<128x32xf32>, vector<32x32xf32>, vector<128x32xf32> -> vector<128x32xf32>
    %c0_198 = arith.constant 0 : index
    %c0_199 = arith.constant 0 : index
    %486 = vector.load %arg39[%c0_198, %c0_199] : memref<128x32xf32, #tpu.memory_space<vmem>>, vector<128x32xf32>
    tpu.vector_store %arg39[%c0_198, %c0_199], %485 {strides = array<i32>} : memref<128x32xf32, #tpu.memory_space<vmem>>, vector<128x32xf32>,
    %c0_200 = arith.constant 0 : index
    %c0_201 = arith.constant 0 : index
    %487 = vector.load %arg38[%c0_200, %c0_201] : memref<128x32xf32, #tpu.memory_space<vmem>>, vector<12x32xf32>
    %488 = vector.broadcast %483 : vector<1x32xf32> to vector<12x32xf32>
    %489 = arith.addf %488, %487 : vector<12x32xf32>
    %c0_202 = arith.constant 0 : index
    %c0_203 = arith.constant 0 : index
    %490 = vector.load %arg38[%c0_202, %c0_203] : memref<128x32xf32, #tpu.memory_space<vmem>>, vector<12x32xf32>
    tpu.vector_store %arg38[%c0_202, %c0_203], %489 {strides = array<i32>} : memref<128x32xf32, #tpu.memory_space<vmem>>, vector<12x32xf32>,
    %c16_204 = arith.constant 16 : index
    %c0_205 = arith.constant 0 : index
    %491 = vector.load %arg38[%c16_204, %c0_205] : memref<128x32xf32, #tpu.memory_space<vmem>>, vector<12x32xf32>
    %c16_206 = arith.constant 16 : index
    %c0_207 = arith.constant 0 : index
    %492 = vector.load %arg39[%c16_206, %c0_207] : memref<128x32xf32, #tpu.memory_space<vmem>>, vector<12x32xf32>
    %cst_208 = arith.constant dense<0.000000e+00> : vector<12x32xf32>
    %493 = tpu.matmul %470, %492, %cst_208 {dimension_numbers = #tpu.dot_dimension_numbers<[1], [0], [0], [1], [0, 0, 1, 1], [], []>} : vector<12x12xf32>, vector<12x32xf32>, vector<12x32xf32> -> vector<12x32xf32>
    %494 = vector.broadcast %481 : vector<1x32xf32> to vector<12x32xf32>
    %495 = arith.addf %493, %494 : vector<12x32xf32>
    %cst_209 = arith.constant 0.000000e+00 : f32
    %496 = vector.broadcast %cst_209 : f32 to vector<12x32xf32>
    %497 = arith.maximumf %495, %496 : vector<12x32xf32>
    %498 = arith.addf %497, %491 : vector<12x32xf32>
    %c16_210 = arith.constant 16 : index
    %c0_211 = arith.constant 0 : index
    %499 = vector.load %arg38[%c16_210, %c0_211] : memref<128x32xf32, #tpu.memory_space<vmem>>, vector<12x32xf32>
    tpu.vector_store %arg38[%c16_210, %c0_211], %498 {strides = array<i32>} : memref<128x32xf32, #tpu.memory_space<vmem>>, vector<12x32xf32>,
    %c32_212 = arith.constant 32 : index
    %c0_213 = arith.constant 0 : index
    %500 = vector.load %arg38[%c32_212, %c0_213] : memref<128x32xf32, #tpu.memory_space<vmem>>, vector<12x32xf32>
    %c32_214 = arith.constant 32 : index
    %c0_215 = arith.constant 0 : index
    %501 = vector.load %arg39[%c32_214, %c0_215] : memref<128x32xf32, #tpu.memory_space<vmem>>, vector<12x32xf32>
    %cst_216 = arith.constant dense<0.000000e+00> : vector<12x32xf32>
    %502 = tpu.matmul %473, %501, %cst_216 {dimension_numbers = #tpu.dot_dimension_numbers<[1], [0], [0], [1], [0, 0, 1, 1], [], []>} : vector<12x12xf32>, vector<12x32xf32>, vector<12x32xf32> -> vector<12x32xf32>
    %503 = vector.broadcast %481 : vector<1x32xf32> to vector<12x32xf32>
    %504 = arith.addf %502, %503 : vector<12x32xf32>
    %cst_217 = arith.constant 0.000000e+00 : f32
    %505 = vector.broadcast %cst_217 : f32 to vector<12x32xf32>
    %506 = arith.maximumf %504, %505 : vector<12x32xf32>
    %507 = arith.addf %506, %500 : vector<12x32xf32>
    %c32_218 = arith.constant 32 : index
    %c0_219 = arith.constant 0 : index
    %508 = vector.load %arg38[%c32_218, %c0_219] : memref<128x32xf32, #tpu.memory_space<vmem>>, vector<12x32xf32>
    tpu.vector_store %arg38[%c32_218, %c0_219], %507 {strides = array<i32>} : memref<128x32xf32, #tpu.memory_space<vmem>>, vector<12x32xf32>,
    %c48_220 = arith.constant 48 : index
    %c0_221 = arith.constant 0 : index
    %509 = vector.load %arg38[%c48_220, %c0_221] : memref<128x32xf32, #tpu.memory_space<vmem>>, vector<12x32xf32>
    %c48_222 = arith.constant 48 : index
    %c0_223 = arith.constant 0 : index
    %510 = vector.load %arg39[%c48_222, %c0_223] : memref<128x32xf32, #tpu.memory_space<vmem>>, vector<12x32xf32>
    %cst_224 = arith.constant dense<0.000000e+00> : vector<12x32xf32>
    %511 = tpu.matmul %477, %510, %cst_224 {dimension_numbers = #tpu.dot_dimension_numbers<[1], [0], [0], [1], [0, 0, 1, 1], [], []>} : vector<12x12xf32>, vector<12x32xf32>, vector<12x32xf32> -> vector<12x32xf32>
    %512 = vector.broadcast %481 : vector<1x32xf32> to vector<12x32xf32>
    %513 = arith.addf %511, %512 : vector<12x32xf32>
    %cst_225 = arith.constant 0.000000e+00 : f32
    %514 = vector.broadcast %cst_225 : f32 to vector<12x32xf32>
    %515 = arith.maximumf %513, %514 : vector<12x32xf32>
    %516 = arith.addf %515, %509 : vector<12x32xf32>
    %c48_226 = arith.constant 48 : index
    %c0_227 = arith.constant 0 : index
    %517 = vector.load %arg38[%c48_226, %c0_227] : memref<128x32xf32, #tpu.memory_space<vmem>>, vector<12x32xf32>
    tpu.vector_store %arg38[%c48_226, %c0_227], %516 {strides = array<i32>} : memref<128x32xf32, #tpu.memory_space<vmem>>, vector<12x32xf32>,
    %c64_228 = arith.constant 64 : index
    %c0_229 = arith.constant 0 : index
    %518 = vector.load %arg38[%c64_228, %c0_229] : memref<128x32xf32, #tpu.memory_space<vmem>>, vector<12x32xf32>
    %519 = vector.broadcast %483 : vector<1x32xf32> to vector<12x32xf32>
    %520 = arith.addf %519, %518 : vector<12x32xf32>
    %c64_230 = arith.constant 64 : index
    %c0_231 = arith.constant 0 : index
    %521 = vector.load %arg38[%c64_230, %c0_231] : memref<128x32xf32, #tpu.memory_space<vmem>>, vector<12x32xf32>
    tpu.vector_store %arg38[%c64_230, %c0_231], %520 {strides = array<i32>} : memref<128x32xf32, #tpu.memory_space<vmem>>, vector<12x32xf32>,
    %c80_232 = arith.constant 80 : index
    %c0_233 = arith.constant 0 : index
    %522 = vector.load %arg38[%c80_232, %c0_233] : memref<128x32xf32, #tpu.memory_space<vmem>>, vector<12x32xf32>
    %c80_234 = arith.constant 80 : index
    %c0_235 = arith.constant 0 : index
    %523 = vector.load %arg39[%c80_234, %c0_235] : memref<128x32xf32, #tpu.memory_space<vmem>>, vector<12x32xf32>
    %cst_236 = arith.constant dense<0.000000e+00> : vector<12x32xf32>
    %524 = tpu.matmul %470, %523, %cst_236 {dimension_numbers = #tpu.dot_dimension_numbers<[1], [0], [0], [1], [0, 0, 1, 1], [], []>} : vector<12x12xf32>, vector<12x32xf32>, vector<12x32xf32> -> vector<12x32xf32>
    %525 = vector.broadcast %481 : vector<1x32xf32> to vector<12x32xf32>
    %526 = arith.addf %524, %525 : vector<12x32xf32>
    %cst_237 = arith.constant 0.000000e+00 : f32
    %527 = vector.broadcast %cst_237 : f32 to vector<12x32xf32>
    %528 = arith.maximumf %526, %527 : vector<12x32xf32>
    %529 = arith.addf %528, %522 : vector<12x32xf32>
    %c80_238 = arith.constant 80 : index
    %c0_239 = arith.constant 0 : index
    %530 = vector.load %arg38[%c80_238, %c0_239] : memref<128x32xf32, #tpu.memory_space<vmem>>, vector<12x32xf32>
    tpu.vector_store %arg38[%c80_238, %c0_239], %529 {strides = array<i32>} : memref<128x32xf32, #tpu.memory_space<vmem>>, vector<12x32xf32>,
    %c96_240 = arith.constant 96 : index
    %c0_241 = arith.constant 0 : index
    %531 = vector.load %arg38[%c96_240, %c0_241] : memref<128x32xf32, #tpu.memory_space<vmem>>, vector<12x32xf32>
    %c96_242 = arith.constant 96 : index
    %c0_243 = arith.constant 0 : index
    %532 = vector.load %arg39[%c96_242, %c0_243] : memref<128x32xf32, #tpu.memory_space<vmem>>, vector<12x32xf32>
    %cst_244 = arith.constant dense<0.000000e+00> : vector<12x32xf32>
    %533 = tpu.matmul %473, %532, %cst_244 {dimension_numbers = #tpu.dot_dimension_numbers<[1], [0], [0], [1], [0, 0, 1, 1], [], []>} : vector<12x12xf32>, vector<12x32xf32>, vector<12x32xf32> -> vector<12x32xf32>
    %534 = vector.broadcast %481 : vector<1x32xf32> to vector<12x32xf32>
    %535 = arith.addf %533, %534 : vector<12x32xf32>
    %cst_245 = arith.constant 0.000000e+00 : f32
    %536 = vector.broadcast %cst_245 : f32 to vector<12x32xf32>
    %537 = arith.maximumf %535, %536 : vector<12x32xf32>
    %538 = arith.addf %537, %531 : vector<12x32xf32>
    %c96_246 = arith.constant 96 : index
    %c0_247 = arith.constant 0 : index
    %539 = vector.load %arg38[%c96_246, %c0_247] : memref<128x32xf32, #tpu.memory_space<vmem>>, vector<12x32xf32>
    tpu.vector_store %arg38[%c96_246, %c0_247], %538 {strides = array<i32>} : memref<128x32xf32, #tpu.memory_space<vmem>>, vector<12x32xf32>,
    %c112_248 = arith.constant 112 : index
    %c0_249 = arith.constant 0 : index
    %540 = vector.load %arg38[%c112_248, %c0_249] : memref<128x32xf32, #tpu.memory_space<vmem>>, vector<12x32xf32>
    %c112_250 = arith.constant 112 : index
    %c0_251 = arith.constant 0 : index
    %541 = vector.load %arg39[%c112_250, %c0_251] : memref<128x32xf32, #tpu.memory_space<vmem>>, vector<12x32xf32>
    %cst_252 = arith.constant dense<0.000000e+00> : vector<12x32xf32>
    %542 = tpu.matmul %477, %541, %cst_252 {dimension_numbers = #tpu.dot_dimension_numbers<[1], [0], [0], [1], [0, 0, 1, 1], [], []>} : vector<12x12xf32>, vector<12x32xf32>, vector<12x32xf32> -> vector<12x32xf32>
    %543 = vector.broadcast %481 : vector<1x32xf32> to vector<12x32xf32>
    %544 = arith.addf %542, %543 : vector<12x32xf32>
    %cst_253 = arith.constant 0.000000e+00 : f32
    %545 = vector.broadcast %cst_253 : f32 to vector<12x32xf32>
    %546 = arith.maximumf %544, %545 : vector<12x32xf32>
    %547 = arith.addf %546, %540 : vector<12x32xf32>
    %c112_254 = arith.constant 112 : index
    %c0_255 = arith.constant 0 : index
    %548 = vector.load %arg38[%c112_254, %c0_255] : memref<128x32xf32, #tpu.memory_space<vmem>>, vector<12x32xf32>
    tpu.vector_store %arg38[%c112_254, %c0_255], %547 {strides = array<i32>} : memref<128x32xf32, #tpu.memory_space<vmem>>, vector<12x32xf32>,
    %c1_256 = arith.constant 1 : index
    %c0_257 = arith.constant 0 : index
    %c0_258 = arith.constant 0 : index
    %549 = vector.load %arg24[%c1_256, %c0_257, %c0_258] : memref<2x32x32xf32, #tpu.memory_space<vmem>>, vector<1x32x32xf32>
    %550 = vector.shape_cast %549 : vector<1x32x32xf32> to vector<32x32xf32>
    %c1_259 = arith.constant 1 : index
    %c0_260 = arith.constant 0 : index
    %c0_261 = arith.constant 0 : index
    %551 = vector.load %arg25[%c1_259, %c0_260, %c0_261] : memref<2x1x32xf32, #tpu.memory_space<vmem>>, vector<1x1x32xf32>
    %552 = vector.shape_cast %551 : vector<1x1x32xf32> to vector<1x32xf32>
    %cst_262 = arith.constant 0.000000e+00 : f32
    %553 = vector.broadcast %cst_262 : f32 to vector<1x32xf32>
    %554 = arith.maximumf %552, %553 : vector<1x32xf32>
    %c0_263 = arith.constant 0 : index
    %c0_264 = arith.constant 0 : index
    %555 = vector.load %arg38[%c0_263, %c0_264] : memref<128x32xf32, #tpu.memory_space<vmem>>, vector<128x32xf32>
    %cst_265 = arith.constant dense<0.000000e+00> : vector<128x32xf32>
    %556 = tpu.matmul %555, %550, %cst_265 {dimension_numbers = #tpu.dot_dimension_numbers<[1], [0], [0], [1], [0, 0, 1, 1], [], []>} : vector<128x32xf32>, vector<32x32xf32>, vector<128x32xf32> -> vector<128x32xf32>
    %c0_266 = arith.constant 0 : index
    %c0_267 = arith.constant 0 : index
    %557 = vector.load %arg39[%c0_266, %c0_267] : memref<128x32xf32, #tpu.memory_space<vmem>>, vector<128x32xf32>
    tpu.vector_store %arg39[%c0_266, %c0_267], %556 {strides = array<i32>} : memref<128x32xf32, #tpu.memory_space<vmem>>, vector<128x32xf32>,
    %c0_268 = arith.constant 0 : index
    %c0_269 = arith.constant 0 : index
    %558 = vector.load %arg38[%c0_268, %c0_269] : memref<128x32xf32, #tpu.memory_space<vmem>>, vector<12x32xf32>
    %559 = vector.broadcast %554 : vector<1x32xf32> to vector<12x32xf32>
    %560 = arith.addf %559, %558 : vector<12x32xf32>
    %c0_270 = arith.constant 0 : index
    %c0_271 = arith.constant 0 : index
    %561 = vector.load %arg38[%c0_270, %c0_271] : memref<128x32xf32, #tpu.memory_space<vmem>>, vector<12x32xf32>
    tpu.vector_store %arg38[%c0_270, %c0_271], %560 {strides = array<i32>} : memref<128x32xf32, #tpu.memory_space<vmem>>, vector<12x32xf32>,
    %c16_272 = arith.constant 16 : index
    %c0_273 = arith.constant 0 : index
    %562 = vector.load %arg38[%c16_272, %c0_273] : memref<128x32xf32, #tpu.memory_space<vmem>>, vector<12x32xf32>
    %c16_274 = arith.constant 16 : index
    %c0_275 = arith.constant 0 : index
    %563 = vector.load %arg39[%c16_274, %c0_275] : memref<128x32xf32, #tpu.memory_space<vmem>>, vector<12x32xf32>
    %cst_276 = arith.constant dense<0.000000e+00> : vector<12x32xf32>
    %564 = tpu.matmul %470, %563, %cst_276 {dimension_numbers = #tpu.dot_dimension_numbers<[1], [0], [0], [1], [0, 0, 1, 1], [], []>} : vector<12x12xf32>, vector<12x32xf32>, vector<12x32xf32> -> vector<12x32xf32>
    %565 = vector.broadcast %552 : vector<1x32xf32> to vector<12x32xf32>
    %566 = arith.addf %564, %565 : vector<12x32xf32>
    %cst_277 = arith.constant 0.000000e+00 : f32
    %567 = vector.broadcast %cst_277 : f32 to vector<12x32xf32>
    %568 = arith.maximumf %566, %567 : vector<12x32xf32>
    %569 = arith.addf %568, %562 : vector<12x32xf32>
    %c16_278 = arith.constant 16 : index
    %c0_279 = arith.constant 0 : index
    %570 = vector.load %arg38[%c16_278, %c0_279] : memref<128x32xf32, #tpu.memory_space<vmem>>, vector<12x32xf32>
    tpu.vector_store %arg38[%c16_278, %c0_279], %569 {strides = array<i32>} : memref<128x32xf32, #tpu.memory_space<vmem>>, vector<12x32xf32>,
    %c32_280 = arith.constant 32 : index
    %c0_281 = arith.constant 0 : index
    %571 = vector.load %arg38[%c32_280, %c0_281] : memref<128x32xf32, #tpu.memory_space<vmem>>, vector<12x32xf32>
    %c32_282 = arith.constant 32 : index
    %c0_283 = arith.constant 0 : index
    %572 = vector.load %arg39[%c32_282, %c0_283] : memref<128x32xf32, #tpu.memory_space<vmem>>, vector<12x32xf32>
    %cst_284 = arith.constant dense<0.000000e+00> : vector<12x32xf32>
    %573 = tpu.matmul %473, %572, %cst_284 {dimension_numbers = #tpu.dot_dimension_numbers<[1], [0], [0], [1], [0, 0, 1, 1], [], []>} : vector<12x12xf32>, vector<12x32xf32>, vector<12x32xf32> -> vector<12x32xf32>
    %574 = vector.broadcast %552 : vector<1x32xf32> to vector<12x32xf32>
    %575 = arith.addf %573, %574 : vector<12x32xf32>
    %cst_285 = arith.constant 0.000000e+00 : f32
    %576 = vector.broadcast %cst_285 : f32 to vector<12x32xf32>
    %577 = arith.maximumf %575, %576 : vector<12x32xf32>
    %578 = arith.addf %577, %571 : vector<12x32xf32>
    %c32_286 = arith.constant 32 : index
    %c0_287 = arith.constant 0 : index
    %579 = vector.load %arg38[%c32_286, %c0_287] : memref<128x32xf32, #tpu.memory_space<vmem>>, vector<12x32xf32>
    tpu.vector_store %arg38[%c32_286, %c0_287], %578 {strides = array<i32>} : memref<128x32xf32, #tpu.memory_space<vmem>>, vector<12x32xf32>,
    %c48_288 = arith.constant 48 : index
    %c0_289 = arith.constant 0 : index
    %580 = vector.load %arg38[%c48_288, %c0_289] : memref<128x32xf32, #tpu.memory_space<vmem>>, vector<12x32xf32>
    %c48_290 = arith.constant 48 : index
    %c0_291 = arith.constant 0 : index
    %581 = vector.load %arg39[%c48_290, %c0_291] : memref<128x32xf32, #tpu.memory_space<vmem>>, vector<12x32xf32>
    %cst_292 = arith.constant dense<0.000000e+00> : vector<12x32xf32>
    %582 = tpu.matmul %477, %581, %cst_292 {dimension_numbers = #tpu.dot_dimension_numbers<[1], [0], [0], [1], [0, 0, 1, 1], [], []>} : vector<12x12xf32>, vector<12x32xf32>, vector<12x32xf32> -> vector<12x32xf32>
    %583 = vector.broadcast %552 : vector<1x32xf32> to vector<12x32xf32>
    %584 = arith.addf %582, %583 : vector<12x32xf32>
    %cst_293 = arith.constant 0.000000e+00 : f32
    %585 = vector.broadcast %cst_293 : f32 to vector<12x32xf32>
    %586 = arith.maximumf %584, %585 : vector<12x32xf32>
    %587 = arith.addf %586, %580 : vector<12x32xf32>
    %c48_294 = arith.constant 48 : index
    %c0_295 = arith.constant 0 : index
    %588 = vector.load %arg38[%c48_294, %c0_295] : memref<128x32xf32, #tpu.memory_space<vmem>>, vector<12x32xf32>
    tpu.vector_store %arg38[%c48_294, %c0_295], %587 {strides = array<i32>} : memref<128x32xf32, #tpu.memory_space<vmem>>, vector<12x32xf32>,
    %c64_296 = arith.constant 64 : index
    %c0_297 = arith.constant 0 : index
    %589 = vector.load %arg38[%c64_296, %c0_297] : memref<128x32xf32, #tpu.memory_space<vmem>>, vector<12x32xf32>
    %590 = vector.broadcast %554 : vector<1x32xf32> to vector<12x32xf32>
    %591 = arith.addf %590, %589 : vector<12x32xf32>
    %c64_298 = arith.constant 64 : index
    %c0_299 = arith.constant 0 : index
    %592 = vector.load %arg38[%c64_298, %c0_299] : memref<128x32xf32, #tpu.memory_space<vmem>>, vector<12x32xf32>
    tpu.vector_store %arg38[%c64_298, %c0_299], %591 {strides = array<i32>} : memref<128x32xf32, #tpu.memory_space<vmem>>, vector<12x32xf32>,
    %c80_300 = arith.constant 80 : index
    %c0_301 = arith.constant 0 : index
    %593 = vector.load %arg38[%c80_300, %c0_301] : memref<128x32xf32, #tpu.memory_space<vmem>>, vector<12x32xf32>
    %c80_302 = arith.constant 80 : index
    %c0_303 = arith.constant 0 : index
    %594 = vector.load %arg39[%c80_302, %c0_303] : memref<128x32xf32, #tpu.memory_space<vmem>>, vector<12x32xf32>
    %cst_304 = arith.constant dense<0.000000e+00> : vector<12x32xf32>
    %595 = tpu.matmul %470, %594, %cst_304 {dimension_numbers = #tpu.dot_dimension_numbers<[1], [0], [0], [1], [0, 0, 1, 1], [], []>} : vector<12x12xf32>, vector<12x32xf32>, vector<12x32xf32> -> vector<12x32xf32>
    %596 = vector.broadcast %552 : vector<1x32xf32> to vector<12x32xf32>
    %597 = arith.addf %595, %596 : vector<12x32xf32>
    %cst_305 = arith.constant 0.000000e+00 : f32
    %598 = vector.broadcast %cst_305 : f32 to vector<12x32xf32>
    %599 = arith.maximumf %597, %598 : vector<12x32xf32>
    %600 = arith.addf %599, %593 : vector<12x32xf32>
    %c80_306 = arith.constant 80 : index
    %c0_307 = arith.constant 0 : index
    %601 = vector.load %arg38[%c80_306, %c0_307] : memref<128x32xf32, #tpu.memory_space<vmem>>, vector<12x32xf32>
    tpu.vector_store %arg38[%c80_306, %c0_307], %600 {strides = array<i32>} : memref<128x32xf32, #tpu.memory_space<vmem>>, vector<12x32xf32>,
    %c96_308 = arith.constant 96 : index
    %c0_309 = arith.constant 0 : index
    %602 = vector.load %arg38[%c96_308, %c0_309] : memref<128x32xf32, #tpu.memory_space<vmem>>, vector<12x32xf32>
    %c96_310 = arith.constant 96 : index
    %c0_311 = arith.constant 0 : index
    %603 = vector.load %arg39[%c96_310, %c0_311] : memref<128x32xf32, #tpu.memory_space<vmem>>, vector<12x32xf32>
    %cst_312 = arith.constant dense<0.000000e+00> : vector<12x32xf32>
    %604 = tpu.matmul %473, %603, %cst_312 {dimension_numbers = #tpu.dot_dimension_numbers<[1], [0], [0], [1], [0, 0, 1, 1], [], []>} : vector<12x12xf32>, vector<12x32xf32>, vector<12x32xf32> -> vector<12x32xf32>
    %605 = vector.broadcast %552 : vector<1x32xf32> to vector<12x32xf32>
    %606 = arith.addf %604, %605 : vector<12x32xf32>
    %cst_313 = arith.constant 0.000000e+00 : f32
    %607 = vector.broadcast %cst_313 : f32 to vector<12x32xf32>
    %608 = arith.maximumf %606, %607 : vector<12x32xf32>
    %609 = arith.addf %608, %602 : vector<12x32xf32>
    %c96_314 = arith.constant 96 : index
    %c0_315 = arith.constant 0 : index
    %610 = vector.load %arg38[%c96_314, %c0_315] : memref<128x32xf32, #tpu.memory_space<vmem>>, vector<12x32xf32>
    tpu.vector_store %arg38[%c96_314, %c0_315], %609 {strides = array<i32>} : memref<128x32xf32, #tpu.memory_space<vmem>>, vector<12x32xf32>,
    %c112_316 = arith.constant 112 : index
    %c0_317 = arith.constant 0 : index
    %611 = vector.load %arg38[%c112_316, %c0_317] : memref<128x32xf32, #tpu.memory_space<vmem>>, vector<12x32xf32>
    %c112_318 = arith.constant 112 : index
    %c0_319 = arith.constant 0 : index
    %612 = vector.load %arg39[%c112_318, %c0_319] : memref<128x32xf32, #tpu.memory_space<vmem>>, vector<12x32xf32>
    %cst_320 = arith.constant dense<0.000000e+00> : vector<12x32xf32>
    %613 = tpu.matmul %477, %612, %cst_320 {dimension_numbers = #tpu.dot_dimension_numbers<[1], [0], [0], [1], [0, 0, 1, 1], [], []>} : vector<12x12xf32>, vector<12x32xf32>, vector<12x32xf32> -> vector<12x32xf32>
    %614 = vector.broadcast %552 : vector<1x32xf32> to vector<12x32xf32>
    %615 = arith.addf %613, %614 : vector<12x32xf32>
    %cst_321 = arith.constant 0.000000e+00 : f32
    %616 = vector.broadcast %cst_321 : f32 to vector<12x32xf32>
    %617 = arith.maximumf %615, %616 : vector<12x32xf32>
    %618 = arith.addf %617, %611 : vector<12x32xf32>
    %c112_322 = arith.constant 112 : index
    %c0_323 = arith.constant 0 : index
    %619 = vector.load %arg38[%c112_322, %c0_323] : memref<128x32xf32, #tpu.memory_space<vmem>>, vector<12x32xf32>
    tpu.vector_store %arg38[%c112_322, %c0_323], %618 {strides = array<i32>} : memref<128x32xf32, #tpu.memory_space<vmem>>, vector<12x32xf32>,
    %c0_324 = arith.constant 0 : index
    %c0_325 = arith.constant 0 : index
    %620 = vector.load %arg38[%c0_324, %c0_325] : memref<128x32xf32, #tpu.memory_space<vmem>>, vector<12x32xf32>
    %c16_326 = arith.constant 16 : index
    %c0_327 = arith.constant 0 : index
    %621 = vector.load %arg38[%c16_326, %c0_327] : memref<128x32xf32, #tpu.memory_space<vmem>>, vector<12x32xf32>
    %622 = arith.addf %620, %621 : vector<12x32xf32>
    %c32_328 = arith.constant 32 : index
    %c0_329 = arith.constant 0 : index
    %623 = vector.load %arg38[%c32_328, %c0_329] : memref<128x32xf32, #tpu.memory_space<vmem>>, vector<12x32xf32>
    %624 = arith.addf %622, %623 : vector<12x32xf32>
    %c48_330 = arith.constant 48 : index
    %c0_331 = arith.constant 0 : index
    %625 = vector.load %arg38[%c48_330, %c0_331] : memref<128x32xf32, #tpu.memory_space<vmem>>, vector<12x32xf32>
    %626 = arith.addf %624, %625 : vector<12x32xf32>
    %c0_332 = arith.constant 0 : index
    %c0_333 = arith.constant 0 : index
    %627 = vector.load %arg40[%c0_332, %c0_333] : memref<32x32xf32, #tpu.memory_space<vmem>>, vector<12x32xf32>
    tpu.vector_store %arg40[%c0_332, %c0_333], %626 {strides = array<i32>} : memref<32x32xf32, #tpu.memory_space<vmem>>, vector<12x32xf32>,
    %c64_334 = arith.constant 64 : index
    %c0_335 = arith.constant 0 : index
    %628 = vector.load %arg38[%c64_334, %c0_335] : memref<128x32xf32, #tpu.memory_space<vmem>>, vector<12x32xf32>
    %c80_336 = arith.constant 80 : index
    %c0_337 = arith.constant 0 : index
    %629 = vector.load %arg38[%c80_336, %c0_337] : memref<128x32xf32, #tpu.memory_space<vmem>>, vector<12x32xf32>
    %630 = arith.addf %628, %629 : vector<12x32xf32>
    %c96_338 = arith.constant 96 : index
    %c0_339 = arith.constant 0 : index
    %631 = vector.load %arg38[%c96_338, %c0_339] : memref<128x32xf32, #tpu.memory_space<vmem>>, vector<12x32xf32>
    %632 = arith.addf %630, %631 : vector<12x32xf32>
    %c112_340 = arith.constant 112 : index
    %c0_341 = arith.constant 0 : index
    %633 = vector.load %arg38[%c112_340, %c0_341] : memref<128x32xf32, #tpu.memory_space<vmem>>, vector<12x32xf32>
    %634 = arith.addf %632, %633 : vector<12x32xf32>
    %c16_342 = arith.constant 16 : index
    %c0_343 = arith.constant 0 : index
    %635 = vector.load %arg40[%c16_342, %c0_343] : memref<32x32xf32, #tpu.memory_space<vmem>>, vector<12x32xf32>
    tpu.vector_store %arg40[%c16_342, %c0_343], %634 {strides = array<i32>} : memref<32x32xf32, #tpu.memory_space<vmem>>, vector<12x32xf32>,
    %c0_344 = arith.constant 0 : index
    %c0_345 = arith.constant 0 : index
    %636 = vector.load %arg27[%c0_344, %c0_345] : memref<1x512xf32, #tpu.memory_space<vmem>>, vector<1x512xf32>
    %c0_346 = arith.constant 0 : index
    %c0_347 = arith.constant 0 : index
    %637 = vector.load %arg27[%c0_346, %c0_347] : memref<1x512xf32, #tpu.memory_space<vmem>>, vector<1x512xf32>
    %c0_348 = arith.constant 0 : index
    %c0_349 = arith.constant 0 : index
    %c0_350 = arith.constant 0 : index
    %638 = vector.load %arg26[%c0_348, %c0_349, %c0_350] : memref<12x32x512xf32, #tpu.memory_space<vmem>>, vector<1x32x512xf32>
    %639 = vector.shape_cast %638 : vector<1x32x512xf32> to vector<32x512xf32>
    %c0_351 = arith.constant 0 : index
    %c0_352 = arith.constant 0 : index
    %640 = vector.load %arg40[%c0_351, %c0_352] : memref<32x32xf32, #tpu.memory_space<vmem>>, vector<1x32xf32>
    %cst_353 = arith.constant dense<0.000000e+00> : vector<1x512xf32>
    %641 = tpu.matmul %640, %639, %cst_353 {dimension_numbers = #tpu.dot_dimension_numbers<[1], [0], [0], [1], [0, 0, 1, 1], [], []>} : vector<1x32xf32>, vector<32x512xf32>, vector<1x512xf32> -> vector<1x512xf32>
    %642 = arith.addf %636, %641 : vector<1x512xf32>
    %c16_354 = arith.constant 16 : index
    %c0_355 = arith.constant 0 : index
    %643 = vector.load %arg40[%c16_354, %c0_355] : memref<32x32xf32, #tpu.memory_space<vmem>>, vector<1x32xf32>
    %cst_356 = arith.constant dense<0.000000e+00> : vector<1x512xf32>
    %644 = tpu.matmul %643, %639, %cst_356 {dimension_numbers = #tpu.dot_dimension_numbers<[1], [0], [0], [1], [0, 0, 1, 1], [], []>} : vector<1x32xf32>, vector<32x512xf32>, vector<1x512xf32> -> vector<1x512xf32>
    %645 = arith.addf %637, %644 : vector<1x512xf32>
    %c1_357 = arith.constant 1 : index
    %c0_358 = arith.constant 0 : index
    %c0_359 = arith.constant 0 : index
    %646 = vector.load %arg26[%c1_357, %c0_358, %c0_359] : memref<12x32x512xf32, #tpu.memory_space<vmem>>, vector<1x32x512xf32>
    %647 = vector.shape_cast %646 : vector<1x32x512xf32> to vector<32x512xf32>
    %c1_360 = arith.constant 1 : index
    %c0_361 = arith.constant 0 : index
    %648 = vector.load %arg40[%c1_360, %c0_361] : memref<32x32xf32, #tpu.memory_space<vmem>>, vector<1x32xf32>
    %cst_362 = arith.constant dense<0.000000e+00> : vector<1x512xf32>
    %649 = tpu.matmul %648, %647, %cst_362 {dimension_numbers = #tpu.dot_dimension_numbers<[1], [0], [0], [1], [0, 0, 1, 1], [], []>} : vector<1x32xf32>, vector<32x512xf32>, vector<1x512xf32> -> vector<1x512xf32>
    %650 = arith.addf %642, %649 : vector<1x512xf32>
    %c17 = arith.constant 17 : index
    %c0_363 = arith.constant 0 : index
    %651 = vector.load %arg40[%c17, %c0_363] : memref<32x32xf32, #tpu.memory_space<vmem>>, vector<1x32xf32>
    %cst_364 = arith.constant dense<0.000000e+00> : vector<1x512xf32>
    %652 = tpu.matmul %651, %647, %cst_364 {dimension_numbers = #tpu.dot_dimension_numbers<[1], [0], [0], [1], [0, 0, 1, 1], [], []>} : vector<1x32xf32>, vector<32x512xf32>, vector<1x512xf32> -> vector<1x512xf32>
    %653 = arith.addf %645, %652 : vector<1x512xf32>
    %c2_365 = arith.constant 2 : index
    %c0_366 = arith.constant 0 : index
    %c0_367 = arith.constant 0 : index
    %654 = vector.load %arg26[%c2_365, %c0_366, %c0_367] : memref<12x32x512xf32, #tpu.memory_space<vmem>>, vector<1x32x512xf32>
    %655 = vector.shape_cast %654 : vector<1x32x512xf32> to vector<32x512xf32>
    %c2_368 = arith.constant 2 : index
    %c0_369 = arith.constant 0 : index
    %656 = vector.load %arg40[%c2_368, %c0_369] : memref<32x32xf32, #tpu.memory_space<vmem>>, vector<1x32xf32>
    %cst_370 = arith.constant dense<0.000000e+00> : vector<1x512xf32>
    %657 = tpu.matmul %656, %655, %cst_370 {dimension_numbers = #tpu.dot_dimension_numbers<[1], [0], [0], [1], [0, 0, 1, 1], [], []>} : vector<1x32xf32>, vector<32x512xf32>, vector<1x512xf32> -> vector<1x512xf32>
    %658 = arith.addf %650, %657 : vector<1x512xf32>
    %c18 = arith.constant 18 : index
    %c0_371 = arith.constant 0 : index
    %659 = vector.load %arg40[%c18, %c0_371] : memref<32x32xf32, #tpu.memory_space<vmem>>, vector<1x32xf32>
    %cst_372 = arith.constant dense<0.000000e+00> : vector<1x512xf32>
    %660 = tpu.matmul %659, %655, %cst_372 {dimension_numbers = #tpu.dot_dimension_numbers<[1], [0], [0], [1], [0, 0, 1, 1], [], []>} : vector<1x32xf32>, vector<32x512xf32>, vector<1x512xf32> -> vector<1x512xf32>
    %661 = arith.addf %653, %660 : vector<1x512xf32>
    %c3_373 = arith.constant 3 : index
    %c0_374 = arith.constant 0 : index
    %c0_375 = arith.constant 0 : index
    %662 = vector.load %arg26[%c3_373, %c0_374, %c0_375] : memref<12x32x512xf32, #tpu.memory_space<vmem>>, vector<1x32x512xf32>
    %663 = vector.shape_cast %662 : vector<1x32x512xf32> to vector<32x512xf32>
    %c3_376 = arith.constant 3 : index
    %c0_377 = arith.constant 0 : index
    %664 = vector.load %arg40[%c3_376, %c0_377] : memref<32x32xf32, #tpu.memory_space<vmem>>, vector<1x32xf32>
    %cst_378 = arith.constant dense<0.000000e+00> : vector<1x512xf32>
    %665 = tpu.matmul %664, %663, %cst_378 {dimension_numbers = #tpu.dot_dimension_numbers<[1], [0], [0], [1], [0, 0, 1, 1], [], []>} : vector<1x32xf32>, vector<32x512xf32>, vector<1x512xf32> -> vector<1x512xf32>
    %666 = arith.addf %658, %665 : vector<1x512xf32>
    %c19 = arith.constant 19 : index
    %c0_379 = arith.constant 0 : index
    %667 = vector.load %arg40[%c19, %c0_379] : memref<32x32xf32, #tpu.memory_space<vmem>>, vector<1x32xf32>
    %cst_380 = arith.constant dense<0.000000e+00> : vector<1x512xf32>
    %668 = tpu.matmul %667, %663, %cst_380 {dimension_numbers = #tpu.dot_dimension_numbers<[1], [0], [0], [1], [0, 0, 1, 1], [], []>} : vector<1x32xf32>, vector<32x512xf32>, vector<1x512xf32> -> vector<1x512xf32>
    %669 = arith.addf %661, %668 : vector<1x512xf32>
    %c4 = arith.constant 4 : index
    %c0_381 = arith.constant 0 : index
    %c0_382 = arith.constant 0 : index
    %670 = vector.load %arg26[%c4, %c0_381, %c0_382] : memref<12x32x512xf32, #tpu.memory_space<vmem>>, vector<1x32x512xf32>
    %671 = vector.shape_cast %670 : vector<1x32x512xf32> to vector<32x512xf32>
    %c4_383 = arith.constant 4 : index
    %c0_384 = arith.constant 0 : index
    %672 = vector.load %arg40[%c4_383, %c0_384] : memref<32x32xf32, #tpu.memory_space<vmem>>, vector<1x32xf32>
    %cst_385 = arith.constant dense<0.000000e+00> : vector<1x512xf32>
    %673 = tpu.matmul %672, %671, %cst_385 {dimension_numbers = #tpu.dot_dimension_numbers<[1], [0], [0], [1], [0, 0, 1, 1], [], []>} : vector<1x32xf32>, vector<32x512xf32>, vector<1x512xf32> -> vector<1x512xf32>
    %674 = arith.addf %666, %673 : vector<1x512xf32>
    %c20 = arith.constant 20 : index
    %c0_386 = arith.constant 0 : index
    %675 = vector.load %arg40[%c20, %c0_386] : memref<32x32xf32, #tpu.memory_space<vmem>>, vector<1x32xf32>
    %cst_387 = arith.constant dense<0.000000e+00> : vector<1x512xf32>
    %676 = tpu.matmul %675, %671, %cst_387 {dimension_numbers = #tpu.dot_dimension_numbers<[1], [0], [0], [1], [0, 0, 1, 1], [], []>} : vector<1x32xf32>, vector<32x512xf32>, vector<1x512xf32> -> vector<1x512xf32>
    %677 = arith.addf %669, %676 : vector<1x512xf32>
    %c5 = arith.constant 5 : index
    %c0_388 = arith.constant 0 : index
    %c0_389 = arith.constant 0 : index
    %678 = vector.load %arg26[%c5, %c0_388, %c0_389] : memref<12x32x512xf32, #tpu.memory_space<vmem>>, vector<1x32x512xf32>
    %679 = vector.shape_cast %678 : vector<1x32x512xf32> to vector<32x512xf32>
    %c5_390 = arith.constant 5 : index
    %c0_391 = arith.constant 0 : index
    %680 = vector.load %arg40[%c5_390, %c0_391] : memref<32x32xf32, #tpu.memory_space<vmem>>, vector<1x32xf32>
    %cst_392 = arith.constant dense<0.000000e+00> : vector<1x512xf32>
    %681 = tpu.matmul %680, %679, %cst_392 {dimension_numbers = #tpu.dot_dimension_numbers<[1], [0], [0], [1], [0, 0, 1, 1], [], []>} : vector<1x32xf32>, vector<32x512xf32>, vector<1x512xf32> -> vector<1x512xf32>
    %682 = arith.addf %674, %681 : vector<1x512xf32>
    %c21 = arith.constant 21 : index
    %c0_393 = arith.constant 0 : index
    %683 = vector.load %arg40[%c21, %c0_393] : memref<32x32xf32, #tpu.memory_space<vmem>>, vector<1x32xf32>
    %cst_394 = arith.constant dense<0.000000e+00> : vector<1x512xf32>
    %684 = tpu.matmul %683, %679, %cst_394 {dimension_numbers = #tpu.dot_dimension_numbers<[1], [0], [0], [1], [0, 0, 1, 1], [], []>} : vector<1x32xf32>, vector<32x512xf32>, vector<1x512xf32> -> vector<1x512xf32>
    %685 = arith.addf %677, %684 : vector<1x512xf32>
    %c6 = arith.constant 6 : index
    %c0_395 = arith.constant 0 : index
    %c0_396 = arith.constant 0 : index
    %686 = vector.load %arg26[%c6, %c0_395, %c0_396] : memref<12x32x512xf32, #tpu.memory_space<vmem>>, vector<1x32x512xf32>
    %687 = vector.shape_cast %686 : vector<1x32x512xf32> to vector<32x512xf32>
    %c6_397 = arith.constant 6 : index
    %c0_398 = arith.constant 0 : index
    %688 = vector.load %arg40[%c6_397, %c0_398] : memref<32x32xf32, #tpu.memory_space<vmem>>, vector<1x32xf32>
    %cst_399 = arith.constant dense<0.000000e+00> : vector<1x512xf32>
    %689 = tpu.matmul %688, %687, %cst_399 {dimension_numbers = #tpu.dot_dimension_numbers<[1], [0], [0], [1], [0, 0, 1, 1], [], []>} : vector<1x32xf32>, vector<32x512xf32>, vector<1x512xf32> -> vector<1x512xf32>
    %690 = arith.addf %682, %689 : vector<1x512xf32>
    %c22 = arith.constant 22 : index
    %c0_400 = arith.constant 0 : index
    %691 = vector.load %arg40[%c22, %c0_400] : memref<32x32xf32, #tpu.memory_space<vmem>>, vector<1x32xf32>
    %cst_401 = arith.constant dense<0.000000e+00> : vector<1x512xf32>
    %692 = tpu.matmul %691, %687, %cst_401 {dimension_numbers = #tpu.dot_dimension_numbers<[1], [0], [0], [1], [0, 0, 1, 1], [], []>} : vector<1x32xf32>, vector<32x512xf32>, vector<1x512xf32> -> vector<1x512xf32>
    %693 = arith.addf %685, %692 : vector<1x512xf32>
    %c7 = arith.constant 7 : index
    %c0_402 = arith.constant 0 : index
    %c0_403 = arith.constant 0 : index
    %694 = vector.load %arg26[%c7, %c0_402, %c0_403] : memref<12x32x512xf32, #tpu.memory_space<vmem>>, vector<1x32x512xf32>
    %695 = vector.shape_cast %694 : vector<1x32x512xf32> to vector<32x512xf32>
    %c7_404 = arith.constant 7 : index
    %c0_405 = arith.constant 0 : index
    %696 = vector.load %arg40[%c7_404, %c0_405] : memref<32x32xf32, #tpu.memory_space<vmem>>, vector<1x32xf32>
    %cst_406 = arith.constant dense<0.000000e+00> : vector<1x512xf32>
    %697 = tpu.matmul %696, %695, %cst_406 {dimension_numbers = #tpu.dot_dimension_numbers<[1], [0], [0], [1], [0, 0, 1, 1], [], []>} : vector<1x32xf32>, vector<32x512xf32>, vector<1x512xf32> -> vector<1x512xf32>
    %698 = arith.addf %690, %697 : vector<1x512xf32>
    %c23 = arith.constant 23 : index
    %c0_407 = arith.constant 0 : index
    %699 = vector.load %arg40[%c23, %c0_407] : memref<32x32xf32, #tpu.memory_space<vmem>>, vector<1x32xf32>
    %cst_408 = arith.constant dense<0.000000e+00> : vector<1x512xf32>
    %700 = tpu.matmul %699, %695, %cst_408 {dimension_numbers = #tpu.dot_dimension_numbers<[1], [0], [0], [1], [0, 0, 1, 1], [], []>} : vector<1x32xf32>, vector<32x512xf32>, vector<1x512xf32> -> vector<1x512xf32>
    %701 = arith.addf %693, %700 : vector<1x512xf32>
    %c8_409 = arith.constant 8 : index
    %c0_410 = arith.constant 0 : index
    %c0_411 = arith.constant 0 : index
    %702 = vector.load %arg26[%c8_409, %c0_410, %c0_411] : memref<12x32x512xf32, #tpu.memory_space<vmem>>, vector<1x32x512xf32>
    %703 = vector.shape_cast %702 : vector<1x32x512xf32> to vector<32x512xf32>
    %c8_412 = arith.constant 8 : index
    %c0_413 = arith.constant 0 : index
    %704 = vector.load %arg40[%c8_412, %c0_413] : memref<32x32xf32, #tpu.memory_space<vmem>>, vector<1x32xf32>
    %cst_414 = arith.constant dense<0.000000e+00> : vector<1x512xf32>
    %705 = tpu.matmul %704, %703, %cst_414 {dimension_numbers = #tpu.dot_dimension_numbers<[1], [0], [0], [1], [0, 0, 1, 1], [], []>} : vector<1x32xf32>, vector<32x512xf32>, vector<1x512xf32> -> vector<1x512xf32>
    %706 = arith.addf %698, %705 : vector<1x512xf32>
    %c24_415 = arith.constant 24 : index
    %c0_416 = arith.constant 0 : index
    %707 = vector.load %arg40[%c24_415, %c0_416] : memref<32x32xf32, #tpu.memory_space<vmem>>, vector<1x32xf32>
    %cst_417 = arith.constant dense<0.000000e+00> : vector<1x512xf32>
    %708 = tpu.matmul %707, %703, %cst_417 {dimension_numbers = #tpu.dot_dimension_numbers<[1], [0], [0], [1], [0, 0, 1, 1], [], []>} : vector<1x32xf32>, vector<32x512xf32>, vector<1x512xf32> -> vector<1x512xf32>
    %709 = arith.addf %701, %708 : vector<1x512xf32>
    %c9 = arith.constant 9 : index
    %c0_418 = arith.constant 0 : index
    %c0_419 = arith.constant 0 : index
    %710 = vector.load %arg26[%c9, %c0_418, %c0_419] : memref<12x32x512xf32, #tpu.memory_space<vmem>>, vector<1x32x512xf32>
    %711 = vector.shape_cast %710 : vector<1x32x512xf32> to vector<32x512xf32>
    %c9_420 = arith.constant 9 : index
    %c0_421 = arith.constant 0 : index
    %712 = vector.load %arg40[%c9_420, %c0_421] : memref<32x32xf32, #tpu.memory_space<vmem>>, vector<1x32xf32>
    %cst_422 = arith.constant dense<0.000000e+00> : vector<1x512xf32>
    %713 = tpu.matmul %712, %711, %cst_422 {dimension_numbers = #tpu.dot_dimension_numbers<[1], [0], [0], [1], [0, 0, 1, 1], [], []>} : vector<1x32xf32>, vector<32x512xf32>, vector<1x512xf32> -> vector<1x512xf32>
    %714 = arith.addf %706, %713 : vector<1x512xf32>
    %c25 = arith.constant 25 : index
    %c0_423 = arith.constant 0 : index
    %715 = vector.load %arg40[%c25, %c0_423] : memref<32x32xf32, #tpu.memory_space<vmem>>, vector<1x32xf32>
    %cst_424 = arith.constant dense<0.000000e+00> : vector<1x512xf32>
    %716 = tpu.matmul %715, %711, %cst_424 {dimension_numbers = #tpu.dot_dimension_numbers<[1], [0], [0], [1], [0, 0, 1, 1], [], []>} : vector<1x32xf32>, vector<32x512xf32>, vector<1x512xf32> -> vector<1x512xf32>
    %717 = arith.addf %709, %716 : vector<1x512xf32>
    %c10 = arith.constant 10 : index
    %c0_425 = arith.constant 0 : index
    %c0_426 = arith.constant 0 : index
    %718 = vector.load %arg26[%c10, %c0_425, %c0_426] : memref<12x32x512xf32, #tpu.memory_space<vmem>>, vector<1x32x512xf32>
    %719 = vector.shape_cast %718 : vector<1x32x512xf32> to vector<32x512xf32>
    %c10_427 = arith.constant 10 : index
    %c0_428 = arith.constant 0 : index
    %720 = vector.load %arg40[%c10_427, %c0_428] : memref<32x32xf32, #tpu.memory_space<vmem>>, vector<1x32xf32>
    %cst_429 = arith.constant dense<0.000000e+00> : vector<1x512xf32>
    %721 = tpu.matmul %720, %719, %cst_429 {dimension_numbers = #tpu.dot_dimension_numbers<[1], [0], [0], [1], [0, 0, 1, 1], [], []>} : vector<1x32xf32>, vector<32x512xf32>, vector<1x512xf32> -> vector<1x512xf32>
    %722 = arith.addf %714, %721 : vector<1x512xf32>
    %c26 = arith.constant 26 : index
    %c0_430 = arith.constant 0 : index
    %723 = vector.load %arg40[%c26, %c0_430] : memref<32x32xf32, #tpu.memory_space<vmem>>, vector<1x32xf32>
    %cst_431 = arith.constant dense<0.000000e+00> : vector<1x512xf32>
    %724 = tpu.matmul %723, %719, %cst_431 {dimension_numbers = #tpu.dot_dimension_numbers<[1], [0], [0], [1], [0, 0, 1, 1], [], []>} : vector<1x32xf32>, vector<32x512xf32>, vector<1x512xf32> -> vector<1x512xf32>
    %725 = arith.addf %717, %724 : vector<1x512xf32>
    %c11 = arith.constant 11 : index
    %c0_432 = arith.constant 0 : index
    %c0_433 = arith.constant 0 : index
    %726 = vector.load %arg26[%c11, %c0_432, %c0_433] : memref<12x32x512xf32, #tpu.memory_space<vmem>>, vector<1x32x512xf32>
    %727 = vector.shape_cast %726 : vector<1x32x512xf32> to vector<32x512xf32>
    %c11_434 = arith.constant 11 : index
    %c0_435 = arith.constant 0 : index
    %728 = vector.load %arg40[%c11_434, %c0_435] : memref<32x32xf32, #tpu.memory_space<vmem>>, vector<1x32xf32>
    %cst_436 = arith.constant dense<0.000000e+00> : vector<1x512xf32>
    %729 = tpu.matmul %728, %727, %cst_436 {dimension_numbers = #tpu.dot_dimension_numbers<[1], [0], [0], [1], [0, 0, 1, 1], [], []>} : vector<1x32xf32>, vector<32x512xf32>, vector<1x512xf32> -> vector<1x512xf32>
    %730 = arith.addf %722, %729 : vector<1x512xf32>
    %c27 = arith.constant 27 : index
    %c0_437 = arith.constant 0 : index
    %731 = vector.load %arg40[%c27, %c0_437] : memref<32x32xf32, #tpu.memory_space<vmem>>, vector<1x32xf32>
    %cst_438 = arith.constant dense<0.000000e+00> : vector<1x512xf32>
    %732 = tpu.matmul %731, %727, %cst_438 {dimension_numbers = #tpu.dot_dimension_numbers<[1], [0], [0], [1], [0, 0, 1, 1], [], []>} : vector<1x32xf32>, vector<32x512xf32>, vector<1x512xf32> -> vector<1x512xf32>
    %733 = arith.addf %725, %732 : vector<1x512xf32>
    %cst_439 = arith.constant 0.000000e+00 : f32
    %734 = vector.broadcast %cst_439 : f32 to vector<1x512xf32>
    %735 = arith.cmpf ogt, %730, %734 : vector<1x512xf32>
    %cst_440 = arith.constant 0.00999999977 : f32
    %736 = vector.broadcast %cst_440 : f32 to vector<1x512xf32>
    %737 = arith.mulf %736, %730 : vector<1x512xf32>
    %738 = arith.select %735, %730, %737 : vector<1x512xi1>, vector<1x512xf32>
    %c0_441 = arith.constant 0 : index
    %c0_442 = arith.constant 0 : index
    %739 = vector.load %arg28[%c0_441, %c0_442] : memref<1x512xf32, #tpu.memory_space<vmem>>, vector<1x512xf32>
    %740 = arith.mulf %738, %739 : vector<1x512xf32>
    %c0_443 = arith.constant 0 : index
    %c0_444 = arith.constant 0 : index
    %741 = vector.load %arg29[%c0_443, %c0_444] : memref<1x512xf32, #tpu.memory_space<vmem>>, vector<1x512xf32>
    %742 = arith.addf %740, %741 : vector<1x512xf32>
    %c0_445 = arith.constant 0 : index
    %c0_446 = arith.constant 0 : index
    %743 = vector.load %arg30[%c0_445, %c0_446] : memref<512x512xf32, #tpu.memory_space<vmem>>, vector<512x512xf32>
    %cst_447 = arith.constant dense<0.000000e+00> : vector<1x512xf32>
    %744 = tpu.matmul %742, %743, %cst_447 {dimension_numbers = #tpu.dot_dimension_numbers<[1], [0], [0], [1], [0, 0, 1, 1], [], []>} : vector<1x512xf32>, vector<512x512xf32>, vector<1x512xf32> -> vector<1x512xf32>
    %c0_448 = arith.constant 0 : index
    %c0_449 = arith.constant 0 : index
    %745 = vector.load %arg31[%c0_448, %c0_449] : memref<1x512xf32, #tpu.memory_space<vmem>>, vector<1x512xf32>
    %746 = arith.addf %744, %745 : vector<1x512xf32>
    %cst_450 = arith.constant 0.000000e+00 : f32
    %747 = vector.broadcast %cst_450 : f32 to vector<1x512xf32>
    %748 = arith.cmpf ogt, %746, %747 : vector<1x512xf32>
    %cst_451 = arith.constant 0.00999999977 : f32
    %749 = vector.broadcast %cst_451 : f32 to vector<1x512xf32>
    %750 = arith.mulf %749, %746 : vector<1x512xf32>
    %751 = arith.select %748, %746, %750 : vector<1x512xi1>, vector<1x512xf32>
    %c0_452 = arith.constant 0 : index
    %c0_453 = arith.constant 0 : index
    %752 = vector.load %arg32[%c0_452, %c0_453] : memref<1x512xf32, #tpu.memory_space<vmem>>, vector<1x512xf32>
    %753 = arith.mulf %751, %752 : vector<1x512xf32>
    %c0_454 = arith.constant 0 : index
    %c0_455 = arith.constant 0 : index
    %754 = vector.load %arg33[%c0_454, %c0_455] : memref<1x512xf32, #tpu.memory_space<vmem>>, vector<1x512xf32>
    %755 = arith.addf %753, %754 : vector<1x512xf32>
    %c0_456 = arith.constant 0 : index
    %c0_457 = arith.constant 0 : index
    %756 = vector.load %arg34[%c0_456, %c0_457] : memref<512x4xf32, #tpu.memory_space<vmem>>, vector<512x4xf32>
    %cst_458 = arith.constant dense<0.000000e+00> : vector<1x4xf32>
    %757 = tpu.matmul %755, %756, %cst_458 {dimension_numbers = #tpu.dot_dimension_numbers<[1], [0], [0], [1], [0, 0, 1, 1], [], []>} : vector<1x512xf32>, vector<512x4xf32>, vector<1x4xf32> -> vector<1x4xf32>
    %c0_459 = arith.constant 0 : index
    %c0_460 = arith.constant 0 : index
    %758 = vector.load %arg35[%c0_459, %c0_460] : memref<1x4xf32, #tpu.memory_space<vmem>>, vector<1x4xf32>
    %759 = arith.addf %757, %758 : vector<1x4xf32>
    %c0_461 = arith.constant 0 : index
    %c0_462 = arith.constant 0 : index
    %760 = vector.load %arg36[%c0_461, %c0_462] : memref<2x4xf32, #tpu.memory_space<vmem>>, vector<1x4xf32>
    tpu.vector_store %arg36[%c0_461, %c0_462], %759 {strides = array<i32>} : memref<2x4xf32, #tpu.memory_space<vmem>>, vector<1x4xf32>,
    %cst_463 = arith.constant 0.000000e+00 : f32
    %761 = vector.broadcast %cst_463 : f32 to vector<1x512xf32>
    %762 = arith.cmpf ogt, %733, %761 : vector<1x512xf32>
    %cst_464 = arith.constant 0.00999999977 : f32
    %763 = vector.broadcast %cst_464 : f32 to vector<1x512xf32>
    %764 = arith.mulf %763, %733 : vector<1x512xf32>
    %765 = arith.select %762, %733, %764 : vector<1x512xi1>, vector<1x512xf32>
    %c0_465 = arith.constant 0 : index
    %c0_466 = arith.constant 0 : index
    %766 = vector.load %arg28[%c0_465, %c0_466] : memref<1x512xf32, #tpu.memory_space<vmem>>, vector<1x512xf32>
    %767 = arith.mulf %765, %766 : vector<1x512xf32>
    %c0_467 = arith.constant 0 : index
    %c0_468 = arith.constant 0 : index
    %768 = vector.load %arg29[%c0_467, %c0_468] : memref<1x512xf32, #tpu.memory_space<vmem>>, vector<1x512xf32>
    %769 = arith.addf %767, %768 : vector<1x512xf32>
    %c0_469 = arith.constant 0 : index
    %c0_470 = arith.constant 0 : index
    %770 = vector.load %arg30[%c0_469, %c0_470] : memref<512x512xf32, #tpu.memory_space<vmem>>, vector<512x512xf32>
    %cst_471 = arith.constant dense<0.000000e+00> : vector<1x512xf32>
    %771 = tpu.matmul %769, %770, %cst_471 {dimension_numbers = #tpu.dot_dimension_numbers<[1], [0], [0], [1], [0, 0, 1, 1], [], []>} : vector<1x512xf32>, vector<512x512xf32>, vector<1x512xf32> -> vector<1x512xf32>
    %c0_472 = arith.constant 0 : index
    %c0_473 = arith.constant 0 : index
    %772 = vector.load %arg31[%c0_472, %c0_473] : memref<1x512xf32, #tpu.memory_space<vmem>>, vector<1x512xf32>
    %773 = arith.addf %771, %772 : vector<1x512xf32>
    %cst_474 = arith.constant 0.000000e+00 : f32
    %774 = vector.broadcast %cst_474 : f32 to vector<1x512xf32>
    %775 = arith.cmpf ogt, %773, %774 : vector<1x512xf32>
    %cst_475 = arith.constant 0.00999999977 : f32
    %776 = vector.broadcast %cst_475 : f32 to vector<1x512xf32>
    %777 = arith.mulf %776, %773 : vector<1x512xf32>
    %778 = arith.select %775, %773, %777 : vector<1x512xi1>, vector<1x512xf32>
    %c0_476 = arith.constant 0 : index
    %c0_477 = arith.constant 0 : index
    %779 = vector.load %arg32[%c0_476, %c0_477] : memref<1x512xf32, #tpu.memory_space<vmem>>, vector<1x512xf32>
    %780 = arith.mulf %778, %779 : vector<1x512xf32>
    %c0_478 = arith.constant 0 : index
    %c0_479 = arith.constant 0 : index
    %781 = vector.load %arg33[%c0_478, %c0_479] : memref<1x512xf32, #tpu.memory_space<vmem>>, vector<1x512xf32>
    %782 = arith.addf %780, %781 : vector<1x512xf32>
    %c0_480 = arith.constant 0 : index
    %c0_481 = arith.constant 0 : index
    %783 = vector.load %arg34[%c0_480, %c0_481] : memref<512x4xf32, #tpu.memory_space<vmem>>, vector<512x4xf32>
    %cst_482 = arith.constant dense<0.000000e+00> : vector<1x4xf32>
    %784 = tpu.matmul %782, %783, %cst_482 {dimension_numbers = #tpu.dot_dimension_numbers<[1], [0], [0], [1], [0, 0, 1, 1], [], []>} : vector<1x512xf32>, vector<512x4xf32>, vector<1x4xf32> -> vector<1x4xf32>
    %c0_483 = arith.constant 0 : index
    %c0_484 = arith.constant 0 : index
    %785 = vector.load %arg35[%c0_483, %c0_484] : memref<1x4xf32, #tpu.memory_space<vmem>>, vector<1x4xf32>
    %786 = arith.addf %784, %785 : vector<1x4xf32>
    %c1_485 = arith.constant 1 : index
    %c0_486 = arith.constant 0 : index
    %787 = vector.load %arg36[%c1_485, %c0_486] : memref<2x4xf32, #tpu.memory_space<vmem>>, vector<1x4xf32>
    tpu.vector_store %arg36[%c1_485, %c0_486], %786 {strides = array<i32>} : memref<2x4xf32, #tpu.memory_space<vmem>>, vector<1x4xf32>,
    return
  }
}

</mosaic_0001>

<bundles_post_ra>
// kernel: ecg_gcn_forward.1
= control target key start
LH: loop header
LB: loop body
LE: loop exit
PB: predicated region body
PF: predicated region fallthrough
CT: control target
= control target key end

     0   :  { %s15752_s6 = smov 1   ;;  %s15753_s10 = smov 2   ;;  %s17473_s0 = inlined_call_operand.smem [shape: u32[37], index: -1, kind: input, shape index: {}] }
   0x1   :  { %s15807_s5 = sld [smem:[%s17473_s0]]   ;;  %s15754_s14 = smov 3  }
   0x2   :  { %s15812_s9 = sld [smem:[%s17473_s0 + %s15752_s6]]   ;;  %s15755_s18 = smov 4  }
   0x3   :  { %s15817_s13 = sld [smem:[%s17473_s0 + %s15753_s10]]   ;;  %s15756_s22 = smov 5  }
   0x4   :  { %s15822_s17 = sld [smem:[%s17473_s0 + %s15754_s14]]   ;;  %s15757_s26 = smov 6  }
   0x5   :  { %s15827_s21 = sld [smem:[%s17473_s0 + %s15755_s18]]   ;;  %s15758_s30 = smov 7  }
   0x6   :  { %s15832_s25 = sld [smem:[%s17473_s0 + %s15756_s22]]   ;;  %s15759_s4 = smov 8  }
   0x7   :  { %s15837_s29 = sld [smem:[%s17473_s0 + %s15757_s26]]   ;;  %s15760_s10 = smov 9  }
   0x8   :  { %s15842_s3 = sld [smem:[%s17473_s0 + %s15758_s30]]   ;;  %s15761_s15 = smov 10  }
   0x9   :  { %s15847_s8 = sld [smem:[%s17473_s0 + %s15759_s4]]   ;;  %s15762_s20 = smov 11  }
   0xa   :  { %s15852_s14 = sld [smem:[%s17473_s0 + %s15760_s10]]   ;;  %s15763_s26 = smov 12  }
   0xb   :  { %s15857_s19 = sld [smem:[%s17473_s0 + %s15761_s15]]   ;;  %s15764_s1 = smov 13  }
   0xc   :  { %s15862_s24 = sld [smem:[%s17473_s0 + %s15762_s20]]   ;;  %s15765_s7 = smov 14  }
   0xd   :  { %s15867_s30 = sld [smem:[%s17473_s0 + %s15763_s26]]   ;;  %s15766_s15 = smov 15  }
   0xe   :  { %s15872_s6 = sld [smem:[%s17473_s0 + %s15764_s1]]   ;;  %s15767_s22 = smov 16  }
   0xf   :  { %s15877_s12 = sld [smem:[%s17473_s0 + %s15765_s7]]   ;;  %s15768_s28 = smov 17  }
  0x10   :  { %s15882_s20 = sld [smem:[%s17473_s0 + %s15766_s15]]   ;;  %s15769_s7 = smov 18  }
  0x11   :  { %s15887_s27 = sld [smem:[%s17473_s0 + %s15767_s22]]   ;;  %s15770_s15 = smov 19  }
  0x12   :  { %s15892_s4 = sld [smem:[%s17473_s0 + %s15768_s28]]   ;;  %s15771_s22 = smov 20  }
  0x13   :  { %17487 = sst [smem:[#allocation15_spill]] %s15867_s30  ;;  %s15772_s28 = smov 21  }
  0x14   :  { %17488 = sst [smem:[#allocation16_spill]] %s15872_s6 }
  0x15   :  { %17489 = sst [smem:[#allocation17_spill]] %s15877_s12 }
  0x16   :  { %17490 = sst [smem:[#allocation18_spill]] %s15882_s20 }
  0x17   :  { %17491 = sst [smem:[#allocation19_spill]] %s15887_s27 }
  0x18   :  { %17492 = sst [smem:[#allocation20_spill]] %s15892_s4 }
  0x19   :  { %s15897_s12 = sld [smem:[%s17473_s0 + %s15769_s7]]   ;;  %s15773_s7 = smov 22  }
  0x1a   :  { %s15902_s20 = sld [smem:[%s17473_s0 + %s15770_s15]]   ;;  %s15774_s15 = smov 23  }
  0x1b   :  { %s15907_s27 = sld [smem:[%s17473_s0 + %s15771_s22]]   ;;  %s15775_s22 = smov 24  }
  0x1c   :  { %s15912_s4 = sld [smem:[%s17473_s0 + %s15772_s28]]   ;;  %s15776_s28 = smov 25  }
  0x1f   :  { %17493 = sst [smem:[#allocation21_spill]] %s15897_s12 }
  0x20   :  { %17494 = sst [smem:[#allocation22_spill]] %s15902_s20 }
  0x21   :  { %17495 = sst [smem:[#allocation23_spill]] %s15907_s27 }
  0x22   :  { %17496 = sst [smem:[#allocation24_spill]] %s15912_s4 }
  0x23   :  { %s15917_s12 = sld [smem:[%s17473_s0 + %s15773_s7]]   ;;  %s15777_s7 = smov 26  }
  0x24   :  { %s15922_s20 = sld [smem:[%s17473_s0 + %s15774_s15]]   ;;  %s15778_s15 = smov 27  }
  0x25   :  { %s15927_s27 = sld [smem:[%s17473_s0 + %s15775_s22]]   ;;  %s15779_s22 = smov 28  }
  0x26   :  { %s15932_s4 = sld [smem:[%s17473_s0 + %s15776_s28]]   ;;  %s15780_s28 = smov 29  }
  0x27   :  { %s15952_s6 = sld [smem:[%s17473_s0 + %s15780_s28]]   ;;  %s15784_s28 = smov 33  }
  0x29   :  { %17497 = sst [smem:[#allocation25_spill]] %s15917_s12 }
  0x2a   :  { %17498 = sst [smem:[#allocation26_spill]] %s15922_s20 }
  0x2b   :  { %17499 = sst [smem:[#allocation27_spill]] %s15927_s27 }
  0x2c   :  { %17500 = sst [smem:[#allocation28_spill]] %s15932_s4 }
  0x2d   :  { %s15937_s12 = sld [smem:[%s17473_s0 + %s15777_s7]]   ;;  %s15781_s7 = smov 30  }
  0x2e   :  { %s15942_s20 = sld [smem:[%s17473_s0 + %s15778_s15]]   ;;  %s15782_s15 = smov 31  }
  0x2f   :  { %s15947_s27 = sld [smem:[%s17473_s0 + %s15779_s22]]   ;;  %s15783_s22 = smov 32  }
  0x30   :  { %17503 = sst [smem:[#allocation31_spill]] %s15952_s6 }
  0x31   :  { %s15957_s4 = sld [smem:[%s17473_s0 + %s15781_s7]]   ;;  %s15785_s7 = smov 34  }
  0x32   :  { %s15972_s6 = sld [smem:[%s17473_s0 + %s15784_s28]]  }
  0x33   :  { %s15977_s30 = sld [smem:[%s17473_s0 + %s15785_s7]]  }
  0x34   :  { %17501 = sst [smem:[#allocation29_spill]] %s15942_s20 }
  0x35   :  { %17502 = sst [smem:[#allocation30_spill]] %s15947_s27 }
  0x36   :  { %s15962_s20 = sld [smem:[%s17473_s0 + %s15782_s15]]   ;;  %s15786_s15 = smov 35  }
  0x37   :  { %s15967_s27 = sld [smem:[%s17473_s0 + %s15783_s22]]   ;;  %s15787_s22 = smov 36  }
  0x3c   :  { %17504 = sst [smem:[#allocation32_spill]] %s15962_s20 }
  0x3d   :  { %17505 = sst [smem:[#allocation33_spill]] %s15967_s27 }
  0x3e   :  { %s15982_s20 = sld [smem:[%s17473_s0 + %s15786_s15]]  }
  0x3f   :  { %s15987_s27 = sld [smem:[%s17473_s0 + %s15787_s22]]  }
  0x40   :  { %78 = vsyncpa [#allocation7], 0 }
  0x41   :  { %79 = vsyncpa [#allocation10], 0 }
  0x42   :  { %80 = vsyncpa [#allocation8], 0  ;;  %s15788_s28 = smov [#allocation6]   ;;  %s15680_s2 = scalar_lea.hbm %s15937_s12, 24576 }
  0x43   :  { %s138_s1 = sshll.u32 %s15788_s28, 4  ;;  %p15681_p0 = scmp.ne.s32.totalorder %s15937_s12, %s15680_s2  ;;  %s139_s1 = int_to_ptr.vmem [resolvable:$true] %s138_s1 }
  0x44   :  { %p15684_p1 = scmp.lt.u32.totalorder %s15680_s2, %s15937_s12 }
  0x46   :  { %p15686_p2 = pnand %p15684_p1, %p15681_p0 }
  0x48   :  { %15689 = shalt.err (!%p15686_p2)
}
  0x49   :  { %s15690_s7 = scalar_lea.vmem %s139_s1, 24576  ;;  %p15695_p4 = scmp.lt.s32.totalorder %s139_s1, %s139_s1 }
  0x4a   :  { %p15691_p3 = scmp.ne.s32.totalorder %s139_s1, %s15690_s7  ;;  %p15696_p5 = scmp.lt.s32.totalorder %s15690_s7, %s15690_s7 }
  0x4c   :  { %p15697_p6 = por %p15696_p5, %p15695_p4 }
  0x4e   :  { %p15698_p7 = pnand %p15697_p6, %p15691_p3 }
  0x50   :  { %15701 = shalt.err (!%p15698_p7)
}
  0x51   :  { %s15789_s0 = smov 512   ;;  %s15790_s10 = smov 32  }
  0x52   :  { %144 = dma.hbm_to_vmem [thread:$0]  %s15937_s12, 24576, %s139_s1, [#allocation7], %s15789_s0, %s15789_s0, %s15790_s10  }
  0x53   :  { %s15791_s11 = smov [#allocation9]   ;;  %s15702_s16 = scalar_lea.hbm %s15957_s4, 32768 }
  0x54   :  { %s156_s15 = sshll.u32 %s15791_s11, 4  ;;  %p15703_p8 = scmp.ne.s32.totalorder %s15957_s4, %s15702_s16  ;;  %s157_s15 = int_to_ptr.vmem [resolvable:$true] %s156_s15 }
  0x55   :  { %p15706_p9 = scmp.lt.u32.totalorder %s15702_s16, %s15957_s4 }
  0x57   :  { %p15708_p10 = pnand %p15706_p9, %p15703_p8 }
  0x59   :  { %15711 = shalt.err (!%p15708_p10)
}
  0x5a   :  { %s15712_s18 = scalar_lea.vmem %s157_s15, 32768  ;;  %p15717_p12 = scmp.lt.s32.totalorder %s157_s15, %s157_s15 }
  0x5b   :  { %p15713_p11 = scmp.ne.s32.totalorder %s157_s15, %s15712_s18  ;;  %p15718_p13 = scmp.lt.s32.totalorder %s15712_s18, %s15712_s18 }
  0x5d   :  { %p15719_p0 = por %p15718_p13, %p15717_p12 }
  0x5f   :  { %p15720_p1 = pnand %p15719_p0, %p15713_p11 }
  0x61   :  { %15723 = shalt.err (!%p15720_p1)
}
  0x62   :  { %162 = dma.hbm_to_vmem [thread:$0]  %s15957_s4, 32768, %s157_s15, [#allocation10], %s15789_s0, %s15789_s0, %s15790_s10  }
  0x63   :  { %15746 = dma.done.wait [#allocation7], 24576  }
  0x64   :  { %15747 = vsyncadd [#allocation7], 4294942720 }
  0x65   :  { %15748 = dma.done.wait [#allocation10], 32768  }
  0x66   :  { %15749 = vsyncadd [#allocation10], 4294934528  ;;  %v191_v0 = vld [vmem:[%s15807_s5] sm:$0xff]  ;;  %v192_v1 = vld [vmem:[%s15807_s5 + $0x8] sm:$0xff]  ;;  %vm203_vm0 = vcmask 785408   ;;  %vm376_vm1 = vcmask 261120  }
  0x67   :  { %v193_v2 = vld [vmem:[%s15807_s5 + $0x10] sm:$0xff]  ;;  %v14023_v3 = vpack.c.bf16 %v192_v1, %v191_v0  ;;  %v194_v4 = vld [vmem:[%s15807_s5 + $0x18] sm:$0xff]  ;;  %v195_v6 = vld [vmem:[%s15807_s5 + $0x20] sm:$0xff]  ;;  %v15792_v1 = vmov 0.0|0.0   ;;  %vm15793_vm2 = vmmov 0   ;;  %vm4925_vm3 = vcmask 257024  }
  0x68   :  { %v14027_v5 = vpack.c.bf16 %v194_v4, %v193_v2  ;;  %v196_v7 = vld [vmem:[%s15807_s5 + $0x28] sm:$0xff]  ;;  %v179_v8 = vld [vmem:[%s15812_s9] sm:$0xff]  ;;  %v197_v10 = vld [vmem:[%s15807_s5 + $0x30] sm:$0xff]  ;;  %vm3824_vm4 = vcmask 1043456   ;;  %vm15795_vm6 = vmmov 1   ;;  %vm3820_vm8 = vcmask 97280  }
  0x69   :  { %14024 = vmatprep.subr.bf16.mxu0 %v14023_v3  ;;  %v14031_v9 = vpack.c.bf16 %v196_v7, %v195_v6  ;;  %13319 = vmatprep.mubr.msk.f32.mxu0 %vm203_vm0, %v179_v8  ;;  %v198_v11 = vld [vmem:[%s15807_s5 + $0x38] sm:$0xff]  ;;  %v365_v12 = vld [vmem:[%s15817_s13] sm:$0xff]  ;;  %v366_v13 = vld [vmem:[%s15817_s13 + $0x8] sm:$0xff]  ;;  %vm4125_vm9 = vcmask 130048   ;;  %s17522_s12 = sld [smem:[#allocation24_spill]]  ;;  %s17523_s4 = sld [smem:[#allocation27_spill]] }
  0x6a   :  { %14026 = vmatpush3.bf16.msra.mxu0 %v14023_v3  ;;  %v14035_v14 = vpack.c.bf16 %v198_v11, %v197_v10  ;;  %v14047_v15 = vpack.c.bf16 %v366_v13, %v365_v12  ;;  %v367_v16 = vld [vmem:[%s15817_s13 + $0x10] sm:$0xff]  ;;  %v368_v17 = vld [vmem:[%s15817_s13 + $0x18] sm:$0xff]  ;;  %v199_v18 = vld [vmem:[%s15807_s5 + $0x40] sm:$0xff]  ;;  %s17508_s13 = sld [smem:[#allocation16_spill]]  ;;  %s17524_s22 = sld [smem:[#allocation29_spill]] }
  0x6b   :  { %14028 = vmatprep.subr.bf16.mxu0 %v14027_v5  ;;  %v200_v19 = vld [vmem:[%s15807_s5 + $0x48] sm:$0xff]  ;;  %v14051_v20 = vpack.c.bf16 %v368_v17, %v367_v16  ;;  %v201_v22 = vld [vmem:[%s15807_s5 + $0x50] sm:$0xff]  ;;  %v202_v23 = vld [vmem:[%s15807_s5 + $0x58] sm:$0xff]  ;;  %s17506_s5 = sld [smem:[#allocation15_spill]]  ;;  %s17525_s23 = sld [smem:[#allocation30_spill]] }
  0x6c   :  { %14048 = vmatprep.subr.bf16.mxu1 %v14047_v15  ;;  %v14039_v21 = vpack.c.bf16 %v200_v19, %v199_v18  ;;  %v14043_v24 = vpack.c.bf16 %v202_v23, %v201_v22  ;;  %v674_v25 = vld [vmem:[%s15827_s21] sm:$0xff]  ;;  %v675_v26 = vld [vmem:[%s15827_s21 + $0x8] sm:$0xff]  ;;  %v676_v28 = vld [vmem:[%s15827_s21 + $0x10] sm:$0xff]  ;;  %s17526_s26 = sld [smem:[#allocation31_spill]]  ;;  %s17527_s28 = sld [smem:[#allocation32_spill]] }
  0x6d   :  { %14050 = vmatpush3.bf16.msra.mxu1 %v14047_v15  ;;  %v14063_v27 = vpack.c.bf16 %v675_v26, %v674_v25  ;;  %v677_v29 = vld [vmem:[%s15827_s21 + $0x18] sm:$0xff]  ;;  %v180_v30 = vld [vmem:[%s15812_s9 + $0x8] sm:$0xff]  ;;  %v181_v31 = vld [vmem:[%s15812_s9 + $0x10] sm:$0xff]  ;;  %s17510_s21 = sld [smem:[#allocation20_spill]]  ;;  %s17528_s1 = sld [smem:[#allocation33_spill]] }
  0x6e   :  { %14030 = vmatpush3.bf16.msra.mxu0 %v14027_v5  ;;  %14052 = vmatprep.subr.bf16.mxu1 %v14051_v20  ;;  %v14067_v32 = vpack.c.bf16 %v677_v29, %v676_v28  ;;  %v182_v33 = vld [vmem:[%s15812_s9 + $0x18] sm:$0xff]  ;;  %v183_v34 = vld [vmem:[%s15812_s9 + $0x20] sm:$0xff]  ;;  %v184_v35 = vld [vmem:[%s15812_s9 + $0x28] sm:$0xff] }
  0x6f   :  { %14032 = vmatprep.subr.bf16.mxu0 %v14031_v9  ;;  %v185_v36 = vld [vmem:[%s15812_s9 + $0x30] sm:$0xff]  ;;  %v186_v37 = vld [vmem:[%s15812_s9 + $0x38] sm:$0xff]  ;;  %v187_v38 = vld [vmem:[%s15812_s9 + $0x40] sm:$0xff] }
  0x70   :  { %v188_v39 = vld [vmem:[%s15812_s9 + $0x48] sm:$0xff]  ;;  %v189_v40 = vld [vmem:[%s15812_s9 + $0x50] sm:$0xff]  ;;  %v190_v41 = vld [vmem:[%s15812_s9 + $0x58] sm:$0xff]  ;;  %s17507_s9 = sld [smem:[#allocation28_spill]] }
  0x71   :  { %14054 = vmatpush3.bf16.msra.mxu1 %v14051_v20  ;;  %v538_v42 = vld [vmem:[%s15822_s17] sm:$0xff]  ;;  %v539_v43 = vld [vmem:[%s15822_s17 + $0x8] sm:$0xff]  ;;  %v540_v45 = vld [vmem:[%s15822_s17 + $0x10] sm:$0xff] }
  0x72   :  { %14034 = vmatpush3.bf16.msra.mxu0 %v14031_v9  ;;  %v14055_v44 = vpack.c.bf16 %v539_v43, %v538_v42  ;;  %v541_v46 = vld [vmem:[%s15822_s17 + $0x18] sm:$0xff]  ;;  %v810_v60 = vld [vmem:[%s15832_s25] sm:$0xff]  ;;  %v811_v61 = vld [vmem:[%s15832_s25 + $0x8] sm:$0xff]  ;;  %v15794_v9 = vmov 0.0   ;;  %s17509_s17 = sld [smem:[#allocation17_spill]] }
  0x73   :  { %14036 = vmatprep.subr.bf16.mxu0 %v14035_v14  ;;  %v14059_v49 = vpack.c.bf16 %v541_v46, %v540_v45  ;;  %v16083_v62 = vpack.c.bf16 %v811_v61, %v810_v60  ;;  %v818_v63 = vld [vmem:[%s15842_s3] sm:$0xff]  ;;  %v819_v0 = vld [vmem:[%s15842_s3 + $0x8] sm:$0xff]  ;;  %v812_v3 = vld [vmem:[%s15832_s25 + $0x10] sm:$0xff] }
  0x74   :  { %14056 = vmatprep.subr.bf16.mxu1 %v14055_v44  ;;  %v16089_v2 = vpack.c.bf16 %v819_v0, %v818_v63  ;;  %v813_v4 = vld [vmem:[%s15832_s25 + $0x18] sm:$0xff]  ;;  %v820_v6 = vld [vmem:[%s15842_s3 + $0x10] sm:$0xff]  ;;  %v12508_v10 = vld [vmem:[%s15847_s8] ss:$0 sm:$0xff]  ;;  %s17511_s25 = sld [smem:[#allocation18_spill]]  ;;  %s17518_s8 = sld [smem:[#allocation25_spill]] }
  0x75   :  { %v16096_v5 = vpack.c.bf16 %v813_v4, %v812_v3  ;;  %v821_v7 = vld [vmem:[%s15842_s3 + $0x18] sm:$0xff]  ;;  %v16113_v11 = vld [vmem:[%s15857_s19] ss:$0 sm:$0xff]  ;;  %vm16599_vm5 = vmpackc.low %vm376_vm1, %vm376_vm1  ;;  %s17517_s3 = sld [smem:[#allocation23_spill]]  ;;  %s17520_s19 = sld [smem:[#allocation22_spill]] }
  0x76   :  { %14038 = vmatpush3.bf16.msra.mxu0 %v14035_v14  ;;  %v16101_v8 = vpack.c.bf16 %v821_v7, %v820_v6  ;;  %v12521_v63 = vld [vmem:[%s15852_s14] ss:$0 sm:$0xff]  ;;  %vm16605_vm7 = vmpackc.low %vm3824_vm4, %vm15795_vm6  ;;  %s17519_s14 = sld [smem:[#allocation21_spill]] }
  0x77   :  { %14040 = vmatprep.subr.bf16.mxu0 %v14039_v21  ;;  %v16174_v7 = vld [vmem:[%s15862_s24] ss:$0 sm:$0xff]  ;;  %vm14348_vm10 = vmpackc.low %vm3820_vm8, %vm3820_vm8 }
  0x7a   :  { %14042 = vmatpush3.bf16.msra.mxu0 %v14039_v21 }
  0x7b   :  { %14044 = vmatprep.subr.bf16.mxu0 %v14043_v24 }
  0x7e   :  { %14046 = vmatpush3.bf16.msra.mxu0 %v14043_v24 }
  0x7f   :  { %14064 = vmatprep.subr.bf16.mxu0 %v14063_v27 }
  0x81   :  { %13320 = vmatmul.mubr.msk.f32.vlgmr.msra.gmra.mrb[0].mxu0 %vm203_vm0, %v180_v30 }
  0x82   :  { %13322 = vmatprep.mubr.msk.f32.mxu0 %vm203_vm0, %v181_v31  ;;  %14066 = vmatpush3.bf16.msra.mxu0 %v14063_v27 }
  0x83   :  { %14068 = vmatprep.subr.bf16.mxu0 %v14067_v32 }
  0x85   :  { %13323 = vmatmul.mubr.msk.f32.gmra.mrb[2].mxu0 %vm203_vm0, %v182_v33 }
  0x86   :  { %13325 = vmatprep.mubr.msk.f32.mxu0 %vm203_vm0, %v183_v34  ;;  %14070 = vmatpush3.bf16.msra.mxu0 %v14067_v32 }
  0x87   :  { %14083 = vmatprep.subr.bf16.mxu0 %v15792_v1 }
  0x89   :  { %13326 = vmatmul.mubr.msk.f32.gmra.mrb[4].mxu0 %vm203_vm0, %v184_v35 }
  0x8a   :  { %13328 = vmatprep.mubr.msk.f32.mxu0 %vm203_vm0, %v185_v36 }
  0x8d   :  { %13329 = vmatmul.mubr.msk.f32.gmra.mrb[6].mxu0 %vm203_vm0, %v186_v37 }
  0x8e   :  { %13331 = vmatprep.mubr.msk.f32.mxu0 %vm203_vm0, %v187_v38 }
  0x91   :  { %13332 = vmatmul.mubr.msk.f32.gmra.mrb[8].mxu0 %vm203_vm0, %v188_v39 }
  0x92   :  { %13334 = vmatprep.mubr.msk.f32.mxu0 %vm203_vm0, %v189_v40 }
  0x95   :  { %13335 = vmatmul.mubr.msk.f32.gmra.mrb[10].mxu0 %vm203_vm0, %v190_v41 }
 0x154   :  { %v13321_v47 = vpop.f32.mrb[0].mxu0 }
 0x155   :  { %v306_v48 = vpop.f32.mrb[1].mxu0 }
 0x156   :  { %13345 = vmatprep.mubr.msk.f32.mxu1 %vm376_vm1, %v306_v48  ;;  %13397 = vmatprep.mubr.msk.f32.mxu0 %vm376_vm1, %v306_v48 }
 0x157   :  { %13346 = vmatmul.mubr.msk.f32.vlgmr.msra.gmra.mrb[0].mxu1 %vm376_vm1, %v13321_v47  ;;  %13398 = vmatmul.mubr.msk.f32.vlgmr.msra.gmra.mrb[12].mxu0 %vm376_vm1, %v13321_v47 }
 0x158   :  { %v13324_v50 = vpop.f32.mrb[2].mxu0  ;;  %14058 = vmatpush3.bf16.msra.mxu1 %v14055_v44  ;;  %14085 = vmatpush3.bf16.msra.mxu0 %v16089_v2 }
 0x159   :  { %v316_v51 = vpop.f32.mrb[3].mxu0  ;;  %14060 = vmatprep.subr.bf16.mxu1 %v14059_v49  ;;  %14086 = vmatprep.subr.bf16.mxu0 %v15792_v1 }
 0x15a   :  { %13348 = vmatprep.mubr.msk.f32.mxu1 %vm376_vm1, %v316_v51  ;;  %13400 = vmatprep.mubr.msk.f32.mxu0 %vm376_vm1, %v316_v51 }
 0x15b   :  { %13349 = vmatmul.mubr.msk.f32.gmra.mrb[2].mxu1 %vm376_vm1, %v13324_v50  ;;  %13401 = vmatmul.mubr.msk.f32.gmra.mrb[14].mxu0 %vm376_vm1, %v13324_v50 }
 0x15c   :  { %v13327_v52 = vpop.f32.mrb[4].mxu0  ;;  %14062 = vmatpush3.bf16.msra.mxu1 %v14059_v49  ;;  %14088 = vmatpush3.bf16.msra.mxu0 %v16101_v8 }
 0x15d   :  { %v326_v53 = vpop.f32.mrb[5].mxu0  ;;  %14071 = vmatprep.subr.bf16.mxu1 %v15792_v1  ;;  %14095 = vmatprep.subr.bf16.mxu0 %v15792_v1 }
 0x15e   :  { %13351 = vmatprep.mubr.msk.f32.mxu1 %vm376_vm1, %v326_v53  ;;  %13403 = vmatprep.mubr.msk.f32.mxu0 %vm376_vm1, %v326_v53 }
 0x15f   :  { %13352 = vmatmul.mubr.msk.f32.gmra.mrb[4].mxu1 %vm376_vm1, %v13327_v52  ;;  %13404 = vmatmul.mubr.msk.f32.gmra.mrb[16].mxu0 %vm376_vm1, %v13327_v52 }
 0x160   :  { %v13330_v54 = vpop.f32.mrb[6].mxu0 }
 0x161   :  { %v336_v55 = vpop.f32.mrb[7].mxu0 }
 0x162   :  { %13354 = vmatprep.mubr.msk.f32.mxu1 %vm376_vm1, %v336_v55  ;;  %13406 = vmatprep.mubr.msk.f32.mxu0 %vm376_vm1, %v336_v55 }
 0x163   :  { %13355 = vmatmul.mubr.msk.f32.gmra.mrb[6].mxu1 %vm376_vm1, %v13330_v54  ;;  %13407 = vmatmul.mubr.msk.f32.gmra.mrb[18].mxu0 %vm376_vm1, %v13330_v54 }
 0x164   :  { %v13333_v56 = vpop.f32.mrb[8].mxu0 }
 0x165   :  { %v346_v57 = vpop.f32.mrb[9].mxu0 }
 0x166   :  { %13357 = vmatprep.mubr.msk.f32.mxu1 %vm376_vm1, %v346_v57  ;;  %13409 = vmatprep.mubr.msk.f32.mxu0 %vm376_vm1, %v346_v57 }
 0x167   :  { %13358 = vmatmul.mubr.msk.f32.gmra.mrb[8].mxu1 %vm376_vm1, %v13333_v56  ;;  %13410 = vmatmul.mubr.msk.f32.gmra.mrb[20].mxu0 %vm376_vm1, %v13333_v56 }
 0x168   :  { %v13336_v58 = vpop.f32.mrb[10].mxu0 }
 0x169   :  { %v356_v59 = vpop.f32.mrb[11].mxu0 }
 0x16a   :  { %13360 = vmatprep.mubr.msk.f32.mxu1 %vm376_vm1, %v356_v59  ;;  %13412 = vmatprep.mubr.msk.f32.mxu0 %vm376_vm1, %v356_v59 }
 0x16b   :  { %13361 = vmatmul.mubr.msk.f32.gmra.mrb[10].mxu1 %vm376_vm1, %v13336_v58  ;;  %13413 = vmatmul.mubr.msk.f32.gmra.mrb[22].mxu0 %vm376_vm1, %v13336_v58 }
 0x16c   :  { %13371 = vmatprep.mubr.msk.f32.mxu1 %vm376_vm1, %v306_v48  ;;  %13445 = vmatprep.mubr.msk.f32.mxu0 %vm15793_vm2, %v15794_v9 }
 0x16f   :  { %13372 = vmatmul.mubr.msk.f32.vlgmr.msra.gmra.mrb[12].mxu1 %vm376_vm1, %v13321_v47 }
 0x170   :  { %13374 = vmatprep.mubr.msk.f32.mxu1 %vm376_vm1, %v316_v51  ;;  %14073 = vmatpush3.bf16.msra.mxu1 %v16083_v62 }
 0x171   :  { %14074 = vmatprep.subr.bf16.mxu1 %v15792_v1 }
 0x173   :  { %13375 = vmatmul.mubr.msk.f32.gmra.mrb[14].mxu1 %vm376_vm1, %v13324_v50 }
 0x174   :  { %13377 = vmatprep.mubr.msk.f32.mxu1 %vm376_vm1, %v326_v53  ;;  %14076 = vmatpush3.bf16.msra.mxu1 %v16096_v5 }
 0x175   :  { %14077 = vmatprep.subr.bf16.mxu1 %v15792_v1 }
 0x177   :  { %13378 = vmatmul.mubr.msk.f32.gmra.mrb[16].mxu1 %vm376_vm1, %v13327_v52 }
 0x178   :  { %13380 = vmatprep.mubr.msk.f32.mxu1 %vm376_vm1, %v336_v55 }
 0x17b   :  { %13381 = vmatmul.mubr.msk.f32.gmra.mrb[18].mxu1 %vm376_vm1, %v13330_v54 }
 0x17c   :  { %13383 = vmatprep.mubr.msk.f32.mxu1 %vm376_vm1, %v346_v57 }
 0x17f   :  { %13384 = vmatmul.mubr.msk.f32.gmra.mrb[20].mxu1 %vm376_vm1, %v13333_v56 }
 0x180   :  { %13386 = vmatprep.mubr.msk.f32.mxu1 %vm376_vm1, %v356_v59 }
 0x183   :  { %13387 = vmatmul.mubr.msk.f32.gmra.mrb[22].mxu1 %vm376_vm1, %v13336_v58 }
 0x184   :  { %13423 = vmatprep.mubr.msk.f32.mxu1 %vm15793_vm2, %v15794_v9 }
 0x22a   :  { %v13347_v12 = vpop.f32.mrb[0].mxu1  ;;  %v13399_v13 = vpop.f32.mrb[12].mxu0 }
 0x22b   :  { %v16115_v14 = vadd.f32 %v13347_v12, %v12508_v10  ;;  %v16118_v15 = vadd.f32 %v13399_v13, %v16113_v11  ;;  %v479_v16 = vpop.f32.mrb[1].mxu1  ;;  %v751_v17 = vpop.f32.mrb[13].mxu0 }
 0x22c   :  { %v480_v18 = vadd.f32 %v12508_v10, %v479_v16 }
 0x22e   :  { %v12547_v19 = vmul.f32 -1.442695, %v480_v18  ;;  %v13350_v20 = vpop.f32.mrb[2].mxu1  ;;  %v13402_v21 = vpop.f32.mrb[14].mxu0 }
 0x22f   :  { %v16120_v22 = vadd.f32 %v13350_v20, %v12508_v10  ;;  %v16123_v23 = vadd.f32 %v13402_v21, %v16113_v11  ;;  %v489_v24 = vpop.f32.mrb[3].mxu1  ;;  %v761_v25 = vpop.f32.mrb[15].mxu0 }
 0x230   :  { %15545 = vpow2.f32 %v12547_v19  ;;  %v16125_v26 = vadd.f32 %v12508_v10, %v489_v24  ;;  %v16128_v27 = vadd.f32 %v16113_v11, %v761_v25 }
 0x232   :  { %v13353_v28 = vpop.f32.mrb[4].mxu1  ;;  %v13405_v29 = vpop.f32.mrb[16].mxu0 }
 0x233   :  { %v16130_v30 = vadd.f32 %v13353_v28, %v12508_v10  ;;  %v16133_v31 = vadd.f32 %v13405_v29, %v16113_v11  ;;  %v499_v32 = vpop.f32.mrb[5].mxu1  ;;  %v771_v33 = vpop.f32.mrb[17].mxu0 }
 0x234   :  { %v16135_v34 = vadd.f32 %v12508_v10, %v499_v32  ;;  %v16138_v35 = vadd.f32 %v16113_v11, %v771_v33 }
 0x236   :  { %v13356_v36 = vpop.f32.mrb[6].mxu1  ;;  %v13408_v37 = vpop.f32.mrb[18].mxu0 }
 0x237   :  { %v16140_v38 = vadd.f32 %v13356_v36, %v12508_v10  ;;  %v16143_v39 = vadd.f32 %v13408_v37, %v16113_v11  ;;  %v509_v40 = vpop.f32.mrb[7].mxu1  ;;  %v781_v41 = vpop.f32.mrb[19].mxu0 }
 0x238   :  { %v16145_v42 = vadd.f32 %v12508_v10, %v509_v40  ;;  %v16148_v43 = vadd.f32 %v16113_v11, %v781_v41 }
 0x23a   :  { %v15546_v44 = vpop.eup %15545  ;;  %v13359_v45 = vpop.f32.mrb[8].mxu1 }
 0x23b   :  { %v13411_v46 = vpop.f32.mrb[20].mxu0  ;;  %v826_v47 = vadd.f32 1.0, %v15546_v44  ;;  %v16150_v48 = vadd.f32 %v13359_v45, %v12508_v10  ;;  %v519_v50 = vpop.f32.mrb[9].mxu1 }
 0x23c   :  { %v16153_v49 = vadd.f32 %v13411_v46, %v16113_v11  ;;  %v791_v51 = vpop.f32.mrb[21].mxu0  ;;  %v16155_v52 = vadd.f32 %v12508_v10, %v519_v50 }
 0x23d   :  { %v16158_v53 = vadd.f32 %v16113_v11, %v791_v51  ;;  %15547 = vrcp.f32 %v826_v47 }
 0x23e   :  { %v13362_v54 = vpop.f32.mrb[10].mxu1  ;;  %v13414_v55 = vpop.f32.mrb[22].mxu0 }
 0x23f   :  { %v16160_v56 = vadd.f32 %v13362_v54, %v12508_v10  ;;  %v16163_v57 = vadd.f32 %v13414_v55, %v16113_v11  ;;  %v529_v58 = vpop.f32.mrb[11].mxu1  ;;  %v801_v59 = vpop.f32.mrb[23].mxu0  ;;  %v814_v55 = vld [vmem:[%s15837_s29] sm:$0xff] }
 0x240   :  { %v16165_v60 = vadd.f32 %v12508_v10, %v529_v58  ;;  %v16168_v61 = vadd.f32 %v16113_v11, %v801_v59  ;;  %v752_v10 = vadd.f32 %v16113_v11, %v751_v17  ;;  %v815_v58 = vld [vmem:[%s15837_s29 + $0x8] sm:$0xff] }
 0x242   :  { %v13373_v0 = vpop.f32.mrb[12].mxu1 }
 0x243   :  { %v16171_v3 = vadd.f32 %v13373_v0, %v12521_v63  ;;  %v615_v4 = vpop.f32.mrb[13].mxu1 }
 0x244   :  { %v616_v6 = vadd.f32 %v12521_v63, %v615_v4 }
 0x246   :  { %v12548_v12 = vmul.f32 -1.442695, %v616_v6  ;;  %v13376_v13 = vpop.f32.mrb[14].mxu1  ;;  %v16200_v6 = vpack.c.bf16 %v815_v58, %v814_v55 }
 0x247   :  { %v15548_v16 = vpop.eup %15547  ;;  %v16176_v18 = vadd.f32 %v13376_v13, %v12521_v63  ;;  %v625_v19 = vpop.f32.mrb[15].mxu1  ;;  %v816_v13 = vld [vmem:[%s15837_s29 + $0x10] sm:$0xff] }
 0x248   :  { %v841_v20 = vmul.f32 %v15548_v16, %v16174_v7  ;;  %15549 = vpow2.f32 %v12548_v12  ;;  %v16180_v21 = vadd.f32 %v12521_v63, %v625_v19  ;;  %v817_v16 = vld [vmem:[%s15837_s29 + $0x18] sm:$0xff]  ;;  %s17516_s29 = sld [smem:[#allocation19_spill]] }
 0x24a   :  { %v842_v24 = vadd.f32 %v841_v20, %v752_v10  ;;  %v13379_v25 = vpop.f32.mrb[16].mxu1 }
 0x24b   :  { %v16182_v28 = vadd.f32 %v13379_v25, %v12521_v63  ;;  %v635_v29 = vpop.f32.mrb[17].mxu1 }
 0x24c   :  { %v16184_v32 = vadd.f32 %v12521_v63, %v635_v29 }
 0x24e   :  { %v13382_v33 = vpop.f32.mrb[18].mxu1 }
 0x24f   :  { %v16186_v36 = vadd.f32 %v13382_v33, %v12521_v63  ;;  %v645_v37 = vpop.f32.mrb[19].mxu1 }
 0x250   :  { %v16188_v40 = vadd.f32 %v12521_v63, %v645_v37 }
 0x252   :  { %v15550_v11 = vpop.eup %15549  ;;  %v13385_v17 = vpop.f32.mrb[20].mxu1 }
 0x253   :  { %v832_v41 = vadd.f32 1.0, %v15550_v11  ;;  %v16190_v44 = vadd.f32 %v13385_v17, %v12521_v63  ;;  %v655_v45 = vpop.f32.mrb[21].mxu1 }
 0x254   :  { %v16192_v46 = vadd.f32 %v12521_v63, %v655_v45 }
 0x255   :  { %15551 = vrcp.f32 %v832_v41 }
 0x256   :  { %v13388_v47 = vpop.f32.mrb[22].mxu1  ;;  %15553 = vtanh.f32 %v842_v24 }
 0x257   :  { %v16194_v50 = vadd.f32 %v13388_v47, %v12521_v63  ;;  %v665_v51 = vpop.f32.mrb[23].mxu1 }
 0x258   :  { %v16196_v54 = vadd.f32 %v12521_v63, %v665_v51  ;;  %v16208_v63 = vpack.c.bf16 %v817_v16, %v816_v13 }
 0x25f   :  { %v15552_v59 = vpop.eup %15551 }
 0x260   :  { %v844_v0 = vsub.f32 1.0, %v15552_v59  ;;  %v15554_v4 = vpop.eup %15553 }
 0x262   :  { %v845_v12 = vmul.f32 %v15554_v4, %v844_v0 }
 0x264   :  { %846 = vst.msk [vmem:[#allocation2] sm:$0xff] %vm376_vm1, %v845_v12  ;;  %13424 = vmatmul.mubr.msk.f32.vlgmr.msra.gmra.mrb[24].mxu1 %vm376_vm1, %v845_v12  ;;  %13446 = vmatmul.mubr.msk.f32.vlgmr.msra.gmra.mrb[24].mxu0 %vm376_vm1, %v845_v12 }
 0x265   :  { %14079 = vmatpush3.bf16.msra.mxu1 %v16200_v6  ;;  %13434 = vmatprep.mubr.msk.f32.mxu1 %vm15793_vm2, %v15794_v9 }
 0x266   :  { %14080 = vmatprep.subr.bf16.mxu1 %v15792_v1  ;;  %14097 = vmatpush3.bf16.msra.mxu0 %v16200_v6 }
 0x267   :  { %14098 = vmatprep.subr.bf16.mxu0 %v15792_v1  ;;  %13467 = vmatprep.mubr.msk.f32.mxu0 %vm15793_vm2, %v15794_v9 }
 0x269   :  { %14082 = vmatpush3.bf16.msra.mxu1 %v16208_v63 }
 0x26a   :  { %14089 = vmatprep.subr.bf16.mxu1 %v15792_v1  ;;  %14100 = vmatpush3.bf16.msra.mxu0 %v16208_v63 }
 0x26b   :  { %14107 = vmatprep.subr.bf16.mxu0 %v15792_v1 }
 0x26c   :  { %13435 = vmatmul.mubr.msk.f32.vlgmr.msra.gmra.mrb[26].mxu1 %vm376_vm1, %v845_v12 }
 0x26d   :  { %14091 = vmatpush3.bf16.msra.mxu1 %v16083_v62  ;;  %13456 = vmatprep.mubr.msk.f32.mxu1 %vm15793_vm2, %v15794_v9 }
 0x26e   :  { %14092 = vmatprep.subr.bf16.mxu1 %v15792_v1 }
 0x271   :  { %14094 = vmatpush3.bf16.msra.mxu1 %v16096_v5 }
 0x272   :  { %14101 = vmatprep.subr.bf16.mxu1 %v15792_v1 }
 0x337   :  { %v916_v19 = vpop.f32.mrb[24].mxu1  ;;  %v1056_v10 = vpop.f32.mrb[24].mxu0 }
 0x338   :  { %v1060_v20 = vadd.f32 %v916_v19, %v16115_v14  ;;  %v13425_v24 = vpop.f32.mrb[25].mxu1  ;;  %v13447_v25 = vpop.f32.mrb[25].mxu0  ;;  %v1057_v55 = vadd.f32 %v16174_v7, %v1056_v10 }
 0x33a   :  { %v12553_v29 = vmul.f32 -1.442695, %v1060_v20 }
 0x33c   :  { %15555 = vpow2.f32 %v12553_v29 }
 0x33f   :  { %v986_v33 = vpop.f32.mrb[26].mxu1 }
 0x340   :  { %v1067_v37 = vadd.f32 %v986_v33, %v16171_v3  ;;  %v13436_v11 = vpop.f32.mrb[27].mxu1 }
 0x342   :  { %v12554_v17 = vmul.f32 -1.442695, %v1067_v37 }
 0x344   :  { %15557 = vpow2.f32 %v12554_v17 }
 0x346   :  { %v15556_v41 = vpop.eup %15555 }
 0x347   :  { %v1064_v45 = vadd.f32 1.0, %v15556_v41 }
 0x349   :  { %15559 = vrcp.f32 %v1064_v45 }
 0x34e   :  { %v15558_v47 = vpop.eup %15557 }
 0x34f   :  { %v1071_v51 = vadd.f32 1.0, %v15558_v47 }
 0x351   :  { %15561 = vrcp.f32 %v1071_v51 }
 0x353   :  { %v15560_v58 = vpop.eup %15559 }
 0x354   :  { %v1074_v59 = vmul.f32 %v15560_v58, %v1057_v55 }
 0x356   :  { %v1075_v14 = vadd.f32 %v1074_v59, %v16118_v15 }
 0x358   :  { %15563 = vtanh.f32 %v1075_v14 }
 0x35b   :  { %v15562_v0 = vpop.eup %15561 }
 0x35c   :  { %v1077_v4 = vsub.f32 1.0, %v15562_v0  ;;  %v1079_v16 = vmul.f32 %v15562_v0, %v845_v12 }
 0x362   :  { %v15564_v13 = vpop.eup %15563 }
 0x363   :  { %v1078_v3 = vmul.f32 %v15564_v13, %v1077_v4 }
 0x365   :  { %v1080_v19 = vadd.f32 %v1079_v16, %v1078_v3 }
 0x367   :  { %1081 = vst.msk [vmem:[#allocation2 + $0x8] sm:$0xff] %vm376_vm1, %v1080_v19  ;;  %13457 = vmatmul.mubr.msk.f32.vlgmr.msra.gmra.mrb[28].mxu1 %vm376_vm1, %v1080_v19  ;;  %13468 = vmatmul.mubr.msk.f32.vlgmr.msra.gmra.mrb[26].mxu0 %vm376_vm1, %v1080_v19 }
 0x368   :  { %14103 = vmatpush3.bf16.msra.mxu1 %v16089_v2  ;;  %13478 = vmatprep.mubr.msk.f32.mxu1 %vm15793_vm2, %v15794_v9 }
 0x369   :  { %14104 = vmatprep.subr.bf16.mxu1 %v15792_v1  ;;  %14109 = vmatpush3.bf16.msra.mxu0 %v16083_v62 }
 0x36a   :  { %14110 = vmatprep.subr.bf16.mxu0 %v15792_v1  ;;  %13489 = vmatprep.mubr.msk.f32.mxu0 %vm15793_vm2, %v15794_v9 }
 0x36c   :  { %14106 = vmatpush3.bf16.msra.mxu1 %v16101_v8 }
 0x36d   :  { %14113 = vmatprep.subr.bf16.mxu1 %v15792_v1  ;;  %14112 = vmatpush3.bf16.msra.mxu0 %v16096_v5 }
 0x36e   :  { %14119 = vmatprep.subr.bf16.mxu0 %v15792_v1 }
 0x36f   :  { %13479 = vmatmul.mubr.msk.f32.vlgmr.msra.gmra.mrb[30].mxu1 %vm376_vm1, %v1080_v19 }
 0x370   :  { %14115 = vmatpush3.bf16.msra.mxu1 %v16200_v6  ;;  %13500 = vmatprep.mubr.msk.f32.mxu1 %vm15793_vm2, %v15794_v9 }
 0x371   :  { %14116 = vmatprep.subr.bf16.mxu1 %v15792_v1 }
 0x374   :  { %14118 = vmatpush3.bf16.msra.mxu1 %v16208_v63 }
 0x375   :  { %14125 = vmatprep.subr.bf16.mxu1 %v15792_v1 }
 0x43a   :  { %v1151_v15 = vpop.f32.mrb[28].mxu1  ;;  %v1221_v12 = vpop.f32.mrb[26].mxu0 }
 0x43b   :  { %v1295_v10 = vadd.f32 %v1151_v15, %v16125_v26  ;;  %v1302_v20 = vadd.f32 %v1221_v12, %v16180_v21  ;;  %v13458_v24 = vpop.f32.mrb[29].mxu1  ;;  %v13469_v25 = vpop.f32.mrb[27].mxu0 }
 0x43d   :  { %v12558_v29 = vmul.f32 -1.442695, %v1295_v10  ;;  %v12559_v33 = vmul.f32 -1.442695, %v1302_v20 }
 0x43f   :  { %15565 = vpow2.f32 %v12558_v29 }
 0x440   :  { %15567 = vpow2.f32 %v12559_v33 }
 0x442   :  { %v1291_v37 = vpop.f32.mrb[30].mxu1 }
 0x443   :  { %v13480_v11 = vpop.f32.mrb[31].mxu1  ;;  %v1292_v51 = vadd.f32 %v16174_v7, %v1291_v37 }
 0x449   :  { %v15566_v17 = vpop.eup %15565 }
 0x44a   :  { %v1299_v41 = vadd.f32 1.0, %v15566_v17  ;;  %v15568_v45 = vpop.eup %15567 }
 0x44b   :  { %v1306_v47 = vadd.f32 1.0, %v15568_v45 }
 0x44c   :  { %15569 = vrcp.f32 %v1299_v41 }
 0x44d   :  { %15571 = vrcp.f32 %v1306_v47 }
 0x456   :  { %v15570_v55 = vpop.eup %15569 }
 0x457   :  { %v1309_v26 = vmul.f32 %v15570_v55, %v1292_v51  ;;  %v15572_v58 = vpop.eup %15571 }
 0x458   :  { %v1312_v59 = vsub.f32 1.0, %v15572_v58  ;;  %v1314_v4 = vmul.f32 %v15572_v58, %v1080_v19 }
 0x459   :  { %v1310_v21 = vadd.f32 %v1309_v26, %v16128_v27 }
 0x45b   :  { %15573 = vtanh.f32 %v1310_v21 }
 0x465   :  { %v15574_v14 = vpop.eup %15573 }
 0x466   :  { %v1313_v0 = vmul.f32 %v15574_v14, %v1312_v59 }
 0x468   :  { %v1315_v13 = vadd.f32 %v1314_v4, %v1313_v0 }
 0x46a   :  { %1316 = vst.msk [vmem:[#allocation2 + $0x10] sm:$0xff] %vm376_vm1, %v1315_v13  ;;  %13490 = vmatmul.mubr.msk.f32.vlgmr.msra.gmra.mrb[28].mxu0 %vm376_vm1, %v1315_v13  ;;  %13501 = vmatmul.mubr.msk.f32.vlgmr.msra.gmra.mrb[32].mxu1 %vm376_vm1, %v1315_v13 }
 0x46b   :  { %14121 = vmatpush3.bf16.msra.mxu0 %v16089_v2  ;;  %13511 = vmatprep.mubr.msk.f32.mxu0 %vm15793_vm2, %v15794_v9 }
 0x46c   :  { %14122 = vmatprep.subr.bf16.mxu0 %v15792_v1  ;;  %14127 = vmatpush3.bf16.msra.mxu1 %v16083_v62 }
 0x46d   :  { %14128 = vmatprep.subr.bf16.mxu1 %v15792_v1  ;;  %13522 = vmatprep.mubr.msk.f32.mxu1 %vm15793_vm2, %v15794_v9 }
 0x46f   :  { %14124 = vmatpush3.bf16.msra.mxu0 %v16101_v8 }
 0x470   :  { %14131 = vmatprep.subr.bf16.mxu0 %v15792_v1  ;;  %14130 = vmatpush3.bf16.msra.mxu1 %v16096_v5 }
 0x471   :  { %14137 = vmatprep.subr.bf16.mxu1 %v15792_v1 }
 0x472   :  { %13512 = vmatmul.mubr.msk.f32.vlgmr.msra.gmra.mrb[30].mxu0 %vm376_vm1, %v1315_v13 }
 0x473   :  { %14133 = vmatpush3.bf16.msra.mxu0 %v16200_v6  ;;  %13533 = vmatprep.mubr.msk.f32.mxu0 %vm15793_vm2, %v15794_v9 }
 0x474   :  { %14134 = vmatprep.subr.bf16.mxu0 %v15792_v1 }
 0x477   :  { %14136 = vmatpush3.bf16.msra.mxu0 %v16208_v63 }
 0x478   :  { %14143 = vmatprep.subr.bf16.mxu0 %v15792_v1 }
 0x53d   :  { %v1386_v27 = vpop.f32.mrb[28].mxu0  ;;  %v1456_v3 = vpop.f32.mrb[32].mxu1 }
 0x53e   :  { %v1530_v16 = vadd.f32 %v1386_v27, %v16120_v22  ;;  %v1537_v19 = vadd.f32 %v1456_v3, %v16176_v18  ;;  %v13491_v15 = vpop.f32.mrb[29].mxu0  ;;  %v13502_v12 = vpop.f32.mrb[33].mxu1 }
 0x540   :  { %v12563_v10 = vmul.f32 -1.442695, %v1530_v16  ;;  %v12564_v20 = vmul.f32 -1.442695, %v1537_v19 }
 0x542   :  { %15575 = vpow2.f32 %v12563_v10 }
 0x543   :  { %15577 = vpow2.f32 %v12564_v20 }
 0x545   :  { %v1526_v24 = vpop.f32.mrb[30].mxu0 }
 0x546   :  { %v13513_v25 = vpop.f32.mrb[31].mxu0  ;;  %v1527_v17 = vadd.f32 %v16174_v7, %v1526_v24 }
 0x54c   :  { %v15576_v29 = vpop.eup %15575 }
 0x54d   :  { %v1534_v33 = vadd.f32 1.0, %v15576_v29  ;;  %v15578_v37 = vpop.eup %15577 }
 0x54e   :  { %v1541_v11 = vadd.f32 1.0, %v15578_v37 }
 0x54f   :  { %15579 = vrcp.f32 %v1534_v33 }
 0x550   :  { %15581 = vrcp.f32 %v1541_v11 }
 0x559   :  { %v15580_v41 = vpop.eup %15579 }
 0x55a   :  { %v1544_v22 = vmul.f32 %v15580_v41, %v1527_v17  ;;  %v15582_v45 = vpop.eup %15581 }
 0x55b   :  { %v1547_v47 = vsub.f32 1.0, %v15582_v45  ;;  %v1549_v26 = vmul.f32 %v15582_v45, %v1315_v13 }
 0x55c   :  { %v1545_v18 = vadd.f32 %v1544_v22, %v16123_v23 }
 0x55e   :  { %15583 = vtanh.f32 %v1545_v18 }
 0x568   :  { %v15584_v51 = vpop.eup %15583 }
 0x569   :  { %v1548_v55 = vmul.f32 %v15584_v51, %v1547_v47 }
 0x56b   :  { %v1550_v21 = vadd.f32 %v1549_v26, %v1548_v55 }
 0x56d   :  { %1551 = vst.msk [vmem:[#allocation2 + $0x18] sm:$0xff] %vm376_vm1, %v1550_v21  ;;  %13523 = vmatmul.mubr.msk.f32.vlgmr.msra.gmra.mrb[34].mxu1 %vm376_vm1, %v1550_v21  ;;  %13534 = vmatmul.mubr.msk.f32.vlgmr.msra.gmra.mrb[32].mxu0 %vm376_vm1, %v1550_v21 }
 0x56e   :  { %14139 = vmatpush3.bf16.msra.mxu1 %v16089_v2  ;;  %13544 = vmatprep.mubr.msk.f32.mxu1 %vm15793_vm2, %v15794_v9 }
 0x56f   :  { %14140 = vmatprep.subr.bf16.mxu1 %v15792_v1  ;;  %14145 = vmatpush3.bf16.msra.mxu0 %v16083_v62 }
 0x570   :  { %14146 = vmatprep.subr.bf16.mxu0 %v15792_v1  ;;  %13555 = vmatprep.mubr.msk.f32.mxu0 %vm15793_vm2, %v15794_v9 }
 0x572   :  { %14142 = vmatpush3.bf16.msra.mxu1 %v16101_v8 }
 0x573   :  { %14149 = vmatprep.subr.bf16.mxu1 %v15792_v1  ;;  %14148 = vmatpush3.bf16.msra.mxu0 %v16096_v5 }
 0x574   :  { %14155 = vmatprep.subr.bf16.mxu0 %v15792_v1 }
 0x575   :  { %13545 = vmatmul.mubr.msk.f32.vlgmr.msra.gmra.mrb[36].mxu1 %vm376_vm1, %v1550_v21 }
 0x576   :  { %14151 = vmatpush3.bf16.msra.mxu1 %v16200_v6  ;;  %13566 = vmatprep.mubr.msk.f32.mxu1 %vm15793_vm2, %v15794_v9 }
 0x577   :  { %14152 = vmatprep.subr.bf16.mxu1 %v15792_v1 }
 0x57a   :  { %14154 = vmatpush3.bf16.msra.mxu1 %v16208_v63 }
 0x57b   :  { %14161 = vmatprep.subr.bf16.mxu1 %v15792_v1 }
 0x640   :  { %v1621_v23 = vpop.f32.mrb[34].mxu1  ;;  %v1691_v58 = vpop.f32.mrb[32].mxu0 }
 0x641   :  { %v1765_v59 = vadd.f32 %v1621_v23, %v16135_v34  ;;  %v1772_v14 = vadd.f32 %v1691_v58, %v16184_v32  ;;  %v13524_v0 = vpop.f32.mrb[35].mxu1  ;;  %v13535_v4 = vpop.f32.mrb[33].mxu0 }
 0x643   :  { %v12568_v13 = vmul.f32 -1.442695, %v1765_v59  ;;  %v12569_v27 = vmul.f32 -1.442695, %v1772_v14 }
 0x645   :  { %15585 = vpow2.f32 %v12568_v13 }
 0x646   :  { %15587 = vpow2.f32 %v12569_v27 }
 0x648   :  { %v1761_v3 = vpop.f32.mrb[36].mxu1 }
 0x649   :  { %v13546_v16 = vpop.f32.mrb[37].mxu1  ;;  %v1762_v20 = vadd.f32 %v16174_v7, %v1761_v3 }
 0x64f   :  { %v15586_v19 = vpop.eup %15585 }
 0x650   :  { %v1769_v15 = vadd.f32 1.0, %v15586_v19  ;;  %v15588_v12 = vpop.eup %15587 }
 0x651   :  { %v1776_v10 = vadd.f32 1.0, %v15588_v12 }
 0x652   :  { %15589 = vrcp.f32 %v1769_v15 }
 0x653   :  { %15591 = vrcp.f32 %v1776_v10 }
 0x65c   :  { %v15590_v24 = vpop.eup %15589 }
 0x65d   :  { %v1779_v34 = vmul.f32 %v15590_v24, %v1762_v20  ;;  %v15592_v25 = vpop.eup %15591 }
 0x65e   :  { %v1782_v29 = vsub.f32 1.0, %v15592_v25  ;;  %v1784_v11 = vmul.f32 %v15592_v25, %v1550_v21 }
 0x65f   :  { %v1780_v32 = vadd.f32 %v1779_v34, %v16138_v35 }
 0x661   :  { %15593 = vtanh.f32 %v1780_v32 }
 0x66b   :  { %v15594_v33 = vpop.eup %15593 }
 0x66c   :  { %v1783_v37 = vmul.f32 %v15594_v33, %v1782_v29 }
 0x66e   :  { %v1785_v17 = vadd.f32 %v1784_v11, %v1783_v37 }
 0x670   :  { %1786 = vst.msk [vmem:[#allocation2 + $0x20] sm:$0xff] %vm376_vm1, %v1785_v17  ;;  %13556 = vmatmul.mubr.msk.f32.vlgmr.msra.gmra.mrb[34].mxu0 %vm376_vm1, %v1785_v17  ;;  %13567 = vmatmul.mubr.msk.f32.vlgmr.msra.gmra.mrb[38].mxu1 %vm376_vm1, %v1785_v17 }
 0x671   :  { %14157 = vmatpush3.bf16.msra.mxu0 %v16089_v2  ;;  %13577 = vmatprep.mubr.msk.f32.mxu0 %vm15793_vm2, %v15794_v9 }
 0x672   :  { %14158 = vmatprep.subr.bf16.mxu0 %v15792_v1  ;;  %14163 = vmatpush3.bf16.msra.mxu1 %v16083_v62 }
 0x673   :  { %14164 = vmatprep.subr.bf16.mxu1 %v15792_v1  ;;  %13588 = vmatprep.mubr.msk.f32.mxu1 %vm15793_vm2, %v15794_v9 }
 0x675   :  { %14160 = vmatpush3.bf16.msra.mxu0 %v16101_v8 }
 0x676   :  { %14167 = vmatprep.subr.bf16.mxu0 %v15792_v1  ;;  %14166 = vmatpush3.bf16.msra.mxu1 %v16096_v5 }
 0x677   :  { %14173 = vmatprep.subr.bf16.mxu1 %v15792_v1 }
 0x678   :  { %13578 = vmatmul.mubr.msk.f32.vlgmr.msra.gmra.mrb[36].mxu0 %vm376_vm1, %v1785_v17 }
 0x679   :  { %14169 = vmatpush3.bf16.msra.mxu0 %v16200_v6  ;;  %13599 = vmatprep.mubr.msk.f32.mxu0 %vm15793_vm2, %v15794_v9 }
 0x67a   :  { %14170 = vmatprep.subr.bf16.mxu0 %v15792_v1 }
 0x67d   :  { %14172 = vmatpush3.bf16.msra.mxu0 %v16208_v63 }
 0x67e   :  { %14179 = vmatprep.subr.bf16.mxu0 %v15792_v1 }
 0x743   :  { %v1856_v35 = vpop.f32.mrb[34].mxu0  ;;  %v1926_v41 = vpop.f32.mrb[38].mxu1 }
 0x744   :  { %v2000_v22 = vadd.f32 %v1856_v35, %v16130_v30  ;;  %v2007_v18 = vadd.f32 %v1926_v41, %v16182_v28  ;;  %v13557_v45 = vpop.f32.mrb[35].mxu0  ;;  %v13568_v47 = vpop.f32.mrb[39].mxu1 }
 0x746   :  { %v12573_v51 = vmul.f32 -1.442695, %v2000_v22  ;;  %v12574_v55 = vmul.f32 -1.442695, %v2007_v18 }
 0x748   :  { %15595 = vpow2.f32 %v12573_v51 }
 0x749   :  { %15597 = vpow2.f32 %v12574_v55 }
 0x74b   :  { %v1996_v26 = vpop.f32.mrb[36].mxu0 }
 0x74c   :  { %v13579_v21 = vpop.f32.mrb[37].mxu0  ;;  %v1997_v0 = vadd.f32 %v16174_v7, %v1996_v26 }
 0x752   :  { %v15596_v23 = vpop.eup %15595 }
 0x753   :  { %v2004_v58 = vadd.f32 1.0, %v15596_v23  ;;  %v15598_v59 = vpop.eup %15597 }
 0x754   :  { %v2011_v14 = vadd.f32 1.0, %v15598_v59 }
 0x755   :  { %15599 = vrcp.f32 %v2004_v58 }
 0x756   :  { %15601 = vrcp.f32 %v2011_v14 }
 0x75f   :  { %v15600_v4 = vpop.eup %15599 }
 0x760   :  { %v2014_v30 = vmul.f32 %v15600_v4, %v1997_v0  ;;  %v15602_v13 = vpop.eup %15601 }
 0x761   :  { %v2017_v27 = vsub.f32 1.0, %v15602_v13  ;;  %v2019_v19 = vmul.f32 %v15602_v13, %v1785_v17 }
 0x762   :  { %v2015_v28 = vadd.f32 %v2014_v30, %v16133_v31 }
 0x764   :  { %15603 = vtanh.f32 %v2015_v28 }
 0x76e   :  { %v15604_v3 = vpop.eup %15603 }
 0x76f   :  { %v2018_v16 = vmul.f32 %v15604_v3, %v2017_v27 }
 0x771   :  { %v2020_v15 = vadd.f32 %v2019_v19, %v2018_v16 }
 0x773   :  { %2021 = vst.msk [vmem:[#allocation2 + $0x28] sm:$0xff] %vm376_vm1, %v2020_v15  ;;  %13589 = vmatmul.mubr.msk.f32.vlgmr.msra.gmra.mrb[40].mxu1 %vm376_vm1, %v2020_v15  ;;  %13600 = vmatmul.mubr.msk.f32.vlgmr.msra.gmra.mrb[38].mxu0 %vm376_vm1, %v2020_v15 }
 0x774   :  { %14175 = vmatpush3.bf16.msra.mxu1 %v16089_v2  ;;  %13610 = vmatprep.mubr.msk.f32.mxu1 %vm15793_vm2, %v15794_v9 }
 0x775   :  { %14176 = vmatprep.subr.bf16.mxu1 %v15792_v1  ;;  %14181 = vmatpush3.bf16.msra.mxu0 %v16083_v62 }
 0x776   :  { %14182 = vmatprep.subr.bf16.mxu0 %v15792_v1  ;;  %13621 = vmatprep.mubr.msk.f32.mxu0 %vm15793_vm2, %v15794_v9 }
 0x778   :  { %14178 = vmatpush3.bf16.msra.mxu1 %v16101_v8 }
 0x779   :  { %14185 = vmatprep.subr.bf16.mxu1 %v15792_v1  ;;  %14184 = vmatpush3.bf16.msra.mxu0 %v16096_v5 }
 0x77a   :  { %14191 = vmatprep.subr.bf16.mxu0 %v15792_v1 }
 0x77b   :  { %13611 = vmatmul.mubr.msk.f32.vlgmr.msra.gmra.mrb[42].mxu1 %vm376_vm1, %v2020_v15 }
 0x77c   :  { %14187 = vmatpush3.bf16.msra.mxu1 %v16200_v6  ;;  %13632 = vmatprep.mubr.msk.f32.mxu1 %vm15793_vm2, %v15794_v9 }
 0x77d   :  { %14188 = vmatprep.subr.bf16.mxu1 %v15792_v1 }
 0x780   :  { %14190 = vmatpush3.bf16.msra.mxu1 %v16208_v63 }
 0x781   :  { %14197 = vmatprep.subr.bf16.mxu1 %v15792_v1 }
 0x846   :  { %v2091_v31 = vpop.f32.mrb[40].mxu1  ;;  %v2161_v12 = vpop.f32.mrb[38].mxu0 }
 0x847   :  { %v2235_v10 = vadd.f32 %v2091_v31, %v16145_v42  ;;  %v2242_v20 = vadd.f32 %v2161_v12, %v16188_v40  ;;  %v13590_v24 = vpop.f32.mrb[41].mxu1  ;;  %v13601_v34 = vpop.f32.mrb[39].mxu0 }
 0x849   :  { %v12578_v32 = vmul.f32 -1.442695, %v2235_v10  ;;  %v12579_v25 = vmul.f32 -1.442695, %v2242_v20 }
 0x84b   :  { %15605 = vpow2.f32 %v12578_v32 }
 0x84c   :  { %15607 = vpow2.f32 %v12579_v25 }
 0x84e   :  { %v2231_v29 = vpop.f32.mrb[42].mxu1 }
 0x84f   :  { %v13612_v33 = vpop.f32.mrb[43].mxu1  ;;  %v2232_v41 = vadd.f32 %v16174_v7, %v2231_v29 }
 0x855   :  { %v15606_v37 = vpop.eup %15605 }
 0x856   :  { %v2239_v11 = vadd.f32 1.0, %v15606_v37  ;;  %v15608_v17 = vpop.eup %15607 }
 0x857   :  { %v2246_v35 = vadd.f32 1.0, %v15608_v17 }
 0x858   :  { %15609 = vrcp.f32 %v2239_v11 }
 0x859   :  { %15611 = vrcp.f32 %v2246_v35 }
 0x862   :  { %v15610_v22 = vpop.eup %15609 }
 0x863   :  { %v2249_v42 = vmul.f32 %v15610_v22, %v2232_v41  ;;  %v15612_v18 = vpop.eup %15611 }
 0x864   :  { %v2252_v45 = vsub.f32 1.0, %v15612_v18  ;;  %v2254_v55 = vmul.f32 %v15612_v18, %v2020_v15 }
 0x865   :  { %v2250_v40 = vadd.f32 %v2249_v42, %v16148_v43 }
 0x867   :  { %15613 = vtanh.f32 %v2250_v40 }
 0x871   :  { %v15614_v47 = vpop.eup %15613 }
 0x872   :  { %v2253_v51 = vmul.f32 %v15614_v47, %v2252_v45 }
 0x874   :  { %v2255_v26 = vadd.f32 %v2254_v55, %v2253_v51 }
 0x876   :  { %2256 = vst.msk [vmem:[#allocation2 + $0x30] sm:$0xff] %vm376_vm1, %v2255_v26  ;;  %13622 = vmatmul.mubr.msk.f32.vlgmr.msra.gmra.mrb[40].mxu0 %vm376_vm1, %v2255_v26  ;;  %13633 = vmatmul.mubr.msk.f32.vlgmr.msra.gmra.mrb[44].mxu1 %vm376_vm1, %v2255_v26 }
 0x877   :  { %14193 = vmatpush3.bf16.msra.mxu0 %v16089_v2  ;;  %13643 = vmatprep.mubr.msk.f32.mxu0 %vm15793_vm2, %v15794_v9 }
 0x878   :  { %14194 = vmatprep.subr.bf16.mxu0 %v15792_v1  ;;  %14199 = vmatpush3.bf16.msra.mxu1 %v16083_v62 }
 0x879   :  { %14200 = vmatprep.subr.bf16.mxu1 %v15792_v1  ;;  %13654 = vmatprep.mubr.msk.f32.mxu1 %vm15793_vm2, %v15794_v9 }
 0x87b   :  { %14196 = vmatpush3.bf16.msra.mxu0 %v16101_v8 }
 0x87c   :  { %14203 = vmatprep.subr.bf16.mxu0 %v15792_v1  ;;  %14202 = vmatpush3.bf16.msra.mxu1 %v16096_v5 }
 0x87d   :  { %14209 = vmatprep.subr.bf16.mxu1 %v15792_v1 }
 0x87e   :  { %13644 = vmatmul.mubr.msk.f32.vlgmr.msra.gmra.mrb[42].mxu0 %vm376_vm1, %v2255_v26 }
 0x87f   :  { %14205 = vmatpush3.bf16.msra.mxu0 %v16200_v6  ;;  %13665 = vmatprep.mubr.msk.f32.mxu0 %vm15793_vm2, %v15794_v9 }
 0x880   :  { %14206 = vmatprep.subr.bf16.mxu0 %v15792_v1 }
 0x883   :  { %14208 = vmatpush3.bf16.msra.mxu0 %v16208_v63 }
 0x884   :  { %14215 = vmatprep.subr.bf16.mxu0 %v15792_v1 }
 0x949   :  { %v2326_v43 = vpop.f32.mrb[40].mxu0  ;;  %v2396_v21 = vpop.f32.mrb[44].mxu1 }
 0x94a   :  { %v2470_v23 = vadd.f32 %v2326_v43, %v16140_v38  ;;  %v2477_v58 = vadd.f32 %v2396_v21, %v16186_v36  ;;  %v13623_v59 = vpop.f32.mrb[41].mxu0  ;;  %v13634_v14 = vpop.f32.mrb[45].mxu1 }
 0x94c   :  { %v12583_v0 = vmul.f32 -1.442695, %v2470_v23  ;;  %v12584_v4 = vmul.f32 -1.442695, %v2477_v58 }
 0x94e   :  { %15615 = vpow2.f32 %v12583_v0 }
 0x94f   :  { %15617 = vpow2.f32 %v12584_v4 }
 0x951   :  { %v2466_v30 = vpop.f32.mrb[42].mxu0 }
 0x952   :  { %v13645_v28 = vpop.f32.mrb[43].mxu0  ;;  %v2467_v19 = vadd.f32 %v16174_v7, %v2466_v30 }
 0x958   :  { %v15616_v13 = vpop.eup %15615 }
 0x959   :  { %v2474_v27 = vadd.f32 1.0, %v15616_v13  ;;  %v15618_v3 = vpop.eup %15617 }
 0x95a   :  { %v2481_v16 = vadd.f32 1.0, %v15618_v3 }
 0x95b   :  { %15619 = vrcp.f32 %v2474_v27 }
 0x95c   :  { %15621 = vrcp.f32 %v2481_v16 }
 0x965   :  { %v15620_v15 = vpop.eup %15619 }
 0x966   :  { %v2484_v38 = vmul.f32 %v15620_v15, %v2467_v19  ;;  %v15622_v31 = vpop.eup %15621 }
 0x967   :  { %v2487_v12 = vsub.f32 1.0, %v15622_v31  ;;  %v2489_v24 = vmul.f32 %v15622_v31, %v2255_v26 }
 0x968   :  { %v2485_v36 = vadd.f32 %v2484_v38, %v16143_v39 }
 0x96a   :  { %15623 = vtanh.f32 %v2485_v36 }
 0x974   :  { %v15624_v10 = vpop.eup %15623 }
 0x975   :  { %v2488_v20 = vmul.f32 %v15624_v10, %v2487_v12 }
 0x977   :  { %v2490_v34 = vadd.f32 %v2489_v24, %v2488_v20 }
 0x979   :  { %2491 = vst.msk [vmem:[#allocation2 + $0x38] sm:$0xff] %vm376_vm1, %v2490_v34  ;;  %13655 = vmatmul.mubr.msk.f32.vlgmr.msra.gmra.mrb[46].mxu1 %vm376_vm1, %v2490_v34  ;;  %13666 = vmatmul.mubr.msk.f32.vlgmr.msra.gmra.mrb[44].mxu0 %vm376_vm1, %v2490_v34 }
 0x97a   :  { %14211 = vmatpush3.bf16.msra.mxu1 %v16089_v2  ;;  %13676 = vmatprep.mubr.msk.f32.mxu1 %vm15793_vm2, %v15794_v9 }
 0x97b   :  { %14212 = vmatprep.subr.bf16.mxu1 %v15792_v1  ;;  %14217 = vmatpush3.bf16.msra.mxu0 %v16083_v62 }
 0x97c   :  { %14218 = vmatprep.subr.bf16.mxu0 %v15792_v1  ;;  %13687 = vmatprep.mubr.msk.f32.mxu0 %vm15793_vm2, %v15794_v9 }
 0x97e   :  { %14214 = vmatpush3.bf16.msra.mxu1 %v16101_v8 }
 0x97f   :  { %14221 = vmatprep.subr.bf16.mxu1 %v15792_v1  ;;  %14220 = vmatpush3.bf16.msra.mxu0 %v16096_v5 }
 0x980   :  { %14227 = vmatprep.subr.bf16.mxu0 %v15792_v1 }
 0x981   :  { %13677 = vmatmul.mubr.msk.f32.vlgmr.msra.gmra.mrb[48].mxu1 %vm376_vm1, %v2490_v34 }
 0x982   :  { %14223 = vmatpush3.bf16.msra.mxu1 %v16200_v6  ;;  %13698 = vmatprep.mubr.msk.f32.mxu1 %vm15793_vm2, %v15794_v9 }
 0x983   :  { %14224 = vmatprep.subr.bf16.mxu1 %v15792_v1 }
 0x986   :  { %14226 = vmatpush3.bf16.msra.mxu1 %v16208_v63 }
 0x987   :  { %14233 = vmatprep.subr.bf16.mxu1 %v15792_v1 }
 0xa4c   :  { %v2561_v39 = vpop.f32.mrb[46].mxu1  ;;  %v2631_v32 = vpop.f32.mrb[44].mxu0 }
 0xa4d   :  { %v2705_v25 = vadd.f32 %v2561_v39, %v16155_v52  ;;  %v2712_v29 = vadd.f32 %v2631_v32, %v16192_v46  ;;  %v13656_v33 = vpop.f32.mrb[47].mxu1  ;;  %v13667_v37 = vpop.f32.mrb[45].mxu0 }
 0xa4f   :  { %v12588_v11 = vmul.f32 -1.442695, %v2705_v25  ;;  %v12589_v17 = vmul.f32 -1.442695, %v2712_v29 }
 0xa51   :  { %15625 = vpow2.f32 %v12588_v11 }
 0xa52   :  { %15627 = vpow2.f32 %v12589_v17 }
 0xa54   :  { %v2701_v35 = vpop.f32.mrb[48].mxu1 }
 0xa55   :  { %v13678_v41 = vpop.f32.mrb[49].mxu1  ;;  %v2702_v45 = vadd.f32 %v16174_v7, %v2701_v35 }
 0xa5b   :  { %v15626_v22 = vpop.eup %15625 }
 0xa5c   :  { %v2709_v42 = vadd.f32 1.0, %v15626_v22  ;;  %v15628_v40 = vpop.eup %15627 }
 0xa5d   :  { %v2716_v18 = vadd.f32 1.0, %v15628_v40 }
 0xa5e   :  { %15629 = vrcp.f32 %v2709_v42  ;;  %v16464_v42 = vld [vmem:[%s15862_s24] ss:$0 sm:$0xff]  ;;  %s17521_s24 = sld [smem:[#allocation26_spill]] }
 0xa5f   :  { %15631 = vrcp.f32 %v2716_v18 }
 0xa68   :  { %v15630_v47 = vpop.eup %15629 }
 0xa69   :  { %v2719_v52 = vmul.f32 %v15630_v47, %v2702_v45  ;;  %v15632_v51 = vpop.eup %15631 }
 0xa6a   :  { %v2722_v55 = vsub.f32 1.0, %v15632_v51  ;;  %v2724_v21 = vmul.f32 %v15632_v51, %v2490_v34 }
 0xa6b   :  { %v2720_v46 = vadd.f32 %v2719_v52, %v16158_v53 }
 0xa6d   :  { %15633 = vtanh.f32 %v2720_v46 }
 0xa77   :  { %v15634_v26 = vpop.eup %15633 }
 0xa78   :  { %v2723_v43 = vmul.f32 %v15634_v26, %v2722_v55  ;;  %v3451_v55 = vld [vmem:[#allocation2 + $0x18] sm:$0xff] }
 0xa7a   :  { %v2725_v23 = vadd.f32 %v2724_v21, %v2723_v43  ;;  %v3450_v43 = vld [vmem:[#allocation2 + $0x10] sm:$0xff] }
 0xa7b   :  { %v14273_v21 = vpack.c.bf16 %v3451_v55, %v3450_v43 }
 0xa7c   :  { %2726 = vst.msk [vmem:[#allocation2 + $0x40] sm:$0xff] %vm376_vm1, %v2725_v23  ;;  %13688 = vmatmul.mubr.msk.f32.vlgmr.msra.gmra.mrb[46].mxu0 %vm376_vm1, %v2725_v23  ;;  %13699 = vmatmul.mubr.msk.f32.vlgmr.msra.gmra.mrb[50].mxu1 %vm376_vm1, %v2725_v23 }
 0xa7d   :  { %14229 = vmatpush3.bf16.msra.mxu0 %v16089_v2  ;;  %13709 = vmatprep.mubr.msk.f32.mxu0 %vm15793_vm2, %v15794_v9 }
 0xa7e   :  { %14230 = vmatprep.subr.bf16.mxu0 %v15792_v1  ;;  %14235 = vmatpush3.bf16.msra.mxu1 %v16083_v62 }
 0xa7f   :  { %14236 = vmatprep.subr.bf16.mxu1 %v15792_v1  ;;  %13720 = vmatprep.mubr.msk.f32.mxu1 %vm15793_vm2, %v15794_v9 }
 0xa81   :  { %14232 = vmatpush3.bf16.msra.mxu0 %v16101_v8 }
 0xa82   :  { %14239 = vmatprep.subr.bf16.mxu0 %v15792_v1  ;;  %14238 = vmatpush3.bf16.msra.mxu1 %v16096_v5 }
 0xa83   :  { %14245 = vmatprep.subr.bf16.mxu1 %v15792_v1 }
 0xa84   :  { %13710 = vmatmul.mubr.msk.f32.vlgmr.msra.gmra.mrb[48].mxu0 %vm376_vm1, %v2725_v23 }
 0xa85   :  { %14241 = vmatpush3.bf16.msra.mxu0 %v16200_v6  ;;  %13731 = vmatprep.mubr.msk.f32.mxu0 %vm15793_vm2, %v15794_v9 }
 0xa86   :  { %14242 = vmatprep.subr.bf16.mxu0 %v15792_v1 }
 0xa89   :  { %14244 = vmatpush3.bf16.msra.mxu0 %v16208_v63 }
 0xa8a   :  { %14251 = vmatprep.subr.bf16.mxu0 %v15792_v1 }
 0xb4f   :  { %v2796_v53 = vpop.f32.mrb[46].mxu0  ;;  %v2866_v58 = vpop.f32.mrb[50].mxu1 }
 0xb50   :  { %v2940_v59 = vadd.f32 %v2796_v53, %v16150_v48  ;;  %v2947_v14 = vadd.f32 %v2866_v58, %v16190_v44  ;;  %v13689_v0 = vpop.f32.mrb[47].mxu0  ;;  %v13700_v4 = vpop.f32.mrb[51].mxu1  ;;  %v3455_v58 = vld [vmem:[#allocation2 + $0x38] sm:$0xff] }
 0xb51   :  { %v3456_v0 = vld [vmem:[#allocation2 + $0x40] sm:$0xff] }
 0xb52   :  { %v12593_v30 = vmul.f32 -1.442695, %v2940_v59  ;;  %v12594_v28 = vmul.f32 -1.442695, %v2947_v14  ;;  %v3454_v59 = vld [vmem:[#allocation2 + $0x30] sm:$0xff] }
 0xb54   :  { %15635 = vpow2.f32 %v12593_v30 }
 0xb55   :  { %15637 = vpow2.f32 %v12594_v28 }
 0xb57   :  { %v2936_v13 = vpop.f32.mrb[48].mxu0 }
 0xb58   :  { %v13711_v27 = vpop.f32.mrb[49].mxu0  ;;  %v2937_v38 = vadd.f32 %v16174_v7, %v2936_v13 }
 0xb5e   :  { %v15636_v3 = vpop.eup %15635 }
 0xb5f   :  { %v2944_v16 = vadd.f32 1.0, %v15636_v3  ;;  %v15638_v19 = vpop.eup %15637 }
 0xb60   :  { %v2951_v15 = vadd.f32 1.0, %v15638_v19 }
 0xb61   :  { %15639 = vrcp.f32 %v2944_v16 }
 0xb62   :  { %15641 = vrcp.f32 %v2951_v15 }
 0xb6b   :  { %v15640_v36 = vpop.eup %15639 }
 0xb6c   :  { %v2954_v48 = vmul.f32 %v15640_v36, %v2937_v38  ;;  %v15642_v31 = vpop.eup %15641 }
 0xb6d   :  { %v2957_v12 = vsub.f32 1.0, %v15642_v31  ;;  %v2959_v24 = vmul.f32 %v15642_v31, %v2725_v23  ;;  %v3452_v23 = vld [vmem:[#allocation2 + $0x20] sm:$0xff] }
 0xb6e   :  { %v2955_v44 = vadd.f32 %v2954_v48, %v16153_v49  ;;  %v3449_v49 = vld [vmem:[#allocation2 + $0x8] sm:$0xff] }
 0xb70   :  { %15643 = vtanh.f32 %v2955_v44 }
 0xb7a   :  { %v15644_v10 = vpop.eup %15643 }
 0xb7b   :  { %v2958_v20 = vmul.f32 %v15644_v10, %v2957_v12 }
 0xb7d   :  { %v2960_v34 = vadd.f32 %v2959_v24, %v2958_v20 }
 0xb7f   :  { %2961 = vst.msk [vmem:[#allocation2 + $0x48] sm:$0xff] %vm376_vm1, %v2960_v34  ;;  %13721 = vmatmul.mubr.msk.f32.vlgmr.msra.gmra.mrb[52].mxu1 %vm376_vm1, %v2960_v34  ;;  %13732 = vmatmul.mubr.msk.f32.vlgmr.msra.gmra.mrb[50].mxu0 %vm376_vm1, %v2960_v34 }
 0xb80   :  { %14247 = vmatpush3.bf16.msra.mxu1 %v16089_v2  ;;  %13742 = vmatprep.mubr.msk.f32.mxu1 %vm15793_vm2, %v15794_v9 }
 0xb81   :  { %14248 = vmatprep.subr.bf16.mxu1 %v15792_v1  ;;  %14253 = vmatpush3.bf16.msra.mxu0 %v16083_v62  ;;  %v3448_v62 = vld [vmem:[#allocation2] sm:$0xff] }
 0xb82   :  { %14254 = vmatprep.subr.bf16.mxu0 %v15792_v1  ;;  %13753 = vmatprep.mubr.msk.f32.mxu0 %vm15793_vm2, %v15794_v9  ;;  %v14269_v7 = vpack.c.bf16 %v3449_v49, %v3448_v62 }
 0xb84   :  { %14250 = vmatpush3.bf16.msra.mxu1 %v16101_v8 }
 0xb85   :  { %14257 = vmatprep.subr.bf16.mxu1 %v15792_v1  ;;  %14256 = vmatpush3.bf16.msra.mxu0 %v16096_v5 }
 0xb86   :  { %14263 = vmatprep.subr.bf16.mxu0 %v15792_v1  ;;  %v3457_v14 = vld [vmem:[#allocation2 + $0x48] sm:$0xff] }
 0xb87   :  { %13743 = vmatmul.mubr.msk.f32.vlgmr.msra.gmra.mrb[54].mxu1 %vm376_vm1, %v2960_v34  ;;  %v14285_v4 = vpack.c.bf16 %v3457_v14, %v3456_v0  ;;  %v16541_v0 = vld [vmem:[%s17508_s13] ss:$0 sm:$0xff] }
 0xb88   :  { %14259 = vmatpush3.bf16.msra.mxu1 %v16200_v6  ;;  %13764 = vmatprep.mubr.msk.f32.mxu1 %vm15793_vm2, %v15794_v9 }
 0xb89   :  { %14260 = vmatprep.subr.bf16.mxu1 %v15792_v1 }
 0xb8c   :  { %14262 = vmatpush3.bf16.msra.mxu1 %v16208_v63 }
 0xb8d   :  { %14270 = vmatprep.subr.bf16.mxu1 %v14269_v7 }
 0xc52   :  { %v3031_v39 = vpop.f32.mrb[52].mxu1  ;;  %v3101_v32 = vpop.f32.mrb[50].mxu0 }
 0xc53   :  { %v3175_v5 = vadd.f32 %v3031_v39, %v16165_v60  ;;  %v3182_v25 = vadd.f32 %v3101_v32, %v16196_v54  ;;  %v13722_v29 = vpop.f32.mrb[53].mxu1  ;;  %v13733_v6 = vpop.f32.mrb[51].mxu0 }
 0xc54   :  { %v3434_v29 = vld [vmem:[%s17506_s5 + $0x10] sm:$0xff]  ;;  %v3435_v6 = vld [vmem:[%s17506_s5 + $0x18] sm:$0xff] }
 0xc55   :  { %v12598_v33 = vmul.f32 -1.442695, %v3175_v5  ;;  %v12599_v37 = vmul.f32 -1.442695, %v3182_v25 }
 0xc57   :  { %15645 = vpow2.f32 %v12598_v33  ;;  %v3436_v33 = vld [vmem:[%s17506_s5 + $0x20] sm:$0xff] }
 0xc58   :  { %15647 = vpow2.f32 %v12599_v37  ;;  %v3437_v37 = vld [vmem:[%s17506_s5 + $0x28] sm:$0xff] }
 0xc5a   :  { %v3171_v11 = vpop.f32.mrb[54].mxu1 }
 0xc5b   :  { %v13744_v17 = vpop.f32.mrb[55].mxu1  ;;  %v3172_v40 = vadd.f32 %v16464_v42, %v3171_v11  ;;  %v3438_v11 = vld [vmem:[%s17506_s5 + $0x30] sm:$0xff] }
 0xc5c   :  { %v3439_v17 = vld [vmem:[%s17506_s5 + $0x38] sm:$0xff] }
 0xc61   :  { %v15646_v35 = vpop.eup %15645 }
 0xc62   :  { %v3179_v41 = vadd.f32 1.0, %v15646_v35  ;;  %v15648_v63 = vpop.eup %15647  ;;  %v3440_v35 = vld [vmem:[%s17506_s5 + $0x40] sm:$0xff] }
 0xc63   :  { %v3186_v22 = vadd.f32 1.0, %v15648_v63  ;;  %v3442_v63 = vld [vmem:[%s17506_s5 + $0x50] sm:$0xff] }
 0xc64   :  { %15649 = vrcp.f32 %v3179_v41  ;;  %v3441_v41 = vld [vmem:[%s17506_s5 + $0x48] sm:$0xff] }
 0xc65   :  { %15651 = vrcp.f32 %v3186_v22  ;;  %v3443_v22 = vld [vmem:[%s17506_s5 + $0x58] sm:$0xff] }
 0xc6e   :  { %v15650_v60 = vpop.eup %15649 }
 0xc6f   :  { %v3189_v54 = vmul.f32 %v15650_v60, %v3172_v40  ;;  %v15652_v45 = vpop.eup %15651  ;;  %v3445_v40 = vld [vmem:[%s17506_s5 + $0x68] sm:$0xff]  ;;  %v3446_v60 = vld [vmem:[%s17506_s5 + $0x70] sm:$0xff] }
 0xc70   :  { %v3192_v47 = vsub.f32 1.0, %v15652_v45  ;;  %v3194_v51 = vmul.f32 %v15652_v45, %v2960_v34 }
 0xc71   :  { %v3190_v18 = vadd.f32 %v3189_v54, %v16168_v61  ;;  %v3453_v61 = vld [vmem:[#allocation2 + $0x28] sm:$0xff]  ;;  %v3447_v54 = vld [vmem:[%s17506_s5 + $0x78] sm:$0xff] }
 0xc72   :  { %v14277_v53 = vpack.c.bf16 %v3453_v61, %v3452_v23 }
 0xc73   :  { %15653 = vtanh.f32 %v3190_v18  ;;  %v3810_v18 = vlaneseq }
 0xc75   :  { %v16518_v45 = vshrl.u32 %v3810_v18, 7  ;;  %v6298_v18 = vld [vmem:[#allocation6 + $0x10] sm:$0xff] }
 0xc7d   :  { %v15654_v52 = vpop.eup %15653 }
 0xc7e   :  { %v3193_v46 = vmul.f32 %v15654_v52, %v3192_v47  ;;  %v16521_v47 = vld [vmem:[%s17507_s9] sm:$0x1] }
 0xc7f   :  { %v4688_v55 = vmax.f32 %v16521_v47, 0.0 }
 0xc80   :  { %v3195_v26 = vadd.f32 %v3194_v51, %v3193_v46  ;;  %v16525_v51 = vsub.s32 0, %v16518_v45 }
 0xc82   :  { %3196 = vst.msk [vmem:[#allocation2 + $0x50] sm:$0xff] %vm376_vm1, %v3195_v26  ;;  %13754 = vmatmul.mubr.msk.f32.vlgmr.msra.gmra.mrb[52].mxu0 %vm376_vm1, %v3195_v26  ;;  %13765 = vmatmul.mubr.msk.f32.vlgmr.msra.gmra.mrb[56].mxu1 %vm376_vm1, %v3195_v26 }
 0xc83   :  { %14265 = vmatpush3.bf16.msra.mxu0 %v16089_v2  ;;  %14272 = vmatpush3.bf16.msra.mxu1 %v14269_v7  ;;  %v14281_v2 = vpack.c.bf16 %v3455_v58, %v3454_v59 }
 0xc84   :  { %14274 = vmatprep.subr.bf16.mxu1 %v14273_v21  ;;  %14266 = vmatprep.subr.bf16.mxu0 %v15792_v1 }
 0xc85   :  { %13775 = vmatprep.mubr.msk.f32.mxu0 %vm15793_vm2, %v15794_v9 }
 0xc87   :  { %14268 = vmatpush3.bf16.msra.mxu0 %v16101_v8  ;;  %14276 = vmatpush3.bf16.msra.mxu1 %v14273_v21  ;;  %v3432_v8 = vld [vmem:[%s17506_s5] sm:$0xff]  ;;  %v16531_v21 = vrot.slane %v4688_v55, %v16525_v51 }
 0xc88   :  { %14278 = vmatprep.subr.bf16.mxu1 %v14277_v53  ;;  %14293 = vmatprep.subr.bf16.mxu0 %v15792_v1  ;;  %v16617_v55 = vld [vmem:[%s17511_s25] sm:$0x1] }
 0xc89   :  { %13802 = vmatprep.mubr.msk.f32.mxu1 %vm203_vm0, %v3432_v8  ;;  %v3458_v32 = vld [vmem:[#allocation2 + $0x50] sm:$0xff] }
 0xc8a   :  { %13776 = vmatmul.mubr.msk.f32.vlgmr.msra.gmra.mrb[54].mxu0 %vm376_vm1, %v3195_v26 }
 0xc8b   :  { %14280 = vmatpush3.bf16.msra.mxu1 %v14277_v53  ;;  %13830 = vmatprep.mubr.msk.f32.mxu0 %vm15793_vm2, %v15794_v9  ;;  %v12694_v53 = vld [vmem:[%s17507_s9 + $0x1] sm:$0x1] }
 0xc8c   :  { %14282 = vmatprep.subr.bf16.mxu1 %v14281_v2 }
 0xc8f   :  { %14284 = vmatpush3.bf16.msra.mxu1 %v14281_v2 }
 0xc90   :  { %14286 = vmatprep.subr.bf16.mxu1 %v14285_v4 }
 0xc93   :  { %14288 = vmatpush3.bf16.msra.mxu1 %v14285_v4 }
 0xd55   :  { %v3266_v30 = vpop.f32.mrb[52].mxu0  ;;  %v3336_v28 = vpop.f32.mrb[56].mxu1 }
 0xd56   :  { %v3410_v13 = vadd.f32 %v3266_v30, %v16160_v56  ;;  %v3417_v27 = vadd.f32 %v3336_v28, %v16194_v50  ;;  %v13755_v3 = vpop.f32.mrb[53].mxu0  ;;  %v13766_v16 = vpop.f32.mrb[57].mxu1  ;;  %v5485_v30 = vmax.f32 %v12694_v53, 0.0 }
 0xd58   :  { %v12603_v19 = vmul.f32 -1.442695, %v3410_v13  ;;  %v12604_v15 = vmul.f32 -1.442695, %v3417_v27  ;;  %v16549_v27 = vld [vmem:[%s17508_s13 + $0x1] ss:$0 sm:$0xff] }
 0xd5a   :  { %15655 = vpow2.f32 %v12603_v19 }
 0xd5b   :  { %15657 = vpow2.f32 %v12604_v15  ;;  %v16558_v15 = vld [vmem:[%s17509_s17] ss:$0 sm:$0xff] }
 0xd5d   :  { %v3406_v38 = vpop.f32.mrb[54].mxu0 }
 0xd5e   :  { %v13777_v36 = vpop.f32.mrb[55].mxu0  ;;  %v3407_v10 = vadd.f32 %v16464_v42, %v3406_v38  ;;  %v3444_v42 = vld [vmem:[%s17506_s5 + $0x60] sm:$0xff] }
 0xd5f   :  { %v16563_v36 = vld [vmem:[%s17508_s13 + $0x2] ss:$0 sm:$0xff] }
 0xd64   :  { %v15656_v48 = vpop.eup %15655 }
 0xd65   :  { %v3414_v44 = vadd.f32 1.0, %v15656_v48  ;;  %v15658_v31 = vpop.eup %15657 }
 0xd66   :  { %v3421_v12 = vadd.f32 1.0, %v15658_v31 }
 0xd67   :  { %15659 = vrcp.f32 %v3414_v44  ;;  %v16567_v44 = vrot.slane %v5485_v30, %v16525_v51 }
 0xd68   :  { %15661 = vrcp.f32 %v3421_v12 }
 0xd71   :  { %v15660_v20 = vpop.eup %15659 }
 0xd72   :  { %v3424_v56 = vmul.f32 %v15660_v20, %v3407_v10  ;;  %v15662_v24 = vpop.eup %15661 }
 0xd73   :  { %v3427_v34 = vsub.f32 1.0, %v15662_v24  ;;  %v3429_v62 = vmul.f32 %v15662_v24, %v3195_v26 }
 0xd74   :  { %v3425_v50 = vadd.f32 %v3424_v56, %v16163_v57  ;;  %v3433_v57 = vld [vmem:[%s17506_s5 + $0x8] sm:$0xff] }
 0xd76   :  { %15663 = vtanh.f32 %v3425_v50 }
 0xd80   :  { %v15664_v49 = vpop.eup %15663 }
 0xd81   :  { %v3428_v7 = vmul.f32 %v15664_v49, %v3427_v34  ;;  %v16579_v34 = vld [vmem:[%s17508_s13 + $0x3] ss:$0 sm:$0xff] }
 0xd83   :  { %v3430_v39 = vadd.f32 %v3429_v62, %v3428_v7 }
 0xd85   :  { %3431 = vst.msk [vmem:[#allocation2 + $0x58] sm:$0xff] %vm376_vm1, %v3430_v39 }
 0xd8c   :  { %v3459_v5 = vld [vmem:[#allocation2 + $0x58] sm:$0xff] }
 0xd8d   :  { %v14289_v25 = vpack.c.bf16 %v3459_v5, %v3458_v32 }
 0xd8f   :  { %14290 = vmatprep.subr.bf16.mxu1 %v14289_v25 }
 0xd90   :  { %14292 = vmatpush3.bf16.msra.mxu1 %v14289_v25 }
 0xd91   :  { %14313 = vmatprep.subr.bf16.mxu1 %v15792_v1 }
 0xd93   :  { %13803 = vmatmul.mubr.msk.f32.vlgmr.msra.gmra.mrb[58].mxu1 %vm203_vm0, %v3433_v57 }
 0xd94   :  { %13805 = vmatprep.mubr.msk.f32.mxu1 %vm203_vm0, %v3434_v29 }
 0xd97   :  { %13806 = vmatmul.mubr.msk.f32.gmra.mrb[60].mxu1 %vm203_vm0, %v3435_v6 }
 0xd98   :  { %13808 = vmatprep.mubr.msk.f32.mxu1 %vm203_vm0, %v3436_v33 }
 0xd9b   :  { %13809 = vmatmul.mubr.msk.f32.gmra.mrb[62].mxu1 %vm203_vm0, %v3437_v37 }
 0xd9c   :  { %13811 = vmatprep.mubr.msk.f32.mxu1 %vm203_vm0, %v3438_v11 }
 0xd9f   :  { %13812 = vmatmul.mubr.msk.f32.gmra.mrb[64].mxu1 %vm203_vm0, %v3439_v17 }
 0xda0   :  { %13814 = vmatprep.mubr.msk.f32.mxu1 %vm203_vm0, %v3440_v35 }
 0xda3   :  { %13815 = vmatmul.mubr.msk.f32.gmra.mrb[66].mxu1 %vm203_vm0, %v3441_v41  ;;  %v3673_v41 = vld [vmem:[%s17510_s21 + $0x8] sm:$0xff] }
 0xda4   :  { %13817 = vmatprep.mubr.msk.f32.mxu1 %vm203_vm0, %v3442_v63  ;;  %v3675_v63 = vld [vmem:[%s17510_s21 + $0x18] sm:$0xf] }
 0xda7   :  { %13818 = vmatmul.mubr.msk.f32.gmra.mrb[68].mxu1 %vm203_vm0, %v3443_v22 }
 0xda8   :  { %13820 = vmatprep.mubr.msk.f32.mxu1 %vm203_vm0, %v3444_v42 }
 0xdab   :  { %13821 = vmatmul.mubr.msk.f32.gmra.mrb[70].mxu1 %vm203_vm0, %v3445_v40  ;;  %v4108_v40 = vld [vmem:[%s17517_s3 + $0x8] sm:$0xff] }
 0xdac   :  { %13823 = vmatprep.mubr.msk.f32.mxu1 %vm203_vm0, %v3446_v60  ;;  %v16603_v60 = vpack.c.bf16 %v3675_v63, %v3673_v41 }
 0xdaf   :  { %13824 = vmatmul.mubr.msk.f32.gmra.mrb[72].mxu1 %vm203_vm0, %v3447_v54 }
 0xe66   :  { %v13804_v52 = vpop.f32.mrb[58].mxu1 }
 0xe67   :  { %3654 = vst.msk [vmem:[#allocation3 + $0x8] sm:$0xff] %vm376_vm1, %v13804_v52  ;;  %v3574_v46 = vpop.f32.mrb[59].mxu1  ;;  %v3672_v52 = vld [vmem:[%s17510_s21] sm:$0xff] }
 0xe68   :  { %3653 = vst.msk [vmem:[#allocation3] sm:$0xff] %vm376_vm1, %v3574_v46  ;;  %v3674_v46 = vld [vmem:[%s17510_s21 + $0x10] sm:$0xf] }
 0xe6a   :  { %v13807_v26 = vpop.f32.mrb[60].mxu1 }
 0xe6b   :  { %3656 = vst.msk [vmem:[#allocation3 + $0x18] sm:$0xff] %vm376_vm1, %v13807_v26  ;;  %v3584_v43 = vpop.f32.mrb[61].mxu1  ;;  %v16619_v26 = vpack.c.bf16 %v3674_v46, %v3672_v52 }
 0xe6c   :  { %3655 = vst.msk [vmem:[#allocation3 + $0x10] sm:$0xff] %vm376_vm1, %v3584_v43 }
 0xe6e   :  { %v13810_v61 = vpop.f32.mrb[62].mxu1  ;;  %v4915_v23 = vld [vmem:[#allocation3 + $0x8] sm:$0xf] }
 0xe6f   :  { %3658 = vst.msk [vmem:[#allocation3 + $0x28] sm:$0xff] %vm376_vm1, %v13810_v61  ;;  %v3594_v58 = vpop.f32.mrb[63].mxu1  ;;  %v16536_v59 = vld [vmem:[#allocation3] sm:$0xff]  ;;  %v4923_v2 = vadd.f32 %v16531_v21, %v4915_v23  ;;  %v3678_v14 = vld [vmem:[#allocation3 + $0x8] sm:$0xf] }
 0xe70   :  { %3657 = vst.msk [vmem:[#allocation3 + $0x20] sm:$0xff] %vm376_vm1, %v3594_v58  ;;  %v4922_v4 = vadd.f32 %v16531_v21, %v16536_v59  ;;  %v16545_v8 = vld [vmem:[#allocation3 + $0x8] sm:$0xff]  ;;  %v3685_v16 = vmul.f32 %v16541_v0, %v3678_v14  ;;  %v3684_v38 = vmul.f32 %v16541_v0, %v16536_v59 }
 0xe71   :  { %4926 = vst.msk [vmem:[#allocation3 + $0x8] sm:$0xf] %vm4925_vm3, %v4923_v2 }
 0xe72   :  { %v13813_v28 = vpop.f32.mrb[64].mxu1  ;;  %v3695_v13 = vld [vmem:[#allocation3 + $0x18] sm:$0xf]  ;;  %4924 = vst.msk [vmem:[#allocation3] sm:$0xff] %vm376_vm1, %v4922_v4  ;;  %v3693_v10 = vadd.f32 %v16558_v15, %v3685_v16  ;;  %v3692_v50 = vadd.f32 %v16558_v15, %v3684_v38 }
 0xe73   :  { %3660 = vst.msk [vmem:[#allocation3 + $0x38] sm:$0xff] %vm376_vm1, %v13813_v28  ;;  %v3604_v3 = vpop.f32.mrb[65].mxu1  ;;  %v16554_v19 = vld [vmem:[#allocation3 + $0x10] sm:$0xff]  ;;  %v3702_v48 = vmul.f32 %v16549_v27, %v3695_v13 }
 0xe74   :  { %3659 = vst.msk [vmem:[#allocation3 + $0x30] sm:$0xff] %vm376_vm1, %v3604_v3  ;;  %v3701_v31 = vmul.f32 %v16549_v27, %v16554_v19 }
 0xe75   :  { %v3704_v62 = vadd.f32 %v3702_v48, %v3693_v10 }
 0xe76   :  { %v3706_v12 = vld [vmem:[#allocation3 + $0x28] sm:$0xf]  ;;  %v3703_v32 = vadd.f32 %v3701_v31, %v3692_v50  ;;  %v13816_v43 = vpop.f32.mrb[66].mxu1 }
 0xe77   :  { %v16572_v20 = vld [vmem:[#allocation3 + $0x20] sm:$0xff]  ;;  %v3713_v56 = vmul.f32 %v16563_v36, %v3706_v12  ;;  %3662 = vst.msk [vmem:[#allocation3 + $0x48] sm:$0xff] %vm376_vm1, %v13816_v43  ;;  %v3614_v61 = vpop.f32.mrb[67].mxu1 }
 0xe78   :  { %v3712_v24 = vmul.f32 %v16563_v36, %v16572_v20  ;;  %v5712_v49 = vld [vmem:[#allocation3 + $0x8] sm:$0xf]  ;;  %3661 = vst.msk [vmem:[#allocation3 + $0x40] sm:$0xff] %vm376_vm1, %v3614_v61 }
 0xe79   :  { %v16581_v7 = vld [vmem:[#allocation3] sm:$0xff]  ;;  %v5720_v39 = vadd.f32 %v16567_v44, %v5712_v49  ;;  %v16586_v57 = vld [vmem:[#allocation3 + $0x8] sm:$0xff]  ;;  %v3715_v29 = vadd.f32 %v3713_v56, %v3704_v62 }
 0xe7a   :  { %v3717_v5 = vld [vmem:[#allocation3 + $0x38] sm:$0xf]  ;;  %v5719_v25 = vadd.f32 %v16567_v44, %v16581_v7  ;;  %v3714_v37 = vadd.f32 %v3712_v24, %v3703_v32  ;;  %v13819_v23 = vpop.f32.mrb[68].mxu1 }
 0xe7b   :  { %v16588_v6 = vld [vmem:[#allocation3 + $0x30] sm:$0xff]  ;;  %v3724_v33 = vmul.f32 %v16579_v34, %v3717_v5  ;;  %5722 = vst.msk [vmem:[#allocation3 + $0x8] sm:$0xf] %vm4925_vm3, %v5720_v39  ;;  %v3624_v53 = vpop.f32.mrb[69].mxu1 }
 0xe7c   :  { %v3723_v11 = vmul.f32 %v16579_v34, %v16588_v6  ;;  %5721 = vst.msk [vmem:[#allocation3] sm:$0xff] %vm376_vm1, %v5719_v25  ;;  %3664 = vst.msk [vmem:[#allocation3 + $0x58] sm:$0xff] %vm376_vm1, %v13819_v23 }
 0xe7d   :  { %v3726_v17 = vadd.f32 %v3724_v33, %v3715_v29  ;;  %3663 = vst.msk [vmem:[#allocation3 + $0x50] sm:$0xff] %vm376_vm1, %v3624_v53  ;;  %v4109_v53 = vld [vmem:[%s17517_s3 + $0x10] sm:$0xff] }
 0xe7e   :  { %v3725_v35 = vadd.f32 %v3723_v11, %v3714_v37  ;;  %v5209_v58 = vld [vmem:[#allocation3 + $0x48] sm:$0xf]  ;;  %v13822_v30 = vpop.f32.mrb[70].mxu1 }
 0xe7f   :  { %v3728_v22 = vmax.f32 %v3726_v17, 0.0  ;;  %v5211_v2 = vadd.f32 %v5209_v58, %v16531_v21  ;;  %v3907_v14 = vld [vmem:[#allocation3 + $0x48] sm:$0xf]  ;;  %3666 = vst.msk [vmem:[#allocation3 + $0x68] sm:$0xff] %vm376_vm1, %v13822_v30  ;;  %v3634_v28 = vpop.f32.mrb[71].mxu1  ;;  %v16640_v16 = vld [vmem:[#allocation3 + $0x40] sm:$0xff] }
 0xe80   :  { %v3727_v42 = vmax.f32 %v3725_v35, 0.0  ;;  %v16633_v4 = vld [vmem:[#allocation3 + $0x48] sm:$0xff]  ;;  %3665 = vst.msk [vmem:[#allocation3 + $0x60] sm:$0xff] %vm376_vm1, %v3634_v28  ;;  %v5210_v38 = vadd.f32 %v16531_v21, %v16640_v16  ;;  %v3908_v50 = vmul.f32 %v16541_v0, %v16640_v16  ;;  %v3909_v21 = vmul.f32 %v16541_v0, %v3907_v14  ;;  %v4114_v28 = vld [vmem:[%s17517_s3 + $0x38] sm:$0xff] }
 0xe81   :  { %5213 = vst.msk [vmem:[#allocation3 + $0x48] sm:$0xf] %vm4925_vm3, %v5211_v2  ;;  %v4110_v2 = vld [vmem:[%s17517_s3 + $0x18] sm:$0xff]  ;;  %v4112_v14 = vld [vmem:[%s17517_s3 + $0x28] sm:$0xff] }
 0xe82   :  { %v14294_v54 = vpack.c.bf16 %v3728_v22, %v3727_v42  ;;  %v13825_v13 = vpop.f32.mrb[72].mxu1  ;;  %5212 = vst.msk [vmem:[#allocation3 + $0x40] sm:$0xff] %vm376_vm1, %v5210_v38  ;;  %v3910_v62 = vadd.f32 %v16558_v15, %v3908_v50  ;;  %v3911_v39 = vadd.f32 %v16558_v15, %v3909_v21  ;;  %v3671_v42 = vld [vmem:[%s17516_s29] sm:$0x1]  ;;  %v4116_v38 = vld [vmem:[%s17517_s3 + $0x48] sm:$0xff] }
 0xe83   :  { %3668 = vst.msk [vmem:[#allocation3 + $0x78] sm:$0xff] %vm376_vm1, %v13825_v13  ;;  %v3644_v3 = vpop.f32.mrb[73].mxu1  ;;  %v3913_v49 = vld [vmem:[#allocation3 + $0x58] sm:$0xf] }
 0xe84   :  { %14296 = vmatpush3.bf16.xpose.msk.msra.mxu0 %vm16599_vm5, %v14294_v54  ;;  %3667 = vst.msk [vmem:[#allocation3 + $0x70] sm:$0xff] %vm376_vm1, %v3644_v3  ;;  %v16657_v24 = vld [vmem:[#allocation3 + $0x50] sm:$0xff]  ;;  %v3915_v32 = vmul.f32 %v16549_v27, %v3913_v49  ;;  %v4115_v3 = vld [vmem:[%s17517_s3 + $0x40] sm:$0xff] }
 0xe85   :  { %14299 = vmatprep.subr.msk.bf16.mxu0 %vm16605_vm7, %v16603_v60 }
 0xe86   :  { %v3919_v25 = vld [vmem:[#allocation3 + $0x68] sm:$0xf]  ;;  %v3917_v33 = vadd.f32 %v3915_v32, %v3911_v39  ;;  %v4117_v39 = vld [vmem:[%s17517_s3 + $0x50] sm:$0xff] }
 0xe87   :  { %v16664_v5 = vld [vmem:[#allocation3 + $0x60] sm:$0xff]  ;;  %v3921_v37 = vmul.f32 %v16563_v36, %v3919_v25 }
 0xe88   :  { %v5994_v48 = vld [vmem:[#allocation3 + $0x48] sm:$0xf]  ;;  %v3920_v0 = vmul.f32 %v16563_v36, %v16664_v5  ;;  %v4119_v25 = vld [vmem:[%s17517_s3 + $0x60] sm:$0xff] }
 0xe89   :  { %v16645_v31 = vld [vmem:[#allocation3 + $0x40] sm:$0xff]  ;;  %v5996_v12 = vadd.f32 %v5994_v48, %v16567_v44  ;;  %v16650_v56 = vld [vmem:[#allocation3 + $0x48] sm:$0xff]  ;;  %v3923_v35 = vadd.f32 %v3921_v37, %v3917_v33  ;;  %v14326_v48 = vpack.c.bf16 %v4116_v38, %v4115_v3  ;;  %v4122_v37 = vld [vmem:[%s17517_s3 + $0x78] sm:$0xff] }
 0xe8a   :  { %v5995_v10 = vadd.f32 %v16567_v44, %v16645_v31  ;;  %v3914_v44 = vmul.f32 %v16549_v27, %v16657_v24  ;;  %v3925_v17 = vld [vmem:[#allocation3 + $0x78] sm:$0xf] }
 0xe8b   :  { %13831 = vmatmul.mubr.msk.f32.vlgmr.msra.gmra.mrb[56].mxu0 %vm376_vm1, %v16617_v55  ;;  %5998 = vst.msk [vmem:[#allocation3 + $0x48] sm:$0xf] %vm4925_vm3, %v5996_v12  ;;  %v16669_v11 = vld [vmem:[#allocation3 + $0x70] sm:$0xff]  ;;  %v3927_v27 = vmul.f32 %v16579_v34, %v3925_v17  ;;  %v4094_v38 = vld [vmem:[%s17520_s19 + $0x18] sm:$0xf] }
 0xe8c   :  { %14302 = vmatpush1.bf16.msk.msra.mxu0 %vm16605_vm7, %v16619_v26  ;;  %3895 = vmatprep.mubr.f32.mxu0 %v15794_v9  ;;  %5997 = vst.msk [vmem:[#allocation3 + $0x40] sm:$0xff] %vm376_vm1, %v5995_v10  ;;  %v3916_v29 = vadd.f32 %v3914_v44, %v3910_v62  ;;  %v3926_v41 = vmul.f32 %v16579_v34, %v16669_v11  ;;  %v4107_v34 = vld [vmem:[%s17517_s3] sm:$0xff]  ;;  %v4118_v44 = vld [vmem:[%s17517_s3 + $0x58] sm:$0xff] }
 0xe8d   :  { %14303 = vmatprep.subr.bf16.mxu0 %v15792_v1  ;;  %v3929_v22 = vadd.f32 %v3927_v27, %v3923_v35  ;;  %v14314_v58 = vpack.c.bf16 %v4108_v40, %v4107_v34  ;;  %v14329_v32 = vpack.c.bf16 %v4118_v44, %v4117_v39  ;;  %v4124_v35 = vld [vmem:[%s17517_s3 + $0x88] sm:$0xff]  ;;  %v4209_v27 = vld [vmem:[%s17518_s8] sm:$0xff] }
 0xe8e   :  { %v3922_v15 = vadd.f32 %v3920_v0, %v3916_v29  ;;  %v4120_v29 = vld [vmem:[%s17517_s3 + $0x68] sm:$0xff]  ;;  %v4121_v0 = vld [vmem:[%s17517_s3 + $0x70] sm:$0xff] }
 0xe8f   :  { %v3931_v46 = vmax.f32 %v3929_v22, 0.0  ;;  %14315 = vmatpush1.bf16.msra.mxu1 %v14314_v58  ;;  %v14332_v33 = vpack.c.bf16 %v4120_v29, %v4119_v25  ;;  %v14335_v17 = vpack.c.bf16 %v4122_v37, %v4121_v0  ;;  %v4089_v0 = vld [vmem:[%s17522_s12] sm:$0xff]  ;;  %v4090_v37 = vld [vmem:[%s17522_s12 + $0x8] sm:$0xf] }
 0xe90   :  { %v3928_v63 = vadd.f32 %v3926_v41, %v3922_v15  ;;  %14316 = vmatprep.subr.bf16.mxu1 %v15792_v1  ;;  %v4123_v15 = vld [vmem:[%s17517_s3 + $0x80] sm:$0xff] }
 0xe91   :  { %v14338_v41 = vpack.c.bf16 %v4124_v35, %v4123_v15 }
 0xe92   :  { %v3930_v52 = vmax.f32 %v3928_v63, 0.0  ;;  %v4210_v63 = vld [vmem:[%s17518_s8 + $0x8] sm:$0xf] }
 0xe93   :  { %v14340_v22 = vpack.c.bf16 %v4210_v63, %v4209_v27 }
 0xe94   :  { %v14304_v23 = vpack.c.bf16 %v3931_v46, %v3930_v52 }
 0xf5e   :  { %v3804_v54 = vpop.f32.mrb[56].mxu0 }
 0xf5f   :  { %v3805_v36 = vadd.f32 %v3804_v54, %v3671_v42  ;;  %v13832_v43 = vpop.f32.mrb[57].mxu0  ;;  %v16725_v54 = vsub.s32 1, %v16518_v45 }
 0xf61   :  { %v3808_v61 = vmax.f32 %v3805_v36, 0.0 }
 0xf63   :  { %12631 = vmatmul.mubr.msk.f32.vlgmr.msra.gmra.mrb[58].mxu0 %vm3820_vm8, %v3808_v61 }
 0xf64   :  { %14306 = vmatpush3.bf16.xpose.msk.msra.mxu0 %vm16599_vm5, %v14304_v23  ;;  %13837 = vmatprep.mubr.msk.f32.mxu0 %vm15793_vm2, %v15794_v9 }
 0xf65   :  { %14309 = vmatprep.subr.msk.bf16.mxu0 %vm16605_vm7, %v16603_v60  ;;  %v14317_v60 = vpack.c.bf16 %v4110_v2, %v4109_v53 }
 0xf67   :  { %14318 = vmatpush1.bf16.msra.mxu1 %v14317_v60 }
 0xf68   :  { %14319 = vmatprep.subr.bf16.mxu1 %v15792_v1 }
 0xf6b   :  { %13838 = vmatmul.mubr.msk.f32.vlgmr.msra.gmra.mrb[60].mxu0 %vm376_vm1, %v16617_v55  ;;  %v4111_v55 = vld [vmem:[%s17517_s3 + $0x20] sm:$0xff] }
 0xf6c   :  { %14312 = vmatpush1.bf16.msk.msra.mxu0 %vm16605_vm7, %v16619_v26  ;;  %4076 = vmatprep.mubr.f32.mxu0 %v15794_v9  ;;  %v14320_v30 = vpack.c.bf16 %v4112_v14, %v4111_v55  ;;  %v4113_v26 = vld [vmem:[%s17517_s3 + $0x30] sm:$0xff] }
 0xf6d   :  { %v14323_v13 = vpack.c.bf16 %v4114_v28, %v4113_v26  ;;  %14342 = vmatprep.subr.msk.bf16.mxu0 %vm16605_vm7, %v14340_v22  ;;  %v4092_v28 = vld [vmem:[%s17520_s19 + $0x8] sm:$0xff] }
 0xf6e   :  { %14321 = vmatpush1.bf16.msra.mxu1 %v14320_v30 }
 0xf6f   :  { %14322 = vmatprep.subr.bf16.mxu1 %v15792_v1 }
 0xf72   :  { %14324 = vmatpush1.bf16.msra.mxu1 %v14323_v13  ;;  %v4091_v13 = vld [vmem:[%s17520_s19] sm:$0xff] }
 0xf73   :  { %14325 = vmatprep.subr.bf16.mxu1 %v15792_v1 }
 0xf76   :  { %14327 = vmatpush1.bf16.msra.mxu1 %v14326_v48 }
 0xf77   :  { %14328 = vmatprep.subr.bf16.mxu1 %v15792_v1 }
 0xf7a   :  { %14330 = vmatpush1.bf16.msra.mxu1 %v14329_v32 }
 0xf7b   :  { %14331 = vmatprep.subr.bf16.mxu1 %v15792_v1 }
 0xf7e   :  { %14333 = vmatpush1.bf16.msra.mxu1 %v14332_v33  ;;  %v4295_v33 = vld [vmem:[%s17521_s24] sm:$0x1] }
 0xf7f   :  { %14334 = vmatprep.subr.bf16.mxu1 %v15792_v1 }
 0xf82   :  { %14336 = vmatpush1.bf16.msra.mxu1 %v14335_v17  ;;  %v15796_v17 = vmov 0  }
 0xf83   :  { %14337 = vmatprep.subr.bf16.mxu1 %v15792_v1  ;;  %15543 = vset.pattern.permute.xlu0 %v15796_v17 }
 0xf84   :  { %15544 = vset.pattern.permute.xlu1 %v15796_v17 }
 0xf86   :  { %14339 = vmatpush1.bf16.msra.mxu1 %v14338_v41 }
0x1036   :  { %v3897_v12 = vpop.f32.mrb[58].mxu0 }
0x1037   :  { %v3899_v10 = vpop.f32.mrb[59].mxu0 }
0x103e   :  { %v4004_v50 = vpop.f32.mrb[60].mxu0 }
0x103f   :  { %v4005_v21 = vadd.f32 %v4004_v50, %v3671_v42  ;;  %v13839_v49 = vpop.f32.mrb[61].mxu0  ;;  %v3676_v42 = vld [vmem:[%s17519_s14] sm:$0x3]  ;;  %v4093_v50 = vld [vmem:[%s17520_s19 + $0x10] sm:$0xf] }
0x1040   :  { %v3813_v52 = vrot.slane %v3676_v42, %v16525_v51  ;;  %v3817_v46 = vrot.slane %v3676_v42, %v16725_v54 }
0x1041   :  { %v4008_v62 = vmax.f32 %v4005_v21, 0.0 }
0x1042   :  { %v3898_v36 = vadd.f32 %v3897_v12, %v3813_v52  ;;  %v3900_v43 = vadd.f32 %v3899_v10, %v3817_v46 }
0x1043   :  { %12637 = vmatmul.mubr.msk.f32.vlgmr.msra.gmra.mrb[62].mxu0 %vm3820_vm8, %v4008_v62 }
0x1044   :  { %14345 = vmatpush3.bf16.msk.msra.mxu0 %vm16605_vm7, %v14340_v22  ;;  %v3902_v53 = vmax.f32 %v3898_v36, 0.0 }
0x1045   :  { %14346 = vmatprep.subr.bf16.mxu0 %v15792_v1  ;;  %v3903_v1 = vmax.f32 %v3900_v43, 0.0 }
0x1116   :  { %v4078_v61 = vpop.f32.mrb[62].mxu0 }
0x1117   :  { %v4079_v23 = vadd.f32 %v4078_v61, %v3813_v52  ;;  %v4080_v34 = vpop.f32.mrb[63].mxu0 }
0x1118   :  { %v4081_v40 = vadd.f32 %v4080_v34, %v3817_v46 }
0x1119   :  { %v4083_v58 = vmax.f32 %v4079_v23, 0.0 }
0x111a   :  { %v4084_v2 = vmax.f32 %v4081_v40, 0.0 }
0x111b   :  { %v4085_v60 = vadd.f32 %v4083_v58, %v3902_v53 }
0x111c   :  { %v4086_v55 = vadd.f32 %v4084_v2, %v3903_v1 }
0x111d   :  { %v4087_v14 = vmul.f32 0.5, %v4085_v60 }
0x111e   :  { %v4088_v30 = vmul.f32 0.5, %v4086_v55 }
0x111f   :  { %v4098_v26 = vrot.slane %v4087_v14, %v16525_v51 }
0x1120   :  { %v4102_v3 = vrot.slane %v4088_v30, %v16525_v51 }
0x1121   :  { %v4103_v12 = vmul.f32 %v4098_v26, %v4091_v13  ;;  %v4105_v21 = vmul.f32 %v4098_v26, %v4093_v50 }
0x1122   :  { %v4104_v48 = vmul.f32 %v4102_v3, %v4092_v28  ;;  %v4106_v10 = vmul.f32 %v4102_v3, %v4094_v38 }
0x1124   :  { %12638 = vmatprep.mubr.msk.f32.mxu1 %vm4125_vm9, %v4104_v48 }
0x1125   :  { %4197 = vmatmul.mubr.f32.vlgmr.msra.gmra.mrb[74].mxu1 %v4103_v12 }
0x1126   :  { %12639 = vmatprep.mubr.msk.f32.mxu1 %vm4125_vm9, %v4106_v10 }
0x1129   :  { %4202 = vmatmul.mubr.f32.gmra.mrb[76].mxu1 %v4105_v21 }
0x11f8   :  { %v4198_v49 = vpop.f32.mrb[74].mxu1 }
0x11f9   :  { %v16735_v62 = vmax.f32 %v4198_v49, 0.0  ;;  %v4200_v39 = vpop.f32.mrb[75].mxu1 }
0x11fb   :  { %13844 = vmatprep.mubr.msk.f32.mxu0 %vm3820_vm8, %v16735_v62 }
0x11fc   :  { %v4203_v44 = vpop.f32.mrb[76].mxu1 }
0x11fd   :  { %v16739_v32 = vmax.f32 %v4203_v44, 0.0  ;;  %v4205_v25 = vpop.f32.mrb[77].mxu1 }
0x11ff   :  { %v14347_v29 = vpack.c.bf16 %v16739_v32, %v16735_v62  ;;  %13845 = vmatmul.mubr.msk.f32.vlgmr.msra.gmra.mrb[64].mxu0 %vm3820_vm8, %v16739_v32 }
0x1200   :  { %13851 = vmatprep.mubr.msk.f32.mxu0 %vm15793_vm2, %v15794_v9 }
0x1201   :  { %14349 = vmatpush3.bf16.xpose.msk.msra.mxu0 %vm14348_vm10, %v14347_v29 }
0x1202   :  { %14352 = vmatprep.subr.msk.bf16.mxu0 %vm14348_vm10, %v14347_v29 }
0x1208   :  { %13852 = vmatmul.mubr.msk.f32.vlgmr.msra.gmra.mrb[66].mxu0 %vm3820_vm8, %v4295_v33 }
0x1209   :  { %14355 = vmatpush3.bf16.xpose.msk.msra.mxu0 %vm14348_vm10, %v14347_v29  ;;  %13858 = vmatprep.mubr.msk.f32.mxu0 %vm3820_vm8, %v4089_v0 }
0x1210   :  { %13859 = vmatmul.mubr.msk.f32.vlgmr.msra.gmra.mrb[68].mxu0 %vm3820_vm8, %v4090_v37 }
0x12d2   :  { %v13846_v15 = vpop.f32.mrb[64].mxu0 }
0x12d3   :  { %15665 = vrsqrt.f32 %v13846_v15  ;;  %v4286_v35 = vpop.f32.mrb[65].mxu0  ;;  %vm4463_vm11 = vcmp.eq.f32.partialorder %v13846_v15, inf  ;;  %v4466_v36 = vand.u32 2147483648, %v13846_v15  ;;  %vm4465_vm13 = vcmp.eq.f32.partialorder %v13846_v15, 0.0 }
0x12d4   :  { %15667 = vrsqrt.f32 %v4286_v35  ;;  %4486 = vperm.xlu0 %15543, %v4286_v35   ;;  %vm4456_vm12 = vcmp.eq.f32.partialorder %v4286_v35, inf  ;;  %v4459_v43 = vand.u32 2147483648, %v4286_v35  ;;  %vm4458_vm14 = vcmp.eq.f32.partialorder %v4286_v35, 0.0 }
0x12d8   :  { %4491 = vperm.xlu0 %15543, %v13846_v15  }
0x12db   :  { %v4365_v41 = vpop.f32.mrb[66].mxu0 }
0x12dc   :  { %v13853_v27 = vpop.f32.mrb[67].mxu0  ;;  %vm4476_vm15 = vcmp.eq.f32.partialorder %v4365_v41, inf  ;;  %v4479_v30 = vand.u32 2147483648, %v4365_v41  ;;  %vm4478_vm0 = vcmp.eq.f32.partialorder %v4365_v41, 0.0 }
0x12dd   :  { %v15666_v63 = vpop.eup %15665 }
0x12de   :  { %v15668_v22 = vpop.eup %15667  ;;  %v4462_v42 = vmul.f32 %v15666_v63, %v13846_v15  ;;  %v4683_v63 = vld [vmem:[%s17523_s4] sm:$0xff] }
0x12df   :  { %v4455_v52 = vmul.f32 %v15668_v22, %v4286_v35  ;;  %v4684_v22 = vld [vmem:[%s17523_s4 + $0x8] sm:$0xff] }
0x12e0   :  { %v4464_v46 = vsel %vm4463_vm11, %v13846_v15, %v4462_v42 }
0x12e1   :  { %v4457_v61 = vsel %vm4456_vm12, %v4286_v35, %v4455_v52  ;;  %v4467_v23 = vsel %vm4465_vm13, %v4466_v36, %v4464_v46  ;;  %v14368_v46 = vpack.c.bf16 %v4684_v22, %v4683_v63  ;;  %v4685_v36 = vld [vmem:[%s17523_s4 + $0x10] sm:$0xff] }
0x12e2   :  { %v4460_v34 = vsel %vm4458_vm14, %v4459_v43, %v4457_v61  ;;  %v4469_v1 = vadd.f32 1e-07, %v4467_v23  ;;  %v4686_v43 = vld [vmem:[%s17523_s4 + $0x18] sm:$0xff] }
0x12e3   :  { %v13860_v40 = vpop.f32.mrb[68].mxu0  ;;  %v4468_v53 = vadd.f32 1e-07, %v4460_v34  ;;  %v14372_v61 = vpack.c.bf16 %v4686_v43, %v4685_v36  ;;  %v4692_v23 = vld [vmem:[#allocation3 + $0x18] sm:$0xff]  ;;  %v4694_v34 = vld [vmem:[#allocation3 + $0x28] sm:$0xff] }
0x12e4   :  { %v4441_v58 = vpop.f32.mrb[69].mxu0  ;;  %v4451_v10 = vadd.f32 %v13860_v40, %v16739_v32  ;;  %v4702_v40 = vld [vmem:[#allocation3 + $0x68] sm:$0xff] }
0x12e5   :  { %15669 = vrcp.f32 %v4468_v53  ;;  %v4450_v38 = vadd.f32 %v4441_v58, %v16735_v62  ;;  %v4704_v53 = vld [vmem:[#allocation3 + $0x78] sm:$0xff] }
0x12e6   :  { %15671 = vrcp.f32 %v4469_v1  ;;  %v4453_v25 = vmul.f32 0.5, %v4451_v10 }
0x12e7   :  { %15673 = vrsqrt.f32 %v4365_v41  ;;  %v4452_v50 = vmul.f32 0.5, %v4450_v38 }
0x12ef   :  { %v15670_v2 = vpop.eup %15669 }
0x12f0   :  { %4500 = vperm.xlu1 %15544, %v15670_v2   ;;  %v15672_v60 = vpop.eup %15671 }
0x12f1   :  { %v15674_v55 = vpop.eup %15673 }
0x12f2   :  { %v4475_v14 = vmul.f32 %v15674_v55, %v4365_v41 }
0x12f4   :  { %4505 = vperm.xlu1 %15544, %v15672_v60   ;;  %v4477_v26 = vsel %vm4476_vm15, %v4365_v41, %v4475_v14 }
0x12f5   :  { %v4480_v28 = vsel %vm4478_vm0, %v4479_v30, %v4477_v26 }
0x12f6   :  { %v4481_v13 = vadd.f32 1e-07, %v4480_v28 }
0x12f8   :  { %15675 = vrcp.f32 %v4481_v13 }
0x1302   :  { %v15676_v21 = vpop.eup %15675 }
0x1303   :  { %v4513_v33 = vrot.slane %v15676_v21, %v16525_v51 }
0x1353   :  { %v4487_v3 = vpop.permute.xlu0 %4486 }
0x1354   :  { %v4494_v48 = vmul.f32 %v4487_v3, %v4089_v0 }
0x1356   :  { %v4496_v39 = vsub.f32 %v4494_v48, %v4452_v50 }
0x1357   :  { %v4492_v12 = vpop.permute.xlu0 %4491 }
0x1358   :  { %v4495_v49 = vmul.f32 %v4492_v12, %v4090_v37 }
0x135a   :  { %v4497_v15 = vsub.f32 %v4495_v49, %v4453_v25 }
0x136f   :  { %v4501_v44 = vpop.permute.xlu1 %4500 }
0x1370   :  { %v4508_v29 = vmul.f32 %v4501_v44, %v4496_v39 }
0x1372   :  { %v16758_v17 = vmul.f32 %v4513_v33, %v4508_v29 }
0x1373   :  { %v4506_v35 = vpop.permute.xlu1 %4505 }
0x1374   :  { %v4509_v62 = vmul.f32 %v4506_v35, %v4497_v15  ;;  %13865 = vmatprep.mubr.msk.f32.mxu0 %vm3820_vm8, %v16758_v17  ;;  %13911 = vmatprep.mubr.msk.f32.mxu1 %vm3820_vm8, %v16758_v17 }
0x1376   :  { %v16764_v32 = vmul.f32 %v4513_v33, %v4509_v62 }
0x1378   :  { %v14356_v0 = vpack.c.bf16 %v16764_v32, %v16758_v17 }
0x137a   :  { %14358 = vmatprep.subr.msk.bf16.mxu0 %vm16605_vm7, %v14356_v0 }
0x137b   :  { %14361 = vmatpush3.bf16.msk.msra.mxu0 %vm16605_vm7, %v14356_v0 }
0x137e   :  { %13866 = vmatmul.mubr.msk.f32.vlgmr.msra.gmra.mrb[70].mxu0 %vm3820_vm8, %v16764_v32 }
0x137f   :  { %13872 = vmatprep.mubr.msk.f32.mxu0 %vm3820_vm8, %v16758_v17 }
0x1451   :  { %v13867_v37 = vpop.f32.mrb[70].mxu0 }
0x1452   :  { %v16776_v41 = vmul.f32 2.0, %v13867_v37  ;;  %v4590_v27 = vpop.f32.mrb[71].mxu0 }
0x1453   :  { %v16780_v42 = vmul.f32 2.0, %v4590_v27 }
0x1455   :  { %v14362_v52 = vpack.c.bf16 %v16776_v41, %v16780_v42 }
0x1457   :  { %14364 = vmatprep.subr.msk.bf16.mxu0 %vm16605_vm7, %v14362_v52 }
0x1458   :  { %14367 = vmatpush3.bf16.msk.msra.mxu0 %vm16605_vm7, %v14362_v52 }
0x1459   :  { %14369 = vmatprep.subr.bf16.mxu0 %v14368_v46 }
0x145b   :  { %13873 = vmatmul.mubr.msk.f32.vlgmr.msra.gmra.mrb[72].mxu0 %vm3820_vm8, %v16764_v32 }
0x145c   :  { %14371 = vmatpush3.bf16.msra.mxu0 %v14368_v46  ;;  %13883 = vmatprep.mubr.msk.f32.mxu0 %vm376_vm1, %v16536_v59  ;;  %v4696_v59 = vld [vmem:[#allocation3 + $0x38] sm:$0xff] }
0x145d   :  { %14373 = vmatprep.subr.bf16.mxu0 %v14372_v61 }
0x1460   :  { %14375 = vmatpush3.bf16.msra.mxu0 %v14372_v61  ;;  %v12690_v61 = vld [vmem:[%s17523_s4 + $0x20] sm:$0xff] }
0x1463   :  { %13884 = vmatmul.mubr.msk.f32.vlgmr.msra.gmra.mrb[74].mxu0 %vm376_vm1, %v16545_v8  ;;  %v4700_v8 = vld [vmem:[#allocation3 + $0x58] sm:$0xff] }
0x1464   :  { %13886 = vmatprep.mubr.msk.f32.mxu0 %vm376_vm1, %v16554_v19 }
0x1467   :  { %13887 = vmatmul.mubr.msk.f32.gmra.mrb[76].mxu0 %vm376_vm1, %v4692_v23  ;;  %v12691_v23 = vld [vmem:[%s17523_s4 + $0x28] sm:$0xff] }
0x1468   :  { %13889 = vmatprep.mubr.msk.f32.mxu0 %vm376_vm1, %v16572_v20 }
0x146b   :  { %13890 = vmatmul.mubr.msk.f32.gmra.mrb[78].mxu0 %vm376_vm1, %v4694_v34 }
0x146c   :  { %13892 = vmatprep.mubr.msk.f32.mxu0 %vm376_vm1, %v16588_v6 }
0x146f   :  { %13893 = vmatmul.mubr.msk.f32.gmra.mrb[80].mxu0 %vm376_vm1, %v4696_v59 }
0x1470   :  { %13895 = vmatprep.mubr.msk.f32.mxu0 %vm376_vm1, %v16640_v16 }
0x1473   :  { %13896 = vmatmul.mubr.msk.f32.gmra.mrb[82].mxu0 %vm376_vm1, %v16633_v4 }
0x1474   :  { %13898 = vmatprep.mubr.msk.f32.mxu0 %vm376_vm1, %v16657_v24 }
0x1477   :  { %13899 = vmatmul.mubr.msk.f32.gmra.mrb[84].mxu0 %vm376_vm1, %v4700_v8 }
0x1478   :  { %13901 = vmatprep.mubr.msk.f32.mxu0 %vm376_vm1, %v16664_v5 }
0x147b   :  { %13902 = vmatmul.mubr.msk.f32.gmra.mrb[86].mxu0 %vm376_vm1, %v4702_v40  ;;  %v14412_v40 = vpack.c.bf16 %v12691_v23, %v12690_v61 }
0x147c   :  { %13904 = vmatprep.mubr.msk.f32.mxu0 %vm376_vm1, %v16669_v11 }
0x147f   :  { %13905 = vmatmul.mubr.msk.f32.gmra.mrb[88].mxu0 %vm376_vm1, %v4704_v53  ;;  %v12692_v53 = vld [vmem:[%s17523_s4 + $0x30] sm:$0xff] }
0x1480   :  { %13985 = vmatprep.mubr.msk.f32.mxu0 %vm3820_vm8, %v16758_v17 }
0x152e   :  { %v13874_v4 = vpop.f32.mrb[72].mxu0 }
0x152f   :  { %v4670_v16 = vpop.f32.mrb[73].mxu0  ;;  %v4680_v29 = vmul.f32 2.0, %v13874_v4  ;;  %v12693_v4 = vld [vmem:[%s17523_s4 + $0x38] sm:$0xff] }
0x1530   :  { %v4679_v21 = vmul.f32 2.0, %v4670_v16  ;;  %v14416_v16 = vpack.c.bf16 %v12693_v4, %v12692_v53 }
0x1531   :  { %v16853_v0 = vsub.f32 %v4680_v29, %v16764_v32 }
0x1532   :  { %v16841_v15 = vsub.f32 %v4679_v21, %v16758_v17 }
0x1536   :  { %v13885_v58 = vpop.f32.mrb[74].mxu0 }
0x1537   :  { %v4819_v1 = vpop.f32.mrb[75].mxu0  ;;  %v16894_v58 = vrot.slane %v16521_v47, %v16525_v51 }
0x153a   :  { %v13888_v2 = vpop.f32.mrb[76].mxu0 }
0x153b   :  { %4901 = vst.msk [vmem:[#allocation4 + $0x18] sm:$0xff] %vm376_vm1, %v13888_v2  ;;  %v4829_v60 = vpop.f32.mrb[77].mxu0 }
0x153c   :  { %4900 = vst.msk [vmem:[#allocation4 + $0x10] sm:$0xff] %vm376_vm1, %v4829_v60 }
0x153e   :  { %v13891_v55 = vpop.f32.mrb[78].mxu0 }
0x153f   :  { %4903 = vst.msk [vmem:[#allocation4 + $0x28] sm:$0xff] %vm376_vm1, %v13891_v55  ;;  %v4839_v14 = vpop.f32.mrb[79].mxu0 }
0x1540   :  { %4902 = vst.msk [vmem:[#allocation4 + $0x20] sm:$0xff] %vm376_vm1, %v4839_v14 }
0x1542   :  { %v13894_v30 = vpop.f32.mrb[80].mxu0  ;;  %v4930_v26 = vld [vmem:[#allocation4 + $0x18] sm:$0xf] }
0x1543   :  { %4905 = vst.msk [vmem:[#allocation4 + $0x38] sm:$0xff] %vm376_vm1, %v13894_v30  ;;  %v4849_v28 = vpop.f32.mrb[81].mxu0  ;;  %v4929_v13 = vld [vmem:[#allocation4 + $0x10] sm:$0xff]  ;;  %v4928_v30 = vld [vmem:[#allocation3 + $0x18] sm:$0xf] }
0x1544   :  { %4904 = vst.msk [vmem:[#allocation4 + $0x30] sm:$0xff] %vm376_vm1, %v4849_v28  ;;  %v14376_v3 = vpack.c.bf16 %v4930_v26, %v4929_v13 }
0x1546   :  { %v13897_v38 = vpop.f32.mrb[82].mxu0  ;;  %14378 = vmatprep.subr.msk.bf16.mxu1 %vm16605_vm7, %v14376_v3  ;;  %v5024_v48 = vld [vmem:[#allocation4 + $0x28] sm:$0xf] }
0x1547   :  { %v4859_v12 = vpop.f32.mrb[83].mxu0  ;;  %14381 = vmatpush3.bf16.msk.msra.mxu1 %vm16605_vm7, %v14376_v3  ;;  %v5023_v10 = vld [vmem:[#allocation4 + $0x20] sm:$0xff] }
0x1548   :  { %v14382_v50 = vpack.c.bf16 %v5024_v48, %v5023_v10  ;;  %v5022_v48 = vld [vmem:[#allocation3 + $0x28] sm:$0xf] }
0x154a   :  { %v13900_v49 = vpop.f32.mrb[84].mxu0  ;;  %13912 = vmatmul.mubr.msk.f32.vlgmr.msra.gmra.mrb[78].mxu1 %vm3820_vm8, %v16764_v32  ;;  %14384 = vmatprep.subr.msk.bf16.mxu1 %vm16605_vm7, %v14382_v50  ;;  %v5117_v39 = vld [vmem:[#allocation4 + $0x38] sm:$0xf] }
0x154b   :  { %4909 = vst.msk [vmem:[#allocation4 + $0x58] sm:$0xff] %vm376_vm1, %v13900_v49  ;;  %v4869_v44 = vpop.f32.mrb[85].mxu0  ;;  %14387 = vmatpush3.bf16.msk.msra.mxu1 %vm16605_vm7, %v14382_v50  ;;  %13918 = vmatprep.mubr.msk.f32.mxu1 %vm3820_vm8, %v16780_v42  ;;  %v5116_v25 = vld [vmem:[#allocation4 + $0x30] sm:$0xff] }
0x154c   :  { %4908 = vst.msk [vmem:[#allocation4 + $0x50] sm:$0xff] %vm376_vm1, %v4869_v44  ;;  %v14388_v33 = vpack.c.bf16 %v5117_v39, %v5116_v25  ;;  %v5115_v25 = vld [vmem:[#allocation3 + $0x38] sm:$0xf] }
0x154e   :  { %v13903_v35 = vpop.f32.mrb[86].mxu0  ;;  %13919 = vmatmul.mubr.msk.f32.vlgmr.msra.gmra.mrb[80].mxu1 %vm3820_vm8, %v16776_v41  ;;  %14390 = vmatprep.subr.msk.bf16.mxu1 %vm16605_vm7, %v14388_v33 }
0x154f   :  { %4911 = vst.msk [vmem:[#allocation4 + $0x68] sm:$0xff] %vm376_vm1, %v13903_v35  ;;  %v4879_v62 = vpop.f32.mrb[87].mxu0  ;;  %14393 = vmatpush3.bf16.msk.msra.mxu1 %vm16605_vm7, %v14388_v33  ;;  %13925 = vmatprep.mubr.msk.f32.mxu1 %vm3820_vm8, %v16841_v15 }
0x1550   :  { %4910 = vst.msk [vmem:[#allocation4 + $0x60] sm:$0xff] %vm376_vm1, %v4879_v62 }
0x1552   :  { %v13906_v37 = vpop.f32.mrb[88].mxu0  ;;  %13926 = vmatmul.mubr.msk.f32.vlgmr.msra.gmra.mrb[82].mxu1 %vm3820_vm8, %v16853_v0  ;;  %v5217_v27 = vld [vmem:[#allocation4 + $0x58] sm:$0xf] }
0x1553   :  { %4913 = vst.msk [vmem:[#allocation4 + $0x78] sm:$0xff] %vm376_vm1, %v13906_v37  ;;  %v4889_v63 = vpop.f32.mrb[89].mxu0  ;;  %13932 = vmatprep.mubr.msk.f32.mxu1 %vm3820_vm8, %v16758_v17  ;;  %v5216_v22 = vld [vmem:[#allocation4 + $0x50] sm:$0xff] }
0x1554   :  { %4912 = vst.msk [vmem:[#allocation4 + $0x70] sm:$0xff] %vm376_vm1, %v4889_v63  ;;  %v14394_v52 = vpack.c.bf16 %v5217_v27, %v5216_v22 }
0x1556   :  { %14396 = vmatprep.subr.msk.bf16.mxu1 %vm16605_vm7, %v14394_v52  ;;  %v5305_v46 = vld [vmem:[#allocation4 + $0x68] sm:$0xf] }
0x1557   :  { %14399 = vmatpush3.bf16.msk.msra.mxu1 %vm16605_vm7, %v14394_v52  ;;  %v5304_v36 = vld [vmem:[#allocation4 + $0x60] sm:$0xff] }
0x1558   :  { %v14400_v43 = vpack.c.bf16 %v5305_v46, %v5304_v36  ;;  %v5215_v46 = vld [vmem:[#allocation3 + $0x58] sm:$0xf] }
0x155a   :  { %13933 = vmatmul.mubr.msk.f32.vlgmr.msra.gmra.mrb[84].mxu1 %vm3820_vm8, %v16764_v32  ;;  %14402 = vmatprep.subr.msk.bf16.mxu1 %vm16605_vm7, %v14400_v43  ;;  %v5393_v34 = vld [vmem:[#allocation4 + $0x78] sm:$0xf] }
0x155b   :  { %14405 = vmatpush3.bf16.msk.msra.mxu1 %vm16605_vm7, %v14400_v43  ;;  %13939 = vmatprep.mubr.msk.f32.mxu1 %vm3820_vm8, %v16780_v42  ;;  %v5392_v59 = vld [vmem:[#allocation4 + $0x70] sm:$0xff] }
0x155c   :  { %v14406_v8 = vpack.c.bf16 %v5393_v34, %v5392_v59 }
0x155e   :  { %13940 = vmatmul.mubr.msk.f32.vlgmr.msra.gmra.mrb[86].mxu1 %vm3820_vm8, %v16776_v41  ;;  %14408 = vmatprep.subr.msk.bf16.mxu1 %vm16605_vm7, %v14406_v8 }
0x155f   :  { %14411 = vmatpush3.bf16.msk.msra.mxu1 %vm16605_vm7, %v14406_v8  ;;  %13946 = vmatprep.mubr.msk.f32.mxu1 %vm3820_vm8, %v16841_v15 }
0x1560   :  { %14413 = vmatprep.subr.bf16.mxu1 %v14412_v40 }
0x1562   :  { %13947 = vmatmul.mubr.msk.f32.vlgmr.msra.gmra.mrb[88].mxu1 %vm3820_vm8, %v16853_v0 }
0x1563   :  { %14415 = vmatpush3.bf16.msra.mxu1 %v14412_v40  ;;  %13957 = vmatprep.mubr.msk.f32.mxu1 %vm376_vm1, %v16581_v7 }
0x1564   :  { %14417 = vmatprep.subr.bf16.mxu1 %v14416_v16 }
0x1567   :  { %14419 = vmatpush3.bf16.msra.mxu1 %v14416_v16  ;;  %v5303_v16 = vld [vmem:[#allocation3 + $0x68] sm:$0xf] }
0x156a   :  { %13958 = vmatmul.mubr.msk.f32.vlgmr.msra.gmra.mrb[90].mxu1 %vm376_vm1, %v16586_v57 }
0x161d   :  { %v13913_v1 = vpop.f32.mrb[78].mxu1 }
0x161e   :  { %v5012_v2 = vadd.f32 %v13913_v1, %v16894_v58  ;;  %v5006_v60 = vpop.f32.mrb[79].mxu1 }
0x161f   :  { %v5007_v55 = vadd.f32 %v5006_v60, %v16894_v58 }
0x1620   :  { %v5016_v14 = vmax.f32 %v5012_v2, 0.0 }
0x1621   :  { %v5015_v26 = vmax.f32 %v5007_v55, 0.0  ;;  %v13920_v28 = vpop.f32.mrb[80].mxu1 }
0x1622   :  { %v5018_v7 = vadd.f32 %v5016_v14, %v4928_v30  ;;  %v5105_v13 = vadd.f32 %v13920_v28, %v16894_v58  ;;  %v5099_v3 = vpop.f32.mrb[81].mxu1 }
0x1623   :  { %v5017_v57 = vadd.f32 %v5015_v26, %v16554_v19  ;;  %v5100_v38 = vadd.f32 %v5099_v3, %v16894_v58 }
0x1624   :  { %5020 = vst.msk [vmem:[#allocation3 + $0x18] sm:$0xf] %vm4925_vm3, %v5018_v7  ;;  %v5109_v47 = vmax.f32 %v5105_v13, 0.0  ;;  %v5391_v7 = vld [vmem:[#allocation3 + $0x78] sm:$0xf] }
0x1625   :  { %5019 = vst.msk [vmem:[#allocation3 + $0x10] sm:$0xff] %vm376_vm1, %v5017_v57  ;;  %v5108_v12 = vmax.f32 %v5100_v38, 0.0  ;;  %v13927_v10 = vpop.f32.mrb[82].mxu1 }
0x1626   :  { %v5111_v50 = vadd.f32 %v5109_v47, %v5022_v48  ;;  %v5199_v21 = vadd.f32 %v13927_v10, %v16894_v58  ;;  %v5193_v49 = vpop.f32.mrb[83].mxu1 }
0x1627   :  { %v5110_v39 = vadd.f32 %v5108_v12, %v16572_v20  ;;  %v5194_v44 = vadd.f32 %v5193_v49, %v16894_v58 }
0x1628   :  { %5113 = vst.msk [vmem:[#allocation3 + $0x28] sm:$0xf] %vm4925_vm3, %v5111_v50  ;;  %v5203_v19 = vmax.f32 %v5199_v21, 0.0 }
0x1629   :  { %5112 = vst.msk [vmem:[#allocation3 + $0x20] sm:$0xff] %vm376_vm1, %v5110_v39  ;;  %v5202_v29 = vmax.f32 %v5194_v44, 0.0 }
0x162a   :  { %v5205_v33 = vadd.f32 %v5203_v19, %v5115_v25 }
0x162b   :  { %v5204_v35 = vadd.f32 %v5202_v29, %v16588_v6  ;;  %v5489_v20 = vld [vmem:[#allocation3 + $0x18] sm:$0xff] }
0x162c   :  { %5207 = vst.msk [vmem:[#allocation3 + $0x38] sm:$0xf] %vm4925_vm3, %v5205_v33  ;;  %v16910_v62 = vld [vmem:[#allocation3 + $0x10] sm:$0xff] }
0x162d   :  { %5206 = vst.msk [vmem:[#allocation3 + $0x30] sm:$0xff] %vm376_vm1, %v5204_v35  ;;  %v13934_v37 = vpop.f32.mrb[84].mxu1  ;;  %13960 = vmatprep.mubr.msk.f32.mxu1 %vm376_vm1, %v16910_v62 }
0x162e   :  { %v5293_v27 = vadd.f32 %v13934_v37, %v16894_v58  ;;  %v5287_v63 = vpop.f32.mrb[85].mxu1  ;;  %13961 = vmatmul.mubr.msk.f32.gmra.mrb[92].mxu1 %vm376_vm1, %v5489_v20 }
0x162f   :  { %v5288_v22 = vadd.f32 %v5287_v63, %v16894_v58  ;;  %v5491_v61 = vld [vmem:[#allocation3 + $0x28] sm:$0xff] }
0x1630   :  { %v5297_v52 = vmax.f32 %v5293_v27, 0.0  ;;  %v16918_v6 = vld [vmem:[#allocation3 + $0x20] sm:$0xff] }
0x1631   :  { %v5296_v36 = vmax.f32 %v5288_v22, 0.0  ;;  %v13941_v43 = vpop.f32.mrb[86].mxu1  ;;  %13963 = vmatprep.mubr.msk.f32.mxu1 %vm376_vm1, %v16918_v6 }
0x1632   :  { %v5299_v23 = vadd.f32 %v5297_v52, %v5215_v46  ;;  %v5381_v34 = vadd.f32 %v13941_v43, %v16894_v58  ;;  %v5375_v59 = vpop.f32.mrb[87].mxu1  ;;  %13964 = vmatmul.mubr.msk.f32.gmra.mrb[94].mxu1 %vm376_vm1, %v5491_v61 }
0x1633   :  { %v5298_v8 = vadd.f32 %v5296_v36, %v16657_v24  ;;  %v5376_v40 = vadd.f32 %v5375_v59, %v16894_v58  ;;  %v5493_v60 = vld [vmem:[#allocation3 + $0x38] sm:$0xff] }
0x1634   :  { %5301 = vst.msk [vmem:[#allocation3 + $0x58] sm:$0xf] %vm4925_vm3, %v5299_v23  ;;  %v5385_v53 = vmax.f32 %v5381_v34, 0.0  ;;  %v16927_v4 = vld [vmem:[#allocation3 + $0x30] sm:$0xff] }
0x1635   :  { %5300 = vst.msk [vmem:[#allocation3 + $0x50] sm:$0xff] %vm376_vm1, %v5298_v8  ;;  %v5384_v1 = vmax.f32 %v5376_v40, 0.0  ;;  %v13948_v2 = vpop.f32.mrb[88].mxu1  ;;  %13966 = vmatprep.mubr.msk.f32.mxu1 %vm376_vm1, %v16927_v4 }
0x1636   :  { %v5387_v55 = vadd.f32 %v5385_v53, %v5303_v16  ;;  %v5469_v14 = vadd.f32 %v13948_v2, %v16894_v58  ;;  %v5463_v24 = vpop.f32.mrb[89].mxu1  ;;  %13967 = vmatmul.mubr.msk.f32.gmra.mrb[96].mxu1 %vm376_vm1, %v5493_v60  ;;  %v6299_v60 = vld [vmem:[#allocation6 + $0x18] sm:$0xff] }
0x1637   :  { %v5386_v30 = vadd.f32 %v5384_v1, %v16664_v5  ;;  %v5464_v26 = vadd.f32 %v5463_v24, %v16894_v58  ;;  %13969 = vmatprep.mubr.msk.f32.mxu1 %vm376_vm1, %v16645_v31  ;;  %v6300_v24 = vld [vmem:[#allocation6 + $0x20] sm:$0xff] }
0x1638   :  { %5389 = vst.msk [vmem:[#allocation3 + $0x68] sm:$0xf] %vm4925_vm3, %v5387_v55  ;;  %v5473_v28 = vmax.f32 %v5469_v14, 0.0  ;;  %v6303_v14 = vld [vmem:[#allocation6 + $0x38] sm:$0xff] }
0x1639   :  { %5388 = vst.msk [vmem:[#allocation3 + $0x60] sm:$0xff] %vm376_vm1, %v5386_v30  ;;  %v5472_v13 = vmax.f32 %v5464_v26, 0.0  ;;  %v14464_v30 = vpack.c.bf16 %v6303_v14, %v6299_v60  ;;  %v6264_v60 = vld [vmem:[#allocation3 + $0x8] sm:$0xf]  ;;  %v6263_v14 = vld [vmem:[#allocation3] sm:$0xff] }
0x163a   :  { %v5475_v3 = vadd.f32 %v5473_v28, %v5391_v7  ;;  %13970 = vmatmul.mubr.msk.f32.gmra.mrb[98].mxu1 %vm376_vm1, %v16650_v56  ;;  %v6302_v28 = vld [vmem:[#allocation6 + $0x30] sm:$0xff] }
0x163b   :  { %v5474_v57 = vadd.f32 %v5472_v13, %v16669_v11  ;;  %v5497_v58 = vld [vmem:[#allocation3 + $0x58] sm:$0xff]  ;;  %v17022_v7 = vpack.c.bf16 %v6302_v28, %v6298_v18  ;;  %14465 = vmatprep.subr.bf16.mxu1 %v14464_v30 }
0x163c   :  { %5477 = vst.msk [vmem:[#allocation3 + $0x78] sm:$0xf] %vm4925_vm3, %v5475_v3  ;;  %v16944_v5 = vld [vmem:[#allocation3 + $0x50] sm:$0xff]  ;;  %v6307_v13 = vld [vmem:[#allocation6 + $0x58] sm:$0xff] }
0x163d   :  { %5476 = vst.msk [vmem:[#allocation3 + $0x70] sm:$0xff] %vm376_vm1, %v5474_v57  ;;  %v13959_v31 = vpop.f32.mrb[90].mxu1  ;;  %13972 = vmatprep.mubr.msk.f32.mxu1 %vm376_vm1, %v16944_v5  ;;  %14467 = vmatpush1.bf16.msra.mxu1 %v17022_v7  ;;  %v6311_v57 = vld [vmem:[#allocation6 + $0x78] sm:$0xff] }
0x163e   :  { %v5616_v38 = vpop.f32.mrb[91].mxu1  ;;  %13973 = vmatmul.mubr.msk.f32.gmra.mrb[100].mxu1 %vm376_vm1, %v5497_v58  ;;  %v6304_v31 = vld [vmem:[#allocation6 + $0x40] sm:$0xff] }
0x163f   :  { %v5499_v56 = vld [vmem:[#allocation3 + $0x68] sm:$0xff]  ;;  %v6308_v58 = vld [vmem:[#allocation6 + $0x60] sm:$0xff]  ;;  %v17028_v38 = vpack.c.bf16 %v6311_v57, %v6307_v13 }
0x1640   :  { %v16950_v47 = vld [vmem:[#allocation3 + $0x60] sm:$0xff] }
0x1641   :  { %13975 = vmatprep.mubr.msk.f32.mxu1 %vm376_vm1, %v16950_v47  ;;  %14469 = vmatprep.subr.bf16.mxu1 %v17028_v38 }
0x1642   :  { %13976 = vmatmul.mubr.msk.f32.gmra.mrb[102].mxu1 %vm376_vm1, %v5499_v56  ;;  %v17030_v56 = vpack.c.bf16 %v6308_v58, %v6304_v31 }
0x1643   :  { %v5501_v48 = vld [vmem:[#allocation3 + $0x78] sm:$0xff] }
0x1644   :  { %v16955_v11 = vld [vmem:[#allocation3 + $0x70] sm:$0xff] }
0x1645   :  { %13978 = vmatprep.mubr.msk.f32.mxu1 %vm376_vm1, %v16955_v11 }
0x1646   :  { %13979 = vmatmul.mubr.msk.f32.gmra.mrb[104].mxu1 %vm376_vm1, %v5501_v48  ;;  %v6306_v48 = vld [vmem:[#allocation6 + $0x50] sm:$0xff] }
0x1647   :  { %6451 = vmatprep.mubr.f32.mxu1 %v15794_v9 }
0x1701   :  { %v13962_v12 = vpop.f32.mrb[92].mxu1 }
0x1702   :  { %5698 = vst.msk [vmem:[#allocation4 + $0x18] sm:$0xff] %vm376_vm1, %v13962_v12  ;;  %v5626_v10 = vpop.f32.mrb[93].mxu1  ;;  %v6310_v12 = vld [vmem:[#allocation6 + $0x70] sm:$0xff] }
0x1703   :  { %5697 = vst.msk [vmem:[#allocation4 + $0x10] sm:$0xff] %vm376_vm1, %v5626_v10  ;;  %v17033_v10 = vpack.c.bf16 %v6310_v12, %v6306_v48 }
0x1705   :  { %v13965_v50 = vpop.f32.mrb[94].mxu1  ;;  %14471 = vmatpush1.bf16.msra.mxu1 %v17033_v10 }
0x1706   :  { %5700 = vst.msk [vmem:[#allocation4 + $0x28] sm:$0xff] %vm376_vm1, %v13965_v50  ;;  %v5636_v21 = vpop.f32.mrb[95].mxu1  ;;  %14481 = vmatprep.subr.bf16.mxu1 %v14464_v30  ;;  %v17039_v50 = vld [vmem:[%s17507_s9 + $0x1] ss:$0 sm:$0xff] }
0x1707   :  { %5699 = vst.msk [vmem:[#allocation4 + $0x20] sm:$0xff] %vm376_vm1, %v5636_v21 }
0x1709   :  { %v13968_v49 = vpop.f32.mrb[96].mxu1  ;;  %v5726_v39 = vld [vmem:[#allocation4 + $0x18] sm:$0xf] }
0x170a   :  { %5702 = vst.msk [vmem:[#allocation4 + $0x38] sm:$0xff] %vm376_vm1, %v13968_v49  ;;  %v5646_v44 = vpop.f32.mrb[97].mxu1  ;;  %v5725_v19 = vld [vmem:[#allocation4 + $0x10] sm:$0xff] }
0x170b   :  { %5701 = vst.msk [vmem:[#allocation4 + $0x30] sm:$0xff] %vm376_vm1, %v5646_v44  ;;  %v14420_v25 = vpack.c.bf16 %v5726_v39, %v5725_v19 }
0x170d   :  { %v13971_v29 = vpop.f32.mrb[98].mxu1  ;;  %14422 = vmatprep.subr.msk.bf16.mxu0 %vm16605_vm7, %v14420_v25  ;;  %v5820_v33 = vld [vmem:[#allocation4 + $0x28] sm:$0xf] }
0x170e   :  { %v5656_v35 = vpop.f32.mrb[99].mxu1  ;;  %14425 = vmatpush3.bf16.msk.msra.mxu0 %vm16605_vm7, %v14420_v25  ;;  %v5819_v37 = vld [vmem:[#allocation4 + $0x20] sm:$0xff]  ;;  %v5724_v25 = vld [vmem:[#allocation3 + $0x18] sm:$0xf] }
0x170f   :  { %v14426_v20 = vpack.c.bf16 %v5820_v33, %v5819_v37 }
0x1711   :  { %v13974_v27 = vpop.f32.mrb[100].mxu1  ;;  %13986 = vmatmul.mubr.msk.f32.vlgmr.msra.gmra.mrb[90].mxu0 %vm3820_vm8, %v16764_v32  ;;  %14428 = vmatprep.subr.msk.bf16.mxu0 %vm16605_vm7, %v14426_v20  ;;  %v5908_v63 = vld [vmem:[#allocation4 + $0x38] sm:$0xf] }
0x1712   :  { %5706 = vst.msk [vmem:[#allocation4 + $0x58] sm:$0xff] %vm376_vm1, %v13974_v27  ;;  %v5666_v22 = vpop.f32.mrb[101].mxu1  ;;  %14431 = vmatpush3.bf16.msk.msra.mxu0 %vm16605_vm7, %v14426_v20  ;;  %13992 = vmatprep.mubr.msk.f32.mxu0 %vm3820_vm8, %v16780_v42  ;;  %v5907_v52 = vld [vmem:[#allocation4 + $0x30] sm:$0xff] }
0x1713   :  { %5705 = vst.msk [vmem:[#allocation4 + $0x50] sm:$0xff] %vm376_vm1, %v5666_v22  ;;  %v14432_v46 = vpack.c.bf16 %v5908_v63, %v5907_v52  ;;  %v5818_v52 = vld [vmem:[#allocation3 + $0x28] sm:$0xf] }
0x1715   :  { %v13977_v36 = vpop.f32.mrb[102].mxu1  ;;  %13993 = vmatmul.mubr.msk.f32.vlgmr.msra.gmra.mrb[92].mxu0 %vm3820_vm8, %v16776_v41  ;;  %14434 = vmatprep.subr.msk.bf16.mxu0 %vm16605_vm7, %v14432_v46 }
0x1716   :  { %5708 = vst.msk [vmem:[#allocation4 + $0x68] sm:$0xff] %vm376_vm1, %v13977_v36  ;;  %v5676_v43 = vpop.f32.mrb[103].mxu1  ;;  %14437 = vmatpush3.bf16.msk.msra.mxu0 %vm16605_vm7, %v14432_v46  ;;  %13999 = vmatprep.mubr.msk.f32.mxu0 %vm3820_vm8, %v16841_v15 }
0x1717   :  { %5707 = vst.msk [vmem:[#allocation4 + $0x60] sm:$0xff] %vm376_vm1, %v5676_v43 }
0x1719   :  { %v13980_v61 = vpop.f32.mrb[104].mxu1  ;;  %14000 = vmatmul.mubr.msk.f32.vlgmr.msra.gmra.mrb[94].mxu0 %vm3820_vm8, %v16853_v0  ;;  %v6002_v23 = vld [vmem:[#allocation4 + $0x58] sm:$0xf] }
0x171a   :  { %5710 = vst.msk [vmem:[#allocation4 + $0x78] sm:$0xff] %vm376_vm1, %v13980_v61  ;;  %v5686_v34 = vpop.f32.mrb[105].mxu1  ;;  %14006 = vmatprep.mubr.msk.f32.mxu0 %vm3820_vm8, %v16758_v17  ;;  %v6001_v59 = vld [vmem:[#allocation4 + $0x50] sm:$0xff] }
0x171b   :  { %5709 = vst.msk [vmem:[#allocation4 + $0x70] sm:$0xff] %vm376_vm1, %v5686_v34  ;;  %v14438_v8 = vpack.c.bf16 %v6002_v23, %v6001_v59 }
0x171d   :  { %14440 = vmatprep.subr.msk.bf16.mxu0 %vm16605_vm7, %v14438_v8  ;;  %v6090_v40 = vld [vmem:[#allocation4 + $0x68] sm:$0xf] }
0x171e   :  { %14443 = vmatpush3.bf16.msk.msra.mxu0 %vm16605_vm7, %v14438_v8  ;;  %v6089_v53 = vld [vmem:[#allocation4 + $0x60] sm:$0xff]  ;;  %v5906_v8 = vld [vmem:[#allocation3 + $0x38] sm:$0xf] }
0x171f   :  { %v14444_v16 = vpack.c.bf16 %v6090_v40, %v6089_v53 }
0x1721   :  { %14007 = vmatmul.mubr.msk.f32.vlgmr.msra.gmra.mrb[96].mxu0 %vm3820_vm8, %v16764_v32  ;;  %14446 = vmatprep.subr.msk.bf16.mxu0 %vm16605_vm7, %v14444_v16  ;;  %v6178_v17 = vld [vmem:[#allocation4 + $0x78] sm:$0xf]  ;;  %v6297_v32 = vld [vmem:[#allocation6 + $0x8] sm:$0xff] }
0x1722   :  { %14449 = vmatpush3.bf16.msk.msra.mxu0 %vm16605_vm7, %v14444_v16  ;;  %14013 = vmatprep.mubr.msk.f32.mxu0 %vm3820_vm8, %v16780_v42  ;;  %v6177_v1 = vld [vmem:[#allocation4 + $0x70] sm:$0xff]  ;;  %v6301_v42 = vld [vmem:[#allocation6 + $0x28] sm:$0xff] }
0x1723   :  { %v14450_v2 = vpack.c.bf16 %v6178_v17, %v6177_v1  ;;  %v14456_v55 = vpack.c.bf16 %v6301_v42, %v6297_v32 }
0x1725   :  { %14014 = vmatmul.mubr.msk.f32.vlgmr.msra.gmra.mrb[98].mxu0 %vm3820_vm8, %v16776_v41  ;;  %14452 = vmatprep.subr.msk.bf16.mxu0 %vm16605_vm7, %v14450_v2  ;;  %v6296_v41 = vld [vmem:[#allocation6] sm:$0xff] }
0x1726   :  { %14455 = vmatpush3.bf16.msk.msra.mxu0 %vm16605_vm7, %v14450_v2  ;;  %14020 = vmatprep.mubr.msk.f32.mxu0 %vm3820_vm8, %v16841_v15  ;;  %v17020_v26 = vpack.c.bf16 %v6300_v24, %v6296_v41  ;;  %v6305_v15 = vld [vmem:[#allocation6 + $0x48] sm:$0xff]  ;;  %vm11582_vm7 = vcmask 24576  }
0x1727   :  { %14457 = vmatprep.subr.bf16.mxu0 %v14456_v55 }
0x1729   :  { %14021 = vmatmul.mubr.msk.f32.vlgmr.msra.gmra.mrb[100].mxu0 %vm3820_vm8, %v16853_v0  ;;  %v6309_v0 = vld [vmem:[#allocation6 + $0x68] sm:$0xff] }
0x172a   :  { %6380 = vmatprep.mubr.f32.mxu0 %v15794_v9  ;;  %14459 = vmatpush1.bf16.msra.mxu0 %v17020_v26  ;;  %v17026_v3 = vpack.c.bf16 %v6309_v0, %v6305_v15 }
0x172c   :  { %14461 = vmatprep.subr.bf16.mxu0 %v17026_v3 }
0x172e   :  { %14463 = vmatpush1.bf16.msra.mxu0 %v17030_v56 }
0x172f   :  { %14473 = vmatprep.subr.bf16.mxu0 %v14456_v55 }
0x17e4   :  { %v13987_v21 = vpop.f32.mrb[90].mxu0 }
0x17e5   :  { %v5808_v49 = vadd.f32 %v17039_v50, %v13987_v21  ;;  %v5802_v39 = vpop.f32.mrb[91].mxu0 }
0x17e6   :  { %v5803_v44 = vadd.f32 %v17039_v50, %v5802_v39 }
0x17e7   :  { %v5812_v19 = vmax.f32 %v5808_v49, 0.0 }
0x17e8   :  { %v5811_v29 = vmax.f32 %v5803_v44, 0.0  ;;  %v13994_v33 = vpop.f32.mrb[92].mxu0 }
0x17e9   :  { %v5814_v35 = vadd.f32 %v5812_v19, %v5724_v25  ;;  %v5896_v37 = vadd.f32 %v17039_v50, %v13994_v33  ;;  %v5890_v20 = vpop.f32.mrb[93].mxu0  ;;  %v6088_v19 = vld [vmem:[#allocation3 + $0x68] sm:$0xf] }
0x17ea   :  { %v5813_v27 = vadd.f32 %v5811_v29, %v16910_v62  ;;  %v5891_v63 = vadd.f32 %v17039_v50, %v5890_v20 }
0x17eb   :  { %5816 = vst.msk [vmem:[#allocation3 + $0x18] sm:$0xf] %vm4925_vm3, %v5814_v35  ;;  %v5900_v22 = vmax.f32 %v5896_v37, 0.0 }
0x17ec   :  { %5815 = vst.msk [vmem:[#allocation3 + $0x10] sm:$0xff] %vm376_vm1, %v5813_v27  ;;  %v5899_v46 = vmax.f32 %v5891_v63, 0.0  ;;  %v14001_v36 = vpop.f32.mrb[94].mxu0 }
0x17ed   :  { %v5902_v43 = vadd.f32 %v5900_v22, %v5818_v52  ;;  %v5984_v61 = vadd.f32 %v17039_v50, %v14001_v36  ;;  %v5978_v23 = vpop.f32.mrb[95].mxu0  ;;  %v6176_v22 = vld [vmem:[#allocation3 + $0x78] sm:$0xf] }
0x17ee   :  { %v5901_v34 = vadd.f32 %v5899_v46, %v16918_v6  ;;  %v5979_v59 = vadd.f32 %v17039_v50, %v5978_v23 }
0x17ef   :  { %5904 = vst.msk [vmem:[#allocation3 + $0x28] sm:$0xf] %vm4925_vm3, %v5902_v43  ;;  %v5988_v62 = vmax.f32 %v5984_v61, 0.0  ;;  %v6666_v43 = vld [vmem:[#allocation6 + $0x88] sm:$0xff]  ;;  %v6668_v61 = vld [vmem:[#allocation6 + $0x98] sm:$0xff] }
0x17f0   :  { %5903 = vst.msk [vmem:[#allocation3 + $0x20] sm:$0xff] %vm376_vm1, %v5901_v34  ;;  %v5987_v40 = vmax.f32 %v5979_v59, 0.0  ;;  %v6672_v34 = vld [vmem:[#allocation6 + $0xb8] sm:$0xff]  ;;  %v6279_v59 = vld [vmem:[#allocation3 + $0x40] sm:$0xff] }
0x17f1   :  { %v5990_v53 = vadd.f32 %v5988_v62, %v5906_v8 }
0x17f2   :  { %v5989_v16 = vadd.f32 %v5987_v40, %v16927_v4  ;;  %v6266_v1 = vld [vmem:[#allocation3 + $0x18] sm:$0xf]  ;;  %v14496_v40 = vpack.c.bf16 %v6672_v34, %v6668_v61  ;;  %v7048_v61 = vld [vmem:[#allocation6 + $0x170] sm:$0xff] }
0x17f3   :  { %5992 = vst.msk [vmem:[#allocation3 + $0x38] sm:$0xf] %vm4925_vm3, %v5990_v53  ;;  %v6265_v2 = vld [vmem:[#allocation3 + $0x10] sm:$0xff]  ;;  %v6268_v30 = vadd.f32 %v6266_v1, %v6264_v60  ;;  %v6000_v4 = vld [vmem:[#allocation3 + $0x58] sm:$0xf] }
0x17f4   :  { %5991 = vst.msk [vmem:[#allocation3 + $0x30] sm:$0xff] %vm376_vm1, %v5989_v16  ;;  %v14008_v17 = vpop.f32.mrb[96].mxu0  ;;  %v6267_v18 = vadd.f32 %v6265_v2, %v6263_v14  ;;  %v6671_v60 = vld [vmem:[#allocation6 + $0xb0] sm:$0xff] }
0x17f5   :  { %v6078_v6 = vadd.f32 %v17039_v50, %v14008_v17  ;;  %v6072_v32 = vpop.f32.mrb[97].mxu0  ;;  %v6280_v17 = vld [vmem:[#allocation3 + $0x48] sm:$0xf] }
0x17f6   :  { %v6073_v42 = vadd.f32 %v17039_v50, %v6072_v32  ;;  %v6270_v55 = vld [vmem:[#allocation3 + $0x28] sm:$0xf]  ;;  %v6669_v32 = vld [vmem:[#allocation6 + $0xa0] sm:$0xff] }
0x17f7   :  { %v6269_v41 = vld [vmem:[#allocation3 + $0x20] sm:$0xff]  ;;  %v6082_v24 = vmax.f32 %v6078_v6, 0.0  ;;  %v6272_v31 = vadd.f32 %v6270_v55, %v6268_v30  ;;  %v6674_v55 = vld [vmem:[#allocation6 + $0xc8] sm:$0xff] }
0x17f8   :  { %v6081_v28 = vmax.f32 %v6073_v42, 0.0  ;;  %v14015_v15 = vpop.f32.mrb[98].mxu0  ;;  %v6271_v12 = vadd.f32 %v6269_v41, %v6267_v18  ;;  %v6665_v6 = vld [vmem:[#allocation6 + $0x80] sm:$0xff]  ;;  %v6667_v42 = vld [vmem:[#allocation6 + $0x90] sm:$0xff]  ;;  %v6676_v41 = vld [vmem:[#allocation6 + $0xd8] sm:$0xff] }
0x17f9   :  { %v6084_v0 = vadd.f32 %v6082_v24, %v6000_v4  ;;  %v6166_v13 = vadd.f32 %v17039_v50, %v14015_v15  ;;  %v6160_v57 = vpop.f32.mrb[99].mxu0  ;;  %v14490_v24 = vpack.c.bf16 %v6669_v32, %v6665_v6  ;;  %v14498_v30 = vpack.c.bf16 %v6671_v60, %v6667_v42  ;;  %v6673_v18 = vld [vmem:[#allocation6 + $0xc0] sm:$0xff]  ;;  %v7418_v6 = vld [vmem:[#allocation6 + $0x1f8] sm:$0xff] }
0x17fa   :  { %v6083_v58 = vadd.f32 %v6081_v28, %v16944_v5  ;;  %v6161_v48 = vadd.f32 %v17039_v50, %v6160_v57  ;;  %v6274_v21 = vld [vmem:[#allocation3 + $0x38] sm:$0xf]  ;;  %v6677_v15 = vld [vmem:[#allocation6 + $0xe0] sm:$0xff] }
0x17fb   :  { %6086 = vst.msk [vmem:[#allocation3 + $0x58] sm:$0xf] %vm4925_vm3, %v6084_v0  ;;  %v6170_v49 = vmax.f32 %v6166_v13, 0.0  ;;  %v6273_v39 = vld [vmem:[#allocation3 + $0x30] sm:$0xff]  ;;  %v6276_v44 = vadd.f32 %v6274_v21, %v6272_v31  ;;  %v14494_v31 = vpack.c.bf16 %v6677_v15, %v6673_v18  ;;  %v7411_v60 = vld [vmem:[#allocation6 + $0x1c0] sm:$0xff] }
0x17fc   :  { %6085 = vst.msk [vmem:[#allocation3 + $0x50] sm:$0xff] %vm376_vm1, %v6083_v58  ;;  %v6169_v25 = vmax.f32 %v6161_v48, 0.0  ;;  %v14022_v29 = vpop.f32.mrb[100].mxu0  ;;  %v6275_v33 = vadd.f32 %v6273_v39, %v6271_v12  ;;  %v6675_v0 = vld [vmem:[#allocation6 + $0xd0] sm:$0xff]  ;;  %v7035_v48 = vld [vmem:[#allocation6 + $0x108] sm:$0xff]  ;;  %v7041_v39 = vld [vmem:[#allocation6 + $0x138] sm:$0xff] }
0x17fd   :  { %v6172_v35 = vadd.f32 %v6170_v49, %v6088_v19  ;;  %v6254_v37 = vadd.f32 %v17039_v50, %v14022_v29  ;;  %v6248_v20 = vpop.f32.mrb[101].mxu0  ;;  %6278 = vst.msk [vmem:[#allocation5 + $0x8] sm:$0xf] %vm4925_vm3, %v6276_v44  ;;  %v6679_v13 = vld [vmem:[#allocation6 + $0xf0] sm:$0xff]  ;;  %v7039_v12 = vld [vmem:[#allocation6 + $0x128] sm:$0xff]  ;;  %v7037_v49 = vld [vmem:[#allocation6 + $0x118] sm:$0xff] }
0x17fe   :  { %v6171_v5 = vadd.f32 %v6169_v25, %v16950_v47  ;;  %v6249_v27 = vadd.f32 %v17039_v50, %v6248_v20  ;;  %6277 = vst.msk [vmem:[#allocation5] sm:$0xff] %vm376_vm1, %v6275_v33  ;;  %v6670_v47 = vld [vmem:[#allocation6 + $0xa8] sm:$0xff]  ;;  %v14502_v58 = vpack.c.bf16 %v6679_v13, %v6675_v0  ;;  %v7034_v44 = vld [vmem:[#allocation6 + $0x100] sm:$0xff]  ;;  %v14520_v25 = vpack.c.bf16 %v7039_v12, %v7035_v48  ;;  %v7036_v33 = vld [vmem:[#allocation6 + $0x110] sm:$0xff] }
0x17ff   :  { %6174 = vst.msk [vmem:[#allocation3 + $0x68] sm:$0xf] %vm4925_vm3, %v6172_v35  ;;  %v6258_v63 = vmax.f32 %v6254_v37, 0.0  ;;  %v14488_v8 = vpack.c.bf16 %v6670_v47, %v6666_v43  ;;  %v7038_v19 = vld [vmem:[#allocation6 + $0x120] sm:$0xff]  ;;  %v14528_v29 = vpack.c.bf16 %v7041_v39, %v7037_v49  ;;  %v7040_v35 = vld [vmem:[#allocation6 + $0x130] sm:$0xff]  ;;  %v7043_v37 = vld [vmem:[#allocation6 + $0x148] sm:$0xff] }
0x1800   :  { %6173 = vst.msk [vmem:[#allocation3 + $0x60] sm:$0xff] %vm376_vm1, %v6171_v5  ;;  %v6257_v52 = vmax.f32 %v6249_v27, 0.0  ;;  %v7047_v20 = vld [vmem:[#allocation6 + $0x168] sm:$0xff]  ;;  %v7045_v5 = vld [vmem:[#allocation6 + $0x158] sm:$0xff]  ;;  %v7046_v43 = vld [vmem:[#allocation6 + $0x160] sm:$0xff] }
0x1801   :  { %v6260_v46 = vadd.f32 %v6258_v63, %v6176_v22  ;;  %v7049_v27 = vld [vmem:[#allocation6 + $0x178] sm:$0xff]  ;;  %v14522_v63 = vpack.c.bf16 %v7038_v19, %v7034_v44  ;;  %v14530_v22 = vpack.c.bf16 %v7040_v35, %v7036_v33  ;;  %v7044_v47 = vld [vmem:[#allocation6 + $0x150] sm:$0xff]  ;;  %v7781_v49 = vld [vmem:[#allocation6 + $0x248] sm:$0xff] }
0x1802   :  { %v6259_v36 = vadd.f32 %v6257_v52, %v16955_v11  ;;  %v6282_v53 = vld [vmem:[#allocation3 + $0x58] sm:$0xf]  ;;  %v7042_v52 = vld [vmem:[#allocation6 + $0x140] sm:$0xff]  ;;  %v14534_v34 = vpack.c.bf16 %v7048_v61, %v7044_v47  ;;  %v7774_v12 = vld [vmem:[#allocation6 + $0x210] sm:$0xff] }
0x1803   :  { %6262 = vst.msk [vmem:[#allocation3 + $0x78] sm:$0xf] %vm4925_vm3, %v6260_v46  ;;  %v6281_v50 = vld [vmem:[#allocation3 + $0x50] sm:$0xff]  ;;  %v14524_v46 = vpack.c.bf16 %v7047_v20, %v7043_v37  ;;  %v7775_v0 = vld [vmem:[#allocation6 + $0x218] sm:$0xff]  ;;  %v7785_v39 = vld [vmem:[#allocation6 + $0x268] sm:$0xff] }
0x1804   :  { %6261 = vst.msk [vmem:[#allocation3 + $0x70] sm:$0xff] %vm376_vm1, %v6259_v36  ;;  %v6283_v11 = vadd.f32 %v6281_v50, %v6279_v59  ;;  %v14532_v36 = vpack.c.bf16 %v7049_v27, %v7045_v5  ;;  %v7404_v59 = vld [vmem:[#allocation6 + $0x188] sm:$0xff]  ;;  %v7779_v13 = vld [vmem:[#allocation6 + $0x238] sm:$0xff]  ;;  %v7780_v33 = vld [vmem:[#allocation6 + $0x240] sm:$0xff]  ;;  %v14588_v35 = vpack.c.bf16 %v7785_v39, %v7781_v49 }
0x1805   :  { %v6312_v23 = vld [vmem:[#allocation5] sm:$0x1]  ;;  %v6681_v21 = vld [vmem:[#allocation5 + $0x1] sm:$0x1]  ;;  %v7419_v15 = vld [vmem:[#allocation5 + $0x3] sm:$0x1]  ;;  %v14592_v48 = vpack.c.bf16 %v7779_v13, %v7775_v0 }
0x1806   :  { %12729 = vmatmul.mubr.msk.f32.vlgmr.msra.gmra.mrb[102].mxu0 %vm376_vm1, %v6312_v23  ;;  %12730 = vmatmul.mubr.msk.f32.vlgmr.msra.gmra.mrb[106].mxu1 %vm376_vm1, %v6312_v23  ;;  %v6286_v1 = vld [vmem:[#allocation3 + $0x68] sm:$0xf]  ;;  %v14526_v23 = vpack.c.bf16 %v7046_v43, %v7042_v52  ;;  %v7783_v44 = vld [vmem:[#allocation6 + $0x258] sm:$0xff]  ;;  %v7784_v20 = vld [vmem:[#allocation6 + $0x260] sm:$0xff] }
0x1807   :  { %v6285_v62 = vld [vmem:[#allocation3 + $0x60] sm:$0xff]  ;;  %14475 = vmatpush1.bf16.msra.mxu0 %v17020_v26  ;;  %14483 = vmatpush1.bf16.msra.mxu1 %v17022_v7  ;;  %v7787_v19 = vld [vmem:[#allocation6 + $0x278] sm:$0xff]  ;;  %v7782_v5 = vld [vmem:[#allocation6 + $0x250] sm:$0xff] }
0x1808   :  { %14477 = vmatprep.subr.bf16.mxu0 %v17026_v3  ;;  %14485 = vmatprep.subr.bf16.mxu1 %v17028_v38  ;;  %v6287_v16 = vadd.f32 %v6285_v62, %v6283_v11  ;;  %v6284_v3 = vadd.f32 %v6282_v53, %v6280_v17  ;;  %v7408_v62 = vld [vmem:[#allocation6 + $0x1a8] sm:$0xff]  ;;  %v7050_v11 = vld [vmem:[#allocation5 + $0x2] sm:$0x1]  ;;  %v14596_v37 = vpack.c.bf16 %v7787_v19, %v7783_v44  ;;  %v7786_v27 = vld [vmem:[#allocation6 + $0x270] sm:$0xff] }
0x1809   :  { %6556 = vmatprep.mubr.f32.mxu0 %v15794_v9  ;;  %6627 = vmatprep.mubr.f32.mxu1 %v15794_v9  ;;  %v7403_v53 = vld [vmem:[#allocation6 + $0x180] sm:$0xff]  ;;  %v14598_v52 = vpack.c.bf16 %v7786_v27, %v7782_v5  ;;  %v8144_v47 = vld [vmem:[#allocation6 + $0x298] sm:$0xff]  ;;  %v8519_v0 = vld [vmem:[#allocation6 + $0x348] sm:$0xff] }
0x180a   :  { %v6290_v38 = vld [vmem:[#allocation3 + $0x78] sm:$0xf]  ;;  %v6288_v2 = vadd.f32 %v6286_v1, %v6284_v3  ;;  %v7409_v3 = vld [vmem:[#allocation6 + $0x1b0] sm:$0xff]  ;;  %v7412_v1 = vld [vmem:[#allocation6 + $0x1c8] sm:$0xff] }
0x180b   :  { %14479 = vmatpush1.bf16.msra.mxu0 %v17030_v56  ;;  %14487 = vmatpush1.bf16.msra.mxu1 %v17033_v10  ;;  %v6289_v26 = vld [vmem:[#allocation3 + $0x70] sm:$0xff]  ;;  %v6678_v56 = vld [vmem:[#allocation6 + $0xe8] sm:$0xff]  ;;  %v6680_v10 = vld [vmem:[#allocation6 + $0xf8] sm:$0xff] }
0x180c   :  { %14489 = vmatprep.subr.bf16.mxu0 %v14488_v8  ;;  %14497 = vmatprep.subr.bf16.mxu1 %v14496_v40  ;;  %v6291_v7 = vadd.f32 %v6289_v26, %v6287_v16  ;;  %v6292_v14 = vadd.f32 %v6290_v38, %v6288_v2  ;;  %v14492_v4 = vpack.c.bf16 %v6678_v56, %v6674_v55  ;;  %v7407_v16 = vld [vmem:[#allocation6 + $0x1a0] sm:$0xff]  ;;  %v7416_v38 = vld [vmem:[#allocation6 + $0x1e8] sm:$0xff]  ;;  %v7414_v2 = vld [vmem:[#allocation6 + $0x1d8] sm:$0xff] }
0x180d   :  { %v14500_v28 = vpack.c.bf16 %v6680_v10, %v6676_v41  ;;  %v14552_v26 = vpack.c.bf16 %v7408_v62, %v7404_v59  ;;  %v14554_v32 = vpack.c.bf16 %v7407_v16, %v7403_v53  ;;  %v14556_v55 = vpack.c.bf16 %v7416_v38, %v7412_v1  ;;  %v7415_v56 = vld [vmem:[#allocation6 + $0x1e0] sm:$0xff]  ;;  %v7413_v41 = vld [vmem:[#allocation6 + $0x1d0] sm:$0xff]  ;;  %v8148_v61 = vld [vmem:[#allocation6 + $0x2b8] sm:$0xff] }
0x180e   :  { %6293 = vst.msk [vmem:[#allocation5 + $0x10] sm:$0xff] %vm376_vm1, %v6291_v7  ;;  %v7405_v7 = vld [vmem:[#allocation6 + $0x190] sm:$0xff]  ;;  %v7788_v43 = vld [vmem:[#allocation5 + $0x4] sm:$0x1]  ;;  %v14624_v59 = vpack.c.bf16 %v8148_v61, %v8144_v47  ;;  %v8152_v53 = vld [vmem:[#allocation6 + $0x2d8] sm:$0xff] }
0x180f   :  { %6294 = vst.msk [vmem:[#allocation5 + $0x18] sm:$0xf] %vm4925_vm3, %v6292_v14  ;;  %v14562_v42 = vpack.c.bf16 %v7409_v3, %v7405_v7  ;;  %v14564_v14 = vpack.c.bf16 %v7418_v6, %v7414_v2  ;;  %v7417_v10 = vld [vmem:[#allocation6 + $0x1f0] sm:$0xff]  ;;  %v8156_v16 = vld [vmem:[#allocation6 + $0x2f8] sm:$0xff]  ;;  %v8149_v7 = vld [vmem:[#allocation6 + $0x2c0] sm:$0xff] }
0x1810   :  { %v14566_v18 = vpack.c.bf16 %v7417_v10, %v7413_v41  ;;  %v8143_v62 = vld [vmem:[#allocation6 + $0x290] sm:$0xff]  ;;  %v14628_v1 = vpack.c.bf16 %v8156_v16, %v8152_v53  ;;  %v8153_v38 = vld [vmem:[#allocation6 + $0x2e0] sm:$0xff]  ;;  %v8513_v41 = vld [vmem:[#allocation6 + $0x318] sm:$0xff] }
0x1811   :  { %v8151_v2 = vld [vmem:[#allocation6 + $0x2d0] sm:$0xff]  ;;  %v8517_v10 = vld [vmem:[#allocation6 + $0x338] sm:$0xff]  ;;  %v8523_v13 = vld [vmem:[#allocation6 + $0x368] sm:$0xff] }
0x1812   :  { %v8155_v6 = vld [vmem:[#allocation6 + $0x2f0] sm:$0xff]  ;;  %v8522_v39 = vld [vmem:[#allocation6 + $0x360] sm:$0xff]  ;;  %v8882_v5 = vld [vmem:[#allocation6 + $0x398] sm:$0xff] }
0x1813   :  { %v8520_v44 = vld [vmem:[#allocation6 + $0x350] sm:$0xff]  ;;  %v8886_v27 = vld [vmem:[#allocation6 + $0x3b8] sm:$0xff]  ;;  %v8888_v47 = vld [vmem:[#allocation6 + $0x3c8] sm:$0xff] }
0x1814   :  { %v8524_v19 = vld [vmem:[#allocation6 + $0x370] sm:$0xff]  ;;  %v8892_v61 = vld [vmem:[#allocation6 + $0x3e8] sm:$0xff] }
0x1815   :  { %v6488_v57 = vld [vmem:[#allocation5 + $0x10] sm:$0x1]  ;;  %v6857_v50 = vld [vmem:[#allocation5 + $0x11] sm:$0x1] }
0x1816   :  { %12731 = vmatmul.mubr.msk.f32.vlgmr.msra.gmra.mrb[104].mxu0 %vm376_vm1, %v6488_v57  ;;  %12732 = vmatmul.mubr.msk.f32.vlgmr.msra.gmra.mrb[108].mxu1 %vm376_vm1, %v6488_v57  ;;  %v7772_v57 = vld [vmem:[#allocation6 + $0x200] sm:$0xff]  ;;  %v8889_v53 = vld [vmem:[#allocation6 + $0x3d0] sm:$0xff] }
0x1817   :  { %14491 = vmatpush1.bf16.msra.mxu0 %v14490_v24  ;;  %14499 = vmatpush1.bf16.msra.mxu1 %v14498_v30  ;;  %v8893_v16 = vld [vmem:[#allocation6 + $0x3f0] sm:$0xff] }
0x1818   :  { %14493 = vmatprep.subr.bf16.mxu0 %v14492_v4  ;;  %14501 = vmatprep.subr.bf16.mxu1 %v14500_v28 }
0x1819   :  { %6749 = vmatprep.mubr.f32.mxu0 %v15794_v9  ;;  %6820 = vmatprep.mubr.f32.mxu1 %v15794_v9 }
0x181b   :  { %14495 = vmatpush1.bf16.msra.mxu0 %v14494_v31  ;;  %14503 = vmatpush1.bf16.msra.mxu1 %v14502_v58 }
0x181c   :  { %14505 = vmatprep.subr.bf16.mxu0 %v14488_v8  ;;  %14513 = vmatprep.subr.bf16.mxu1 %v14496_v40  ;;  %v7406_v8 = vld [vmem:[#allocation6 + $0x198] sm:$0xff] }
0x181d   :  { %v7410_v40 = vld [vmem:[#allocation6 + $0x1b8] sm:$0xff] }
0x181e   :  { %12733 = vmatmul.mubr.msk.f32.vlgmr.msra.gmra.mrb[106].mxu0 %vm376_vm1, %v6681_v21  ;;  %12734 = vmatmul.mubr.msk.f32.vlgmr.msra.gmra.mrb[110].mxu1 %vm376_vm1, %v6681_v21  ;;  %v14560_v17 = vpack.c.bf16 %v7410_v40, %v7406_v8  ;;  %v7778_v21 = vld [vmem:[#allocation6 + $0x230] sm:$0xff]  ;;  %v8150_v8 = vld [vmem:[#allocation6 + $0x2c8] sm:$0xff] }
0x181f   :  { %14507 = vmatpush1.bf16.msra.mxu0 %v14490_v24  ;;  %14515 = vmatpush1.bf16.msra.mxu1 %v14498_v30  ;;  %v7226_v24 = vld [vmem:[#allocation5 + $0x12] sm:$0x1]  ;;  %v14558_v30 = vpack.c.bf16 %v7415_v56, %v7411_v60  ;;  %v8154_v40 = vld [vmem:[#allocation6 + $0x2e8] sm:$0xff]  ;;  %v14630_v60 = vpack.c.bf16 %v8155_v6, %v8151_v2  ;;  %v8157_v56 = vld [vmem:[#allocation5 + $0x5] sm:$0x1] }
0x1820   :  { %14509 = vmatprep.subr.bf16.mxu0 %v14492_v4  ;;  %14517 = vmatprep.subr.bf16.mxu1 %v14500_v28  ;;  %v7773_v4 = vld [vmem:[#allocation6 + $0x208] sm:$0xff]  ;;  %v14620_v3 = vpack.c.bf16 %v8154_v40, %v8150_v8  ;;  %v8891_v40 = vld [vmem:[#allocation6 + $0x3e0] sm:$0xff]  ;;  %v9251_v2 = vld [vmem:[#allocation6 + $0x418] sm:$0xff] }
0x1821   :  { %6925 = vmatprep.mubr.f32.mxu0 %v15794_v9  ;;  %6996 = vmatprep.mubr.f32.mxu1 %v15794_v9  ;;  %v7777_v28 = vld [vmem:[#allocation6 + $0x228] sm:$0xff]  ;;  %v9255_v6 = vld [vmem:[#allocation6 + $0x438] sm:$0xff] }
0x1823   :  { %14511 = vmatpush1.bf16.msra.mxu0 %v14494_v31  ;;  %14519 = vmatpush1.bf16.msra.mxu1 %v14502_v58  ;;  %v7776_v31 = vld [vmem:[#allocation6 + $0x220] sm:$0xff]  ;;  %v14584_v58 = vpack.c.bf16 %v7777_v28, %v7773_v4  ;;  %v14656_v4 = vpack.c.bf16 %v8517_v10, %v8513_v41  ;;  %v8512_v28 = vld [vmem:[#allocation6 + $0x310] sm:$0xff]  ;;  %v9257_v41 = vld [vmem:[#allocation6 + $0x448] sm:$0xff] }
0x1824   :  { %14521 = vmatprep.subr.bf16.mxu0 %v14520_v25  ;;  %14529 = vmatprep.subr.bf16.mxu1 %v14528_v29  ;;  %v9261_v10 = vld [vmem:[#allocation6 + $0x468] sm:$0xff] }
0x1826   :  { %12735 = vmatmul.mubr.msk.f32.vlgmr.msra.gmra.mrb[108].mxu0 %vm376_vm1, %v6857_v50  ;;  %12736 = vmatmul.mubr.msk.f32.vlgmr.msra.gmra.mrb[112].mxu1 %vm376_vm1, %v6857_v50  ;;  %v8141_v50 = vld [vmem:[#allocation6 + $0x280] sm:$0xff] }
0x1827   :  { %14523 = vmatpush1.bf16.msra.mxu0 %v14522_v63  ;;  %14531 = vmatpush1.bf16.msra.mxu1 %v14530_v22 }
0x1828   :  { %14525 = vmatprep.subr.bf16.mxu0 %v14524_v46  ;;  %14533 = vmatprep.subr.bf16.mxu1 %v14532_v36 }
0x1829   :  { %7118 = vmatprep.mubr.f32.mxu0 %v15794_v9  ;;  %7189 = vmatprep.mubr.f32.mxu1 %v15794_v9 }
0x182b   :  { %14527 = vmatpush1.bf16.msra.mxu0 %v14526_v23  ;;  %14535 = vmatpush1.bf16.msra.mxu1 %v14534_v34 }
0x182c   :  { %14537 = vmatprep.subr.bf16.mxu0 %v14520_v25  ;;  %14545 = vmatprep.subr.bf16.mxu1 %v14528_v29  ;;  %v14586_v25 = vpack.c.bf16 %v7776_v31, %v7772_v57  ;;  %v14594_v29 = vpack.c.bf16 %v7778_v21, %v7774_v12  ;;  %v8521_v57 = vld [vmem:[#allocation6 + $0x358] sm:$0xff]  ;;  %v8518_v12 = vld [vmem:[#allocation6 + $0x340] sm:$0xff]  ;;  %v14652_v21 = vpack.c.bf16 %v8523_v13, %v8519_v0 }
0x182d   :  { %v8525_v31 = vld [vmem:[#allocation6 + $0x378] sm:$0xff]  ;;  %v9260_v13 = vld [vmem:[#allocation6 + $0x460] sm:$0xff] }
0x182e   :  { %12737 = vmatmul.mubr.msk.f32.vlgmr.msra.gmra.mrb[110].mxu0 %vm376_vm1, %v7050_v11  ;;  %12738 = vmatmul.mubr.msk.f32.vlgmr.msra.gmra.mrb[114].mxu1 %vm376_vm1, %v7050_v11  ;;  %v8147_v11 = vld [vmem:[#allocation6 + $0x2b0] sm:$0xff]  ;;  %v14660_v49 = vpack.c.bf16 %v8525_v31, %v8521_v57 }
0x182f   :  { %14539 = vmatpush1.bf16.msra.mxu0 %v14522_v63  ;;  %14547 = vmatpush1.bf16.msra.mxu1 %v14530_v22  ;;  %v7595_v63 = vld [vmem:[#allocation5 + $0x13] sm:$0x1]  ;;  %v14590_v22 = vpack.c.bf16 %v7784_v20, %v7780_v33  ;;  %v14662_v33 = vpack.c.bf16 %v8524_v19, %v8520_v44  ;;  %v8526_v20 = vld [vmem:[#allocation5 + $0x6] sm:$0x1]  ;;  %v9620_v44 = vld [vmem:[#allocation6 + $0x498] sm:$0xff] }
0x1830   :  { %14541 = vmatprep.subr.bf16.mxu0 %v14524_v46  ;;  %14549 = vmatprep.subr.bf16.mxu1 %v14532_v36  ;;  %v8142_v46 = vld [vmem:[#allocation6 + $0x288] sm:$0xff]  ;;  %v9258_v57 = vld [vmem:[#allocation6 + $0x450] sm:$0xff]  ;;  %v9624_v19 = vld [vmem:[#allocation6 + $0x4b8] sm:$0xff] }
0x1831   :  { %7294 = vmatprep.mubr.f32.mxu0 %v15794_v9  ;;  %7365 = vmatprep.mubr.f32.mxu1 %v15794_v9  ;;  %v8146_v36 = vld [vmem:[#allocation6 + $0x2a8] sm:$0xff]  ;;  %v9262_v31 = vld [vmem:[#allocation6 + $0x470] sm:$0xff] }
0x1833   :  { %14543 = vmatpush1.bf16.msra.mxu0 %v14526_v23  ;;  %14551 = vmatpush1.bf16.msra.mxu1 %v14534_v34  ;;  %v8145_v23 = vld [vmem:[#allocation6 + $0x2a0] sm:$0xff]  ;;  %v14616_v34 = vpack.c.bf16 %v8146_v36, %v8142_v46  ;;  %v14688_v46 = vpack.c.bf16 %v8886_v27, %v8882_v5  ;;  %v8881_v36 = vld [vmem:[#allocation6 + $0x390] sm:$0xff]  ;;  %v9626_v5 = vld [vmem:[#allocation6 + $0x4c8] sm:$0xff] }
0x1834   :  { %14553 = vmatprep.subr.bf16.mxu0 %v14552_v26  ;;  %14561 = vmatprep.subr.bf16.mxu1 %v14560_v17  ;;  %v9630_v27 = vld [vmem:[#allocation6 + $0x4e8] sm:$0xff] }
0x1836   :  { %12739 = vmatmul.mubr.msk.f32.vlgmr.msra.gmra.mrb[112].mxu0 %vm376_vm1, %v7226_v24  ;;  %12740 = vmatmul.mubr.msk.f32.vlgmr.msra.gmra.mrb[116].mxu1 %vm376_vm1, %v7226_v24  ;;  %v8510_v24 = vld [vmem:[#allocation6 + $0x300] sm:$0xff] }
0x1837   :  { %14555 = vmatpush1.bf16.msra.mxu0 %v14554_v32  ;;  %14563 = vmatpush1.bf16.msra.mxu1 %v14562_v42 }
0x1838   :  { %14557 = vmatprep.subr.bf16.mxu0 %v14556_v55  ;;  %14565 = vmatprep.subr.bf16.mxu1 %v14564_v14 }
0x1839   :  { %7487 = vmatprep.mubr.f32.mxu0 %v15794_v9  ;;  %7558 = vmatprep.mubr.f32.mxu1 %v15794_v9 }
0x183b   :  { %14559 = vmatpush1.bf16.msra.mxu0 %v14558_v30  ;;  %14567 = vmatpush1.bf16.msra.mxu1 %v14566_v18 }
0x183c   :  { %14569 = vmatprep.subr.bf16.mxu0 %v14552_v26  ;;  %14577 = vmatprep.subr.bf16.mxu1 %v14560_v17  ;;  %v14618_v26 = vpack.c.bf16 %v8145_v23, %v8141_v50  ;;  %v14626_v17 = vpack.c.bf16 %v8147_v11, %v8143_v62  ;;  %v8890_v50 = vld [vmem:[#allocation6 + $0x3d8] sm:$0xff]  ;;  %v8887_v62 = vld [vmem:[#allocation6 + $0x3c0] sm:$0xff]  ;;  %v14684_v11 = vpack.c.bf16 %v8892_v61, %v8888_v47 }
0x183d   :  { %v8894_v23 = vld [vmem:[#allocation6 + $0x3f8] sm:$0xff]  ;;  %v9629_v61 = vld [vmem:[#allocation6 + $0x4e0] sm:$0xff] }
0x183e   :  { %12741 = vmatmul.mubr.msk.f32.vlgmr.msra.gmra.mrb[114].mxu0 %vm376_vm1, %v7419_v15  ;;  %12742 = vmatmul.mubr.msk.f32.vlgmr.msra.gmra.mrb[118].mxu1 %vm376_vm1, %v7419_v15  ;;  %v8516_v15 = vld [vmem:[#allocation6 + $0x330] sm:$0xff]  ;;  %v14692_v8 = vpack.c.bf16 %v8894_v23, %v8890_v50 }
0x183f   :  { %14571 = vmatpush1.bf16.msra.mxu0 %v14554_v32  ;;  %14579 = vmatpush1.bf16.msra.mxu1 %v14562_v42  ;;  %v7964_v32 = vld [vmem:[#allocation5 + $0x14] sm:$0x1]  ;;  %v14622_v42 = vpack.c.bf16 %v8153_v38, %v8149_v7  ;;  %v14694_v7 = vpack.c.bf16 %v8893_v16, %v8889_v53  ;;  %v8895_v38 = vld [vmem:[#allocation5 + $0x7] sm:$0x1]  ;;  %v9989_v53 = vld [vmem:[#allocation6 + $0x518] sm:$0xff] }
0x1840   :  { %14573 = vmatprep.subr.bf16.mxu0 %v14556_v55  ;;  %14581 = vmatprep.subr.bf16.mxu1 %v14564_v14  ;;  %v8511_v55 = vld [vmem:[#allocation6 + $0x308] sm:$0xff]  ;;  %v9627_v50 = vld [vmem:[#allocation6 + $0x4d0] sm:$0xff]  ;;  %v9993_v16 = vld [vmem:[#allocation6 + $0x538] sm:$0xff] }
0x1841   :  { %7663 = vmatprep.mubr.f32.mxu0 %v15794_v9  ;;  %7734 = vmatprep.mubr.f32.mxu1 %v15794_v9  ;;  %v8515_v14 = vld [vmem:[#allocation6 + $0x328] sm:$0xff]  ;;  %v9631_v23 = vld [vmem:[#allocation6 + $0x4f0] sm:$0xff] }
0x1843   :  { %14575 = vmatpush1.bf16.msra.mxu0 %v14558_v30  ;;  %14583 = vmatpush1.bf16.msra.mxu1 %v14566_v18  ;;  %v8514_v30 = vld [vmem:[#allocation6 + $0x320] sm:$0xff]  ;;  %v14648_v18 = vpack.c.bf16 %v8515_v14, %v8511_v55  ;;  %v14720_v55 = vpack.c.bf16 %v9255_v6, %v9251_v2  ;;  %v9250_v14 = vld [vmem:[#allocation6 + $0x410] sm:$0xff]  ;;  %v9995_v2 = vld [vmem:[#allocation6 + $0x548] sm:$0xff] }
0x1844   :  { %14585 = vmatprep.subr.bf16.mxu0 %v14584_v58  ;;  %14593 = vmatprep.subr.bf16.mxu1 %v14592_v48  ;;  %v9999_v6 = vld [vmem:[#allocation6 + $0x568] sm:$0xff] }
0x1846   :  { %12743 = vmatmul.mubr.msk.f32.vlgmr.msra.gmra.mrb[116].mxu0 %vm376_vm1, %v7595_v63  ;;  %12744 = vmatmul.mubr.msk.f32.vlgmr.msra.gmra.mrb[120].mxu1 %vm376_vm1, %v7595_v63  ;;  %v8879_v63 = vld [vmem:[#allocation6 + $0x380] sm:$0xff] }
0x1847   :  { %14587 = vmatpush1.bf16.msra.mxu0 %v14586_v25  ;;  %14595 = vmatpush1.bf16.msra.mxu1 %v14594_v29 }
0x1848   :  { %14589 = vmatprep.subr.bf16.mxu0 %v14588_v35  ;;  %14597 = vmatprep.subr.bf16.mxu1 %v14596_v37 }
0x1849   :  { %7856 = vmatprep.mubr.f32.mxu0 %v15794_v9  ;;  %7927 = vmatprep.mubr.f32.mxu1 %v15794_v9 }
0x184b   :  { %14591 = vmatpush1.bf16.msra.mxu0 %v14590_v22  ;;  %14599 = vmatpush1.bf16.msra.mxu1 %v14598_v52 }
0x184c   :  { %14601 = vmatprep.subr.bf16.mxu0 %v14584_v58  ;;  %14609 = vmatprep.subr.bf16.mxu1 %v14592_v48  ;;  %v14650_v58 = vpack.c.bf16 %v8514_v30, %v8510_v24  ;;  %v14658_v48 = vpack.c.bf16 %v8516_v15, %v8512_v28  ;;  %v9259_v24 = vld [vmem:[#allocation6 + $0x458] sm:$0xff]  ;;  %v9256_v28 = vld [vmem:[#allocation6 + $0x440] sm:$0xff]  ;;  %v14716_v15 = vpack.c.bf16 %v9261_v10, %v9257_v41 }
0x184d   :  { %v9263_v30 = vld [vmem:[#allocation6 + $0x478] sm:$0xff]  ;;  %v9998_v10 = vld [vmem:[#allocation6 + $0x560] sm:$0xff] }
0x184e   :  { %12745 = vmatmul.mubr.msk.f32.vlgmr.msra.gmra.mrb[118].mxu0 %vm376_vm1, %v7788_v43  ;;  %12746 = vmatmul.mubr.msk.f32.vlgmr.msra.gmra.mrb[122].mxu1 %vm376_vm1, %v7788_v43  ;;  %v8885_v43 = vld [vmem:[#allocation6 + $0x3b0] sm:$0xff]  ;;  %v14724_v0 = vpack.c.bf16 %v9263_v30, %v9259_v24 }
0x184f   :  { %14603 = vmatpush1.bf16.msra.mxu0 %v14586_v25  ;;  %14611 = vmatpush1.bf16.msra.mxu1 %v14594_v29  ;;  %v8333_v25 = vld [vmem:[#allocation5 + $0x15] sm:$0x1]  ;;  %v14654_v29 = vpack.c.bf16 %v8522_v39, %v8518_v12  ;;  %v14726_v12 = vpack.c.bf16 %v9262_v31, %v9258_v57  ;;  %v9622_v39 = vld [vmem:[#allocation6 + $0x4a8] sm:$0xff]  ;;  %v10358_v57 = vld [vmem:[#allocation6 + $0x598] sm:$0xff] }
0x1850   :  { %14605 = vmatprep.subr.bf16.mxu0 %v14588_v35  ;;  %14613 = vmatprep.subr.bf16.mxu1 %v14596_v37  ;;  %v8880_v35 = vld [vmem:[#allocation6 + $0x388] sm:$0xff]  ;;  %v9996_v24 = vld [vmem:[#allocation6 + $0x550] sm:$0xff]  ;;  %v10362_v31 = vld [vmem:[#allocation6 + $0x5b8] sm:$0xff] }
0x1851   :  { %8032 = vmatprep.mubr.f32.mxu0 %v15794_v9  ;;  %8103 = vmatprep.mubr.f32.mxu1 %v15794_v9  ;;  %v8884_v37 = vld [vmem:[#allocation6 + $0x3a8] sm:$0xff]  ;;  %v10000_v30 = vld [vmem:[#allocation6 + $0x570] sm:$0xff] }
0x1853   :  { %14607 = vmatpush1.bf16.msra.mxu0 %v14590_v22  ;;  %14615 = vmatpush1.bf16.msra.mxu1 %v14598_v52  ;;  %v8883_v22 = vld [vmem:[#allocation6 + $0x3a0] sm:$0xff]  ;;  %v14680_v52 = vpack.c.bf16 %v8884_v37, %v8880_v35  ;;  %v14752_v35 = vpack.c.bf16 %v9624_v19, %v9620_v44  ;;  %v9619_v37 = vld [vmem:[#allocation6 + $0x490] sm:$0xff]  ;;  %v10364_v44 = vld [vmem:[#allocation6 + $0x5c8] sm:$0xff] }
0x1854   :  { %14617 = vmatprep.subr.bf16.mxu0 %v14616_v34  ;;  %14625 = vmatprep.subr.bf16.mxu1 %v14624_v59  ;;  %v10368_v19 = vld [vmem:[#allocation6 + $0x5e8] sm:$0xff] }
0x1856   :  { %12747 = vmatmul.mubr.msk.f32.vlgmr.msra.gmra.mrb[120].mxu0 %vm376_vm1, %v7964_v32  ;;  %12748 = vmatmul.mubr.msk.f32.vlgmr.msra.gmra.mrb[124].mxu1 %vm376_vm1, %v7964_v32  ;;  %v9248_v32 = vld [vmem:[#allocation6 + $0x400] sm:$0xff] }
0x1857   :  { %14619 = vmatpush1.bf16.msra.mxu0 %v14618_v26  ;;  %14627 = vmatpush1.bf16.msra.mxu1 %v14626_v17 }
0x1858   :  { %14621 = vmatprep.subr.bf16.mxu0 %v14620_v3  ;;  %14629 = vmatprep.subr.bf16.mxu1 %v14628_v1 }
0x1859   :  { %8225 = vmatprep.mubr.f32.mxu0 %v15794_v9  ;;  %8296 = vmatprep.mubr.f32.mxu1 %v15794_v9 }
0x185b   :  { %14623 = vmatpush1.bf16.msra.mxu0 %v14622_v42  ;;  %14631 = vmatpush1.bf16.msra.mxu1 %v14630_v60 }
0x185c   :  { %14633 = vmatprep.subr.bf16.mxu0 %v14616_v34  ;;  %14641 = vmatprep.subr.bf16.mxu1 %v14624_v59  ;;  %v14682_v34 = vpack.c.bf16 %v8883_v22, %v8879_v63  ;;  %v14690_v59 = vpack.c.bf16 %v8885_v43, %v8881_v36  ;;  %v9628_v63 = vld [vmem:[#allocation6 + $0x4d8] sm:$0xff]  ;;  %v9625_v36 = vld [vmem:[#allocation6 + $0x4c0] sm:$0xff]  ;;  %v14748_v43 = vpack.c.bf16 %v9630_v27, %v9626_v5 }
0x185d   :  { %v9632_v22 = vld [vmem:[#allocation6 + $0x4f8] sm:$0xff]  ;;  %v10367_v27 = vld [vmem:[#allocation6 + $0x5e0] sm:$0xff] }
0x185e   :  { %12749 = vmatmul.mubr.msk.f32.vlgmr.msra.gmra.mrb[122].mxu0 %vm376_vm1, %v8157_v56  ;;  %12750 = vmatmul.mubr.msk.f32.vlgmr.msra.gmra.mrb[126].mxu1 %vm376_vm1, %v8157_v56  ;;  %v9254_v56 = vld [vmem:[#allocation6 + $0x430] sm:$0xff]  ;;  %v14756_v47 = vpack.c.bf16 %v9632_v22, %v9628_v63 }
0x185f   :  { %14635 = vmatpush1.bf16.msra.mxu0 %v14618_v26  ;;  %14643 = vmatpush1.bf16.msra.mxu1 %v14626_v17  ;;  %v8702_v26 = vld [vmem:[#allocation5 + $0x16] sm:$0x1]  ;;  %v14686_v17 = vpack.c.bf16 %v8891_v40, %v8887_v62  ;;  %v14758_v62 = vpack.c.bf16 %v9631_v23, %v9627_v50  ;;  %v9991_v40 = vld [vmem:[#allocation6 + $0x528] sm:$0xff] }
0x1860   :  { %14637 = vmatprep.subr.bf16.mxu0 %v14620_v3  ;;  %14645 = vmatprep.subr.bf16.mxu1 %v14628_v1  ;;  %v9249_v3 = vld [vmem:[#allocation6 + $0x408] sm:$0xff]  ;;  %v10365_v63 = vld [vmem:[#allocation6 + $0x5d0] sm:$0xff] }
0x1861   :  { %8401 = vmatprep.mubr.f32.mxu0 %v15794_v9  ;;  %8472 = vmatprep.mubr.f32.mxu1 %v15794_v9  ;;  %v9253_v1 = vld [vmem:[#allocation6 + $0x428] sm:$0xff]  ;;  %v10369_v22 = vld [vmem:[#allocation6 + $0x5f0] sm:$0xff] }
0x1863   :  { %14639 = vmatpush1.bf16.msra.mxu0 %v14622_v42  ;;  %14647 = vmatpush1.bf16.msra.mxu1 %v14630_v60  ;;  %v9252_v42 = vld [vmem:[#allocation6 + $0x420] sm:$0xff]  ;;  %v14712_v60 = vpack.c.bf16 %v9253_v1, %v9249_v3  ;;  %v14784_v3 = vpack.c.bf16 %v9993_v16, %v9989_v53  ;;  %v9988_v1 = vld [vmem:[#allocation6 + $0x510] sm:$0xff] }
0x1864   :  { %14649 = vmatprep.subr.bf16.mxu0 %v14648_v18  ;;  %14657 = vmatprep.subr.bf16.mxu1 %v14656_v4 }
0x1866   :  { %12751 = vmatmul.mubr.msk.f32.vlgmr.msra.gmra.mrb[124].mxu0 %vm376_vm1, %v8333_v25  ;;  %12752 = vmatmul.mubr.msk.f32.vlgmr.msra.gmra.mrb[128].mxu1 %vm376_vm1, %v8333_v25  ;;  %v9617_v25 = vld [vmem:[#allocation6 + $0x480] sm:$0xff] }
0x1867   :  { %14651 = vmatpush1.bf16.msra.mxu0 %v14650_v58  ;;  %14659 = vmatpush1.bf16.msra.mxu1 %v14658_v48 }
0x1868   :  { %14653 = vmatprep.subr.bf16.mxu0 %v14652_v21  ;;  %14661 = vmatprep.subr.bf16.mxu1 %v14660_v49 }
0x1869   :  { %8594 = vmatprep.mubr.f32.mxu0 %v15794_v9  ;;  %8665 = vmatprep.mubr.f32.mxu1 %v15794_v9 }
0x186b   :  { %14655 = vmatpush1.bf16.msra.mxu0 %v14654_v29  ;;  %14663 = vmatpush1.bf16.msra.mxu1 %v14662_v33 }
0x186c   :  { %14665 = vmatprep.subr.bf16.mxu0 %v14648_v18  ;;  %14673 = vmatprep.subr.bf16.mxu1 %v14656_v4  ;;  %v14714_v18 = vpack.c.bf16 %v9252_v42, %v9248_v32  ;;  %v14722_v4 = vpack.c.bf16 %v9254_v56, %v9250_v14  ;;  %v9997_v32 = vld [vmem:[#allocation6 + $0x558] sm:$0xff]  ;;  %v9994_v14 = vld [vmem:[#allocation6 + $0x540] sm:$0xff]  ;;  %v14780_v56 = vpack.c.bf16 %v9999_v6, %v9995_v2  ;;  %v10731_v6 = vld [vmem:[#allocation9 + $0x8] sm:$0xff] }
0x186d   :  { %v10001_v42 = vld [vmem:[#allocation6 + $0x578] sm:$0xff] }
0x186e   :  { %12753 = vmatmul.mubr.msk.f32.vlgmr.msra.gmra.mrb[126].mxu0 %vm376_vm1, %v8526_v20  ;;  %12754 = vmatmul.mubr.msk.f32.vlgmr.msra.gmra.mrb[130].mxu1 %vm376_vm1, %v8526_v20  ;;  %v9623_v20 = vld [vmem:[#allocation6 + $0x4b0] sm:$0xff]  ;;  %v14788_v41 = vpack.c.bf16 %v10001_v42, %v9997_v32  ;;  %v10735_v32 = vld [vmem:[#allocation9 + $0x28] sm:$0xff]  ;;  %v10733_v42 = vld [vmem:[#allocation9 + $0x18] sm:$0xff] }
0x186f   :  { %14667 = vmatpush1.bf16.msra.mxu0 %v14650_v58  ;;  %14675 = vmatpush1.bf16.msra.mxu1 %v14658_v48  ;;  %v9071_v58 = vld [vmem:[#allocation5 + $0x17] sm:$0x1]  ;;  %v14718_v48 = vpack.c.bf16 %v9260_v13, %v9256_v28  ;;  %v14790_v28 = vpack.c.bf16 %v10000_v30, %v9996_v24  ;;  %v10360_v13 = vld [vmem:[#allocation6 + $0x5a8] sm:$0xff] }
0x1870   :  { %14669 = vmatprep.subr.bf16.mxu0 %v14652_v21  ;;  %14677 = vmatprep.subr.bf16.mxu1 %v14660_v49  ;;  %v9264_v21 = vld [vmem:[#allocation5 + $0x8] sm:$0x1] }
0x1871   :  { %8770 = vmatprep.mubr.f32.mxu0 %v15794_v9  ;;  %8841 = vmatprep.mubr.f32.mxu1 %v15794_v9  ;;  %v9618_v49 = vld [vmem:[#allocation6 + $0x488] sm:$0xff] }
0x1873   :  { %14671 = vmatpush1.bf16.msra.mxu0 %v14654_v29  ;;  %14679 = vmatpush1.bf16.msra.mxu1 %v14662_v33  ;;  %v9621_v29 = vld [vmem:[#allocation6 + $0x4a0] sm:$0xff]  ;;  %v14744_v33 = vpack.c.bf16 %v9622_v39, %v9618_v49  ;;  %v10357_v49 = vld [vmem:[#allocation6 + $0x590] sm:$0xff] }
0x1874   :  { %14681 = vmatprep.subr.bf16.mxu0 %v14680_v52  ;;  %14689 = vmatprep.subr.bf16.mxu1 %v14688_v46  ;;  %v10361_v39 = vld [vmem:[#allocation6 + $0x5b0] sm:$0xff] }
0x1876   :  { %12755 = vmatmul.mubr.msk.f32.vlgmr.msra.gmra.mrb[128].mxu0 %vm376_vm1, %v8702_v26  ;;  %12756 = vmatmul.mubr.msk.f32.vlgmr.msra.gmra.mrb[132].mxu1 %vm376_vm1, %v8702_v26  ;;  %v9986_v26 = vld [vmem:[#allocation6 + $0x500] sm:$0xff] }
0x1877   :  { %14683 = vmatpush1.bf16.msra.mxu0 %v14682_v34  ;;  %14691 = vmatpush1.bf16.msra.mxu1 %v14690_v59 }
0x1878   :  { %14685 = vmatprep.subr.bf16.mxu0 %v14684_v11  ;;  %14693 = vmatprep.subr.bf16.mxu1 %v14692_v8 }
0x1879   :  { %8963 = vmatprep.mubr.f32.mxu0 %v15794_v9  ;;  %9034 = vmatprep.mubr.f32.mxu1 %v15794_v9 }
0x187b   :  { %14687 = vmatpush1.bf16.msra.mxu0 %v14686_v17  ;;  %14695 = vmatpush1.bf16.msra.mxu1 %v14694_v7 }
0x187c   :  { %14697 = vmatprep.subr.bf16.mxu0 %v14680_v52  ;;  %14705 = vmatprep.subr.bf16.mxu1 %v14688_v46  ;;  %v14746_v52 = vpack.c.bf16 %v9621_v29, %v9617_v25  ;;  %v14754_v46 = vpack.c.bf16 %v9623_v20, %v9619_v37  ;;  %v10366_v25 = vld [vmem:[#allocation6 + $0x5d8] sm:$0xff]  ;;  %v10363_v37 = vld [vmem:[#allocation6 + $0x5c0] sm:$0xff]  ;;  %v14812_v20 = vpack.c.bf16 %v10368_v19, %v10364_v44 }
0x187d   :  { %v10370_v29 = vld [vmem:[#allocation6 + $0x5f8] sm:$0xff]  ;;  %v6295_v44 = vld [vmem:[%s17524_s22] sm:$0xf] }
0x187e   :  { %12757 = vmatmul.mubr.msk.f32.vlgmr.msra.gmra.mrb[130].mxu0 %vm376_vm1, %v8895_v38  ;;  %12758 = vmatmul.mubr.msk.f32.vlgmr.msra.gmra.mrb[134].mxu1 %vm376_vm1, %v8895_v38  ;;  %v9992_v38 = vld [vmem:[#allocation6 + $0x530] sm:$0xff]  ;;  %v14820_v5 = vpack.c.bf16 %v10370_v29, %v10366_v25 }
0x187f   :  { %14699 = vmatpush1.bf16.msra.mxu0 %v14682_v34  ;;  %14707 = vmatpush1.bf16.msra.mxu1 %v14690_v59  ;;  %v9440_v34 = vld [vmem:[#allocation5 + $0x18] sm:$0x1]  ;;  %v14750_v59 = vpack.c.bf16 %v9629_v61, %v9625_v36  ;;  %v14822_v36 = vpack.c.bf16 %v10369_v22, %v10365_v63  ;;  %v15797_v61 = vmov 1966171168   ;;  %v10747_v22 = vld [vmem:[#allocation9 + $0x88] sm:$0xff] }
0x1880   :  { %14701 = vmatprep.subr.bf16.mxu0 %v14684_v11  ;;  %14709 = vmatprep.subr.bf16.mxu1 %v14692_v8  ;;  %v9633_v11 = vld [vmem:[#allocation5 + $0x9] sm:$0x1]  ;;  %v6465_v50 = vunpack.c.l.s4 %v15797_v61  ;;  %v10746_v61 = vld [vmem:[#allocation9 + $0x80] sm:$0xff] }
0x1881   :  { %9139 = vmatprep.mubr.f32.mxu0 %v15794_v9  ;;  %9210 = vmatprep.mubr.f32.mxu1 %v15794_v9  ;;  %v9987_v8 = vld [vmem:[#allocation6 + $0x508] sm:$0xff] }
0x1882   :  { %v6466_v23 = vunpack.c.0.s8 %v6465_v50  ;;  %v10750_v50 = vld [vmem:[#allocation9 + $0xa0] sm:$0xff] }
0x1883   :  { %14703 = vmatpush1.bf16.msra.mxu0 %v14686_v17  ;;  %14711 = vmatpush1.bf16.msra.mxu1 %v14694_v7  ;;  %v9990_v17 = vld [vmem:[#allocation6 + $0x520] sm:$0xff]  ;;  %v14776_v7 = vpack.c.bf16 %v9991_v40, %v9987_v8 }
0x1884   :  { %14713 = vmatprep.subr.bf16.mxu0 %v14712_v60  ;;  %14721 = vmatprep.subr.bf16.mxu1 %v14720_v55 }
0x1886   :  { %12759 = vmatmul.mubr.msk.f32.vlgmr.msra.gmra.mrb[132].mxu0 %vm376_vm1, %v9071_v58  ;;  %12760 = vmatmul.mubr.msk.f32.vlgmr.msra.gmra.mrb[136].mxu1 %vm376_vm1, %v9071_v58  ;;  %v10355_v58 = vld [vmem:[#allocation6 + $0x580] sm:$0xff] }
0x1887   :  { %14715 = vmatpush1.bf16.msra.mxu0 %v14714_v18  ;;  %14723 = vmatpush1.bf16.msra.mxu1 %v14722_v4 }
0x1888   :  { %14717 = vmatprep.subr.bf16.mxu0 %v14716_v15  ;;  %14725 = vmatprep.subr.bf16.mxu1 %v14724_v0 }
0x1889   :  { %9332 = vmatprep.mubr.f32.mxu0 %v15794_v9  ;;  %9403 = vmatprep.mubr.f32.mxu1 %v15794_v9 }
0x188b   :  { %14719 = vmatpush1.bf16.msra.mxu0 %v14718_v48  ;;  %14727 = vmatpush1.bf16.msra.mxu1 %v14726_v12 }
0x188c   :  { %14729 = vmatprep.subr.bf16.mxu0 %v14712_v60  ;;  %14737 = vmatprep.subr.bf16.mxu1 %v14720_v55  ;;  %v14778_v60 = vpack.c.bf16 %v9990_v17, %v9986_v26  ;;  %v14786_v55 = vpack.c.bf16 %v9992_v38, %v9988_v1 }
0x188e   :  { %12761 = vmatmul.mubr.msk.f32.vlgmr.msra.gmra.mrb[134].mxu0 %vm376_vm1, %v9264_v21  ;;  %12762 = vmatmul.mubr.msk.f32.vlgmr.msra.gmra.mrb[138].mxu1 %vm376_vm1, %v9264_v21  ;;  %v14816_v21 = vpack.c.bf16 %v10362_v31, %v10358_v57  ;;  %v10741_v57 = vld [vmem:[#allocation9 + $0x58] sm:$0xff] }
0x188f   :  { %14731 = vmatpush1.bf16.msra.mxu0 %v14714_v18  ;;  %14739 = vmatpush1.bf16.msra.mxu1 %v14722_v4  ;;  %v9809_v18 = vld [vmem:[#allocation5 + $0x19] sm:$0x1]  ;;  %v14782_v4 = vpack.c.bf16 %v9998_v10, %v9994_v14  ;;  %v10730_v14 = vld [vmem:[#allocation9] sm:$0xff] }
0x1890   :  { %14733 = vmatprep.subr.bf16.mxu0 %v14716_v15  ;;  %14741 = vmatprep.subr.bf16.mxu1 %v14724_v0  ;;  %v10002_v15 = vld [vmem:[#allocation5 + $0xa] sm:$0x1] }
0x1891   :  { %9508 = vmatprep.mubr.f32.mxu0 %v15794_v9  ;;  %9579 = vmatprep.mubr.f32.mxu1 %v15794_v9  ;;  %v10356_v0 = vld [vmem:[#allocation6 + $0x588] sm:$0xff] }
0x1893   :  { %14735 = vmatpush1.bf16.msra.mxu0 %v14718_v48  ;;  %14743 = vmatpush1.bf16.msra.mxu1 %v14726_v12  ;;  %v10359_v48 = vld [vmem:[#allocation6 + $0x5a0] sm:$0xff]  ;;  %v14808_v12 = vpack.c.bf16 %v10360_v13, %v10356_v0  ;;  %v10739_v0 = vld [vmem:[#allocation9 + $0x48] sm:$0xff] }
0x1894   :  { %14745 = vmatprep.subr.bf16.mxu0 %v14744_v33  ;;  %14753 = vmatprep.subr.bf16.mxu1 %v14752_v35  ;;  %v10743_v13 = vld [vmem:[#allocation9 + $0x68] sm:$0xff] }
0x1896   :  { %12763 = vmatmul.mubr.msk.f32.vlgmr.msra.gmra.mrb[136].mxu0 %vm376_vm1, %v9440_v34  ;;  %12764 = vmatmul.mubr.msk.f32.vlgmr.msra.gmra.mrb[140].mxu1 %vm376_vm1, %v9440_v34  ;;  %v17176_v34 = vsub.s32 %v6466_v23, %v16518_v45 }
0x1897   :  { %14747 = vmatpush1.bf16.msra.mxu0 %v14746_v52  ;;  %14755 = vmatpush1.bf16.msra.mxu1 %v14754_v46 }
0x1898   :  { %14749 = vmatprep.subr.bf16.mxu0 %v14748_v43  ;;  %14757 = vmatprep.subr.bf16.mxu1 %v14756_v47 }
0x1899   :  { %9701 = vmatprep.mubr.f32.mxu0 %v15794_v9  ;;  %9772 = vmatprep.mubr.f32.mxu1 %v15794_v9 }
0x189b   :  { %14751 = vmatpush1.bf16.msra.mxu0 %v14750_v59  ;;  %14759 = vmatpush1.bf16.msra.mxu1 %v14758_v62 }
0x189c   :  { %14761 = vmatprep.subr.bf16.mxu0 %v14744_v33  ;;  %14769 = vmatprep.subr.bf16.mxu1 %v14752_v35  ;;  %v14810_v33 = vpack.c.bf16 %v10359_v48, %v10355_v58  ;;  %v14818_v35 = vpack.c.bf16 %v10361_v39, %v10357_v49  ;;  %v10738_v49 = vld [vmem:[#allocation9 + $0x40] sm:$0xff] }
0x189d   :  { %v10742_v39 = vld [vmem:[#allocation9 + $0x60] sm:$0xff] }
0x189e   :  { %12765 = vmatmul.mubr.msk.f32.vlgmr.msra.gmra.mrb[138].mxu0 %vm376_vm1, %v9633_v11  ;;  %12766 = vmatmul.mubr.msk.f32.vlgmr.msra.gmra.mrb[142].mxu1 %vm376_vm1, %v9633_v11 }
0x189f   :  { %14763 = vmatpush1.bf16.msra.mxu0 %v14746_v52  ;;  %14771 = vmatpush1.bf16.msra.mxu1 %v14754_v46  ;;  %v10178_v52 = vld [vmem:[#allocation5 + $0x1a] sm:$0x1]  ;;  %v14814_v46 = vpack.c.bf16 %v10367_v27, %v10363_v37  ;;  %v10744_v37 = vld [vmem:[#allocation9 + $0x70] sm:$0xff] }
0x18a0   :  { %14765 = vmatprep.subr.bf16.mxu0 %v14748_v43  ;;  %14773 = vmatprep.subr.bf16.mxu1 %v14756_v47  ;;  %v10371_v43 = vld [vmem:[#allocation5 + $0xb] sm:$0x1]  ;;  %v10547_v47 = vld [vmem:[#allocation5 + $0x1b] sm:$0x1] }
0x18a1   :  { %9877 = vmatprep.mubr.f32.mxu0 %v15794_v9  ;;  %9948 = vmatprep.mubr.f32.mxu1 %v15794_v9 }
0x18a3   :  { %14767 = vmatpush1.bf16.msra.mxu0 %v14750_v59  ;;  %14775 = vmatpush1.bf16.msra.mxu1 %v14758_v62 }
0x18a4   :  { %14777 = vmatprep.subr.bf16.mxu0 %v14776_v7  ;;  %14785 = vmatprep.subr.bf16.mxu1 %v14784_v3 }
0x18a6   :  { %12767 = vmatmul.mubr.msk.f32.vlgmr.msra.gmra.mrb[140].mxu0 %vm376_vm1, %v9809_v18  ;;  %12768 = vmatmul.mubr.msk.f32.vlgmr.msra.gmra.mrb[144].mxu1 %vm376_vm1, %v9809_v18  ;;  %v10732_v18 = vld [vmem:[#allocation9 + $0x10] sm:$0xff] }
0x18a7   :  { %14779 = vmatpush1.bf16.msra.mxu0 %v14778_v60  ;;  %14787 = vmatpush1.bf16.msra.mxu1 %v14786_v55 }
0x18a8   :  { %14781 = vmatprep.subr.bf16.mxu0 %v14780_v56  ;;  %14789 = vmatprep.subr.bf16.mxu1 %v14788_v41 }
0x18a9   :  { %10070 = vmatprep.mubr.f32.mxu0 %v15794_v9  ;;  %10141 = vmatprep.mubr.f32.mxu1 %v15794_v9 }
0x18ab   :  { %14783 = vmatpush1.bf16.msra.mxu0 %v14782_v4  ;;  %14791 = vmatpush1.bf16.msra.mxu1 %v14790_v28 }
0x18ac   :  { %14793 = vmatprep.subr.bf16.mxu0 %v14776_v7  ;;  %14801 = vmatprep.subr.bf16.mxu1 %v14784_v3 }
0x18ae   :  { %12769 = vmatmul.mubr.msk.f32.vlgmr.msra.gmra.mrb[142].mxu0 %vm376_vm1, %v10002_v15  ;;  %12770 = vmatmul.mubr.msk.f32.vlgmr.msra.gmra.mrb[146].mxu1 %vm376_vm1, %v10002_v15 }
0x18af   :  { %14795 = vmatpush1.bf16.msra.mxu0 %v14778_v60  ;;  %14803 = vmatpush1.bf16.msra.mxu1 %v14786_v55  ;;  %v14840_v60 = vpack.c.bf16 %v10735_v32, %v10731_v6  ;;  %v10737_v55 = vld [vmem:[#allocation9 + $0x38] sm:$0xff]  ;;  %v10754_v32 = vld [vmem:[#allocation9 + $0xc0] sm:$0xff] }
0x18b0   :  { %14797 = vmatprep.subr.bf16.mxu0 %v14780_v56  ;;  %14805 = vmatprep.subr.bf16.mxu1 %v14788_v41  ;;  %v10734_v56 = vld [vmem:[#allocation9 + $0x20] sm:$0xff]  ;;  %v14968_v24 = vpack.c.bf16 %v10737_v55, %v10733_v42  ;;  %v10761_v6 = vld [vmem:[#allocation9 + $0xf8] sm:$0xff] }
0x18b1   :  { %10246 = vmatprep.mubr.f32.mxu0 %v15794_v9  ;;  %10317 = vmatprep.mubr.f32.mxu1 %v15794_v9  ;;  %v14842_v30 = vpack.c.bf16 %v10734_v56, %v10730_v14  ;;  %v10758_v42 = vld [vmem:[#allocation9 + $0xe0] sm:$0xff] }
0x18b2   :  { %v14854_v56 = vpack.c.bf16 %v10758_v42, %v10754_v32 }
0x18b3   :  { %14799 = vmatpush1.bf16.msra.mxu0 %v14782_v4  ;;  %14807 = vmatpush1.bf16.msra.mxu1 %v14790_v28  ;;  %v10736_v4 = vld [vmem:[#allocation9 + $0x30] sm:$0xff] }
0x18b4   :  { %14809 = vmatprep.subr.bf16.mxu0 %v14808_v12  ;;  %14817 = vmatprep.subr.bf16.mxu1 %v14816_v21  ;;  %v14970_v28 = vpack.c.bf16 %v10736_v4, %v10732_v18 }
0x18b6   :  { %12771 = vmatmul.mubr.msk.f32.vlgmr.msra.gmra.mrb[144].mxu0 %vm376_vm1, %v10178_v52  ;;  %12772 = vmatmul.mubr.msk.f32.vlgmr.msra.gmra.mrb[148].mxu1 %vm376_vm1, %v10178_v52  ;;  %v10751_v52 = vld [vmem:[#allocation9 + $0xa8] sm:$0xff] }
0x18b7   :  { %14811 = vmatpush1.bf16.msra.mxu0 %v14810_v33  ;;  %14819 = vmatpush1.bf16.msra.mxu1 %v14818_v35 }
0x18b8   :  { %14813 = vmatprep.subr.bf16.mxu0 %v14812_v20  ;;  %14821 = vmatprep.subr.bf16.mxu1 %v14820_v5 }
0x18b9   :  { %10439 = vmatprep.mubr.f32.mxu0 %v15794_v9  ;;  %10510 = vmatprep.mubr.f32.mxu1 %v15794_v9 }
0x18bb   :  { %14815 = vmatpush1.bf16.msra.mxu0 %v14814_v46  ;;  %14823 = vmatpush1.bf16.msra.mxu1 %v14822_v36 }
0x18bc   :  { %14825 = vmatprep.subr.bf16.mxu0 %v14808_v12  ;;  %14833 = vmatprep.subr.bf16.mxu1 %v14816_v21  ;;  %v14844_v12 = vpack.c.bf16 %v10743_v13, %v10739_v0  ;;  %v10745_v21 = vld [vmem:[#allocation9 + $0x78] sm:$0xff] }
0x18bd   :  { %v14972_v29 = vpack.c.bf16 %v10745_v21, %v10741_v57  ;;  %v10765_v0 = vld [vmem:[#allocation9 + $0x118] sm:$0xff] }
0x18be   :  { %12773 = vmatmul.mubr.msk.f32.vlgmr.msra.gmra.mrb[146].mxu0 %vm376_vm1, %v10371_v43  ;;  %12774 = vmatmul.mubr.msk.f32.vlgmr.msra.gmra.mrb[150].mxu1 %vm376_vm1, %v10371_v43  ;;  %v14848_v43 = vpack.c.bf16 %v10751_v52, %v10747_v22  ;;  %v10769_v57 = vld [vmem:[#allocation9 + $0x138] sm:$0xff]  ;;  %v10770_v52 = vld [vmem:[#allocation9 + $0x140] sm:$0xff] }
0x18bf   :  { %14827 = vmatpush1.bf16.msra.mxu0 %v14810_v33  ;;  %14835 = vmatpush1.bf16.msra.mxu1 %v14818_v35  ;;  %v14846_v33 = vpack.c.bf16 %v10742_v39, %v10738_v49  ;;  %v10740_v35 = vld [vmem:[#allocation9 + $0x50] sm:$0xff]  ;;  %v14984_v21 = vpack.c.bf16 %v10769_v57, %v10765_v0  ;;  %v10777_v22 = vld [vmem:[#allocation9 + $0x178] sm:$0xff] }
0x18c0   :  { %14829 = vmatprep.subr.bf16.mxu0 %v14812_v20  ;;  %14837 = vmatprep.subr.bf16.mxu1 %v14820_v5  ;;  %v14974_v63 = vpack.c.bf16 %v10744_v37, %v10740_v35  ;;  %v10764_v39 = vld [vmem:[#allocation9 + $0x110] sm:$0xff]  ;;  %v10773_v35 = vld [vmem:[#allocation9 + $0x158] sm:$0xff] }
0x18c1   :  { %10615 = vmatprep.mubr.f32.mxu0 %v15794_v9  ;;  %10686 = vmatprep.mubr.f32.mxu1 %v15794_v9 }
0x18c3   :  { %14831 = vmatpush1.bf16.msra.mxu0 %v14814_v46  ;;  %14839 = vmatpush1.bf16.msra.mxu1 %v14822_v36  ;;  %v10749_v46 = vld [vmem:[#allocation9 + $0x98] sm:$0xff] }
0x18c4   :  { %14841 = vmatprep.subr.bf16.mxu0 %v14840_v60  ;;  %14969 = vmatprep.subr.bf16.mxu1 %v14968_v24 }
0x18c6   :  { %12775 = vmatmul.mubr.msk.f32.vlgmr.msra.gmra.mrb[148].mxu0 %vm376_vm1, %v10547_v47  ;;  %12776 = vmatmul.mubr.msk.f32.vlgmr.msra.gmra.mrb[152].mxu1 %vm376_vm1, %v10547_v47  ;;  %v10753_v47 = vld [vmem:[#allocation9 + $0xb8] sm:$0xff] }
0x18c7   :  { %14843 = vmatpush1.bf16.msra.mxu0 %v14842_v30  ;;  %14971 = vmatpush1.bf16.msra.mxu1 %v14970_v28  ;;  %v10763_v28 = vld [vmem:[#allocation9 + $0x108] sm:$0xff] }
0x18c8   :  { %14845 = vmatprep.subr.bf16.mxu0 %v14844_v12  ;;  %14973 = vmatprep.subr.bf16.mxu1 %v14972_v29  ;;  %v10771_v29 = vld [vmem:[#allocation9 + $0x148] sm:$0xff] }
0x18cb   :  { %14847 = vmatpush1.bf16.msra.mxu0 %v14846_v33  ;;  %14975 = vmatpush1.bf16.msra.mxu1 %v14974_v63  ;;  %v10775_v33 = vld [vmem:[#allocation9 + $0x168] sm:$0xff] }
0x18cc   :  { %14849 = vmatprep.subr.bf16.mxu0 %v14848_v43  ;;  %v14860_v63 = vpack.c.bf16 %v10775_v33, %v10771_v29  ;;  %v10801_v29 = vld [vmem:[#allocation9 + $0x238] sm:$0xff]  ;;  %v10794_v33 = vld [vmem:[#allocation9 + $0x200] sm:$0xff] }
0x18d9   :  { %v6382_v59 = vpop.f32.mrb[102].mxu0  ;;  %v6453_v62 = vpop.f32.mrb[106].mxu1 }
0x18da   :  { %v6384_v11 = vpop.f32.mrb[103].mxu0  ;;  %v6455_v8 = vpop.f32.mrb[107].mxu1 }
0x18db   :  { %v6462_v40 = vcombine.low %v6382_v59, %v6384_v11  ;;  %v6463_v53 = vcombine.low %v6453_v62, %v6455_v8  ;;  %v14976_v62 = vpack.c.bf16 %v10753_v47, %v10749_v46  ;;  %v14850_v11 = vpack.c.bf16 %v10750_v50, %v10746_v61  ;;  %v10748_v8 = vld [vmem:[#allocation9 + $0x90] sm:$0xff]  ;;  %v10774_v46 = vld [vmem:[#allocation9 + $0x160] sm:$0xff] }
0x18dc   :  { %v14988_v47 = vpack.c.bf16 %v10777_v22, %v10773_v35  ;;  %v14862_v61 = vpack.c.bf16 %v10774_v46, %v10770_v52  ;;  %v10772_v50 = vld [vmem:[#allocation9 + $0x150] sm:$0xff]  ;;  %v10798_v35 = vld [vmem:[#allocation9 + $0x220] sm:$0xff] }
0x18dd   :  { %v6470_v9 = vrot.slane %v6462_v40, %v17176_v34  ;;  %v6477_v16 = vrot.slane %v6463_v53, %v17176_v34  ;;  %v10752_v40 = vld [vmem:[#allocation9 + $0xb0] sm:$0xff]  ;;  %14977 = vmatprep.subr.bf16.mxu1 %v14976_v62  ;;  %14851 = vmatpush1.bf16.msra.mxu0 %v14850_v11 }
0x18de   :  { %v14978_v53 = vpack.c.bf16 %v10752_v40, %v10748_v8  ;;  %v10779_v40 = vld [vmem:[#allocation9 + $0x188] sm:$0xff]  ;;  %v10800_v22 = vld [vmem:[#allocation9 + $0x230] sm:$0xff] }
0x18df   :  { %v6478_v26 = vcombine.low %v6470_v9, %v6477_v16  ;;  %v10755_v16 = vld [vmem:[#allocation9 + $0xc8] sm:$0xff] }
0x18e0   :  { %14979 = vmatpush1.bf16.msra.mxu1 %v14978_v53  ;;  %v10783_v53 = vld [vmem:[#allocation9 + $0x1a8] sm:$0xff] }
0x18e1   :  { %v6485_v36 = vrot.slane %v6478_v26, %v17176_v34  ;;  %v10759_v26 = vld [vmem:[#allocation9 + $0xe8] sm:$0xff] }
0x18e9   :  { %v6558_v17 = vpop.f32.mrb[104].mxu0  ;;  %v6629_v7 = vpop.f32.mrb[108].mxu1 }
0x18ea   :  { %v6560_v3 = vpop.f32.mrb[105].mxu0  ;;  %v6631_v1 = vpop.f32.mrb[109].mxu1 }
0x18eb   :  { %v6638_v38 = vcombine.low %v6558_v17, %v6560_v3  ;;  %v6639_v2 = vcombine.low %v6629_v7, %v6631_v1  ;;  %v10757_v17 = vld [vmem:[#allocation9 + $0xd8] sm:$0xff]  ;;  %v6487_v7 = vadd.f32 %v6485_v36, %v6295_v44 }
0x18ec   :  { %v14980_v14 = vpack.c.bf16 %v10761_v6, %v10757_v17  ;;  %v10778_v17 = vld [vmem:[#allocation9 + $0x180] sm:$0xff]  ;;  %v10784_v6 = vld [vmem:[#allocation9 + $0x1b0] sm:$0xff] }
0x18ed   :  { %v6646_v41 = vrot.slane %v6638_v38, %v17176_v34  ;;  %v6653_v10 = vrot.slane %v6639_v2, %v17176_v34  ;;  %v14852_v2 = vpack.c.bf16 %v10759_v26, %v10755_v16  ;;  %v14864_v16 = vpack.c.bf16 %v10783_v53, %v10779_v40  ;;  %v10785_v26 = vld [vmem:[#allocation9 + $0x1b8] sm:$0xff]  ;;  %v10806_v40 = vld [vmem:[#allocation9 + $0x260] sm:$0xff] }
0x18ee   :  { %14981 = vmatprep.subr.bf16.mxu1 %v14980_v14  ;;  %v10789_v14 = vld [vmem:[#allocation9 + $0x1d8] sm:$0xff] }
0x18ef   :  { %v6654_v15 = vcombine.low %v6646_v41, %v6653_v10  ;;  %v10756_v41 = vld [vmem:[#allocation9 + $0xd0] sm:$0xff]  ;;  %14853 = vmatprep.subr.bf16.mxu0 %v14852_v2 }
0x18f0   :  { %v10760_v10 = vld [vmem:[#allocation9 + $0xf0] sm:$0xff]  ;;  %14855 = vmatpush1.bf16.msra.mxu0 %v14854_v56 }
0x18f1   :  { %v6661_v31 = vrot.slane %v6654_v15, %v17176_v34  ;;  %v6751_v58 = vpop.f32.mrb[106].mxu0  ;;  %v6822_v48 = vpop.f32.mrb[110].mxu1  ;;  %v14982_v4 = vpack.c.bf16 %v10760_v10, %v10756_v41  ;;  %v10767_v15 = vld [vmem:[#allocation9 + $0x128] sm:$0xff]  ;;  %v10780_v2 = vld [vmem:[#allocation9 + $0x190] sm:$0xff] }
0x18f2   :  { %v6753_v19 = vpop.f32.mrb[107].mxu0  ;;  %v6824_v25 = vpop.f32.mrb[111].mxu1  ;;  %v14856_v13 = vpack.c.bf16 %v10767_v15, %v10763_v28  ;;  %v14994_v32 = vpack.c.bf16 %v10784_v6, %v10780_v2  ;;  %v10790_v28 = vld [vmem:[#allocation9 + $0x1e0] sm:$0xff]  ;;  %v10811_v2 = vld [vmem:[#allocation9 + $0x288] sm:$0xff] }
0x18f3   :  { %v17184_v20 = vadd.f32 %v6661_v31, %v6295_v44  ;;  %v6831_v5 = vcombine.low %v6751_v58, %v6753_v19  ;;  %v6832_v27 = vcombine.low %v6822_v48, %v6824_v25  ;;  %v10762_v31 = vld [vmem:[#allocation9 + $0x100] sm:$0xff]  ;;  %14983 = vmatpush1.bf16.msra.mxu1 %v14982_v4  ;;  %v10768_v44 = vld [vmem:[#allocation9 + $0x130] sm:$0xff]  ;;  %v10815_v6 = vld [vmem:[#allocation9 + $0x2a8] sm:$0xff] }
0x18f4   :  { %v10766_v58 = vld [vmem:[#allocation9 + $0x120] sm:$0xff]  ;;  %14857 = vmatprep.subr.bf16.mxu0 %v14856_v13  ;;  %v14986_v19 = vpack.c.bf16 %v10768_v44, %v10764_v39  ;;  %14985 = vmatprep.subr.bf16.mxu1 %v14984_v21  ;;  %v10795_v39 = vld [vmem:[#allocation9 + $0x208] sm:$0xff] }
0x18f5   :  { %v6839_v23 = vrot.slane %v6831_v5, %v17176_v34  ;;  %v6846_v59 = vrot.slane %v6832_v27, %v17176_v34  ;;  %v14858_v49 = vpack.c.bf16 %v10766_v58, %v10762_v31  ;;  %v10786_v4 = vld [vmem:[#allocation9 + $0x1c0] sm:$0xff]  ;;  %v10788_v31 = vld [vmem:[#allocation9 + $0x1d0] sm:$0xff]  ;;  %v10799_v44 = vld [vmem:[#allocation9 + $0x228] sm:$0xff] }
0x18f6   :  { %v14870_v57 = vpack.c.bf16 %v10790_v28, %v10786_v4  ;;  %v10792_v58 = vld [vmem:[#allocation9 + $0x1f0] sm:$0xff] }
0x18f7   :  { %v6847_v9 = vcombine.low %v6839_v23, %v6846_v59  ;;  %14859 = vmatpush1.bf16.msra.mxu0 %v14858_v49  ;;  %14987 = vmatpush1.bf16.msra.mxu1 %v14986_v19  ;;  %v10776_v23 = vld [vmem:[#allocation9 + $0x170] sm:$0xff]  ;;  %v14998_v49 = vpack.c.bf16 %v10792_v58, %v10788_v31  ;;  %v10797_v19 = vld [vmem:[#allocation9 + $0x218] sm:$0xff] }
0x18f8   :  { %14861 = vmatprep.subr.bf16.mxu0 %v14860_v63  ;;  %v14990_v8 = vpack.c.bf16 %v10776_v23, %v10772_v50  ;;  %14989 = vmatprep.subr.bf16.mxu1 %v14988_v47  ;;  %v10796_v63 = vld [vmem:[#allocation9 + $0x210] sm:$0xff]  ;;  %v10805_v47 = vld [vmem:[#allocation9 + $0x258] sm:$0xff] }
0x18f9   :  { %v6854_v3 = vrot.slane %v6847_v9, %v17176_v34  ;;  %v6927_v1 = vpop.f32.mrb[108].mxu0  ;;  %v6998_v38 = vpop.f32.mrb[112].mxu1  ;;  %v10781_v9 = vld [vmem:[#allocation9 + $0x198] sm:$0xff]  ;;  %v15002_v52 = vpack.c.bf16 %v10800_v22, %v10796_v63  ;;  %v10827_v63 = vld [vmem:[#allocation9 + $0x308] sm:$0xff] }
0x18fa   :  { %v6929_v60 = vpop.f32.mrb[109].mxu0  ;;  %v7000_v55 = vpop.f32.mrb[113].mxu1  ;;  %v10831_v22 = vld [vmem:[#allocation9 + $0x328] sm:$0xff] }
0x18fb   :  { %v17190_v24 = vadd.f32 %v6854_v3, %v6487_v7  ;;  %v7007_v30 = vcombine.low %v6927_v1, %v6929_v60  ;;  %v7008_v18 = vcombine.low %v6998_v38, %v7000_v55  ;;  %14863 = vmatpush1.bf16.msra.mxu0 %v14862_v61  ;;  %v10782_v7 = vld [vmem:[#allocation9 + $0x1a0] sm:$0xff]  ;;  %14991 = vmatpush1.bf16.msra.mxu1 %v14990_v8  ;;  %v10787_v60 = vld [vmem:[#allocation9 + $0x1c8] sm:$0xff] }
0x18fc   :  { %v14866_v38 = vpack.c.bf16 %v10782_v7, %v10778_v17  ;;  %14865 = vmatprep.subr.bf16.mxu0 %v14864_v16  ;;  %v10791_v55 = vld [vmem:[#allocation9 + $0x1e8] sm:$0xff]  ;;  %v10802_v8 = vld [vmem:[#allocation9 + $0x240] sm:$0xff]  ;;  %v10804_v17 = vld [vmem:[#allocation9 + $0x250] sm:$0xff] }
0x18fd   :  { %v7015_v48 = vrot.slane %v7007_v30, %v17176_v34  ;;  %v7022_v12 = vrot.slane %v7008_v18, %v17176_v34  ;;  %v14868_v30 = vpack.c.bf16 %v10791_v55, %v10787_v60  ;;  %v10793_v18 = vld [vmem:[#allocation9 + $0x1f8] sm:$0xff]  ;;  %v10808_v7 = vld [vmem:[#allocation9 + $0x270] sm:$0xff]  ;;  %v10810_v55 = vld [vmem:[#allocation9 + $0x280] sm:$0xff] }
0x18fe   :  { %v14996_v13 = vpack.c.bf16 %v10793_v18, %v10789_v14  ;;  %v10817_v60 = vld [vmem:[#allocation9 + $0x2b8] sm:$0xff]  ;;  %v10814_v14 = vld [vmem:[#allocation9 + $0x2a0] sm:$0xff]  ;;  %v10816_v18 = vld [vmem:[#allocation9 + $0x2b0] sm:$0xff] }
0x18ff   :  { %v7023_v25 = vcombine.low %v7015_v48, %v7022_v12  ;;  %14867 = vmatpush1.bf16.msra.mxu0 %v14866_v38  ;;  %v15006_v38 = vpack.c.bf16 %v10808_v7, %v10804_v17 }
0x1900   :  { %14869 = vmatprep.subr.bf16.mxu0 %v14868_v30  ;;  %v10812_v30 = vld [vmem:[#allocation9 + $0x290] sm:$0xff] }
0x1901   :  { %v7030_v37 = vrot.slane %v7023_v25, %v17176_v34  ;;  %v7120_v5 = vpop.f32.mrb[110].mxu0  ;;  %v7191_v27 = vpop.f32.mrb[114].mxu1  ;;  %v14872_v25 = vpack.c.bf16 %v10799_v44, %v10795_v39  ;;  %v15010_v4 = vpack.c.bf16 %v10816_v18, %v10812_v30  ;;  %v10822_v39 = vld [vmem:[#allocation9 + $0x2e0] sm:$0xff]  ;;  %v10843_v30 = vld [vmem:[#allocation9 + $0x388] sm:$0xff] }
0x1902   :  { %v7122_v36 = vpop.f32.mrb[111].mxu0  ;;  %v7193_v43 = vpop.f32.mrb[115].mxu1  ;;  %v10847_v18 = vld [vmem:[#allocation9 + $0x3a8] sm:$0xff] }
0x1903   :  { %v17196_v59 = vadd.f32 %v7030_v37, %v17184_v20  ;;  %v7200_v62 = vcombine.low %v7120_v5, %v7122_v36  ;;  %v7201_v11 = vcombine.low %v7191_v27, %v7193_v43  ;;  %v14992_v20 = vpack.c.bf16 %v10785_v26, %v10781_v9  ;;  %14871 = vmatpush1.bf16.msra.mxu0 %v14870_v57  ;;  %v10803_v36 = vld [vmem:[#allocation9 + $0x248] sm:$0xff] }
0x1904   :  { %v14874_v27 = vpack.c.bf16 %v10798_v35, %v10794_v33  ;;  %14873 = vmatprep.subr.bf16.mxu0 %v14872_v25  ;;  %v10807_v43 = vld [vmem:[#allocation9 + $0x268] sm:$0xff]  ;;  %v14878_v26 = vpack.c.bf16 %v10806_v40, %v10802_v8  ;;  %v10820_v33 = vld [vmem:[#allocation9 + $0x2d0] sm:$0xff] }
0x1905   :  { %v7208_v3 = vrot.slane %v7200_v62, %v17176_v34  ;;  %v7215_v1 = vrot.slane %v7201_v11, %v17176_v34  ;;  %14993 = vmatprep.subr.bf16.mxu1 %v14992_v20  ;;  %v14876_v62 = vpack.c.bf16 %v10807_v43, %v10803_v36  ;;  %v10809_v11 = vld [vmem:[#allocation9 + $0x278] sm:$0xff]  ;;  %v10824_v35 = vld [vmem:[#allocation9 + $0x2f0] sm:$0xff]  ;;  %v14888_v43 = vpack.c.bf16 %v10831_v22, %v10827_v63 }
0x1906   :  { %14995 = vmatpush1.bf16.msra.mxu1 %v14994_v32  ;;  %v15004_v16 = vpack.c.bf16 %v10809_v11, %v10805_v47  ;;  %v10813_v32 = vld [vmem:[#allocation9 + $0x298] sm:$0xff]  ;;  %v10832_v11 = vld [vmem:[#allocation9 + $0x330] sm:$0xff] }
0x1907   :  { %v7216_v42 = vcombine.low %v7208_v3, %v7215_v1  ;;  %14997 = vmatprep.subr.bf16.mxu1 %v14996_v13  ;;  %14875 = vmatpush1.bf16.msra.mxu0 %v14874_v27  ;;  %v10821_v13 = vld [vmem:[#allocation9 + $0x2d8] sm:$0xff]  ;;  %v15014_v27 = vpack.c.bf16 %v10824_v35, %v10820_v33  ;;  %v10850_v35 = vld [vmem:[#allocation9 + $0x3c0] sm:$0xff] }
0x1908   :  { %14877 = vmatprep.subr.bf16.mxu0 %v14876_v62  ;;  %v10833_v47 = vld [vmem:[#allocation9 + $0x338] sm:$0xff]  ;;  %v10828_v62 = vld [vmem:[#allocation9 + $0x310] sm:$0xff] }
0x1909   :  { %v7223_v56 = vrot.slane %v7216_v42, %v17176_v34  ;;  %v7296_v41 = vpop.f32.mrb[112].mxu0  ;;  %v7367_v10 = vpop.f32.mrb[116].mxu1  ;;  %v14880_v42 = vpack.c.bf16 %v10815_v6, %v10811_v2  ;;  %v15018_v40 = vpack.c.bf16 %v10832_v11, %v10828_v62  ;;  %v10838_v2 = vld [vmem:[#allocation9 + $0x360] sm:$0xff]  ;;  %v10857_v33 = vld [vmem:[#allocation9 + $0x3f8] sm:$0xff] }
0x190a   :  { %v7298_v15 = vpop.f32.mrb[113].mxu0  ;;  %v7369_v0 = vpop.f32.mrb[117].mxu1  ;;  %14999 = vmatpush1.bf16.msra.mxu1 %v14998_v49  ;;  %v10818_v49 = vld [vmem:[#allocation9 + $0x2c0] sm:$0xff] }
0x190b   :  { %v17202_v48 = vadd.f32 %v7223_v56, %v17190_v24  ;;  %v7376_v12 = vcombine.low %v7296_v41, %v7298_v15  ;;  %v7377_v21 = vcombine.low %v7367_v10, %v7369_v0  ;;  %v15000_v24 = vpack.c.bf16 %v10801_v29, %v10797_v19  ;;  %14879 = vmatpush1.bf16.msra.mxu0 %v14878_v26  ;;  %v10819_v15 = vld [vmem:[#allocation9 + $0x2c8] sm:$0xff] }
0x190c   :  { %v14882_v10 = vpack.c.bf16 %v10814_v14, %v10810_v55  ;;  %14881 = vmatprep.subr.bf16.mxu0 %v14880_v42  ;;  %v10823_v0 = vld [vmem:[#allocation9 + $0x2e8] sm:$0xff]  ;;  %v14886_v29 = vpack.c.bf16 %v10822_v39, %v10818_v49  ;;  %v10836_v55 = vld [vmem:[#allocation9 + $0x350] sm:$0xff] }
0x190d   :  { %v7384_v37 = vrot.slane %v7376_v12, %v17176_v34  ;;  %v7391_v5 = vrot.slane %v7377_v21, %v17176_v34  ;;  %15001 = vmatprep.subr.bf16.mxu1 %v15000_v24  ;;  %v14884_v12 = vpack.c.bf16 %v10823_v0, %v10819_v15  ;;  %v10825_v21 = vld [vmem:[#allocation9 + $0x2f8] sm:$0xff]  ;;  %v10840_v14 = vld [vmem:[#allocation9 + $0x370] sm:$0xff]  ;;  %v14896_v0 = vpack.c.bf16 %v10847_v18, %v10843_v30 }
0x190e   :  { %15003 = vmatpush1.bf16.msra.mxu1 %v15002_v52  ;;  %v15012_v25 = vpack.c.bf16 %v10825_v21, %v10821_v13  ;;  %v10829_v52 = vld [vmem:[#allocation9 + $0x318] sm:$0xff]  ;;  %v10848_v21 = vld [vmem:[#allocation9 + $0x3b0] sm:$0xff] }
0x190f   :  { %v7392_v46 = vcombine.low %v7384_v37, %v7391_v5  ;;  %15005 = vmatprep.subr.bf16.mxu1 %v15004_v16  ;;  %14883 = vmatpush1.bf16.msra.mxu0 %v14882_v10  ;;  %v10837_v16 = vld [vmem:[#allocation9 + $0x358] sm:$0xff]  ;;  %v15022_v10 = vpack.c.bf16 %v10840_v14, %v10836_v55 }
0x1910   :  { %14885 = vmatprep.subr.bf16.mxu0 %v14884_v12  ;;  %v10849_v13 = vld [vmem:[#allocation9 + $0x3b8] sm:$0xff]  ;;  %v10844_v12 = vld [vmem:[#allocation9 + $0x390] sm:$0xff] }
0x1911   :  { %v7399_v61 = vrot.slane %v7392_v46, %v17176_v34  ;;  %v7489_v50 = vpop.f32.mrb[114].mxu0  ;;  %v7560_v23 = vpop.f32.mrb[118].mxu1  ;;  %v15026_v39 = vpack.c.bf16 %v10848_v21, %v10844_v12 }
0x1912   :  { %v7491_v53 = vpop.f32.mrb[115].mxu0  ;;  %v7562_v9 = vpop.f32.mrb[119].mxu1  ;;  %15007 = vmatpush1.bf16.msra.mxu1 %v15006_v38  ;;  %v10834_v38 = vld [vmem:[#allocation9 + $0x340] sm:$0xff] }
0x1913   :  { %v17208_v3 = vadd.f32 %v7399_v61, %v17196_v59  ;;  %v7569_v1 = vcombine.low %v7489_v50, %v7491_v53  ;;  %v7570_v20 = vcombine.low %v7560_v23, %v7562_v9  ;;  %v15008_v59 = vpack.c.bf16 %v10817_v60, %v10813_v32  ;;  %14887 = vmatpush1.bf16.msra.mxu0 %v14886_v29  ;;  %v10826_v61 = vld [vmem:[#allocation9 + $0x300] sm:$0xff]  ;;  %v10835_v53 = vld [vmem:[#allocation9 + $0x348] sm:$0xff] }
0x1914   :  { %v10830_v50 = vld [vmem:[#allocation9 + $0x320] sm:$0xff]  ;;  %14889 = vmatprep.subr.bf16.mxu0 %v14888_v43  ;;  %v10839_v9 = vld [vmem:[#allocation9 + $0x368] sm:$0xff]  ;;  %v14894_v60 = vpack.c.bf16 %v10838_v2, %v10834_v38 }
0x1915   :  { %v7577_v56 = vrot.slane %v7569_v1, %v17176_v34  ;;  %v7584_v41 = vrot.slane %v7570_v20, %v17176_v34  ;;  %15009 = vmatprep.subr.bf16.mxu1 %v15008_v59  ;;  %v14890_v23 = vpack.c.bf16 %v10830_v50, %v10826_v61  ;;  %v14892_v1 = vpack.c.bf16 %v10839_v9, %v10835_v53  ;;  %v10841_v20 = vld [vmem:[#allocation9 + $0x378] sm:$0xff]  ;;  %v10859_v50 = vld [vmem:[#allocation9 + $0x408] sm:$0xff] }
0x1916   :  { %15011 = vmatpush1.bf16.msra.mxu1 %v15010_v4  ;;  %v15020_v42 = vpack.c.bf16 %v10841_v20, %v10837_v16  ;;  %v10845_v4 = vld [vmem:[#allocation9 + $0x398] sm:$0xff] }
0x1917   :  { %v7585_v28 = vcombine.low %v7577_v56, %v7584_v41  ;;  %15013 = vmatprep.subr.bf16.mxu1 %v15012_v25  ;;  %14891 = vmatpush1.bf16.msra.mxu0 %v14890_v23  ;;  %v10853_v25 = vld [vmem:[#allocation9 + $0x3d8] sm:$0xff] }
0x1918   :  { %14893 = vmatprep.subr.bf16.mxu0 %v14892_v1  ;;  %v15028_v22 = vpack.c.bf16 %v10857_v33, %v10853_v25  ;;  %v10865_v53 = vld [vmem:[#allocation9 + $0x438] sm:$0xff] }
0x1919   :  { %v7592_v57 = vrot.slane %v7585_v28, %v17176_v34  ;;  %v7665_v31 = vpop.f32.mrb[116].mxu0  ;;  %v7736_v58 = vpop.f32.mrb[120].mxu1 }
0x191a   :  { %v7667_v44 = vpop.f32.mrb[117].mxu0  ;;  %v7738_v19 = vpop.f32.mrb[121].mxu1  ;;  %15015 = vmatpush1.bf16.msra.mxu1 %v15014_v27 }
0x191b   :  { %v17214_v37 = vadd.f32 %v7592_v57, %v17202_v48  ;;  %v7745_v5 = vcombine.low %v7665_v31, %v7667_v44  ;;  %v7746_v24 = vcombine.low %v7736_v58, %v7738_v19  ;;  %v15016_v48 = vpack.c.bf16 %v10833_v47, %v10829_v52  ;;  %14895 = vmatpush1.bf16.msra.mxu0 %v14894_v60  ;;  %v10842_v57 = vld [vmem:[#allocation9 + $0x380] sm:$0xff]  ;;  %v10851_v44 = vld [vmem:[#allocation9 + $0x3c8] sm:$0xff] }
0x191c   :  { %v10846_v31 = vld [vmem:[#allocation9 + $0x3a0] sm:$0xff]  ;;  %14897 = vmatprep.subr.bf16.mxu0 %v14896_v0  ;;  %v10855_v19 = vld [vmem:[#allocation9 + $0x3e8] sm:$0xff] }
0x191d   :  { %v7753_v46 = vrot.slane %v7745_v5, %v17176_v34  ;;  %v7760_v36 = vrot.slane %v7746_v24, %v17176_v34  ;;  %15017 = vmatprep.subr.bf16.mxu1 %v15016_v48  ;;  %v14898_v58 = vpack.c.bf16 %v10846_v31, %v10842_v57  ;;  %v14900_v29 = vpack.c.bf16 %v10855_v19, %v10851_v44  ;;  %v10854_v5 = vld [vmem:[#allocation9 + $0x3e0] sm:$0xff]  ;;  %v10863_v48 = vld [vmem:[#allocation9 + $0x428] sm:$0xff] }
0x191e   :  { %15019 = vmatpush1.bf16.msra.mxu1 %v15018_v40  ;;  %v14902_v52 = vpack.c.bf16 %v10854_v5, %v10850_v35  ;;  %v10861_v40 = vld [vmem:[#allocation9 + $0x418] sm:$0xff] }
0x191f   :  { %v7761_v8 = vcombine.low %v7753_v46, %v7760_v36  ;;  %15021 = vmatprep.subr.bf16.mxu1 %v15020_v42  ;;  %14899 = vmatpush1.bf16.msra.mxu0 %v14898_v58  ;;  %v10852_v46 = vld [vmem:[#allocation9 + $0x3d0] sm:$0xff]  ;;  %v15032_v9 = vpack.c.bf16 %v10865_v53, %v10861_v40 }
0x1920   :  { %v10856_v36 = vld [vmem:[#allocation9 + $0x3f0] sm:$0xff]  ;;  %14901 = vmatprep.subr.bf16.mxu0 %v14900_v29 }
0x1921   :  { %v7768_v26 = vrot.slane %v7761_v8, %v17176_v34  ;;  %v7858_v17 = vpop.f32.mrb[118].mxu0  ;;  %v7929_v7 = vpop.f32.mrb[122].mxu1  ;;  %v15030_v61 = vpack.c.bf16 %v10856_v36, %v10852_v46  ;;  %v14904_v8 = vpack.c.bf16 %v10863_v48, %v10859_v50 }
0x1922   :  { %v7860_v6 = vpop.f32.mrb[119].mxu0  ;;  %v7931_v32 = vpop.f32.mrb[123].mxu1  ;;  %15023 = vmatpush1.bf16.msra.mxu1 %v15022_v10 }
0x1923   :  { %v17220_v56 = vadd.f32 %v7768_v26, %v17208_v3  ;;  %v7938_v41 = vcombine.low %v7858_v17, %v7860_v6  ;;  %v7939_v59 = vcombine.low %v7929_v7, %v7931_v32  ;;  %v15024_v3 = vpack.c.bf16 %v10849_v13, %v10845_v4  ;;  %14903 = vmatpush1.bf16.msra.mxu0 %v14902_v52 }
0x1924   :  { %14905 = vmatprep.subr.bf16.mxu0 %v14904_v8 }
0x1925   :  { %v7946_v28 = vrot.slane %v7938_v41, %v17176_v34  ;;  %v7953_v15 = vrot.slane %v7939_v59, %v17176_v34  ;;  %15025 = vmatprep.subr.bf16.mxu1 %v15024_v3 }
0x1926   :  { %15027 = vmatpush1.bf16.msra.mxu1 %v15026_v39 }
0x1927   :  { %v7954_v49 = vcombine.low %v7946_v28, %v7953_v15  ;;  %15029 = vmatprep.subr.bf16.mxu1 %v15028_v22 }
0x1929   :  { %v7961_v24 = vrot.slane %v7954_v49, %v17176_v34  ;;  %v8034_v27 = vpop.f32.mrb[120].mxu0  ;;  %v8105_v63 = vpop.f32.mrb[124].mxu1 }
0x192a   :  { %v8036_v43 = vpop.f32.mrb[121].mxu0  ;;  %v8107_v47 = vpop.f32.mrb[125].mxu1  ;;  %15031 = vmatpush1.bf16.msra.mxu1 %v15030_v61 }
0x192b   :  { %v7963_v23 = vadd.f32 %v7961_v24, %v17214_v37  ;;  %v8114_v62 = vcombine.low %v8034_v27, %v8036_v43  ;;  %v8115_v11 = vcombine.low %v8105_v63, %v8107_v47  ;;  %15033 = vmatprep.subr.bf16.mxu1 %v15032_v9 }
0x192d   :  { %v8122_v16 = vrot.slane %v8114_v62, %v17176_v34  ;;  %v8129_v26 = vrot.slane %v8115_v11, %v17176_v34 }
0x192f   :  { %v8130_v17 = vcombine.low %v8122_v16, %v8129_v26 }
0x1931   :  { %v8137_v7 = vrot.slane %v8130_v17, %v17176_v34  ;;  %v8227_v1 = vpop.f32.mrb[122].mxu0  ;;  %v8298_v37 = vpop.f32.mrb[126].mxu1 }
0x1932   :  { %v8229_v20 = vpop.f32.mrb[123].mxu0  ;;  %v8300_v38 = vpop.f32.mrb[127].mxu1 }
0x1933   :  { %v8139_v2 = vadd.f32 %v8137_v7, %v17220_v56  ;;  %v8307_v6 = vcombine.low %v8227_v1, %v8229_v20  ;;  %v8308_v32 = vcombine.low %v8298_v37, %v8300_v38 }
0x1935   :  { %v8315_v42 = vrot.slane %v8307_v6, %v17176_v34  ;;  %v8322_v60 = vrot.slane %v8308_v32, %v17176_v34 }
0x1937   :  { %v8323_v55 = vcombine.low %v8315_v42, %v8322_v60 }
0x1939   :  { %v8330_v14 = vrot.slane %v8323_v55, %v17176_v34  ;;  %v8403_v41 = vpop.f32.mrb[124].mxu0  ;;  %v8474_v59 = vpop.f32.mrb[128].mxu1 }
0x193a   :  { %v8405_v10 = vpop.f32.mrb[125].mxu0  ;;  %v8476_v30 = vpop.f32.mrb[129].mxu1 }
0x193b   :  { %v8332_v18 = vadd.f32 %v8330_v14, %v7963_v23  ;;  %v8483_v4 = vcombine.low %v8403_v41, %v8405_v10  ;;  %v8484_v28 = vcombine.low %v8474_v59, %v8476_v30 }
0x193d   :  { %v8491_v15 = vrot.slane %v8483_v4, %v17176_v34  ;;  %v8498_v56 = vrot.slane %v8484_v28, %v17176_v34 }
0x193f   :  { %v8499_v0 = vcombine.low %v8491_v15, %v8498_v56 }
0x1941   :  { %v8506_v13 = vrot.slane %v8499_v0, %v17176_v34  ;;  %v8596_v57 = vpop.f32.mrb[126].mxu0  ;;  %v8667_v31 = vpop.f32.mrb[130].mxu1 }
0x1942   :  { %v8598_v3 = vpop.f32.mrb[127].mxu0  ;;  %v8669_v58 = vpop.f32.mrb[131].mxu1 }
0x1943   :  { %v8508_v12 = vadd.f32 %v8506_v13, %v8139_v2  ;;  %v8676_v21 = vcombine.low %v8596_v57, %v8598_v3  ;;  %v8677_v49 = vcombine.low %v8667_v31, %v8669_v58 }
0x1945   :  { %v8684_v39 = vrot.slane %v8676_v21, %v17176_v34  ;;  %v8691_v44 = vrot.slane %v8677_v49, %v17176_v34 }
0x1947   :  { %v8692_v19 = vcombine.low %v8684_v39, %v8691_v44 }
0x1949   :  { %v8699_v25 = vrot.slane %v8692_v19, %v17176_v34  ;;  %v8772_v29 = vpop.f32.mrb[128].mxu0  ;;  %v8843_v33 = vpop.f32.mrb[132].mxu1 }
0x194a   :  { %v8774_v35 = vpop.f32.mrb[129].mxu0  ;;  %v8845_v5 = vpop.f32.mrb[133].mxu1 }
0x194b   :  { %v8701_v24 = vadd.f32 %v8699_v25, %v8332_v18  ;;  %v8852_v27 = vcombine.low %v8772_v29, %v8774_v35  ;;  %v8853_v63 = vcombine.low %v8843_v33, %v8845_v5 }
0x194d   :  { %v8860_v22 = vrot.slane %v8852_v27, %v17176_v34  ;;  %v8867_v52 = vrot.slane %v8853_v63, %v17176_v34 }
0x194f   :  { %v8868_v46 = vcombine.low %v8860_v22, %v8867_v52 }
0x1951   :  { %v8875_v36 = vrot.slane %v8868_v46, %v17176_v34  ;;  %v8965_v43 = vpop.f32.mrb[130].mxu0  ;;  %v9036_v47 = vpop.f32.mrb[134].mxu1 }
0x1952   :  { %v8967_v61 = vpop.f32.mrb[131].mxu0  ;;  %v9038_v50 = vpop.f32.mrb[135].mxu1 }
0x1953   :  { %v8877_v48 = vadd.f32 %v8875_v36, %v8508_v12  ;;  %v9045_v23 = vcombine.low %v8965_v43, %v8967_v61  ;;  %v9046_v62 = vcombine.low %v9036_v47, %v9038_v50 }
0x1955   :  { %v9053_v11 = vrot.slane %v9045_v23, %v17176_v34  ;;  %v9060_v8 = vrot.slane %v9046_v62, %v17176_v34 }
0x1957   :  { %v9061_v40 = vcombine.low %v9053_v11, %v9060_v8 }
0x1959   :  { %v9068_v53 = vrot.slane %v9061_v40, %v17176_v34  ;;  %v9141_v9 = vpop.f32.mrb[132].mxu0  ;;  %v9212_v16 = vpop.f32.mrb[136].mxu1 }
0x195a   :  { %v9143_v26 = vpop.f32.mrb[133].mxu0  ;;  %v9214_v17 = vpop.f32.mrb[137].mxu1 }
0x195b   :  { %v9070_v7 = vadd.f32 %v9068_v53, %v8701_v24  ;;  %v9221_v1 = vcombine.low %v9141_v9, %v9143_v26  ;;  %v9222_v37 = vcombine.low %v9212_v16, %v9214_v17 }
0x195d   :  { %v9229_v20 = vrot.slane %v9221_v1, %v17176_v34  ;;  %v9236_v38 = vrot.slane %v9222_v37, %v17176_v34 }
0x195f   :  { %v9237_v2 = vcombine.low %v9229_v20, %v9236_v38 }
0x1961   :  { %v9244_v6 = vrot.slane %v9237_v2, %v17176_v34  ;;  %v9334_v32 = vpop.f32.mrb[134].mxu0  ;;  %v9405_v42 = vpop.f32.mrb[138].mxu1 }
0x1962   :  { %v9336_v60 = vpop.f32.mrb[135].mxu0  ;;  %v9407_v55 = vpop.f32.mrb[139].mxu1 }
0x1963   :  { %v9246_v14 = vadd.f32 %v9244_v6, %v8877_v48  ;;  %v9414_v41 = vcombine.low %v9334_v32, %v9336_v60  ;;  %v9415_v59 = vcombine.low %v9405_v42, %v9407_v55 }
0x1965   :  { %v9422_v10 = vrot.slane %v9414_v41, %v17176_v34  ;;  %v9429_v30 = vrot.slane %v9415_v59, %v17176_v34 }
0x1967   :  { %v9430_v18 = vcombine.low %v9422_v10, %v9429_v30 }
0x1969   :  { %v9437_v4 = vrot.slane %v9430_v18, %v17176_v34  ;;  %v9510_v28 = vpop.f32.mrb[136].mxu0  ;;  %v9581_v15 = vpop.f32.mrb[140].mxu1 }
0x196a   :  { %v9512_v56 = vpop.f32.mrb[137].mxu0  ;;  %v9583_v0 = vpop.f32.mrb[141].mxu1 }
0x196b   :  { %v9439_v13 = vadd.f32 %v9437_v4, %v9070_v7  ;;  %v9590_v57 = vcombine.low %v9510_v28, %v9512_v56  ;;  %v9591_v31 = vcombine.low %v9581_v15, %v9583_v0 }
0x196d   :  { %v9598_v3 = vrot.slane %v9590_v57, %v17176_v34  ;;  %v9605_v58 = vrot.slane %v9591_v31, %v17176_v34 }
0x196f   :  { %v9606_v12 = vcombine.low %v9598_v3, %v9605_v58 }
0x1971   :  { %v9613_v21 = vrot.slane %v9606_v12, %v17176_v34  ;;  %v9703_v49 = vpop.f32.mrb[138].mxu0  ;;  %v9774_v39 = vpop.f32.mrb[142].mxu1 }
0x1972   :  { %v9705_v44 = vpop.f32.mrb[139].mxu0  ;;  %v9776_v19 = vpop.f32.mrb[143].mxu1 }
0x1973   :  { %v9615_v25 = vadd.f32 %v9613_v21, %v9246_v14  ;;  %v9783_v29 = vcombine.low %v9703_v49, %v9705_v44  ;;  %v9784_v33 = vcombine.low %v9774_v39, %v9776_v19 }
0x1975   :  { %v9791_v35 = vrot.slane %v9783_v29, %v17176_v34  ;;  %v9798_v5 = vrot.slane %v9784_v33, %v17176_v34  ;;  %v10726_v29 = vld [vmem:[%s17525_s23] sm:$0xf] }
0x1977   :  { %v9799_v24 = vcombine.low %v9791_v35, %v9798_v5  ;;  %v10728_v5 = vld [vmem:[%s17526_s26] sm:$0xf] }
0x1979   :  { %v9806_v27 = vrot.slane %v9799_v24, %v17176_v34  ;;  %v9879_v63 = vpop.f32.mrb[140].mxu0  ;;  %v9950_v22 = vpop.f32.mrb[144].mxu1 }
0x197a   :  { %v9881_v52 = vpop.f32.mrb[141].mxu0  ;;  %v9952_v46 = vpop.f32.mrb[145].mxu1 }
0x197b   :  { %v9808_v36 = vadd.f32 %v9806_v27, %v9439_v13  ;;  %v9959_v43 = vcombine.low %v9879_v63, %v9881_v52  ;;  %v9960_v47 = vcombine.low %v9950_v22, %v9952_v46  ;;  %v10858_v27 = vld [vmem:[#allocation9 + $0x400] sm:$0xff]  ;;  %v10860_v52 = vld [vmem:[#allocation9 + $0x410] sm:$0xff] }
0x197c   :  { %v10862_v22 = vld [vmem:[#allocation9 + $0x420] sm:$0xff]  ;;  %v10864_v46 = vld [vmem:[#allocation9 + $0x430] sm:$0xff] }
0x197d   :  { %v9967_v61 = vrot.slane %v9959_v43, %v17176_v34  ;;  %v9974_v50 = vrot.slane %v9960_v47, %v17176_v34  ;;  %v10867_v43 = vld [vmem:[#allocation9 + $0x448] sm:$0xff] }
0x197f   :  { %v9975_v48 = vcombine.low %v9967_v61, %v9974_v50  ;;  %v17279_v61 = vsub.s32 3, %v16518_v45  ;;  %v10871_v50 = vld [vmem:[#allocation9 + $0x468] sm:$0xff] }
0x1981   :  { %v9982_v23 = vrot.slane %v9975_v48, %v17176_v34  ;;  %v10072_v62 = vpop.f32.mrb[142].mxu0  ;;  %v10143_v11 = vpop.f32.mrb[146].mxu1  ;;  %v10869_v48 = vld [vmem:[#allocation9 + $0x458] sm:$0xff] }
0x1982   :  { %v10074_v8 = vpop.f32.mrb[143].mxu0  ;;  %v10145_v40 = vpop.f32.mrb[147].mxu1 }
0x1983   :  { %v9984_v53 = vadd.f32 %v9982_v23, %v9615_v25  ;;  %v10152_v9 = vcombine.low %v10072_v62, %v10074_v8  ;;  %v10153_v16 = vcombine.low %v10143_v11, %v10145_v40  ;;  %v10873_v23 = vld [vmem:[#allocation9 + $0x478] sm:$0xff]  ;;  %v14906_v11 = vpack.c.bf16 %v10862_v22, %v10858_v27  ;;  %v10866_v40 = vld [vmem:[#allocation9 + $0x440] sm:$0xff] }
0x1984   :  { %v15034_v8 = vpack.c.bf16 %v10864_v46, %v10860_v52  ;;  %v10901_v27 = vld [vmem:[#allocation9 + $0x558] sm:$0xff]  ;;  %v10898_v46 = vld [vmem:[#allocation9 + $0x540] sm:$0xff] }
0x1985   :  { %v10160_v26 = vrot.slane %v10152_v9, %v17176_v34  ;;  %v10167_v17 = vrot.slane %v10153_v16, %v17176_v34  ;;  %v10868_v9 = vld [vmem:[#allocation9 + $0x450] sm:$0xff] }
0x1986   :  { %v10872_v16 = vld [vmem:[#allocation9 + $0x470] sm:$0xff] }
0x1987   :  { %v10168_v7 = vcombine.low %v10160_v26, %v10167_v17  ;;  %v10875_v26 = vld [vmem:[#allocation9 + $0x488] sm:$0xff]  ;;  %v14908_v17 = vpack.c.bf16 %v10871_v50, %v10867_v43  ;;  %v10902_v43 = vld [vmem:[#allocation9 + $0x560] sm:$0xff] }
0x1989   :  { %v10175_v1 = vrot.slane %v10168_v7, %v17176_v34  ;;  %v10248_v37 = vpop.f32.mrb[144].mxu0  ;;  %v10319_v20 = vpop.f32.mrb[148].mxu1  ;;  %v15036_v7 = vpack.c.bf16 %v10873_v23, %v10869_v48  ;;  %v10900_v23 = vld [vmem:[#allocation9 + $0x550] sm:$0xff] }
0x198a   :  { %v10250_v38 = vpop.f32.mrb[145].mxu0  ;;  %v10321_v2 = vpop.f32.mrb[149].mxu1 }
0x198b   :  { %v10177_v6 = vadd.f32 %v10175_v1, %v9808_v36  ;;  %v10328_v32 = vcombine.low %v10248_v37, %v10250_v38  ;;  %v10329_v42 = vcombine.low %v10319_v20, %v10321_v2  ;;  %v10879_v1 = vld [vmem:[#allocation9 + $0x4a8] sm:$0xff]  ;;  %v10877_v37 = vld [vmem:[#allocation9 + $0x498] sm:$0xff] }
0x198c   :  { %v10881_v20 = vld [vmem:[#allocation9 + $0x4b8] sm:$0xff] }
0x198d   :  { %v10336_v60 = vrot.slane %v10328_v32, %v17176_v34  ;;  %v10343_v55 = vrot.slane %v10329_v42, %v17176_v34  ;;  %v10874_v32 = vld [vmem:[#allocation9 + $0x480] sm:$0xff] }
0x198e   :  { %v10878_v42 = vld [vmem:[#allocation9 + $0x4a0] sm:$0xff] }
0x198f   :  { %v10344_v14 = vcombine.low %v10336_v60, %v10343_v55  ;;  %v14912_v60 = vpack.c.bf16 %v10879_v1, %v10875_v26  ;;  %v15040_v55 = vpack.c.bf16 %v10881_v20, %v10877_v37  ;;  %v10910_v26 = vld [vmem:[#allocation9 + $0x5a0] sm:$0xff]  ;;  %v10908_v1 = vld [vmem:[#allocation9 + $0x590] sm:$0xff]  ;;  %v10915_v20 = vld [vmem:[#allocation9 + $0x5c8] sm:$0xff] }
0x1990   :  { %v10912_v37 = vld [vmem:[#allocation9 + $0x5b0] sm:$0xff] }
0x1991   :  { %v10351_v41 = vrot.slane %v10344_v14, %v17176_v34  ;;  %v10441_v59 = vpop.f32.mrb[146].mxu0  ;;  %v10512_v10 = vpop.f32.mrb[150].mxu1  ;;  %v10876_v14 = vld [vmem:[#allocation9 + $0x490] sm:$0xff] }
0x1992   :  { %v10443_v30 = vpop.f32.mrb[147].mxu0  ;;  %v10514_v18 = vpop.f32.mrb[151].mxu1 }
0x1993   :  { %v10353_v4 = vadd.f32 %v10351_v41, %v9984_v53  ;;  %v10521_v28 = vcombine.low %v10441_v59, %v10443_v30  ;;  %v10522_v15 = vcombine.low %v10512_v10, %v10514_v18  ;;  %v10870_v53 = vld [vmem:[#allocation9 + $0x460] sm:$0xff]  ;;  %v10880_v41 = vld [vmem:[#allocation9 + $0x4b0] sm:$0xff]  ;;  %v10883_v59 = vld [vmem:[#allocation9 + $0x4c8] sm:$0xff] }
0x1994   :  { %v14910_v2 = vpack.c.bf16 %v10870_v53, %v10866_v40  ;;  %v10887_v10 = vld [vmem:[#allocation9 + $0x4e8] sm:$0xff]  ;;  %v10885_v30 = vld [vmem:[#allocation9 + $0x4d8] sm:$0xff]  ;;  %v14926_v53 = vpack.c.bf16 %v10902_v43, %v10898_v46 }
0x1995   :  { %v10529_v56 = vrot.slane %v10521_v28, %v17176_v34  ;;  %v10536_v0 = vrot.slane %v10522_v15, %v17176_v34  ;;  %v10889_v18 = vld [vmem:[#allocation9 + $0x4f8] sm:$0xff]  ;;  %v15042_v28 = vpack.c.bf16 %v10880_v41, %v10876_v14  ;;  %v10882_v15 = vld [vmem:[#allocation9 + $0x4c0] sm:$0xff] }
0x1996   :  { %v10913_v40 = vld [vmem:[#allocation9 + $0x5b8] sm:$0xff] }
0x1997   :  { %v10537_v13 = vcombine.low %v10529_v56, %v10536_v0  ;;  %v10886_v56 = vld [vmem:[#allocation9 + $0x4e0] sm:$0xff]  ;;  %v14916_v0 = vpack.c.bf16 %v10887_v10, %v10883_v59  ;;  %v10916_v59 = vld [vmem:[#allocation9 + $0x5d0] sm:$0xff] }
0x1998   :  { %v10920_v10 = vld [vmem:[#allocation9 + $0x5f0] sm:$0xff] }
0x1999   :  { %v10544_v57 = vrot.slane %v10537_v13, %v17176_v34  ;;  %v10617_v31 = vpop.f32.mrb[148].mxu0  ;;  %v10688_v3 = vpop.f32.mrb[152].mxu1  ;;  %v15044_v13 = vpack.c.bf16 %v10889_v18, %v10885_v30  ;;  %v10923_v30 = vld [vmem:[#allocation9 + $0x608] sm:$0xff] }
0x199a   :  { %v10619_v58 = vpop.f32.mrb[149].mxu0  ;;  %v10690_v12 = vpop.f32.mrb[153].mxu1  ;;  %v10927_v18 = vld [vmem:[#allocation9 + $0x628] sm:$0xff] }
0x199b   :  { %v10546_v21 = vadd.f32 %v10544_v57, %v10177_v6  ;;  %v10697_v49 = vcombine.low %v10617_v31, %v10619_v58  ;;  %v10698_v39 = vcombine.low %v10688_v3, %v10690_v12  ;;  %v15038_v6 = vpack.c.bf16 %v10872_v16, %v10868_v9  ;;  %v10884_v57 = vld [vmem:[#allocation9 + $0x4d0] sm:$0xff]  ;;  %v10891_v3 = vld [vmem:[#allocation9 + $0x508] sm:$0xff]  ;;  %v10893_v12 = vld [vmem:[#allocation9 + $0x518] sm:$0xff] }
0x199c   :  { %v10888_v31 = vld [vmem:[#allocation9 + $0x4f0] sm:$0xff]  ;;  %v10895_v58 = vld [vmem:[#allocation9 + $0x528] sm:$0xff]  ;;  %v10906_v16 = vld [vmem:[#allocation9 + $0x580] sm:$0xff] }
0x199d   :  { %vm10723_vm1 = vcmp.gt.f32.partialorder %v10546_v21, 0.0  ;;  %v10724_v44 = vmul.f32 0.01, %v10546_v21  ;;  %v10705_v19 = vrot.slane %v10697_v49, %v17176_v34  ;;  %v10712_v25 = vrot.slane %v10698_v39, %v17176_v34 }
0x199e   :  { %v14918_v49 = vpack.c.bf16 %v10886_v56, %v10882_v15  ;;  %v15046_v39 = vpack.c.bf16 %v10888_v31, %v10884_v57  ;;  %v15062_v56 = vpack.c.bf16 %v10920_v10, %v10916_v59  ;;  %v14936_v57 = vpack.c.bf16 %v10927_v18, %v10923_v30  ;;  %v10956_v30 = vld [vmem:[#allocation9 + $0x710] sm:$0xff] }
0x199f   :  { %v10725_v33 = vsel %vm10723_vm1, %v10546_v21, %v10724_v44  ;;  %v10713_v35 = vcombine.low %v10705_v19, %v10712_v25  ;;  %v10897_v21 = vld [vmem:[#allocation9 + $0x538] sm:$0xff]  ;;  %v10890_v44 = vld [vmem:[#allocation9 + $0x500] sm:$0xff]  ;;  %v14920_v25 = vpack.c.bf16 %v10895_v58, %v10891_v3  ;;  %v10924_v3 = vld [vmem:[#allocation9 + $0x610] sm:$0xff] }
0x19a0   :  { %v10727_v24 = vmul.f32 %v10726_v29, %v10725_v33  ;;  %v10894_v19 = vld [vmem:[#allocation9 + $0x520] sm:$0xff]  ;;  %v15048_v29 = vpack.c.bf16 %v10897_v21, %v10893_v12  ;;  %v10892_v33 = vld [vmem:[#allocation9 + $0x510] sm:$0xff]  ;;  %v10931_v12 = vld [vmem:[#allocation9 + $0x648] sm:$0xff] }
0x19a1   :  { %v10720_v63 = vrot.slane %v10713_v35, %v17176_v34  ;;  %v10896_v35 = vld [vmem:[#allocation9 + $0x530] sm:$0xff]  ;;  %v14922_v22 = vpack.c.bf16 %v10894_v19, %v10890_v44  ;;  %v10935_v21 = vld [vmem:[#allocation9 + $0x668] sm:$0xff] }
0x19a2   :  { %v17274_v36 = vadd.f32 %v10728_v5, %v10727_v24  ;;  %v10899_v5 = vld [vmem:[#allocation9 + $0x548] sm:$0xff]  ;;  %v15050_v52 = vpack.c.bf16 %v10896_v35, %v10892_v33  ;;  %v10928_v58 = vld [vmem:[#allocation9 + $0x630] sm:$0xff]  ;;  %v14940_v33 = vpack.c.bf16 %v10935_v21, %v10931_v12 }
0x19a3   :  { %v17276_v47 = vadd.f32 %v10720_v63, %v10353_v4  ;;  %v14914_v4 = vpack.c.bf16 %v10878_v42, %v10874_v32  ;;  %v10903_v24 = vld [vmem:[#allocation9 + $0x568] sm:$0xff]  ;;  %v10905_v63 = vld [vmem:[#allocation9 + $0x578] sm:$0xff]  ;;  %v14930_v32 = vpack.c.bf16 %v10910_v26, %v10906_v16  ;;  %v15058_v42 = vpack.c.bf16 %v10912_v37, %v10908_v1  ;;  %v10960_v18 = vld [vmem:[#allocation9 + $0x730] sm:$0xff] }
0x19a4   :  { %v10995_v62 = vrot.slane %v17274_v36, %v16725_v54  ;;  %v10991_v34 = vrot.slane %v17274_v36, %v16525_v51  ;;  %v11003_v38 = vrot.slane %v17274_v36, %v17279_v61  ;;  %v14924_v50 = vpack.c.bf16 %v10903_v24, %v10899_v5  ;;  %v10932_v5 = vld [vmem:[#allocation9 + $0x650] sm:$0xff] }
0x19a5   :  { %v15052_v48 = vpack.c.bf16 %v10905_v63, %v10901_v27  ;;  %v15066_v19 = vpack.c.bf16 %v10928_v58, %v10924_v3  ;;  %v10936_v24 = vld [vmem:[#allocation9 + $0x670] sm:$0xff]  ;;  %v10939_v27 = vld [vmem:[#allocation9 + $0x688] sm:$0xff]  ;;  %vm11584_vm2 = vcmp.gt.f32.partialorder %v17276_v47, 0.0 }
0x19a6   :  { %11093 = vmatprep.mubr.f32.mxu0 %v10995_v62  ;;  %11235 = vmatprep.mubr.f32.mxu1 %v10995_v62  ;;  %v10904_v62 = vld [vmem:[#allocation9 + $0x570] sm:$0xff]  ;;  %v10943_v63 = vld [vmem:[#allocation9 + $0x6a8] sm:$0xff]  ;;  %v15070_v43 = vpack.c.bf16 %v10936_v24, %v10932_v5 }
0x19a7   :  { %11094 = vmatmul.mubr.f32.vlgmr.msra.gmra.mrb[150].mxu0 %v10991_v34  ;;  %11236 = vmatmul.mubr.f32.vlgmr.msra.gmra.mrb[154].mxu1 %v10991_v34  ;;  %v10907_v34 = vld [vmem:[#allocation9 + $0x588] sm:$0xff]  ;;  %v15054_v9 = vpack.c.bf16 %v10904_v62, %v10900_v23  ;;  %v14944_v23 = vpack.c.bf16 %v10943_v63, %v10939_v27  ;;  %v10964_v12 = vld [vmem:[#allocation9 + $0x750] sm:$0xff] }
0x19a8   :  { %14907 = vmatpush1.bf16.msra.mxu0 %v14906_v11  ;;  %15035 = vmatpush1.bf16.msra.mxu1 %v15034_v8  ;;  %v10911_v11 = vld [vmem:[#allocation9 + $0x5a8] sm:$0xff]  ;;  %v10909_v8 = vld [vmem:[#allocation9 + $0x598] sm:$0xff]  ;;  %v10968_v21 = vld [vmem:[#allocation9 + $0x770] sm:$0xff] }
0x19a9   :  { %11164 = vmatprep.mubr.f32.mxu0 %v11003_v38  ;;  %11306 = vmatprep.mubr.f32.mxu1 %v11003_v38  ;;  %v10919_v38 = vld [vmem:[#allocation9 + $0x5e8] sm:$0xff]  ;;  %v10972_v27 = vld [vmem:[#allocation9 + $0x790] sm:$0xff] }
0x19aa   :  { %14909 = vmatprep.subr.bf16.mxu0 %v14908_v17  ;;  %15037 = vmatprep.subr.bf16.mxu1 %v15036_v7  ;;  %v14928_v17 = vpack.c.bf16 %v10911_v11, %v10907_v34  ;;  %v15056_v7 = vpack.c.bf16 %v10913_v40, %v10909_v8  ;;  %v14932_v14 = vpack.c.bf16 %v10919_v38, %v10915_v20  ;;  %v10940_v34 = vld [vmem:[#allocation9 + $0x690] sm:$0xff]  ;;  %v10947_v8 = vld [vmem:[#allocation9 + $0x6c8] sm:$0xff] }
0x19ab   :  { %v10944_v11 = vld [vmem:[#allocation9 + $0x6b0] sm:$0xff]  ;;  %v10951_v40 = vld [vmem:[#allocation9 + $0x6e8] sm:$0xff] }
0x19ac   :  { %14911 = vmatpush1.bf16.msra.mxu0 %v14910_v2  ;;  %15039 = vmatpush1.bf16.msra.mxu1 %v15038_v6  ;;  %v10917_v2 = vld [vmem:[#allocation9 + $0x5d8] sm:$0xff]  ;;  %v15074_v26 = vpack.c.bf16 %v10944_v11, %v10940_v34  ;;  %v14948_v1 = vpack.c.bf16 %v10951_v40, %v10947_v8  ;;  %v10948_v20 = vld [vmem:[#allocation9 + $0x6d0] sm:$0xff] }
0x19ad   :  { %14913 = vmatprep.subr.bf16.mxu0 %v14912_v60  ;;  %15041 = vmatprep.subr.bf16.mxu1 %v15040_v55  ;;  %v10921_v6 = vld [vmem:[#allocation9 + $0x5f8] sm:$0xff]  ;;  %v10914_v60 = vld [vmem:[#allocation9 + $0x5c0] sm:$0xff]  ;;  %v10952_v38 = vld [vmem:[#allocation9 + $0x6f0] sm:$0xff] }
0x19ae   :  { %v10918_v55 = vld [vmem:[#allocation9 + $0x5e0] sm:$0xff]  ;;  %v15060_v41 = vpack.c.bf16 %v10921_v6, %v10917_v2  ;;  %v10955_v2 = vld [vmem:[#allocation9 + $0x708] sm:$0xff]  ;;  %v10976_v63 = vld [vmem:[#allocation9 + $0x7b0] sm:$0xff] }
0x19af   :  { %v14934_v15 = vpack.c.bf16 %v10918_v55, %v10914_v60  ;;  %v10959_v6 = vld [vmem:[#allocation9 + $0x728] sm:$0xff]  ;;  %v15078_v55 = vpack.c.bf16 %v10952_v38, %v10948_v20  ;;  %v10980_v8 = vld [vmem:[#allocation9 + $0x7d0] sm:$0xff]  ;;  %v17294_v20 = vsub.s32 2, %v16518_v45 }
0x19b0   :  { %14915 = vmatpush1.bf16.msra.mxu0 %v14914_v4  ;;  %15043 = vmatpush1.bf16.msra.mxu1 %v15042_v28  ;;  %v10925_v4 = vld [vmem:[#allocation9 + $0x618] sm:$0xff]  ;;  %v14952_v59 = vpack.c.bf16 %v10959_v6, %v10955_v2  ;;  %v10984_v40 = vld [vmem:[#allocation9 + $0x7f0] sm:$0xff]  ;;  %v11409_v6 = vld [vmem:[%s15977_s30 + $0x100] sm:$0xff] }
0x19b1   :  { %14917 = vmatprep.subr.bf16.mxu0 %v14916_v0  ;;  %15045 = vmatprep.subr.bf16.mxu1 %v15044_v13  ;;  %v10929_v28 = vld [vmem:[#allocation9 + $0x638] sm:$0xff]  ;;  %v10922_v0 = vld [vmem:[#allocation9 + $0x600] sm:$0xff]  ;;  %v11379_v45 = vld [vmem:[%s15977_s30 + $0x10] sm:$0xff] }
0x19b2   :  { %v10926_v13 = vld [vmem:[#allocation9 + $0x620] sm:$0xff]  ;;  %v15064_v31 = vpack.c.bf16 %v10929_v28, %v10925_v4  ;;  %v10963_v4 = vld [vmem:[#allocation9 + $0x748] sm:$0xff] }
0x19b3   :  { %v14938_v44 = vpack.c.bf16 %v10926_v13, %v10922_v0  ;;  %v10967_v28 = vld [vmem:[#allocation9 + $0x768] sm:$0xff]  ;;  %v15082_v13 = vpack.c.bf16 %v10960_v18, %v10956_v30  ;;  %v10999_v30 = vrot.slane %v17274_v36, %v17294_v20 }
0x19b4   :  { %14919 = vmatpush1.bf16.msra.mxu0 %v14918_v49  ;;  %15047 = vmatpush1.bf16.msra.mxu1 %v15046_v39  ;;  %v10933_v49 = vld [vmem:[#allocation9 + $0x658] sm:$0xff]  ;;  %v14956_v3 = vpack.c.bf16 %v10967_v28, %v10963_v4  ;;  %v11411_v28 = vld [vmem:[%s15977_s30 + $0x110] sm:$0xff] }
0x19b5   :  { %14921 = vmatprep.subr.bf16.mxu0 %v14920_v25  ;;  %15049 = vmatprep.subr.bf16.mxu1 %v15048_v29  ;;  %v10937_v39 = vld [vmem:[#allocation9 + $0x678] sm:$0xff]  ;;  %v10930_v25 = vld [vmem:[#allocation9 + $0x640] sm:$0xff] }
0x19b6   :  { %v10934_v29 = vld [vmem:[#allocation9 + $0x660] sm:$0xff]  ;;  %v15068_v35 = vpack.c.bf16 %v10937_v39, %v10933_v49  ;;  %v10971_v49 = vld [vmem:[#allocation9 + $0x788] sm:$0xff] }
0x19b7   :  { %v14942_v46 = vpack.c.bf16 %v10934_v29, %v10930_v25  ;;  %v10975_v39 = vld [vmem:[#allocation9 + $0x7a8] sm:$0xff]  ;;  %v15086_v29 = vpack.c.bf16 %v10968_v21, %v10964_v12 }
0x19b8   :  { %14923 = vmatpush1.bf16.msra.mxu0 %v14922_v22  ;;  %15051 = vmatpush1.bf16.msra.mxu1 %v15050_v52  ;;  %v10941_v22 = vld [vmem:[#allocation9 + $0x698] sm:$0xff]  ;;  %v14960_v5 = vpack.c.bf16 %v10975_v39, %v10971_v49  ;;  %v11413_v49 = vld [vmem:[%s15977_s30 + $0x120] sm:$0xff]  ;;  %v11414_v39 = vld [vmem:[%s15977_s30 + $0x128] sm:$0xff] }
0x19b9   :  { %14925 = vmatprep.subr.bf16.mxu0 %v14924_v50  ;;  %15053 = vmatprep.subr.bf16.mxu1 %v15052_v48  ;;  %v10945_v52 = vld [vmem:[#allocation9 + $0x6b8] sm:$0xff]  ;;  %v10938_v50 = vld [vmem:[#allocation9 + $0x680] sm:$0xff] }
0x19ba   :  { %v10942_v48 = vld [vmem:[#allocation9 + $0x6a0] sm:$0xff]  ;;  %v15072_v62 = vpack.c.bf16 %v10945_v52, %v10941_v22  ;;  %v10979_v22 = vld [vmem:[#allocation9 + $0x7c8] sm:$0xff] }
0x19bb   :  { %v14946_v16 = vpack.c.bf16 %v10942_v48, %v10938_v50  ;;  %v10983_v52 = vld [vmem:[#allocation9 + $0x7e8] sm:$0xff]  ;;  %v15090_v48 = vpack.c.bf16 %v10976_v63, %v10972_v27 }
0x19bc   :  { %14927 = vmatpush1.bf16.msra.mxu0 %v14926_v53  ;;  %15055 = vmatpush1.bf16.msra.mxu1 %v15054_v9  ;;  %v10949_v53 = vld [vmem:[#allocation9 + $0x6d8] sm:$0xff]  ;;  %v14964_v34 = vpack.c.bf16 %v10983_v52, %v10979_v22  ;;  %v11415_v22 = vld [vmem:[%s15977_s30 + $0x130] sm:$0xff] }
0x19bd   :  { %14929 = vmatprep.subr.bf16.mxu0 %v14928_v17  ;;  %15057 = vmatprep.subr.bf16.mxu1 %v15056_v7  ;;  %v10953_v9 = vld [vmem:[#allocation9 + $0x6f8] sm:$0xff]  ;;  %v10946_v17 = vld [vmem:[#allocation9 + $0x6c0] sm:$0xff] }
0x19be   :  { %v10950_v7 = vld [vmem:[#allocation9 + $0x6e0] sm:$0xff]  ;;  %v15076_v37 = vpack.c.bf16 %v10953_v9, %v10949_v53  ;;  %v11394_v9 = vld [vmem:[%s15977_s30 + $0x88] sm:$0xff]  ;;  %v11416_v52 = vld [vmem:[%s15977_s30 + $0x138] sm:$0xff] }
0x19bf   :  { %v14950_v60 = vpack.c.bf16 %v10950_v7, %v10946_v17  ;;  %v11393_v53 = vld [vmem:[%s15977_s30 + $0x80] sm:$0xff]  ;;  %v15094_v7 = vpack.c.bf16 %v10984_v40, %v10980_v8 }
0x19c0   :  { %14931 = vmatpush1.bf16.msra.mxu0 %v14930_v32  ;;  %15059 = vmatpush1.bf16.msra.mxu1 %v15058_v42  ;;  %v10957_v32 = vld [vmem:[#allocation9 + $0x718] sm:$0xff]  ;;  %v15096_v38 = vpack.c.bf16 %v11394_v9, %v11393_v53  ;;  %v11417_v53 = vld [vmem:[%s15977_s30 + $0x140] sm:$0xff]  ;;  %v11418_v9 = vld [vmem:[%s15977_s30 + $0x148] sm:$0xff] }
0x19c1   :  { %14933 = vmatprep.subr.bf16.mxu0 %v14932_v14  ;;  %15061 = vmatprep.subr.bf16.mxu1 %v15060_v41  ;;  %v10961_v42 = vld [vmem:[#allocation9 + $0x738] sm:$0xff]  ;;  %v10954_v14 = vld [vmem:[#allocation9 + $0x700] sm:$0xff] }
0x19c2   :  { %v10958_v41 = vld [vmem:[#allocation9 + $0x720] sm:$0xff]  ;;  %v15080_v10 = vpack.c.bf16 %v10961_v42, %v10957_v32  ;;  %v11410_v32 = vld [vmem:[%s15977_s30 + $0x108] sm:$0xff]  ;;  %v11395_v42 = vld [vmem:[%s15977_s30 + $0x90] sm:$0xff] }
0x19c3   :  { %v14954_v0 = vpack.c.bf16 %v10958_v41, %v10954_v14  ;;  %v11428_v14 = vld [vmem:[%s15977_s30 + $0x198] sm:$0xff] }
0x19c4   :  { %14935 = vmatpush1.bf16.msra.mxu0 %v14934_v15  ;;  %15063 = vmatpush1.bf16.msra.mxu1 %v15062_v56  ;;  %v10965_v15 = vld [vmem:[#allocation9 + $0x758] sm:$0xff] }
0x19c5   :  { %14937 = vmatprep.subr.bf16.mxu0 %v14936_v57  ;;  %15065 = vmatprep.subr.bf16.mxu1 %v15064_v31  ;;  %v10969_v56 = vld [vmem:[#allocation9 + $0x778] sm:$0xff]  ;;  %v10962_v57 = vld [vmem:[#allocation9 + $0x740] sm:$0xff] }
0x19c6   :  { %v10966_v31 = vld [vmem:[#allocation9 + $0x760] sm:$0xff]  ;;  %v15084_v58 = vpack.c.bf16 %v10969_v56, %v10965_v15  ;;  %v11412_v15 = vld [vmem:[%s15977_s30 + $0x118] sm:$0xff] }
0x19c7   :  { %v14958_v25 = vpack.c.bf16 %v10966_v31, %v10962_v57  ;;  %v11397_v56 = vld [vmem:[%s15977_s30 + $0xa0] sm:$0xff]  ;;  %v11430_v57 = vld [vmem:[%s15977_s30 + $0x1a8] sm:$0xff]  ;;  %v15134_v31 = vpack.c.bf16 %v11412_v15, %v11411_v28 }
0x19c8   :  { %14939 = vmatpush1.bf16.msra.mxu0 %v14938_v44  ;;  %15067 = vmatpush1.bf16.msra.mxu1 %v15066_v19  ;;  %v10973_v44 = vld [vmem:[#allocation9 + $0x798] sm:$0xff]  ;;  %v11390_v28 = vld [vmem:[%s15977_s30 + $0x68] sm:$0xff]  ;;  %v11421_v15 = vld [vmem:[%s15977_s30 + $0x160] sm:$0xff] }
0x19c9   :  { %14941 = vmatprep.subr.bf16.mxu0 %v14940_v33  ;;  %15069 = vmatprep.subr.bf16.mxu1 %v15068_v35  ;;  %v10977_v19 = vld [vmem:[#allocation9 + $0x7b8] sm:$0xff]  ;;  %v10970_v33 = vld [vmem:[#allocation9 + $0x780] sm:$0xff] }
0x19ca   :  { %v10974_v35 = vld [vmem:[#allocation9 + $0x7a0] sm:$0xff]  ;;  %v15088_v24 = vpack.c.bf16 %v10977_v19, %v10973_v44  ;;  %v11399_v44 = vld [vmem:[%s15977_s30 + $0xb0] sm:$0xff]  ;;  %v11400_v19 = vld [vmem:[%s15977_s30 + $0xb8] sm:$0xff] }
0x19cb   :  { %v14962_v50 = vpack.c.bf16 %v10974_v35, %v10970_v33  ;;  %v15138_v35 = vpack.c.bf16 %v11414_v39, %v11413_v49  ;;  %v15108_v27 = vpack.c.bf16 %v11400_v19, %v11399_v44  ;;  %v11392_v49 = vld [vmem:[%s15977_s30 + $0x78] sm:$0xff]  ;;  %v11423_v39 = vld [vmem:[%s15977_s30 + $0x170] sm:$0xff] }
0x19cc   :  { %14943 = vmatpush1.bf16.msra.mxu0 %v14942_v46  ;;  %15071 = vmatpush1.bf16.msra.mxu1 %v15070_v43  ;;  %v10981_v46 = vld [vmem:[#allocation9 + $0x7d8] sm:$0xff] }
0x19cd   :  { %14945 = vmatprep.subr.bf16.mxu0 %v14944_v23  ;;  %15073 = vmatprep.subr.bf16.mxu1 %v15072_v62  ;;  %v10985_v43 = vld [vmem:[#allocation9 + $0x7f8] sm:$0xff]  ;;  %v10978_v23 = vld [vmem:[#allocation9 + $0x7c0] sm:$0xff] }
0x19ce   :  { %v10982_v62 = vld [vmem:[#allocation9 + $0x7e0] sm:$0xff]  ;;  %v15092_v11 = vpack.c.bf16 %v10985_v43, %v10981_v46  ;;  %v11402_v43 = vld [vmem:[%s15977_s30 + $0xc8] sm:$0xff]  ;;  %v11424_v44 = vld [vmem:[%s15977_s30 + $0x178] sm:$0xff] }
0x19cf   :  { %v14966_v17 = vpack.c.bf16 %v10982_v62, %v10978_v23  ;;  %v11401_v46 = vld [vmem:[%s15977_s30 + $0xc0] sm:$0xff]  ;;  %v15142_v62 = vpack.c.bf16 %v11416_v52, %v11415_v22 }
0x19d0   :  { %14947 = vmatpush1.bf16.msra.mxu0 %v14946_v16  ;;  %15075 = vmatpush1.bf16.msra.mxu1 %v15074_v26  ;;  %v11425_v16 = vld [vmem:[%s15977_s30 + $0x180] sm:$0xff]  ;;  %v11426_v26 = vld [vmem:[%s15977_s30 + $0x188] sm:$0xff]  ;;  %v15112_v8 = vpack.c.bf16 %v11402_v43, %v11401_v46 }
0x19d1   :  { %14949 = vmatprep.subr.bf16.mxu0 %v14948_v1  ;;  %15077 = vmatprep.subr.bf16.mxu1 %v15076_v37  ;;  %v11377_v1 = vld [vmem:[%s15977_s30] sm:$0xff]  ;;  %v11378_v37 = vld [vmem:[%s15977_s30 + $0x8] sm:$0xff]  ;;  %v15128_v2 = vpack.c.bf16 %v11426_v26, %v11425_v16  ;;  %v11403_v16 = vld [vmem:[%s15977_s30 + $0xd0] sm:$0xff] }
0x19d2   :  { %v15098_v41 = vpack.c.bf16 %v11378_v37, %v11377_v1  ;;  %v11404_v26 = vld [vmem:[%s15977_s30 + $0xd8] sm:$0xff]  ;;  %v15146_v37 = vpack.c.bf16 %v11418_v9, %v11417_v53  ;;  %v10986_v22 = vld [vmem:[%s17527_s28] sm:$0xf] }
0x19d3   :  { %v11012_v46 = vrot.slane %v10986_v22, %v16525_v51  ;;  %v11325_v43 = vld [vmem:[%s17528_s1] sm:$0xf] }
0x19d4   :  { %14951 = vmatpush1.bf16.msra.mxu0 %v14950_v60  ;;  %15079 = vmatpush1.bf16.msra.mxu1 %v15078_v55  ;;  %v11396_v60 = vld [vmem:[%s15977_s30 + $0x98] sm:$0xff]  ;;  %v11427_v55 = vld [vmem:[%s15977_s30 + $0x190] sm:$0xff]  ;;  %v11338_v53 = vrot.slane %v11325_v43, %v17294_v20 }
0x19d5   :  { %14953 = vmatprep.subr.bf16.mxu0 %v14952_v59  ;;  %15081 = vmatprep.subr.bf16.mxu1 %v15080_v10  ;;  %v15130_v59 = vpack.c.bf16 %v11410_v32, %v11409_v6  ;;  %v11380_v10 = vld [vmem:[%s15977_s30 + $0x18] sm:$0xff]  ;;  %v15100_v18 = vpack.c.bf16 %v11396_v60, %v11395_v42  ;;  %v15132_v4 = vpack.c.bf16 %v11428_v14, %v11427_v55  ;;  %v11387_v6 = vld [vmem:[%s15977_s30 + $0x50] sm:$0xff]  ;;  %v11405_v14 = vld [vmem:[%s15977_s30 + $0xe0] sm:$0xff] }
0x19d6   :  { %v15102_v36 = vpack.c.bf16 %v11380_v10, %v11379_v45  ;;  %v11388_v32 = vld [vmem:[%s15977_s30 + $0x58] sm:$0xff]  ;;  %v11419_v60 = vld [vmem:[%s15977_s30 + $0x150] sm:$0xff]  ;;  %v11437_v45 = vld [vmem:[%s15977_s30 + $0x1e0] sm:$0xff] }
0x19d7   :  { %v15118_v42 = vpack.c.bf16 %v11388_v32, %v11387_v6  ;;  %v11420_v55 = vld [vmem:[%s15977_s30 + $0x158] sm:$0xff]  ;;  %v11438_v10 = vld [vmem:[%s15977_s30 + $0x1e8] sm:$0xff] }
0x19d8   :  { %14955 = vmatpush1.bf16.msra.mxu0 %v14954_v0  ;;  %15083 = vmatpush1.bf16.msra.mxu1 %v15082_v13  ;;  %v11398_v0 = vld [vmem:[%s15977_s30 + $0xa8] sm:$0xff]  ;;  %v11429_v13 = vld [vmem:[%s15977_s30 + $0x1a0] sm:$0xff] }
0x19d9   :  { %14957 = vmatprep.subr.bf16.mxu0 %v14956_v3  ;;  %15085 = vmatprep.subr.bf16.mxu1 %v15084_v58  ;;  %v11381_v3 = vld [vmem:[%s15977_s30 + $0x20] sm:$0xff]  ;;  %v11382_v58 = vld [vmem:[%s15977_s30 + $0x28] sm:$0xff]  ;;  %v15104_v12 = vpack.c.bf16 %v11398_v0, %v11397_v56  ;;  %v15136_v21 = vpack.c.bf16 %v11430_v57, %v11429_v13  ;;  %v11407_v13 = vld [vmem:[%s15977_s30 + $0xf0] sm:$0xff] }
0x19da   :  { %v15106_v33 = vpack.c.bf16 %v11382_v58, %v11381_v3  ;;  %v11422_v0 = vld [vmem:[%s15977_s30 + $0x168] sm:$0xff]  ;;  %v11408_v57 = vld [vmem:[%s15977_s30 + $0xf8] sm:$0xff]  ;;  %v11439_v3 = vld [vmem:[%s15977_s30 + $0x1f0] sm:$0xff] }
0x19db   :  { %v11440_v58 = vld [vmem:[%s15977_s30 + $0x1f8] sm:$0xff] }
0x19dc   :  { %14959 = vmatpush1.bf16.msra.mxu0 %v14958_v25  ;;  %15087 = vmatpush1.bf16.msra.mxu1 %v15086_v29  ;;  %v11431_v25 = vld [vmem:[%s15977_s30 + $0x1b0] sm:$0xff]  ;;  %v11432_v29 = vld [vmem:[%s15977_s30 + $0x1b8] sm:$0xff] }
0x19dd   :  { %14961 = vmatprep.subr.bf16.mxu0 %v14960_v5  ;;  %15089 = vmatprep.subr.bf16.mxu1 %v15088_v24  ;;  %v11383_v5 = vld [vmem:[%s15977_s30 + $0x30] sm:$0xff]  ;;  %v11384_v24 = vld [vmem:[%s15977_s30 + $0x38] sm:$0xff]  ;;  %v15140_v63 = vpack.c.bf16 %v11432_v29, %v11431_v25  ;;  %v11592_v25 = vld [vmem:[#allocation9 + $0x8] sm:$0xff] }
0x19de   :  { %v15110_v23 = vpack.c.bf16 %v11384_v24, %v11383_v5  ;;  %v11596_v29 = vld [vmem:[#allocation9 + $0x28] sm:$0xff]  ;;  %v11594_v5 = vld [vmem:[#allocation9 + $0x18] sm:$0xff] }
0x19df   :  { %v11598_v24 = vld [vmem:[#allocation9 + $0x38] sm:$0xff] }
0x19e0   :  { %14963 = vmatpush1.bf16.msra.mxu0 %v14962_v50  ;;  %15091 = vmatpush1.bf16.msra.mxu1 %v15090_v48  ;;  %v11433_v50 = vld [vmem:[%s15977_s30 + $0x1c0] sm:$0xff]  ;;  %v11434_v48 = vld [vmem:[%s15977_s30 + $0x1c8] sm:$0xff] }
0x19e1   :  { %14965 = vmatprep.subr.bf16.mxu0 %v14964_v34  ;;  %15093 = vmatprep.subr.bf16.mxu1 %v15092_v11  ;;  %v11385_v34 = vld [vmem:[%s15977_s30 + $0x40] sm:$0xff]  ;;  %v11386_v11 = vld [vmem:[%s15977_s30 + $0x48] sm:$0xff]  ;;  %v15144_v40 = vpack.c.bf16 %v11434_v48, %v11433_v50  ;;  %v11020_v50 = vrot.slane %v10986_v22, %v17294_v20 }
0x19e2   :  { %v15114_v1 = vpack.c.bf16 %v11386_v11, %v11385_v34  ;;  %v11587_v48 = vld [vmem:[%s17525_s23] sm:$0xf] }
0x19e3   :  { %v11351_v34 = vld [vmem:[%s15972_s6] sm:$0xf] }
0x19e4   :  { %14967 = vmatpush1.bf16.msra.mxu0 %v14966_v17  ;;  %15095 = vmatpush1.bf16.msra.mxu1 %v15094_v7  ;;  %v11435_v17 = vld [vmem:[%s15977_s30 + $0x1d0] sm:$0xff]  ;;  %v11436_v7 = vld [vmem:[%s15977_s30 + $0x1d8] sm:$0xff]  ;;  %v11368_v6 = vrot.slane %v11351_v34, %v17279_v61 }
0x19e5   :  { %15097 = vmatprep.subr.bf16.mxu0 %v15096_v38  ;;  %15129 = vmatprep.subr.bf16.mxu1 %v15128_v2  ;;  %v15116_v38 = vpack.c.bf16 %v11404_v26, %v11403_v16  ;;  %v15148_v2 = vpack.c.bf16 %v11436_v7, %v11435_v17  ;;  %v11334_v7 = vrot.slane %v11325_v43, %v16725_v54 }
0x19e7   :  { %11165 = vmatmul.mubr.f32.vlgmr.msra.gmra.mrb[150].mxu0 %v10999_v30  ;;  %11307 = vmatmul.mubr.f32.vlgmr.msra.gmra.mrb[154].mxu1 %v10999_v30 }
0x19e8   :  { %15099 = vmatpush3.bf16.msra.mxu0 %v15098_v41  ;;  %15131 = vmatpush3.bf16.msra.mxu1 %v15130_v59  ;;  %v15150_v41 = vpack.c.bf16 %v11420_v55, %v11419_v60  ;;  %v11406_v59 = vld [vmem:[%s15977_s30 + $0xe8] sm:$0xff] }
0x19e9   :  { %15101 = vmatprep.subr.bf16.mxu0 %v15100_v18  ;;  %15133 = vmatprep.subr.bf16.mxu1 %v15132_v4  ;;  %v15120_v30 = vpack.c.bf16 %v11406_v59, %v11405_v14  ;;  %v15152_v18 = vpack.c.bf16 %v11438_v10, %v11437_v45  ;;  %v11389_v4 = vld [vmem:[%s15977_s30 + $0x60] sm:$0xff]  ;;  %v11356_v59 = vrot.slane %v11351_v34, %v16525_v51 }
0x19ea   :  { %v15122_v56 = vpack.c.bf16 %v11390_v28, %v11389_v4  ;;  %v11364_v45 = vrot.slane %v11351_v34, %v17294_v20  ;;  %v11591_v10 = vld [vmem:[#allocation9] sm:$0xff] }
0x19ec   :  { %15103 = vmatpush3.bf16.msra.mxu0 %v15102_v36  ;;  %15135 = vmatpush3.bf16.msra.mxu1 %v15134_v31  ;;  %v15154_v36 = vpack.c.bf16 %v11422_v0, %v11421_v15  ;;  %v15124_v31 = vpack.c.bf16 %v11408_v57, %v11407_v13  ;;  %v11593_v0 = vld [vmem:[#allocation9 + $0x10] sm:$0xff] }
0x19ed   :  { %15105 = vmatprep.subr.bf16.mxu0 %v15104_v12  ;;  %15137 = vmatprep.subr.bf16.mxu1 %v15136_v21  ;;  %v11391_v12 = vld [vmem:[%s15977_s30 + $0x70] sm:$0xff]  ;;  %v15156_v21 = vpack.c.bf16 %v11440_v58, %v11439_v3  ;;  %v11604_v58 = vld [vmem:[#allocation9 + $0x68] sm:$0xff] }
0x19ee   :  { %v15126_v19 = vpack.c.bf16 %v11392_v49, %v11391_v12  ;;  %v11597_v13 = vld [vmem:[#allocation9 + $0x30] sm:$0xff]  ;;  %v11602_v12 = vld [vmem:[#allocation9 + $0x58] sm:$0xff] }
0x19f0   :  { %15107 = vmatpush3.bf16.msra.mxu0 %v15106_v33  ;;  %15139 = vmatpush3.bf16.msra.mxu1 %v15138_v35  ;;  %v15158_v33 = vpack.c.bf16 %v11424_v44, %v11423_v39  ;;  %v15160_v35 = vpack.c.bf16 %v11596_v29, %v11592_v25  ;;  %v11599_v25 = vld [vmem:[#allocation9 + $0x40] sm:$0xff] }
0x19f1   :  { %15109 = vmatprep.subr.bf16.mxu0 %v15108_v27  ;;  %15141 = vmatprep.subr.bf16.mxu1 %v15140_v63  ;;  %v15288_v27 = vpack.c.bf16 %v11598_v24, %v11594_v5  ;;  %v11585_v63 = vmul.f32 0.01, %v17276_v47  ;;  %v11603_v29 = vld [vmem:[#allocation9 + $0x60] sm:$0xff]  ;;  %v11601_v5 = vld [vmem:[#allocation9 + $0x50] sm:$0xff] }
0x19f2   :  { %v11605_v24 = vld [vmem:[#allocation9 + $0x70] sm:$0xff] }
0x19f3   :  { %v11586_v52 = vsel %vm11584_vm2, %v17276_v47, %v11585_v63 }
0x19f4   :  { %15111 = vmatpush3.bf16.msra.mxu0 %v15110_v23  ;;  %15143 = vmatpush3.bf16.msra.mxu1 %v15142_v62  ;;  %v11016_v23 = vrot.slane %v10986_v22, %v16725_v54  ;;  %v11024_v62 = vrot.slane %v10986_v22, %v17279_v61  ;;  %v11588_v9 = vmul.f32 %v11587_v48, %v11586_v52  ;;  %v11612_v52 = vld [vmem:[#allocation9 + $0xa8] sm:$0xff] }
0x19f5   :  { %15113 = vmatprep.subr.bf16.mxu0 %v15112_v8  ;;  %15145 = vmatprep.subr.bf16.mxu1 %v15144_v40  ;;  %v11330_v8 = vrot.slane %v11325_v43, %v16525_v51  ;;  %v15166_v48 = vpack.c.bf16 %v11603_v29, %v11599_v25  ;;  %v11642_v25 = vld [vmem:[#allocation9 + $0x198] sm:$0xff] }
0x19f6   :  { %v11646_v29 = vld [vmem:[#allocation9 + $0x1b8] sm:$0xff] }
0x19f8   :  { %15115 = vmatpush3.bf16.msra.mxu0 %v15114_v1  ;;  %15147 = vmatpush3.bf16.msra.mxu1 %v15146_v37  ;;  %v11342_v1 = vrot.slane %v11325_v43, %v17279_v61  ;;  %v11614_v43 = vld [vmem:[#allocation9 + $0xb8] sm:$0xff] }
0x19f9   :  { %15117 = vmatprep.subr.bf16.mxu0 %v15116_v38  ;;  %15149 = vmatprep.subr.bf16.mxu1 %v15148_v2  ;;  %v11360_v2 = vrot.slane %v11351_v34, %v16725_v54  ;;  %v11611_v34 = vld [vmem:[#allocation9 + $0xa0] sm:$0xff] }
0x19fc   :  { %15119 = vmatpush3.bf16.msra.mxu0 %v15118_v42  ;;  %15151 = vmatpush3.bf16.msra.mxu1 %v15150_v41 }
0x19fd   :  { %15121 = vmatprep.subr.bf16.mxu0 %v15120_v30  ;;  %15153 = vmatprep.subr.bf16.mxu1 %v15152_v18  ;;  %v11589_v30 = vld [vmem:[%s17526_s26] sm:$0xf] }
0x19fe   :  { %v17376_v3 = vadd.f32 %v11589_v30, %v11588_v9  ;;  %v11616_v9 = vld [vmem:[#allocation9 + $0xc8] sm:$0xff] }
0x1a00   :  { %15123 = vmatpush3.bf16.msra.mxu0 %v15122_v56  ;;  %15155 = vmatpush3.bf16.msra.mxu1 %v15154_v36  ;;  %v11595_v56 = vld [vmem:[#allocation9 + $0x20] sm:$0xff] }
0x1a01   :  { %15125 = vmatprep.subr.bf16.mxu0 %v15124_v31  ;;  %15157 = vmatprep.subr.bf16.mxu1 %v15156_v21  ;;  %v11600_v31 = vld [vmem:[#allocation9 + $0x48] sm:$0xff]  ;;  %v11606_v21 = vld [vmem:[#allocation9 + $0x78] sm:$0xff]  ;;  %v15162_v44 = vpack.c.bf16 %v11595_v56, %v11591_v10  ;;  %v11627_v10 = vld [vmem:[#allocation9 + $0x120] sm:$0xff] }
0x1a02   :  { %v15164_v63 = vpack.c.bf16 %v11604_v58, %v11600_v31  ;;  %v15292_v22 = vpack.c.bf16 %v11606_v21, %v11602_v12  ;;  %v11636_v56 = vld [vmem:[#allocation9 + $0x168] sm:$0xff]  ;;  %v11631_v31 = vld [vmem:[#allocation9 + $0x140] sm:$0xff] }
0x1a03   :  { %v11635_v58 = vld [vmem:[#allocation9 + $0x160] sm:$0xff] }
0x1a04   :  { %15127 = vmatpush3.bf16.msra.mxu0 %v15126_v19  ;;  %15159 = vmatpush3.bf16.msra.mxu1 %v15158_v33  ;;  %v15290_v19 = vpack.c.bf16 %v11597_v13, %v11593_v0  ;;  %v11634_v0 = vld [vmem:[#allocation9 + $0x158] sm:$0xff] }
0x1a05   :  { %15161 = vmatprep.subr.bf16.mxu0 %v15160_v35  ;;  %15289 = vmatprep.subr.bf16.mxu1 %v15288_v27  ;;  %v11608_v27 = vld [vmem:[#allocation9 + $0x88] sm:$0xff]  ;;  %v11638_v13 = vld [vmem:[#allocation9 + $0x178] sm:$0xff] }
0x1a06   :  { %v15308_v21 = vpack.c.bf16 %v11638_v13, %v11634_v0  ;;  %v11676_v0 = vld [vmem:[#allocation9 + $0x2a8] sm:$0xff]  ;;  %v11674_v13 = vld [vmem:[#allocation9 + $0x298] sm:$0xff] }
0x1aba   :  { %v11166_v11 = vpop.f32.mrb[150].mxu0  ;;  %v11308_v40 = vpop.f32.mrb[154].mxu1 }
0x1abb   :  { %v15480_v16 = vadd.f32 %v11166_v11, %v11012_v46  ;;  %v15482_v47 = vadd.f32 %v11308_v40, %v11020_v50  ;;  %v11168_v26 = vpop.f32.mrb[151].mxu0  ;;  %v11310_v17 = vpop.f32.mrb[155].mxu1  ;;  %v11610_v46 = vld [vmem:[#allocation9 + $0x98] sm:$0xff]  ;;  %v11856_v50 = vrot.slane %v17376_v3, %v16725_v54  ;;  %v15168_v11 = vpack.c.bf16 %v11612_v52, %v11608_v27  ;;  %v11609_v40 = vld [vmem:[#allocation9 + $0x90] sm:$0xff] }
0x1abc   :  { %v15481_v37 = vadd.f32 %v11168_v26, %v11016_v23  ;;  %v15483_v38 = vadd.f32 %v11310_v17, %v11024_v62  ;;  %v15294_v23 = vpack.c.bf16 %v11605_v24, %v11601_v5  ;;  %v11607_v62 = vld [vmem:[#allocation9 + $0x80] sm:$0xff]  ;;  %v11622_v26 = vld [vmem:[#allocation9 + $0xf8] sm:$0xff]  ;;  %v11645_v52 = vld [vmem:[#allocation9 + $0x1b0] sm:$0xff] }
0x1abd   :  { %vm11313_vm3 = vcmp.gt.f32.partialorder %v15480_v16, 0.0  ;;  %v11317_v32 = vmul.f32 0.01, %v15480_v16  ;;  %vm11315_vm4 = vcmp.gt.f32.partialorder %v15482_v47, 0.0  ;;  %v11319_v42 = vmul.f32 0.01, %v15482_v47 }
0x1abe   :  { %vm11314_vm5 = vcmp.gt.f32.partialorder %v15481_v37, 0.0  ;;  %v11318_v60 = vmul.f32 0.01, %v15481_v37  ;;  %vm11316_vm6 = vcmp.gt.f32.partialorder %v15483_v38, 0.0  ;;  %v11320_v55 = vmul.f32 0.01, %v15483_v38 }
0x1abf   :  { %v11321_v14 = vsel %vm11313_vm3, %v15480_v16, %v11317_v32  ;;  %v11323_v41 = vsel %vm11315_vm4, %v15482_v47, %v11319_v42  ;;  %v11620_v16 = vld [vmem:[#allocation9 + $0xe8] sm:$0xff]  ;;  %v11618_v47 = vld [vmem:[#allocation9 + $0xd8] sm:$0xff]  ;;  %v15170_v17 = vpack.c.bf16 %v11611_v34, %v11607_v62  ;;  %v11621_v32 = vld [vmem:[#allocation9 + $0xf0] sm:$0xff] }
0x1ac0   :  { %v11347_v18 = vmul.f32 %v11330_v8, %v11321_v14  ;;  %v11349_v4 = vmul.f32 %v11338_v53, %v11323_v41  ;;  %v11322_v28 = vsel %vm11314_vm5, %v15481_v37, %v11318_v60  ;;  %v11324_v15 = vsel %vm11316_vm6, %v15483_v38, %v11320_v55  ;;  %v11613_v53 = vld [vmem:[#allocation9 + $0xb0] sm:$0xff]  ;;  %v11619_v37 = vld [vmem:[#allocation9 + $0xe0] sm:$0xff]  ;;  %v11624_v42 = vld [vmem:[#allocation9 + $0x108] sm:$0xff] }
0x1ac1   :  { %v11348_v57 = vmul.f32 %v11334_v7, %v11322_v28  ;;  %v11350_v36 = vmul.f32 %v11342_v1, %v11324_v15  ;;  %v15296_v8 = vpack.c.bf16 %v11614_v43, %v11610_v46  ;;  %v15298_v7 = vpack.c.bf16 %v11613_v53, %v11609_v40  ;;  %v11615_v1 = vld [vmem:[#allocation9 + $0xc0] sm:$0xff]  ;;  %v11628_v60 = vld [vmem:[#allocation9 + $0x128] sm:$0xff]  ;;  %v11626_v55 = vld [vmem:[#allocation9 + $0x118] sm:$0xff] }
0x1ac2   :  { %v11373_v33 = vadd.f32 %v11356_v59, %v11347_v18  ;;  %v11375_v35 = vadd.f32 %v11364_v45, %v11349_v4  ;;  %v15172_v38 = vpack.c.bf16 %v11620_v16, %v11616_v9  ;;  %v11630_v14 = vld [vmem:[#allocation9 + $0x138] sm:$0xff]  ;;  %v15174_v41 = vpack.c.bf16 %v11619_v37, %v11615_v1  ;;  %v11623_v45 = vld [vmem:[#allocation9 + $0x100] sm:$0xff]  ;;  %v11625_v4 = vld [vmem:[#allocation9 + $0x110] sm:$0xff] }
0x1ac3   :  { %v11374_v49 = vadd.f32 %v11360_v2, %v11348_v57  ;;  %v11376_v39 = vadd.f32 %v11368_v6, %v11350_v36  ;;  %v15300_v2 = vpack.c.bf16 %v11622_v26, %v11618_v47  ;;  %v11617_v6 = vld [vmem:[#allocation9 + $0xd0] sm:$0xff]  ;;  %v15176_v30 = vpack.c.bf16 %v11628_v60, %v11624_v42  ;;  %v11632_v15 = vld [vmem:[#allocation9 + $0x148] sm:$0xff]  ;;  %v11639_v5 = vld [vmem:[#allocation9 + $0x180] sm:$0xff] }
0x1ac4   :  { %v15302_v59 = vpack.c.bf16 %v11621_v32, %v11617_v6  ;;  %v15304_v18 = vpack.c.bf16 %v11630_v14, %v11626_v55  ;;  %v11629_v28 = vld [vmem:[#allocation9 + $0x130] sm:$0xff]  ;;  %v15178_v57 = vpack.c.bf16 %v11627_v10, %v11623_v45  ;;  %v15180_v12 = vpack.c.bf16 %v11636_v56, %v11632_v15  ;;  %v11643_v24 = vld [vmem:[#allocation9 + $0x1a0] sm:$0xff]  ;;  %v11648_v46 = vld [vmem:[#allocation9 + $0x1c8] sm:$0xff] }
0x1ac5   :  { %11506 = vmatprep.mubr.f32.mxu0 %v11374_v49  ;;  %11576 = vmatprep.mubr.f32.mxu1 %v11376_v39  ;;  %v15306_v36 = vpack.c.bf16 %v11629_v28, %v11625_v4  ;;  %v11633_v49 = vld [vmem:[#allocation9 + $0x150] sm:$0xff]  ;;  %v11652_v43 = vld [vmem:[#allocation9 + $0x1e8] sm:$0xff]  ;;  %v11647_v34 = vld [vmem:[#allocation9 + $0x1c0] sm:$0xff] }
0x1ac6   :  { %11507 = vmatmul.mubr.f32.vlgmr.msra.gmra.mrb[152].mxu0 %v11373_v33  ;;  %11577 = vmatmul.mubr.f32.vlgmr.msra.gmra.mrb[156].mxu1 %v11375_v35  ;;  %v11637_v39 = vld [vmem:[#allocation9 + $0x170] sm:$0xff]  ;;  %v15182_v33 = vpack.c.bf16 %v11635_v58, %v11631_v31  ;;  %v11656_v16 = vld [vmem:[#allocation9 + $0x208] sm:$0xff]  ;;  %v11658_v26 = vld [vmem:[#allocation9 + $0x218] sm:$0xff] }
0x1ac7   :  { %15163 = vmatpush1.bf16.msra.mxu0 %v15162_v44  ;;  %15291 = vmatpush1.bf16.msra.mxu1 %v15290_v19  ;;  %v11640_v44 = vld [vmem:[#allocation9 + $0x188] sm:$0xff]  ;;  %v15310_v35 = vpack.c.bf16 %v11637_v39, %v11633_v49  ;;  %v11649_v53 = vld [vmem:[#allocation9 + $0x1d0] sm:$0xff]  ;;  %v11655_v37 = vld [vmem:[#allocation9 + $0x200] sm:$0xff] }
0x1ac8   :  { %11954 = vmatprep.mubr.f32.mxu0 %v11856_v50  ;;  %12096 = vmatprep.mubr.f32.mxu1 %v11856_v50  ;;  %v11644_v19 = vld [vmem:[#allocation9 + $0x1a8] sm:$0xff]  ;;  %v11650_v50 = vld [vmem:[#allocation9 + $0x1d8] sm:$0xff]  ;;  %v11653_v9 = vld [vmem:[#allocation9 + $0x1f0] sm:$0xff] }
0x1ac9   :  { %15165 = vmatprep.subr.bf16.mxu0 %v15164_v63  ;;  %15293 = vmatprep.subr.bf16.mxu1 %v15292_v22  ;;  %v15184_v27 = vpack.c.bf16 %v11644_v19, %v11640_v44  ;;  %v15312_v63 = vpack.c.bf16 %v11646_v29, %v11642_v25  ;;  %v11641_v22 = vld [vmem:[#allocation9 + $0x190] sm:$0xff]  ;;  %v11660_v47 = vld [vmem:[#allocation9 + $0x228] sm:$0xff]  ;;  %v15318_v1 = vpack.c.bf16 %v11653_v9, %v11649_v53  ;;  %v11666_v14 = vld [vmem:[#allocation9 + $0x258] sm:$0xff] }
0x1aca   :  { %v15314_v62 = vpack.c.bf16 %v11645_v52, %v11641_v22  ;;  %v11657_v32 = vld [vmem:[#allocation9 + $0x210] sm:$0xff]  ;;  %v11664_v60 = vld [vmem:[#allocation9 + $0x248] sm:$0xff]  ;;  %v11663_v10 = vld [vmem:[#allocation9 + $0x240] sm:$0xff] }
0x1acb   :  { %15167 = vmatpush1.bf16.msra.mxu0 %v15166_v48  ;;  %15295 = vmatpush1.bf16.msra.mxu1 %v15294_v23  ;;  %v11654_v48 = vld [vmem:[#allocation9 + $0x1f8] sm:$0xff]  ;;  %v15186_v23 = vpack.c.bf16 %v11643_v24, %v11639_v5  ;;  %v11661_v42 = vld [vmem:[#allocation9 + $0x230] sm:$0xff]  ;;  %v11668_v55 = vld [vmem:[#allocation9 + $0x268] sm:$0xff] }
0x1acc   :  { %15169 = vmatprep.subr.bf16.mxu0 %v15168_v11  ;;  %15297 = vmatprep.subr.bf16.mxu1 %v15296_v8  ;;  %v11651_v11 = vld [vmem:[#allocation9 + $0x1e0] sm:$0xff]  ;;  %v15188_v8 = vpack.c.bf16 %v11652_v43, %v11648_v46  ;;  %v15316_v40 = vpack.c.bf16 %v11654_v48, %v11650_v50  ;;  %v15322_v45 = vpack.c.bf16 %v11661_v42, %v11657_v32  ;;  %v11665_v28 = vld [vmem:[#allocation9 + $0x250] sm:$0xff]  ;;  %v11672_v56 = vld [vmem:[#allocation9 + $0x288] sm:$0xff] }
0x1acd   :  { %v11669_v15 = vld [vmem:[#allocation9 + $0x270] sm:$0xff]  ;;  %v11671_v58 = vld [vmem:[#allocation9 + $0x280] sm:$0xff]  ;;  %v11680_v19 = vld [vmem:[#allocation9 + $0x2c8] sm:$0xff] }
0x1ace   :  { %v15326_v31 = vpack.c.bf16 %v11669_v15, %v11665_v28  ;;  %v11673_v39 = vld [vmem:[#allocation9 + $0x290] sm:$0xff]  ;;  %v11684_v25 = vld [vmem:[#allocation9 + $0x2e8] sm:$0xff]  ;;  %v11682_v29 = vld [vmem:[#allocation9 + $0x2d8] sm:$0xff] }
0x1acf   :  { %15171 = vmatpush1.bf16.msra.mxu0 %v15170_v17  ;;  %15299 = vmatpush1.bf16.msra.mxu1 %v15298_v7  ;;  %v11662_v17 = vld [vmem:[#allocation9 + $0x238] sm:$0xff]  ;;  %v15190_v7 = vpack.c.bf16 %v11651_v11, %v11647_v34  ;;  %v11677_v44 = vld [vmem:[#allocation9 + $0x2b0] sm:$0xff]  ;;  %v11679_v24 = vld [vmem:[#allocation9 + $0x2c0] sm:$0xff] }
0x1ad0   :  { %15173 = vmatprep.subr.bf16.mxu0 %v15172_v38  ;;  %15301 = vmatprep.subr.bf16.mxu1 %v15300_v2  ;;  %v11659_v38 = vld [vmem:[#allocation9 + $0x220] sm:$0xff]  ;;  %v15192_v2 = vpack.c.bf16 %v11660_v47, %v11656_v16  ;;  %v15320_v6 = vpack.c.bf16 %v11662_v17, %v11658_v26  ;;  %v15330_v5 = vpack.c.bf16 %v11677_v44, %v11673_v39  ;;  %v11681_v52 = vld [vmem:[#allocation9 + $0x2d0] sm:$0xff]  ;;  %v11688_v43 = vld [vmem:[#allocation9 + $0x308] sm:$0xff] }
0x1ad1   :  { %v11685_v46 = vld [vmem:[#allocation9 + $0x2f0] sm:$0xff]  ;;  %v11692_v50 = vld [vmem:[#allocation9 + $0x328] sm:$0xff]  ;;  %v11690_v48 = vld [vmem:[#allocation9 + $0x318] sm:$0xff] }
0x1ad2   :  { %v15334_v34 = vpack.c.bf16 %v11685_v46, %v11681_v52  ;;  %v11687_v11 = vld [vmem:[#allocation9 + $0x300] sm:$0xff]  ;;  %v11689_v9 = vld [vmem:[#allocation9 + $0x310] sm:$0xff]  ;;  %v11696_v47 = vld [vmem:[#allocation9 + $0x348] sm:$0xff] }
0x1ad3   :  { %15175 = vmatpush1.bf16.msra.mxu0 %v15174_v41  ;;  %15303 = vmatpush1.bf16.msra.mxu1 %v15302_v59  ;;  %v11670_v41 = vld [vmem:[#allocation9 + $0x278] sm:$0xff]  ;;  %v15194_v59 = vpack.c.bf16 %v11659_v38, %v11655_v37  ;;  %v11693_v16 = vld [vmem:[#allocation9 + $0x330] sm:$0xff]  ;;  %v11700_v26 = vld [vmem:[#allocation9 + $0x368] sm:$0xff] }
0x1ad4   :  { %15177 = vmatprep.subr.bf16.mxu0 %v15176_v30  ;;  %15305 = vmatprep.subr.bf16.mxu1 %v15304_v18  ;;  %v11667_v30 = vld [vmem:[#allocation9 + $0x260] sm:$0xff]  ;;  %v15196_v18 = vpack.c.bf16 %v11668_v55, %v11664_v60  ;;  %v15324_v4 = vpack.c.bf16 %v11670_v41, %v11666_v14  ;;  %v11698_v17 = vld [vmem:[#allocation9 + $0x358] sm:$0xff]  ;;  %v15338_v37 = vpack.c.bf16 %v11693_v16, %v11689_v9  ;;  %v11697_v42 = vld [vmem:[#allocation9 + $0x350] sm:$0xff] }
0x1ad5   :  { %v11695_v38 = vld [vmem:[#allocation9 + $0x340] sm:$0xff]  ;;  %v11701_v60 = vld [vmem:[#allocation9 + $0x370] sm:$0xff]  ;;  %v11704_v55 = vld [vmem:[#allocation9 + $0x388] sm:$0xff]  ;;  %v11864_v16 = vrot.slane %v17376_v3, %v17279_v61 }
0x1ad6   :  { %v11708_v14 = vld [vmem:[#allocation9 + $0x3a8] sm:$0xff]  ;;  %v11706_v41 = vld [vmem:[#allocation9 + $0x398] sm:$0xff]  ;;  %v11705_v15 = vld [vmem:[#allocation9 + $0x390] sm:$0xff] }
0x1ad7   :  { %15179 = vmatpush1.bf16.msra.mxu0 %v15178_v57  ;;  %15307 = vmatpush1.bf16.msra.mxu1 %v15306_v36  ;;  %v11678_v57 = vld [vmem:[#allocation9 + $0x2b8] sm:$0xff]  ;;  %v15198_v36 = vpack.c.bf16 %v11667_v30, %v11663_v10  ;;  %v15342_v10 = vpack.c.bf16 %v11701_v60, %v11697_v42  ;;  %v11703_v30 = vld [vmem:[#allocation9 + $0x380] sm:$0xff]  ;;  %v11713_v44 = vld [vmem:[#allocation9 + $0x3d0] sm:$0xff] }
0x1ad8   :  { %15181 = vmatprep.subr.bf16.mxu0 %v15180_v12  ;;  %15309 = vmatprep.subr.bf16.mxu1 %v15308_v21  ;;  %v11675_v12 = vld [vmem:[#allocation9 + $0x2a0] sm:$0xff]  ;;  %v15200_v21 = vpack.c.bf16 %v11676_v0, %v11672_v56  ;;  %v15328_v49 = vpack.c.bf16 %v11678_v57, %v11674_v13  ;;  %v11709_v56 = vld [vmem:[#allocation9 + $0x3b0] sm:$0xff]  ;;  %v11712_v0 = vld [vmem:[#allocation9 + $0x3c8] sm:$0xff] }
0x1ad9   :  { %v11716_v13 = vld [vmem:[#allocation9 + $0x3e8] sm:$0xff]  ;;  %v11714_v57 = vld [vmem:[#allocation9 + $0x3d8] sm:$0xff]  ;;  %v11723_v52 = vld [vmem:[#allocation9 + $0x420] sm:$0xff] }
0x1ada   :  { %v11721_v46 = vld [vmem:[#allocation9 + $0x410] sm:$0xff]  ;;  %v11735_v42 = vld [vmem:[#allocation9 + $0x480] sm:$0xff] }
0x1adb   :  { %15183 = vmatpush1.bf16.msra.mxu0 %v15182_v33  ;;  %15311 = vmatpush1.bf16.msra.mxu1 %v15310_v35  ;;  %v11686_v33 = vld [vmem:[#allocation9 + $0x2f8] sm:$0xff]  ;;  %v15202_v35 = vpack.c.bf16 %v11675_v12, %v11671_v58  ;;  %v15346_v58 = vpack.c.bf16 %v11709_v56, %v11705_v15  ;;  %v11711_v12 = vld [vmem:[#allocation9 + $0x3c0] sm:$0xff]  ;;  %v11729_v9 = vld [vmem:[#allocation9 + $0x450] sm:$0xff] }
0x1adc   :  { %15185 = vmatprep.subr.bf16.mxu0 %v15184_v27  ;;  %15313 = vmatprep.subr.bf16.mxu1 %v15312_v63  ;;  %v11683_v27 = vld [vmem:[#allocation9 + $0x2e0] sm:$0xff]  ;;  %v15204_v63 = vpack.c.bf16 %v11684_v25, %v11680_v19  ;;  %v15332_v22 = vpack.c.bf16 %v11686_v33, %v11682_v29  ;;  %v11717_v19 = vld [vmem:[#allocation9 + $0x3f0] sm:$0xff]  ;;  %v11720_v25 = vld [vmem:[#allocation9 + $0x408] sm:$0xff] }
0x1add   :  { %v11724_v29 = vld [vmem:[#allocation9 + $0x428] sm:$0xff]  ;;  %v11722_v33 = vld [vmem:[#allocation9 + $0x418] sm:$0xff]  ;;  %v11739_v60 = vld [vmem:[#allocation9 + $0x4a0] sm:$0xff] }
0x1ade   :  { %v11743_v15 = vld [vmem:[#allocation9 + $0x4c0] sm:$0xff] }
0x1adf   :  { %15187 = vmatpush1.bf16.msra.mxu0 %v15186_v23  ;;  %15315 = vmatpush1.bf16.msra.mxu1 %v15314_v62  ;;  %v11694_v23 = vld [vmem:[#allocation9 + $0x338] sm:$0xff]  ;;  %v15206_v62 = vpack.c.bf16 %v11683_v27, %v11679_v24  ;;  %v15350_v24 = vpack.c.bf16 %v11717_v19, %v11713_v44  ;;  %v15224_v27 = vpack.c.bf16 %v11724_v29, %v11720_v25  ;;  %v11747_v56 = vld [vmem:[#allocation9 + $0x4e0] sm:$0xff]  ;;  %v11753_v25 = vld [vmem:[#allocation9 + $0x510] sm:$0xff] }
0x1ae0   :  { %15189 = vmatprep.subr.bf16.mxu0 %v15188_v8  ;;  %15317 = vmatprep.subr.bf16.mxu1 %v15316_v40  ;;  %v11691_v8 = vld [vmem:[#allocation9 + $0x320] sm:$0xff]  ;;  %v15208_v40 = vpack.c.bf16 %v11692_v50, %v11688_v43  ;;  %v15336_v53 = vpack.c.bf16 %v11694_v23, %v11690_v48  ;;  %v11725_v43 = vld [vmem:[#allocation9 + $0x430] sm:$0xff]  ;;  %v11728_v50 = vld [vmem:[#allocation9 + $0x448] sm:$0xff] }
0x1ae1   :  { %v11732_v48 = vld [vmem:[#allocation9 + $0x468] sm:$0xff]  ;;  %v11730_v23 = vld [vmem:[#allocation9 + $0x458] sm:$0xff]  ;;  %v11751_v44 = vld [vmem:[#allocation9 + $0x500] sm:$0xff] }
0x1ae2   :  { %v11755_v19 = vld [vmem:[#allocation9 + $0x520] sm:$0xff] }
0x1ae3   :  { %15191 = vmatpush1.bf16.msra.mxu0 %v15190_v7  ;;  %15319 = vmatpush1.bf16.msra.mxu1 %v15318_v1  ;;  %v11702_v7 = vld [vmem:[#allocation9 + $0x378] sm:$0xff]  ;;  %v15210_v1 = vpack.c.bf16 %v11691_v8, %v11687_v11  ;;  %v11852_v11 = vrot.slane %v17376_v3, %v16525_v51  ;;  %v15354_v8 = vpack.c.bf16 %v11725_v43, %v11721_v46  ;;  %v11759_v46 = vld [vmem:[#allocation9 + $0x540] sm:$0xff] }
0x1ae4   :  { %15193 = vmatprep.subr.bf16.mxu0 %v15192_v2  ;;  %15321 = vmatprep.subr.bf16.mxu1 %v15320_v6  ;;  %v11699_v2 = vld [vmem:[#allocation9 + $0x360] sm:$0xff]  ;;  %v15212_v6 = vpack.c.bf16 %v11700_v26, %v11696_v47  ;;  %v15340_v32 = vpack.c.bf16 %v11702_v7, %v11698_v17  ;;  %v15228_v47 = vpack.c.bf16 %v11732_v48, %v11728_v50  ;;  %v11733_v17 = vld [vmem:[#allocation9 + $0x470] sm:$0xff]  ;;  %v11736_v7 = vld [vmem:[#allocation9 + $0x488] sm:$0xff] }
0x1ae5   :  { %v11763_v43 = vld [vmem:[#allocation9 + $0x560] sm:$0xff]  ;;  %v11761_v50 = vld [vmem:[#allocation9 + $0x550] sm:$0xff] }
0x1ae7   :  { %15195 = vmatpush1.bf16.msra.mxu0 %v15194_v59  ;;  %15323 = vmatpush1.bf16.msra.mxu1 %v15322_v45  ;;  %v11710_v59 = vld [vmem:[#allocation9 + $0x3b8] sm:$0xff]  ;;  %v15214_v45 = vpack.c.bf16 %v11699_v2, %v11695_v38 }
0x1ae8   :  { %15197 = vmatprep.subr.bf16.mxu0 %v15196_v18  ;;  %15325 = vmatprep.subr.bf16.mxu1 %v15324_v4  ;;  %v11707_v18 = vld [vmem:[#allocation9 + $0x3a0] sm:$0xff]  ;;  %v15216_v4 = vpack.c.bf16 %v11708_v14, %v11704_v55  ;;  %v15344_v28 = vpack.c.bf16 %v11710_v59, %v11706_v41  ;;  %v11742_v38 = vld [vmem:[#allocation9 + $0x4b8] sm:$0xff]  ;;  %v11737_v55 = vld [vmem:[#allocation9 + $0x490] sm:$0xff] }
0x1ae9   :  { %v11741_v41 = vld [vmem:[#allocation9 + $0x4b0] sm:$0xff]  ;;  %v11744_v59 = vld [vmem:[#allocation9 + $0x4c8] sm:$0xff] }
0x1aeb   :  { %15199 = vmatpush1.bf16.msra.mxu0 %v15198_v36  ;;  %15327 = vmatpush1.bf16.msra.mxu1 %v15326_v31  ;;  %v11718_v36 = vld [vmem:[#allocation9 + $0x3f8] sm:$0xff]  ;;  %v15218_v31 = vpack.c.bf16 %v11707_v18, %v11703_v30  ;;  %v15234_v18 = vpack.c.bf16 %v11739_v60, %v11735_v42  ;;  %v11775_v60 = vld [vmem:[#allocation9 + $0x5c0] sm:$0xff] }
0x1aec   :  { %15201 = vmatprep.subr.bf16.mxu0 %v15200_v21  ;;  %15329 = vmatprep.subr.bf16.mxu1 %v15328_v49  ;;  %v11715_v21 = vld [vmem:[#allocation9 + $0x3e0] sm:$0xff]  ;;  %v15220_v49 = vpack.c.bf16 %v11716_v13, %v11712_v0  ;;  %v15348_v39 = vpack.c.bf16 %v11718_v36, %v11714_v57  ;;  %v11750_v30 = vld [vmem:[#allocation9 + $0x4f8] sm:$0xff]  ;;  %v11745_v0 = vld [vmem:[#allocation9 + $0x4d0] sm:$0xff] }
0x1aed   :  { %v11749_v57 = vld [vmem:[#allocation9 + $0x4f0] sm:$0xff]  ;;  %v11752_v36 = vld [vmem:[#allocation9 + $0x508] sm:$0xff] }
0x1aef   :  { %15203 = vmatpush1.bf16.msra.mxu0 %v15202_v35  ;;  %15331 = vmatpush1.bf16.msra.mxu1 %v15330_v5  ;;  %v11726_v35 = vld [vmem:[#allocation9 + $0x438] sm:$0xff]  ;;  %v15222_v5 = vpack.c.bf16 %v11715_v21, %v11711_v12  ;;  %v15238_v21 = vpack.c.bf16 %v11747_v56, %v11743_v15  ;;  %v11783_v56 = vld [vmem:[#allocation9 + $0x600] sm:$0xff] }
0x1af0   :  { %15205 = vmatprep.subr.bf16.mxu0 %v15204_v63  ;;  %15333 = vmatprep.subr.bf16.mxu1 %v15332_v22  ;;  %v15352_v63 = vpack.c.bf16 %v11726_v35, %v11722_v33  ;;  %v11719_v22 = vld [vmem:[#allocation9 + $0x400] sm:$0xff]  ;;  %v11758_v12 = vld [vmem:[#allocation9 + $0x538] sm:$0xff]  ;;  %v11757_v33 = vld [vmem:[#allocation9 + $0x530] sm:$0xff] }
0x1af1   :  { %v11760_v35 = vld [vmem:[#allocation9 + $0x548] sm:$0xff] }
0x1af3   :  { %15207 = vmatpush1.bf16.msra.mxu0 %v15206_v62  ;;  %15335 = vmatpush1.bf16.msra.mxu1 %v15334_v34  ;;  %v11734_v62 = vld [vmem:[#allocation9 + $0x478] sm:$0xff]  ;;  %v15226_v34 = vpack.c.bf16 %v11723_v52, %v11719_v22  ;;  %v15370_v22 = vpack.c.bf16 %v11757_v33, %v11753_v25  ;;  %v11795_v25 = vld [vmem:[#allocation9 + $0x660] sm:$0xff] }
0x1af4   :  { %15209 = vmatprep.subr.bf16.mxu0 %v15208_v40  ;;  %15337 = vmatprep.subr.bf16.mxu1 %v15336_v53  ;;  %v11727_v40 = vld [vmem:[#allocation9 + $0x440] sm:$0xff]  ;;  %v15356_v26 = vpack.c.bf16 %v11734_v62, %v11730_v23  ;;  %v11765_v23 = vld [vmem:[#allocation9 + $0x570] sm:$0xff]  ;;  %v11768_v62 = vld [vmem:[#allocation9 + $0x588] sm:$0xff] }
0x1af5   :  { %v11731_v53 = vld [vmem:[#allocation9 + $0x460] sm:$0xff] }
0x1af6   :  { %v15230_v2 = vpack.c.bf16 %v11731_v53, %v11727_v40  ;;  %v15246_v40 = vpack.c.bf16 %v11763_v43, %v11759_v46  ;;  %v15374_v53 = vpack.c.bf16 %v11765_v23, %v11761_v50  ;;  %v11799_v43 = vld [vmem:[#allocation9 + $0x680] sm:$0xff] }
0x1af7   :  { %15211 = vmatpush1.bf16.msra.mxu0 %v15210_v1  ;;  %15339 = vmatpush1.bf16.msra.mxu1 %v15338_v37  ;;  %v11740_v1 = vld [vmem:[#allocation9 + $0x4a8] sm:$0xff]  ;;  %v11738_v37 = vld [vmem:[#allocation9 + $0x498] sm:$0xff]  ;;  %v11803_v50 = vld [vmem:[#allocation9 + $0x6a0] sm:$0xff] }
0x1af8   :  { %15213 = vmatprep.subr.bf16.mxu0 %v15212_v6  ;;  %15341 = vmatprep.subr.bf16.mxu1 %v15340_v32  ;;  %v15358_v6 = vpack.c.bf16 %v11733_v17, %v11729_v9  ;;  %v15232_v32 = vpack.c.bf16 %v11740_v1, %v11736_v7  ;;  %v15360_v14 = vpack.c.bf16 %v11742_v38, %v11738_v37  ;;  %v11773_v7 = vld [vmem:[#allocation9 + $0x5b0] sm:$0xff]  ;;  %v11776_v1 = vld [vmem:[#allocation9 + $0x5c8] sm:$0xff]  ;;  %v11778_v38 = vld [vmem:[#allocation9 + $0x5d8] sm:$0xff] }
0x1af9   :  { %v11780_v37 = vld [vmem:[#allocation9 + $0x5e8] sm:$0xff] }
0x1afa   :  { %v15252_v42 = vpack.c.bf16 %v11780_v37, %v11776_v1  ;;  %v11813_v1 = vld [vmem:[#allocation9 + $0x6f0] sm:$0xff]  ;;  %v11816_v37 = vld [vmem:[#allocation9 + $0x708] sm:$0xff] }
0x1afb   :  { %15215 = vmatpush1.bf16.msra.mxu0 %v15214_v45  ;;  %15343 = vmatpush1.bf16.msra.mxu1 %v15342_v10  ;;  %v11748_v45 = vld [vmem:[#allocation9 + $0x4e8] sm:$0xff]  ;;  %v11746_v10 = vld [vmem:[#allocation9 + $0x4d8] sm:$0xff] }
0x1afc   :  { %15217 = vmatprep.subr.bf16.mxu0 %v15216_v4  ;;  %15345 = vmatprep.subr.bf16.mxu1 %v15344_v28  ;;  %v15362_v4 = vpack.c.bf16 %v11741_v41, %v11737_v55  ;;  %v15236_v28 = vpack.c.bf16 %v11748_v45, %v11744_v59  ;;  %v15364_v13 = vpack.c.bf16 %v11750_v30, %v11746_v10  ;;  %v11779_v55 = vld [vmem:[#allocation9 + $0x5e0] sm:$0xff]  ;;  %v11781_v59 = vld [vmem:[#allocation9 + $0x5f0] sm:$0xff]  ;;  %v11784_v45 = vld [vmem:[#allocation9 + $0x608] sm:$0xff] }
0x1afd   :  { %v11788_v10 = vld [vmem:[#allocation9 + $0x628] sm:$0xff]  ;;  %v11786_v30 = vld [vmem:[#allocation9 + $0x618] sm:$0xff] }
0x1afe   :  { %v15256_v15 = vpack.c.bf16 %v11788_v10, %v11784_v45  ;;  %v11821_v45 = vld [vmem:[#allocation9 + $0x730] sm:$0xff]  ;;  %v11824_v10 = vld [vmem:[#allocation9 + $0x748] sm:$0xff] }
0x1aff   :  { %15219 = vmatpush1.bf16.msra.mxu0 %v15218_v31  ;;  %15347 = vmatpush1.bf16.msra.mxu1 %v15346_v58  ;;  %v11756_v31 = vld [vmem:[#allocation9 + $0x528] sm:$0xff]  ;;  %v11754_v58 = vld [vmem:[#allocation9 + $0x518] sm:$0xff] }
0x1b00   :  { %15221 = vmatprep.subr.bf16.mxu0 %v15220_v49  ;;  %15349 = vmatprep.subr.bf16.mxu1 %v15348_v39  ;;  %v15366_v49 = vpack.c.bf16 %v11749_v57, %v11745_v0  ;;  %v15240_v39 = vpack.c.bf16 %v11756_v31, %v11752_v36  ;;  %v15368_v29 = vpack.c.bf16 %v11758_v12, %v11754_v58  ;;  %v11787_v0 = vld [vmem:[#allocation9 + $0x620] sm:$0xff]  ;;  %v11789_v36 = vld [vmem:[#allocation9 + $0x630] sm:$0xff]  ;;  %v11792_v31 = vld [vmem:[#allocation9 + $0x648] sm:$0xff] }
0x1b01   :  { %v11796_v58 = vld [vmem:[#allocation9 + $0x668] sm:$0xff]  ;;  %v11794_v12 = vld [vmem:[#allocation9 + $0x658] sm:$0xff] }
0x1b03   :  { %15223 = vmatpush1.bf16.msra.mxu0 %v15222_v5  ;;  %15351 = vmatpush1.bf16.msra.mxu1 %v15350_v24  ;;  %v11764_v5 = vld [vmem:[#allocation9 + $0x568] sm:$0xff]  ;;  %v11762_v24 = vld [vmem:[#allocation9 + $0x558] sm:$0xff] }
0x1b04   :  { %15225 = vmatprep.subr.bf16.mxu0 %v15224_v27  ;;  %15353 = vmatprep.subr.bf16.mxu1 %v15352_v63  ;;  %v11766_v27 = vld [vmem:[#allocation9 + $0x578] sm:$0xff]  ;;  %v15242_v63 = vpack.c.bf16 %v11755_v19, %v11751_v44  ;;  %v15244_v52 = vpack.c.bf16 %v11764_v5, %v11760_v35  ;;  %v15260_v44 = vpack.c.bf16 %v11796_v58, %v11792_v31  ;;  %v11791_v19 = vld [vmem:[#allocation9 + $0x640] sm:$0xff]  ;;  %v11797_v35 = vld [vmem:[#allocation9 + $0x670] sm:$0xff] }
0x1b05   :  { %v15372_v48 = vpack.c.bf16 %v11766_v27, %v11762_v24  ;;  %v11800_v5 = vld [vmem:[#allocation9 + $0x688] sm:$0xff]  ;;  %v11802_v27 = vld [vmem:[#allocation9 + $0x698] sm:$0xff]  ;;  %v11829_v31 = vld [vmem:[#allocation9 + $0x770] sm:$0xff] }
0x1b06   :  { %11955 = vmatmul.mubr.f32.vlgmr.msra.gmra.mrb[154].mxu0 %v11852_v11  ;;  %12097 = vmatmul.mubr.f32.vlgmr.msra.gmra.mrb[158].mxu1 %v11852_v11  ;;  %v11770_v11 = vld [vmem:[#allocation9 + $0x598] sm:$0xff]  ;;  %v11804_v24 = vld [vmem:[#allocation9 + $0x6a8] sm:$0xff] }
0x1b07   :  { %15227 = vmatpush1.bf16.msra.mxu0 %v15226_v34  ;;  %12025 = vmatprep.mubr.f32.mxu0 %v11864_v16  ;;  %v11772_v34 = vld [vmem:[#allocation9 + $0x5a8] sm:$0xff]  ;;  %v15264_v46 = vpack.c.bf16 %v11804_v24, %v11800_v5  ;;  %v11837_v5 = vld [vmem:[#allocation9 + $0x7b0] sm:$0xff] }
0x1b08   :  { %15355 = vmatpush1.bf16.msra.mxu1 %v15354_v8  ;;  %12167 = vmatprep.mubr.f32.mxu1 %v11864_v16  ;;  %v11774_v8 = vld [vmem:[#allocation9 + $0x5b8] sm:$0xff]  ;;  %v15248_v9 = vpack.c.bf16 %v11772_v34, %v11768_v62  ;;  %v11767_v16 = vld [vmem:[#allocation9 + $0x580] sm:$0xff]  ;;  %v11805_v62 = vld [vmem:[#allocation9 + $0x6b0] sm:$0xff] }
0x1b09   :  { %15229 = vmatprep.subr.bf16.mxu0 %v15228_v47  ;;  %15357 = vmatprep.subr.bf16.mxu1 %v15356_v26  ;;  %v11771_v47 = vld [vmem:[#allocation9 + $0x5a0] sm:$0xff]  ;;  %v11769_v26 = vld [vmem:[#allocation9 + $0x590] sm:$0xff]  ;;  %v15376_v17 = vpack.c.bf16 %v11774_v8, %v11770_v11  ;;  %v11808_v34 = vld [vmem:[#allocation9 + $0x6c8] sm:$0xff] }
0x1b0a   :  { %v11812_v11 = vld [vmem:[#allocation9 + $0x6e8] sm:$0xff]  ;;  %v11810_v8 = vld [vmem:[#allocation9 + $0x6d8] sm:$0xff] }
0x1b0b   :  { %15231 = vmatpush1.bf16.msra.mxu0 %v15230_v2  ;;  %v11782_v2 = vld [vmem:[#allocation9 + $0x5f8] sm:$0xff]  ;;  %v11832_v58 = vld [vmem:[#allocation9 + $0x788] sm:$0xff] }
0x1b0c   :  { %15359 = vmatpush1.bf16.msra.mxu1 %v15358_v6  ;;  %15233 = vmatprep.subr.bf16.mxu0 %v15232_v32  ;;  %v15250_v6 = vpack.c.bf16 %v11771_v47, %v11767_v16  ;;  %v15378_v32 = vpack.c.bf16 %v11773_v7, %v11769_v26  ;;  %v15380_v41 = vpack.c.bf16 %v11782_v2, %v11778_v38  ;;  %v11807_v47 = vld [vmem:[#allocation9 + $0x6c0] sm:$0xff]  ;;  %v11820_v38 = vld [vmem:[#allocation9 + $0x728] sm:$0xff]  ;;  %v11818_v2 = vld [vmem:[#allocation9 + $0x718] sm:$0xff] }
0x1b0d   :  { %15361 = vmatprep.subr.bf16.mxu1 %v15360_v14  ;;  %v11777_v14 = vld [vmem:[#allocation9 + $0x5d0] sm:$0xff]  ;;  %v15268_v16 = vpack.c.bf16 %v11812_v11, %v11808_v34  ;;  %v11811_v26 = vld [vmem:[#allocation9 + $0x6e0] sm:$0xff]  ;;  %v11840_v24 = vld [vmem:[#allocation9 + $0x7c8] sm:$0xff] }
0x1b0e   :  { %v11845_v34 = vld [vmem:[#allocation9 + $0x7f0] sm:$0xff]  ;;  %v12254_v11 = vld [vmem:[%s15977_s30 + $0x80] sm:$0xff] }
0x1b0f   :  { %15235 = vmatpush1.bf16.msra.mxu0 %v15234_v18  ;;  %v11790_v18 = vld [vmem:[#allocation9 + $0x638] sm:$0xff] }
0x1b10   :  { %15363 = vmatpush1.bf16.msra.mxu1 %v15362_v4  ;;  %15237 = vmatprep.subr.bf16.mxu0 %v15236_v28  ;;  %v15254_v4 = vpack.c.bf16 %v11779_v55, %v11775_v60  ;;  %v15382_v28 = vpack.c.bf16 %v11781_v59, %v11777_v14  ;;  %v15384_v57 = vpack.c.bf16 %v11790_v18, %v11786_v30  ;;  %v11815_v55 = vld [vmem:[#allocation9 + $0x700] sm:$0xff]  ;;  %v11828_v30 = vld [vmem:[#allocation9 + $0x768] sm:$0xff]  ;;  %v11826_v18 = vld [vmem:[#allocation9 + $0x758] sm:$0xff] }
0x1b11   :  { %15365 = vmatprep.subr.bf16.mxu1 %v15364_v13  ;;  %v11785_v13 = vld [vmem:[#allocation9 + $0x610] sm:$0xff]  ;;  %v15272_v60 = vpack.c.bf16 %v11820_v38, %v11816_v37  ;;  %v11819_v14 = vld [vmem:[#allocation9 + $0x720] sm:$0xff]  ;;  %v12271_v37 = vld [vmem:[%s15977_s30 + $0x108] sm:$0xff] }
0x1b12   :  { %v12256_v38 = vld [vmem:[%s15977_s30 + $0x90] sm:$0xff] }
0x1b13   :  { %15239 = vmatpush1.bf16.msra.mxu0 %v15238_v21  ;;  %v11798_v21 = vld [vmem:[#allocation9 + $0x678] sm:$0xff] }
0x1b14   :  { %15367 = vmatpush1.bf16.msra.mxu1 %v15366_v49  ;;  %15241 = vmatprep.subr.bf16.mxu0 %v15240_v39  ;;  %v15258_v49 = vpack.c.bf16 %v11787_v0, %v11783_v56  ;;  %v15386_v39 = vpack.c.bf16 %v11789_v36, %v11785_v13  ;;  %v15388_v33 = vpack.c.bf16 %v11798_v21, %v11794_v12  ;;  %v11823_v0 = vld [vmem:[#allocation9 + $0x740] sm:$0xff]  ;;  %v11836_v12 = vld [vmem:[#allocation9 + $0x7a8] sm:$0xff]  ;;  %v11834_v21 = vld [vmem:[#allocation9 + $0x798] sm:$0xff] }
0x1b15   :  { %15369 = vmatprep.subr.bf16.mxu1 %v15368_v29  ;;  %v11793_v29 = vld [vmem:[#allocation9 + $0x650] sm:$0xff]  ;;  %v15276_v56 = vpack.c.bf16 %v11828_v30, %v11824_v10  ;;  %v11827_v13 = vld [vmem:[#allocation9 + $0x760] sm:$0xff]  ;;  %v12273_v30 = vld [vmem:[%s15977_s30 + $0x118] sm:$0xff] }
0x1b17   :  { %15243 = vmatpush1.bf16.msra.mxu0 %v15242_v63  ;;  %v11806_v63 = vld [vmem:[#allocation9 + $0x6b8] sm:$0xff] }
0x1b18   :  { %15371 = vmatpush1.bf16.msra.mxu1 %v15370_v22  ;;  %15245 = vmatprep.subr.bf16.mxu0 %v15244_v52  ;;  %v15262_v22 = vpack.c.bf16 %v11795_v25, %v11791_v19  ;;  %v15390_v52 = vpack.c.bf16 %v11797_v35, %v11793_v29  ;;  %v15392_v23 = vpack.c.bf16 %v11806_v63, %v11802_v27  ;;  %v11831_v25 = vld [vmem:[#allocation9 + $0x780] sm:$0xff]  ;;  %v11844_v27 = vld [vmem:[#allocation9 + $0x7e8] sm:$0xff]  ;;  %v11842_v63 = vld [vmem:[#allocation9 + $0x7d8] sm:$0xff] }
0x1b19   :  { %15373 = vmatprep.subr.bf16.mxu1 %v15372_v48  ;;  %v11801_v48 = vld [vmem:[#allocation9 + $0x690] sm:$0xff]  ;;  %v15280_v19 = vpack.c.bf16 %v11836_v12, %v11832_v58  ;;  %v11835_v29 = vld [vmem:[#allocation9 + $0x7a0] sm:$0xff]  ;;  %v12275_v58 = vld [vmem:[%s15977_s30 + $0x128] sm:$0xff] }
0x1b1a   :  { %v12260_v12 = vld [vmem:[%s15977_s30 + $0xb0] sm:$0xff] }
0x1b1b   :  { %15247 = vmatpush1.bf16.msra.mxu0 %v15246_v40  ;;  %v11814_v40 = vld [vmem:[#allocation9 + $0x6f8] sm:$0xff] }
0x1b1c   :  { %15375 = vmatpush1.bf16.msra.mxu1 %v15374_v53  ;;  %15249 = vmatprep.subr.bf16.mxu0 %v15248_v9  ;;  %v15266_v53 = vpack.c.bf16 %v11803_v50, %v11799_v43  ;;  %v15394_v9 = vpack.c.bf16 %v11805_v62, %v11801_v48  ;;  %v15396_v7 = vpack.c.bf16 %v11814_v40, %v11810_v8  ;;  %v11839_v50 = vld [vmem:[#allocation9 + $0x7c0] sm:$0xff]  ;;  %v12255_v8 = vld [vmem:[%s15977_s30 + $0x88] sm:$0xff] }
0x1b1d   :  { %15377 = vmatprep.subr.bf16.mxu1 %v15376_v17  ;;  %v11809_v17 = vld [vmem:[#allocation9 + $0x6d0] sm:$0xff]  ;;  %v15284_v43 = vpack.c.bf16 %v11844_v27, %v11840_v24  ;;  %v11843_v48 = vld [vmem:[#allocation9 + $0x7e0] sm:$0xff]  ;;  %v12277_v24 = vld [vmem:[%s15977_s30 + $0x138] sm:$0xff] }
0x1b1e   :  { %v12286_v40 = vld [vmem:[%s15977_s30 + $0x180] sm:$0xff] }
0x1b1f   :  { %15251 = vmatpush1.bf16.msra.mxu0 %v15250_v6  ;;  %v11822_v6 = vld [vmem:[#allocation9 + $0x738] sm:$0xff]  ;;  %v12262_v27 = vld [vmem:[%s15977_s30 + $0xc0] sm:$0xff] }
0x1b20   :  { %15379 = vmatpush1.bf16.msra.mxu1 %v15378_v32  ;;  %15253 = vmatprep.subr.bf16.mxu0 %v15252_v42  ;;  %v15270_v32 = vpack.c.bf16 %v11811_v26, %v11807_v47  ;;  %v15398_v42 = vpack.c.bf16 %v11813_v1, %v11809_v17  ;;  %v15400_v59 = vpack.c.bf16 %v11822_v6, %v11818_v2  ;;  %v12238_v26 = vld [vmem:[%s15977_s30] sm:$0xff]  ;;  %v12239_v17 = vld [vmem:[%s15977_s30 + $0x8] sm:$0xff]  ;;  %v12257_v2 = vld [vmem:[%s15977_s30 + $0x98] sm:$0xff] }
0x1b21   :  { %15381 = vmatprep.subr.bf16.mxu1 %v15380_v41  ;;  %v11817_v41 = vld [vmem:[#allocation9 + $0x710] sm:$0xff]  ;;  %v15416_v47 = vpack.c.bf16 %v12255_v8, %v12254_v11  ;;  %v12279_v11 = vld [vmem:[%s15977_s30 + $0x148] sm:$0xff] }
0x1b22   :  { %v12288_v6 = vld [vmem:[%s15977_s30 + $0x190] sm:$0xff] }
0x1b23   :  { %15255 = vmatpush1.bf16.msra.mxu0 %v15254_v4  ;;  %v11830_v4 = vld [vmem:[#allocation9 + $0x778] sm:$0xff] }
0x1b24   :  { %15383 = vmatpush1.bf16.msra.mxu1 %v15382_v28  ;;  %15257 = vmatprep.subr.bf16.mxu0 %v15256_v15  ;;  %v15274_v28 = vpack.c.bf16 %v11819_v14, %v11815_v55  ;;  %v15402_v15 = vpack.c.bf16 %v11821_v45, %v11817_v41  ;;  %v15404_v36 = vpack.c.bf16 %v11830_v4, %v11826_v18  ;;  %v12240_v41 = vld [vmem:[%s15977_s30 + $0x10] sm:$0xff]  ;;  %v12258_v18 = vld [vmem:[%s15977_s30 + $0xa0] sm:$0xff]  ;;  %v12259_v4 = vld [vmem:[%s15977_s30 + $0xa8] sm:$0xff] }
0x1b25   :  { %15385 = vmatprep.subr.bf16.mxu1 %v15384_v57  ;;  %v11825_v57 = vld [vmem:[#allocation9 + $0x750] sm:$0xff]  ;;  %v15420_v14 = vpack.c.bf16 %v12257_v2, %v12256_v38  ;;  %v12265_v38 = vld [vmem:[%s15977_s30 + $0xd8] sm:$0xff] }
0x1b26   :  { %v12272_v45 = vld [vmem:[%s15977_s30 + $0x110] sm:$0xff] }
0x1b27   :  { %15259 = vmatpush1.bf16.msra.mxu0 %v15258_v49  ;;  %v11838_v49 = vld [vmem:[#allocation9 + $0x7b8] sm:$0xff]  ;;  %v12296_v2 = vld [vmem:[%s15977_s30 + $0x1d0] sm:$0xff] }
0x1b28   :  { %15387 = vmatpush1.bf16.msra.mxu1 %v15386_v39  ;;  %15261 = vmatprep.subr.bf16.mxu0 %v15260_v44  ;;  %v15278_v39 = vpack.c.bf16 %v11827_v13, %v11823_v0  ;;  %v15406_v44 = vpack.c.bf16 %v11829_v31, %v11825_v57  ;;  %v15408_v35 = vpack.c.bf16 %v11838_v49, %v11834_v21  ;;  %v12242_v13 = vld [vmem:[%s15977_s30 + $0x20] sm:$0xff]  ;;  %v12243_v57 = vld [vmem:[%s15977_s30 + $0x28] sm:$0xff]  ;;  %v12261_v21 = vld [vmem:[%s15977_s30 + $0xb8] sm:$0xff] }
0x1b29   :  { %15389 = vmatprep.subr.bf16.mxu1 %v15388_v33  ;;  %v11833_v33 = vld [vmem:[#allocation9 + $0x790] sm:$0xff]  ;;  %v15424_v0 = vpack.c.bf16 %v12259_v4, %v12258_v18  ;;  %v12298_v18 = vld [vmem:[%s15977_s30 + $0x1e0] sm:$0xff] }
0x1b2a   :  { %v12292_v49 = vld [vmem:[%s15977_s30 + $0x1b0] sm:$0xff] }
0x1b2b   :  { %15263 = vmatpush1.bf16.msra.mxu0 %v15262_v22  ;;  %v11846_v22 = vld [vmem:[#allocation9 + $0x7f8] sm:$0xff] }
0x1b2c   :  { %15391 = vmatpush1.bf16.msra.mxu1 %v15390_v52  ;;  %15265 = vmatprep.subr.bf16.mxu0 %v15264_v46  ;;  %v15282_v52 = vpack.c.bf16 %v11835_v29, %v11831_v25  ;;  %v15410_v46 = vpack.c.bf16 %v11837_v5, %v11833_v33  ;;  %v15412_v62 = vpack.c.bf16 %v11846_v22, %v11842_v63  ;;  %v12244_v29 = vld [vmem:[%s15977_s30 + $0x30] sm:$0xff]  ;;  %v12245_v33 = vld [vmem:[%s15977_s30 + $0x38] sm:$0xff]  ;;  %v12263_v63 = vld [vmem:[%s15977_s30 + $0xc8] sm:$0xff] }
0x1b2d   :  { %15393 = vmatprep.subr.bf16.mxu1 %v15392_v23  ;;  %v11841_v23 = vld [vmem:[#allocation9 + $0x7d0] sm:$0xff]  ;;  %v15428_v25 = vpack.c.bf16 %v12261_v21, %v12260_v12  ;;  %v12294_v22 = vld [vmem:[%s15977_s30 + $0x1c0] sm:$0xff]  ;;  %v12269_v12 = vld [vmem:[%s15977_s30 + $0xf8] sm:$0xff] }
0x1b2e   :  { %v12300_v21 = vld [vmem:[%s15977_s30 + $0x1f0] sm:$0xff] }
0x1b2f   :  { %15267 = vmatpush1.bf16.msra.mxu0 %v15266_v53  ;;  %v12287_v53 = vld [vmem:[%s15977_s30 + $0x188] sm:$0xff] }
0x1b30   :  { %15395 = vmatpush1.bf16.msra.mxu1 %v15394_v9  ;;  %15269 = vmatprep.subr.bf16.mxu0 %v15268_v16  ;;  %v15286_v9 = vpack.c.bf16 %v11843_v48, %v11839_v50  ;;  %v15414_v16 = vpack.c.bf16 %v11845_v34, %v11841_v23  ;;  %v15448_v1 = vpack.c.bf16 %v12287_v53, %v12286_v40  ;;  %v12246_v48 = vld [vmem:[%s15977_s30 + $0x40] sm:$0xff]  ;;  %v12247_v23 = vld [vmem:[%s15977_s30 + $0x48] sm:$0xff] }
0x1b31   :  { %15397 = vmatprep.subr.bf16.mxu1 %v15396_v7  ;;  %v12270_v7 = vld [vmem:[%s15977_s30 + $0x100] sm:$0xff]  ;;  %v15432_v50 = vpack.c.bf16 %v12263_v63, %v12262_v27  ;;  %v15434_v8 = vpack.c.bf16 %v12247_v23, %v12246_v48 }
0x1b32   :  { %v15450_v55 = vpack.c.bf16 %v12271_v37, %v12270_v7  ;;  %v12278_v34 = vld [vmem:[%s15977_s30 + $0x140] sm:$0xff]  ;;  %v12264_v37 = vld [vmem:[%s15977_s30 + $0xd0] sm:$0xff] }
0x1b33   :  { %15271 = vmatpush1.bf16.msra.mxu0 %v15270_v32  ;;  %v12289_v32 = vld [vmem:[%s15977_s30 + $0x198] sm:$0xff]  ;;  %v15466_v40 = vpack.c.bf16 %v12279_v11, %v12278_v34  ;;  %v12186_v63 = vld [vmem:[%s17528_s1] sm:$0xf] }
0x1b34   :  { %15399 = vmatpush1.bf16.msra.mxu1 %v15398_v42  ;;  %15273 = vmatprep.subr.bf16.mxu0 %v15272_v60  ;;  %v15418_v42 = vpack.c.bf16 %v12239_v17, %v12238_v26  ;;  %v11860_v60 = vrot.slane %v17376_v3, %v17294_v20  ;;  %v15452_v10 = vpack.c.bf16 %v12289_v32, %v12288_v6  ;;  %v12291_v3 = vld [vmem:[%s15977_s30 + $0x1a8] sm:$0xff]  ;;  %v12297_v32 = vld [vmem:[%s15977_s30 + $0x1d8] sm:$0xff] }
0x1b35   :  { %15401 = vmatprep.subr.bf16.mxu1 %v15400_v59  ;;  %v12241_v59 = vld [vmem:[%s15977_s30 + $0x18] sm:$0xff]  ;;  %v15436_v6 = vpack.c.bf16 %v12265_v38, %v12264_v37  ;;  %v12191_v23 = vrot.slane %v12186_v63, %v16525_v51  ;;  %v12199_v34 = vrot.slane %v12186_v63, %v17294_v20 }
0x1b37   :  { %15275 = vmatpush1.bf16.msra.mxu0 %v15274_v28  ;;  %v12290_v28 = vld [vmem:[%s15977_s30 + $0x1a0] sm:$0xff] }
0x1b38   :  { %15403 = vmatpush1.bf16.msra.mxu1 %v15402_v15  ;;  %15277 = vmatprep.subr.bf16.mxu0 %v15276_v56  ;;  %v15422_v15 = vpack.c.bf16 %v12241_v59, %v12240_v41  ;;  %v15454_v56 = vpack.c.bf16 %v12273_v30, %v12272_v45  ;;  %v15456_v31 = vpack.c.bf16 %v12291_v3, %v12290_v28  ;;  %v12281_v41 = vld [vmem:[%s15977_s30 + $0x158] sm:$0xff]  ;;  %v12267_v30 = vld [vmem:[%s15977_s30 + $0xe8] sm:$0xff] }
0x1b39   :  { %15405 = vmatprep.subr.bf16.mxu1 %v15404_v36  ;;  %v12274_v36 = vld [vmem:[%s15977_s30 + $0x120] sm:$0xff]  ;;  %v15468_v59 = vpack.c.bf16 %v12297_v32, %v12296_v2  ;;  %v12299_v3 = vld [vmem:[%s15977_s30 + $0x1e8] sm:$0xff] }
0x1b3b   :  { %15279 = vmatpush1.bf16.msra.mxu0 %v15278_v39  ;;  %v12293_v39 = vld [vmem:[%s15977_s30 + $0x1b8] sm:$0xff] }
0x1b3c   :  { %15407 = vmatpush1.bf16.msra.mxu1 %v15406_v44  ;;  %15281 = vmatprep.subr.bf16.mxu0 %v15280_v19  ;;  %v15426_v44 = vpack.c.bf16 %v12243_v57, %v12242_v13  ;;  %v15458_v19 = vpack.c.bf16 %v12275_v58, %v12274_v36  ;;  %v15460_v5 = vpack.c.bf16 %v12293_v39, %v12292_v49  ;;  %v12282_v57 = vld [vmem:[%s15977_s30 + $0x160] sm:$0xff]  ;;  %v12283_v36 = vld [vmem:[%s15977_s30 + $0x168] sm:$0xff]  ;;  %v12301_v49 = vld [vmem:[%s15977_s30 + $0x1f8] sm:$0xff] }
0x1b3d   :  { %15409 = vmatprep.subr.bf16.mxu1 %v15408_v35  ;;  %v12276_v35 = vld [vmem:[%s15977_s30 + $0x130] sm:$0xff]  ;;  %v15474_v58 = vpack.c.bf16 %v12283_v36, %v12282_v57 }
0x1b3f   :  { %15283 = vmatpush1.bf16.msra.mxu0 %v15282_v52  ;;  %v12295_v52 = vld [vmem:[%s15977_s30 + $0x1c8] sm:$0xff] }
0x1b40   :  { %15411 = vmatpush1.bf16.msra.mxu1 %v15410_v46  ;;  %15285 = vmatprep.subr.bf16.mxu0 %v15284_v43  ;;  %v15430_v46 = vpack.c.bf16 %v12245_v33, %v12244_v29  ;;  %v15462_v43 = vpack.c.bf16 %v12277_v24, %v12276_v35  ;;  %v12284_v29 = vld [vmem:[%s15977_s30 + $0x170] sm:$0xff]  ;;  %v12285_v33 = vld [vmem:[%s15977_s30 + $0x178] sm:$0xff]  ;;  %v11847_v24 = vld [vmem:[%s17527_s28] sm:$0xf] }
0x1b41   :  { %15413 = vmatprep.subr.bf16.mxu1 %v15412_v62  ;;  %v15464_v62 = vpack.c.bf16 %v12295_v52, %v12294_v22  ;;  %v11873_v27 = vrot.slane %v11847_v24, %v16525_v51  ;;  %v11881_v22 = vrot.slane %v11847_v24, %v17294_v20  ;;  %v11877_v52 = vrot.slane %v11847_v24, %v16725_v54 }
0x1b43   :  { %15287 = vmatpush1.bf16.msra.mxu0 %v15286_v9 }
0x1b44   :  { %15415 = vmatpush1.bf16.msra.mxu1 %v15414_v16  ;;  %15417 = vmatprep.subr.bf16.mxu0 %v15416_v47  ;;  %v11441_v16 = vld [vmem:[%s15982_s20] sm:$0x1] }
0x1b45   :  { %15449 = vmatprep.subr.bf16.mxu1 %v15448_v1 }
0x1b46   :  { %12026 = vmatmul.mubr.f32.vlgmr.msra.gmra.mrb[154].mxu0 %v11860_v60 }
0x1b47   :  { %12168 = vmatmul.mubr.f32.vlgmr.msra.gmra.mrb[158].mxu1 %v11860_v60  ;;  %15419 = vmatpush3.bf16.msra.mxu0 %v15418_v42  ;;  %v12248_v42 = vld [vmem:[%s15977_s30 + $0x50] sm:$0xff] }
0x1b48   :  { %15451 = vmatpush3.bf16.msra.mxu1 %v15450_v55  ;;  %15421 = vmatprep.subr.bf16.mxu0 %v15420_v14  ;;  %v12249_v55 = vld [vmem:[%s15977_s30 + $0x58] sm:$0xff]  ;;  %v12280_v14 = vld [vmem:[%s15977_s30 + $0x150] sm:$0xff] }
0x1b49   :  { %15453 = vmatprep.subr.bf16.mxu1 %v15452_v10  ;;  %v15438_v45 = vpack.c.bf16 %v12249_v55, %v12248_v42  ;;  %v12266_v10 = vld [vmem:[%s15977_s30 + $0xe0] sm:$0xff]  ;;  %v15470_v4 = vpack.c.bf16 %v12281_v41, %v12280_v14 }
0x1b4a   :  { %v15440_v28 = vpack.c.bf16 %v12267_v30, %v12266_v10 }
0x1b4b   :  { %15423 = vmatpush3.bf16.msra.mxu0 %v15422_v15  ;;  %v12250_v15 = vld [vmem:[%s15977_s30 + $0x60] sm:$0xff] }
0x1b4c   :  { %15455 = vmatpush3.bf16.msra.mxu1 %v15454_v56  ;;  %15425 = vmatprep.subr.bf16.mxu0 %v15424_v0  ;;  %v12251_v56 = vld [vmem:[%s15977_s30 + $0x68] sm:$0xff]  ;;  %v15472_v0 = vpack.c.bf16 %v12299_v3, %v12298_v18 }
0x1b4d   :  { %15457 = vmatprep.subr.bf16.mxu1 %v15456_v31  ;;  %v15442_v13 = vpack.c.bf16 %v12251_v56, %v12250_v15  ;;  %v12268_v31 = vld [vmem:[%s15977_s30 + $0xf0] sm:$0xff] }
0x1b4e   :  { %v15444_v39 = vpack.c.bf16 %v12269_v12, %v12268_v31 }
0x1b4f   :  { %15427 = vmatpush3.bf16.msra.mxu0 %v15426_v44  ;;  %v15476_v44 = vpack.c.bf16 %v12301_v49, %v12300_v21 }
0x1b50   :  { %15459 = vmatpush3.bf16.msra.mxu1 %v15458_v19  ;;  %15429 = vmatprep.subr.bf16.mxu0 %v15428_v25  ;;  %v12252_v19 = vld [vmem:[%s15977_s30 + $0x70] sm:$0xff]  ;;  %v12253_v25 = vld [vmem:[%s15977_s30 + $0x78] sm:$0xff]  ;;  %s15798_s30 = smov [#allocation11]  }
0x1b51   :  { %15461 = vmatprep.subr.bf16.mxu1 %v15460_v5  ;;  %v15446_v35 = vpack.c.bf16 %v12253_v25, %v12252_v19  ;;  %v15478_v5 = vpack.c.bf16 %v12285_v33, %v12284_v29 }
0x1b53   :  { %15431 = vmatpush3.bf16.msra.mxu0 %v15430_v46  ;;  %v11885_v46 = vrot.slane %v11847_v24, %v17279_v61 }
0x1b54   :  { %15463 = vmatpush3.bf16.msra.mxu1 %v15462_v43  ;;  %15433 = vmatprep.subr.bf16.mxu0 %v15432_v50  ;;  %v12212_v50 = vld [vmem:[%s15972_s6] sm:$0xf]  ;;  %s12450_s6 = sshll.u32 %s15798_s30, 4  ;;  %s12451_s6 = int_to_ptr.vmem [resolvable:$true] %s12450_s6 }
0x1b55   :  { %15465 = vmatprep.subr.bf16.mxu1 %v15464_v62  ;;  %v12229_v2 = vrot.slane %v12212_v50, %v17279_v61  ;;  %s15724_s2 = scalar_lea.vmem %s12451_s6, 32  ;;  %p15729_p3 = scmp.lt.s32.totalorder %s12451_s6, %s12451_s6 }
0x1b56   :  { %p15725_p2 = scmp.ne.s32.totalorder %s12451_s6, %s15724_s2  ;;  %p15730_p4 = scmp.lt.s32.totalorder %s15724_s2, %s15724_s2 }
0x1b57   :  { %15435 = vmatpush3.bf16.msra.mxu0 %v15434_v8 }
0x1b58   :  { %15467 = vmatpush3.bf16.msra.mxu1 %v15466_v40  ;;  %15437 = vmatprep.subr.bf16.mxu0 %v15436_v6  ;;  %p15731_p5 = por %p15730_p4, %p15729_p3 }
0x1b59   :  { %15469 = vmatprep.subr.bf16.mxu1 %v15468_v59 }
0x1b5a   :  { %p15732_p6 = pnand %p15731_p5, %p15725_p2 }
0x1b5b   :  { %15439 = vmatpush3.bf16.msra.mxu0 %v15438_v45 }
0x1b5c   :  { %15471 = vmatpush3.bf16.msra.mxu1 %v15470_v4  ;;  %15441 = vmatprep.subr.bf16.mxu0 %v15440_v28  ;;  %v12302_v28 = vld [vmem:[%s15982_s20] sm:$0x1] }
0x1b5d   :  { %15473 = vmatprep.subr.bf16.mxu1 %v15472_v0 }
0x1b5f   :  { %15443 = vmatpush3.bf16.msra.mxu0 %v15442_v13 }
0x1b60   :  { %15475 = vmatpush3.bf16.msra.mxu1 %v15474_v58  ;;  %15445 = vmatprep.subr.bf16.mxu0 %v15444_v39 }
0x1b61   :  { %15477 = vmatprep.subr.bf16.mxu1 %v15476_v44 }
0x1b63   :  { %15447 = vmatpush3.bf16.msra.mxu0 %v15446_v35 }
0x1b64   :  { %15479 = vmatpush3.bf16.msra.mxu1 %v15478_v5 }
0x1b99   :  { %v13187_v53 = vpop.f32.mrb[152].mxu0  ;;  %v13222_v9 = vpop.f32.mrb[156].mxu1 }
0x1b9a   :  { %v13188_v47 = vpop.f32.mrb[153].mxu0  ;;  %v13223_v26 = vpop.f32.mrb[157].mxu1 }
0x1b9b   :  { %v13189_v17 = vadd.f32 %v13188_v47, %v13187_v53  ;;  %v13224_v7 = vadd.f32 %v13223_v26, %v13222_v9  ;;  %v12195_v9 = vrot.slane %v12186_v63, %v16725_v54 }
0x1b9d   :  { %v11509_v1 = vadd.f32 %v13189_v17, %v11441_v16  ;;  %v12203_v16 = vrot.slane %v12186_v63, %v17279_v61  ;;  %v12221_v17 = vrot.slane %v12212_v50, %v16725_v54  ;;  %v12225_v54 = vrot.slane %v12212_v50, %v17294_v20 }
0x1b9f   :  { %v11579_v60 = vadd.f32 %v13224_v7, %v11509_v1 }
0x1ba1   :  { %11583 = vst.msk [vmem:[#allocation11] sm:$0x1] %vm11582_vm7, %v11579_v60  ;;  %v12217_v60 = vrot.slane %v12212_v50, %v16525_v51 }
0x1c19   :  { %v12027_v43 = vpop.f32.mrb[154].mxu0 }
0x1c1a   :  { %v15484_v48 = vadd.f32 %v12027_v43, %v11873_v27  ;;  %v12169_v62 = vpop.f32.mrb[158].mxu1  ;;  %v12029_v11 = vpop.f32.mrb[155].mxu0 }
0x1c1b   :  { %v15486_v8 = vadd.f32 %v12169_v62, %v11881_v22  ;;  %v15485_v40 = vadd.f32 %v12029_v11, %v11877_v52  ;;  %v12171_v53 = vpop.f32.mrb[159].mxu1 }
0x1c1c   :  { %vm12174_vm8 = vcmp.gt.f32.partialorder %v15484_v48, 0.0  ;;  %v12178_v47 = vmul.f32 0.01, %v15484_v48  ;;  %v15487_v26 = vadd.f32 %v12171_v53, %v11885_v46 }
0x1c1d   :  { %vm12176_vm9 = vcmp.gt.f32.partialorder %v15486_v8, 0.0  ;;  %v12180_v7 = vmul.f32 0.01, %v15486_v8  ;;  %vm12175_vm10 = vcmp.gt.f32.partialorder %v15485_v40, 0.0  ;;  %v12179_v1 = vmul.f32 0.01, %v15485_v40 }
0x1c1e   :  { %v12182_v37 = vsel %vm12174_vm8, %v15484_v48, %v12178_v47  ;;  %vm12177_vm11 = vcmp.gt.f32.partialorder %v15487_v26, 0.0  ;;  %v12181_v38 = vmul.f32 0.01, %v15487_v26 }
0x1c1f   :  { %v12208_v6 = vmul.f32 %v12191_v23, %v12182_v37  ;;  %v12184_v32 = vsel %vm12176_vm9, %v15486_v8, %v12180_v7  ;;  %v12183_v42 = vsel %vm12175_vm10, %v15485_v40, %v12179_v1 }
0x1c20   :  { %v12210_v55 = vmul.f32 %v12199_v34, %v12184_v32  ;;  %v12185_v14 = vsel %vm12177_vm11, %v15487_v26, %v12181_v38  ;;  %v12209_v41 = vmul.f32 %v12195_v9, %v12183_v42 }
0x1c21   :  { %v12211_v59 = vmul.f32 %v12203_v16, %v12185_v14  ;;  %v12234_v30 = vadd.f32 %v12217_v60, %v12208_v6 }
0x1c22   :  { %v12235_v45 = vadd.f32 %v12221_v17, %v12209_v41  ;;  %v12236_v18 = vadd.f32 %v12225_v54, %v12210_v55 }
0x1c23   :  { %v12237_v10 = vadd.f32 %v12229_v2, %v12211_v59 }
0x1c24   :  { %12367 = vmatprep.mubr.f32.mxu0 %v12235_v45 }
0x1c25   :  { %12437 = vmatprep.mubr.f32.mxu1 %v12237_v10  ;;  %12368 = vmatmul.mubr.f32.vlgmr.msra.gmra.mrb[156].mxu0 %v12234_v30 }
0x1c26   :  { %12438 = vmatmul.mubr.f32.vlgmr.msra.gmra.mrb[160].mxu1 %v12236_v18 }
0x1cf8   :  { %v13257_v61 = vpop.f32.mrb[156].mxu0 }
0x1cf9   :  { %v13292_v4 = vpop.f32.mrb[160].mxu1  ;;  %v13258_v3 = vpop.f32.mrb[157].mxu0 }
0x1cfa   :  { %v13259_v51 = vadd.f32 %v13258_v3, %v13257_v61  ;;  %v13293_v15 = vpop.f32.mrb[161].mxu1 }
0x1cfb   :  { %v13294_v56 = vadd.f32 %v13293_v15, %v13292_v4 }
0x1cfc   :  { %v12370_v0 = vadd.f32 %v13259_v51, %v12302_v28 }
0x1cfe   :  { %v12440_v20 = vadd.f32 %v13294_v56, %v12370_v0 }
0x1d00   :  { %12443 = vst.msk [vmem:[#allocation11 + $0x1] sm:$0x1] %vm11582_vm7, %v12440_v20 }
0x1d01   :  { %15735 = shalt.err (!%p15732_p6)
}
0x1d02   :  { %s15736_s20 = scalar_lea.hbm %s15987_s27, 32 }
0x1d03   :  { %p15737_p7 = scmp.ne.s32.totalorder %s15987_s27, %s15736_s20  ;;  %p15740_p8 = scmp.lt.u32.totalorder %s15736_s20, %s15987_s27 }
0x1d05   :  { %p15742_p9 = pnand %p15740_p8, %p15737_p7 }
0x1d07   :  { %15745 = shalt.err (!%p15742_p9)
}
0x1d08   :  { %12453 = dma.vmem_to_hbm [thread:$0]  %s12451_s6, 32, %s15987_s27, [#allocation8]  }
0x1d09   :  { %15750 = dma.done.wait [#allocation8], 32  }
0x1d0a   :  { %15751 = vsyncadd [#allocation8], 4294967264 }
0x1d0b   :  { %12457 = vsyncpa [#allocation7], 1 }
0x1d0c   :  { %12458 = vsyncpa [#allocation10], 1 }
0x1d0d   :  { %12459 = vsyncpa [#allocation8], 1 }

</bundles_post_ra>
